<compile_context>
chip_gen: v7x
topology: tpu7x:2x2x1
jax: 0.10.0
libtpu: 0.0.40
codegen_flags: <defaults>
</compile_context>

<pallas_src>
import math
import functools

import jax
import jax.numpy as jnp
from jax.experimental import pallas as pl
from jax.experimental.pallas import tpu as pltpu


_VMEM_LIMIT = 32 * 1024 * 1024  # safe on v5e / v6e / v7x


# ----------------------------------------------------------------------------
# In-kernel helpers (operate on VALUES, not refs)
# ----------------------------------------------------------------------------

def _layernorm(z, gamma, beta, eps=1e-5):
    """LayerNorm over the last dim; z f32 (T, D), gamma/beta f32 (1, D)."""
    inv_n = 1.0 / z.shape[-1]
    mu = jnp.sum(z, axis=-1, keepdims=True) * inv_n
    zc = z - mu
    var = jnp.sum(zc * zc, axis=-1, keepdims=True) * inv_n
    return zc * jax.lax.rsqrt(var + eps) * gamma + beta


def _mha(q, k, v, bias, *, scale, num_heads, head_dim):
    """Multi-head attention on values.

    q: (Tq, D) f32, k/v: (Tk, D) f32, bias: (Tq, Tk) f32 additive or None.
    Returns a single lane-dense (Tq, D) f32 value (heads concatenated).
    """
    qb = q.astype(jnp.bfloat16)
    kb = k.astype(jnp.bfloat16)
    vb = v.astype(jnp.bfloat16)
    outs = []
    for h in range(num_heads):            # static unroll over heads
        lo = h * head_dim
        hi = lo + head_dim
        # scores = q_h @ k_h^T via dot_general (contract last dims, no transpose)
        s = jax.lax.dot_general(
            qb[:, lo:hi], kb[:, lo:hi],
            (((1,), (1,)), ((), ())),
            preferred_element_type=jnp.float32,
        ) * scale
        if bias is not None:
            s = s + bias                  # mask applied in f32
        m = jnp.max(s, axis=-1, keepdims=True)
        p = jnp.exp(s - m)
        l = jnp.sum(p, axis=-1, keepdims=True)
        p = p * pl.reciprocal(l, approx=True)
        o = jax.lax.dot_general(
            p.astype(jnp.bfloat16), vb[:, lo:hi],
            (((1,), (0,)), ((), ())),
            preferred_element_type=jnp.float32,
        )
        outs.append(o)
    return jnp.concatenate(outs, axis=-1)  # (Tq, D) f32, one lane-dense value


# ----------------------------------------------------------------------------
# Fused encoder layer kernel: one grid step per batch element
# ----------------------------------------------------------------------------

def _encoder_layer_kernel(*refs, num_heads, head_dim, scale, has_mask):
    it = iter(refs)
    x_ref = next(it)
    bias_ref = next(it) if has_mask else None
    (w_qkv, b_qkv, w_o, b_o, ln1_g, ln1_b,
     w1, b1, w2, b2, ln2_g, ln2_b, o_ref) = tuple(it)

    D = num_heads * head_dim
    x = x_ref[0]                                                   # (T, D) f32

    # --- self attention (QKV fused, all heads inside) ---
    qkv = jnp.dot(x.astype(jnp.bfloat16), w_qkv[...],
                  preferred_element_type=jnp.float32) + b_qkv[...]
    bias = bias_ref[0] if bias_ref is not None else None
    attn = _mha(qkv[:, :D], qkv[:, D:2 * D], qkv[:, 2 * D:], bias,
                scale=scale, num_heads=num_heads, head_dim=head_dim)

    # --- output projection + residual + LayerNorm ---
    z = jnp.dot(attn.astype(jnp.bfloat16), w_o[...],
                preferred_element_type=jnp.float32) + b_o[...] + x
    x = _layernorm(z, ln1_g[...], ln1_b[...])

    # --- FFN + residual + LayerNorm ---
    h = jnp.maximum(jnp.dot(x.astype(jnp.bfloat16), w1[...],
                            preferred_element_type=jnp.float32) + b1[...], 0.0)
    z = jnp.dot(h.astype(jnp.bfloat16), w2[...],
                preferred_element_type=jnp.float32) + b2[...] + x
    x = _layernorm(z, ln2_g[...], ln2_b[...])

    o_ref[0] = x.astype(o_ref.dtype)


# ----------------------------------------------------------------------------
# Fused decoder layer kernel: self-attn + cross-attn + FFN in one kernel
# ----------------------------------------------------------------------------

def _decoder_layer_kernel(*refs, num_heads, head_dim, scale,
                          has_tgt_mask, has_mem_mask):
    it = iter(refs)
    x_ref = next(it)
    mem_ref = next(it)
    tbias_ref = next(it) if has_tgt_mask else None
    mbias_ref = next(it) if has_mem_mask else None
    (w_qkv, b_qkv, w_o1, b_o1, ln1_g, ln1_b,
     w_q, b_q, w_kv, b_kv, w_o2, b_o2, ln2_g, ln2_b,
     w1, b1, w2, b2, ln3_g, ln3_b, o_ref) = tuple(it)

    D = num_heads * head_dim
    x = x_ref[0]                                                   # (T, D) f32
    mem = mem_ref[0]                                               # (S, D) f32

    # --- masked self attention ---
    qkv = jnp.dot(x.astype(jnp.bfloat16), w_qkv[...],
                  preferred_element_type=jnp.float32) + b_qkv[...]
    tb = tbias_ref[0] if tbias_ref is not None else None
    a = _mha(qkv[:, :D], qkv[:, D:2 * D], qkv[:, 2 * D:], tb,
             scale=scale, num_heads=num_heads, head_dim=head_dim)
    z = jnp.dot(a.astype(jnp.bfloat16), w_o1[...],
                preferred_element_type=jnp.float32) + b_o1[...] + x
    x = _layernorm(z, ln1_g[...], ln1_b[...])

    # --- cross attention (KV fused projection of encoder memory) ---
    q = jnp.dot(x.astype(jnp.bfloat16), w_q[...],
                preferred_element_type=jnp.float32) + b_q[...]
    kv = jnp.dot(mem.astype(jnp.bfloat16), w_kv[...],
                 preferred_element_type=jnp.float32) + b_kv[...]
    mb = mbias_ref[0] if mbias_ref is not None else None
    c = _mha(q, kv[:, :D], kv[:, D:], mb,
             scale=scale, num_heads=num_heads, head_dim=head_dim)
    z = jnp.dot(c.astype(jnp.bfloat16), w_o2[...],
                preferred_element_type=jnp.float32) + b_o2[...] + x
    x = _layernorm(z, ln2_g[...], ln2_b[...])

    # --- FFN + residual + LayerNorm ---
    h = jnp.maximum(jnp.dot(x.astype(jnp.bfloat16), w1[...],
                            preferred_element_type=jnp.float32) + b1[...], 0.0)
    z = jnp.dot(h.astype(jnp.bfloat16), w2[...],
                preferred_element_type=jnp.float32) + b2[...] + x
    x = _layernorm(z, ln3_g[...], ln3_b[...])

    o_ref[0] = x.astype(o_ref.dtype)


# ----------------------------------------------------------------------------
# Output vocabulary head (single matmul, no K-axis accumulator needed)
# ----------------------------------------------------------------------------

def _head_kernel(x_ref, w_ref, b_ref, o_ref):
    o_ref[...] = (jnp.dot(x_ref[...].astype(jnp.bfloat16), w_ref[...],
                          preferred_element_type=jnp.float32)
                  + b_ref[...]).astype(o_ref.dtype)


# ----------------------------------------------------------------------------
# Wrappers (pallas_call construction)
# ----------------------------------------------------------------------------

def _rep_spec(a):
    """Full-array BlockSpec replicated across the batch grid axis."""
    zeros = (0,) * a.ndim
    return pl.BlockSpec(a.shape, lambda b, _z=zeros: _z)


def encoder_layer(x, p, num_heads, src_bias=None):
    B, T, D = x.shape
    Dh = D // num_heads
    weights = [p["w_qkv"], p["b_qkv"], p["w_o"], p["b_o"], p["ln1_g"], p["ln1_b"],
               p["ffn_w1"], p["ffn_b1"], p["ffn_w2"], p["ffn_b2"],
               p["ln2_g"], p["ln2_b"]]
    inputs = [x]
    in_specs = [pl.BlockSpec((1, T, D), lambda b: (b, 0, 0))]
    if src_bias is not None:
        inputs.append(src_bias)
        in_specs.append(pl.BlockSpec((1, T, T), lambda b: (b, 0, 0)))
    inputs += weights
    in_specs += [_rep_spec(w) for w in weights]

    kernel = functools.partial(_encoder_layer_kernel,
                               num_heads=num_heads, head_dim=Dh,
                               scale=1.0 / math.sqrt(Dh),
                               has_mask=src_bias is not None)
    return pl.pallas_call(
        kernel,
        out_shape=jax.ShapeDtypeStruct((B, T, D), x.dtype),
        grid=(B,),
        in_specs=in_specs,
        out_specs=pl.BlockSpec((1, T, D), lambda b: (b, 0, 0)),
        compiler_params=pltpu.CompilerParams(
            dimension_semantics=("parallel",),
            vmem_limit_bytes=_VMEM_LIMIT,
        ),
    )(*inputs)


def decoder_layer(x, memory, p, num_heads, tgt_bias=None, mem_bias=None):
    B, T, D = x.shape
    S = memory.shape[1]
    Dh = D // num_heads
    weights = [p["w_qkv"], p["b_qkv"], p["w_o1"], p["b_o1"], p["ln1_g"], p["ln1_b"],
               p["w_q"], p["b_q"], p["w_kv"], p["b_kv"], p["w_o2"], p["b_o2"],
               p["ln2_g"], p["ln2_b"],
               p["ffn_w1"], p["ffn_b1"], p["ffn_w2"], p["ffn_b2"],
               p["ln3_g"], p["ln3_b"]]
    inputs = [x, memory]
    in_specs = [pl.BlockSpec((1, T, D), lambda b: (b, 0, 0)),
                pl.BlockSpec((1, S, D), lambda b: (b, 0, 0))]
    if tgt_bias is not None:
        inputs.append(tgt_bias)
        in_specs.append(pl.BlockSpec((1, T, T), lambda b: (b, 0, 0)))
    if mem_bias is not None:
        inputs.append(mem_bias)
        in_specs.append(pl.BlockSpec((1, T, S), lambda b: (b, 0, 0)))
    inputs += weights
    in_specs += [_rep_spec(w) for w in weights]

    kernel = functools.partial(_decoder_layer_kernel,
                               num_heads=num_heads, head_dim=Dh,
                               scale=1.0 / math.sqrt(Dh),
                               has_tgt_mask=tgt_bias is not None,
                               has_mem_mask=mem_bias is not None)
    return pl.pallas_call(
        kernel,
        out_shape=jax.ShapeDtypeStruct((B, T, D), x.dtype),
        grid=(B,),
        in_specs=in_specs,
        out_specs=pl.BlockSpec((1, T, D), lambda b: (b, 0, 0)),
        compiler_params=pltpu.CompilerParams(
            dimension_semantics=("parallel",),
            vmem_limit_bytes=_VMEM_LIMIT,
        ),
    )(*inputs)


def output_head(x, w, b):
    """logits = x @ w + b  (tie_output=False).  w is bf16, f32 accumulate."""
    B, T, D = x.shape
    M = B * T
    V = w.shape[1]
    x2d = x.reshape(M, D)
    tn = 128 if V % 128 == 0 else V
    logits = pl.pallas_call(
        _head_kernel,
        out_shape=jax.ShapeDtypeStruct((M, V), jnp.float32),
        grid=(V // tn,),
        in_specs=[
            pl.BlockSpec((M, D), lambda j: (0, 0)),
            pl.BlockSpec((D, tn), lambda j: (0, j)),
            pl.BlockSpec((1, tn), lambda j: (0, j)),
        ],
        out_specs=pl.BlockSpec((M, tn), lambda j: (0, j)),
        compiler_params=pltpu.CompilerParams(
            dimension_semantics=("parallel",),
            vmem_limit_bytes=_VMEM_LIMIT,
        ),
    )(x2d, w, b)
    return logits.reshape(B, T, V)


# ----------------------------------------------------------------------------
# Model glue (embedding lookup, positional encoding) in plain JAX
# ----------------------------------------------------------------------------

def sinusoidal_pe(max_len, d_model):
    pos = jnp.arange(max_len, dtype=jnp.float32)[:, None]
    div = jnp.exp(jnp.arange(0, d_model, 2, dtype=jnp.float32)
                  * (-math.log(10000.0) / d_model))
    pe = jnp.zeros((max_len, d_model), dtype=jnp.float32)
    pe = pe.at[:, 0::2].set(jnp.sin(pos * div))
    pe = pe.at[:, 1::2].set(jnp.cos(pos * div))
    return pe


def input_embedding(ids, token_emb, pe, d_model):
    # glue: embedding gather + positional encoding; dropout is identity (eval mode)
    T = ids.shape[1]
    x = jnp.take(token_emb, ids, axis=0) * math.sqrt(d_model)
    return x + pe[None, :T, :]


def deepseek_transformer_forward(params, src, tgt, cfg,
                                 src_bias=None, tgt_bias=None, mem_bias=None):
    d_model = cfg["d_model"]
    H = cfg["num_heads"]

    enc_x = input_embedding(src, params["token_emb"], params["pe"], d_model)
    for lp in params["encoder"]:
        enc_x = encoder_layer(enc_x, lp, H, src_bias=src_bias)

    dec_x = input_embedding(tgt, params["token_emb"], params["pe"], d_model)
    for lp in params["decoder"]:
        dec_x = decoder_layer(dec_x, enc_x, lp, H,
                              tgt_bias=tgt_bias, mem_bias=mem_bias)

    return output_head(dec_x, params["w_out"], params["b_out"])


# ----------------------------------------------------------------------------
# Deterministic parameter initialization (weights pre-cast to bf16)
# ----------------------------------------------------------------------------

_STD = 0.02


def _w(key, shape):
    return (jax.random.normal(key, shape, jnp.float32) * _STD).astype(jnp.bfloat16)


def init_encoder_layer(key, d_model, d_ff):
    k_qkv, k_o, k1, k2 = jax.random.split(key, 4)
    return {
        "w_qkv": _w(k_qkv, (d_model, 3 * d_model)),
        "b_qkv": jnp.zeros((1, 3 * d_model), jnp.float32),
        "w_o": _w(k_o, (d_model, d_model)),
        "b_o": jnp.zeros((1, d_model), jnp.float32),
        "ln1_g": jnp.ones((1, d_model), jnp.float32),
        "ln1_b": jnp.zeros((1, d_model), jnp.float32),
        "ffn_w1": _w(k1, (d_model, d_ff)),
        "ffn_b1": jnp.zeros((1, d_ff), jnp.float32),
        "ffn_w2": _w(k2, (d_ff, d_model)),
        "ffn_b2": jnp.zeros((1, d_model), jnp.float32),
        "ln2_g": jnp.ones((1, d_model), jnp.float32),
        "ln2_b": jnp.zeros((1, d_model), jnp.float32),
    }


def init_decoder_layer(key, d_model, d_ff):
    k_qkv, k_o1, k_q, k_kv, k_o2, k1, k2 = jax.random.split(key, 7)
    return {
        "w_qkv": _w(k_qkv, (d_model, 3 * d_model)),
        "b_qkv": jnp.zeros((1, 3 * d_model), jnp.float32),
        "w_o1": _w(k_o1, (d_model, d_model)),
        "b_o1": jnp.zeros((1, d_model), jnp.float32),
        "ln1_g": jnp.ones((1, d_model), jnp.float32),
        "ln1_b": jnp.zeros((1, d_model), jnp.float32),
        "w_q": _w(k_q, (d_model, d_model)),
        "b_q": jnp.zeros((1, d_model), jnp.float32),
        "w_kv": _w(k_kv, (d_model, 2 * d_model)),
        "b_kv": jnp.zeros((1, 2 * d_model), jnp.float32),
        "w_o2": _w(k_o2, (d_model, d_model)),
        "b_o2": jnp.zeros((1, d_model), jnp.float32),
        "ln2_g": jnp.ones((1, d_model), jnp.float32),
        "ln2_b": jnp.zeros((1, d_model), jnp.float32),
        "ffn_w1": _w(k1, (d_model, d_ff)),
        "ffn_b1": jnp.zeros((1, d_ff), jnp.float32),
        "ffn_w2": _w(k2, (d_ff, d_model)),
        "ffn_b2": jnp.zeros((1, d_model), jnp.float32),
        "ln3_g": jnp.ones((1, d_model), jnp.float32),
        "ln3_b": jnp.zeros((1, d_model), jnp.float32),
    }


def init_params(key, cfg):
    k_emb, k_enc, k_dec, k_out = jax.random.split(key, 4)
    enc_keys = jax.random.split(k_enc, cfg["num_layers_encoder"])
    dec_keys = jax.random.split(k_dec, cfg["num_layers_decoder"])
    return {
        "token_emb": jax.random.normal(
            k_emb, (cfg["vocab_size"], cfg["d_model"]), jnp.float32) * _STD,
        "pe": sinusoidal_pe(cfg["max_len"], cfg["d_model"]),
        "encoder": [init_encoder_layer(k, cfg["d_model"], cfg["d_ff"]) for k in enc_keys],
        "decoder": [init_decoder_layer(k, cfg["d_model"], cfg["d_ff"]) for k in dec_keys],
        # tie_output=False -> independent output projection
        "w_out": _w(k_out, (cfg["d_model"], cfg["vocab_size"])),
        "b_out": jnp.zeros((1, cfg["vocab_size"]), jnp.float32),
    }


# ----------------------------------------------------------------------------
# Main
# ----------------------------------------------------------------------------

if __name__ == "__main__":
    # Lane-dense small config: d_model / d_ff / vocab are multiples of 128.
    cfg = dict(
        vocab_size=256,
        d_model=128,
        num_layers_encoder=2,
        num_layers_decoder=2,
        num_heads=4,
        d_ff=256,
        max_len=64,
    )
    B, S_src, S_tgt = 2, 8, 8

    key = jax.random.PRNGKey(0)
    k_params, k_src, k_tgt = jax.random.split(key, 3)
    params = init_params(k_params, cfg)

    src = jax.random.randint(k_src, (B, S_src), 0, cfg["vocab_size"], dtype=jnp.int32)
    tgt = jax.random.randint(k_tgt, (B, S_tgt), 0, cfg["vocab_size"], dtype=jnp.int32)

    # src_mask = None, memory_mask = None (never built / DMA'd / added).
    # tgt_mask: causal, as an additive f32 bias (0 = attend, -1e9 = masked).
    causal = jnp.tril(jnp.ones((S_tgt, S_tgt), jnp.float32))
    tgt_bias = jnp.broadcast_to(jnp.where(causal > 0, 0.0, -1e9), (B, S_tgt, S_tgt))

    fwd = jax.jit(lambda p, s, t, tb:
                  deepseek_transformer_forward(p, s, t, cfg,
                                               src_bias=None, tgt_bias=tb,
                                               mem_bias=None))

    logits = fwd(params, src, tgt, tgt_bias)
    logits = jax.block_until_ready(logits)

    assert logits.shape == (B, S_tgt, cfg["vocab_size"]), logits.shape
    assert bool(jnp.all(jnp.isfinite(logits)))
    print("KERNEL_OK")
</pallas_src>

<mosaic_0001>
module attributes {stable_mosaic.version = 11 : i64} {
  func.func @_encoder_layer_kernel(%arg0: i32, %arg1: memref<1x8x128xf32, #tpu.memory_space<vmem>>, %arg2: memref<128x384xbf16, #tpu.memory_space<vmem>>, %arg3: memref<1x384xf32, #tpu.memory_space<vmem>>, %arg4: memref<128x128xbf16, #tpu.memory_space<vmem>>, %arg5: memref<1x128xf32, #tpu.memory_space<vmem>>, %arg6: memref<1x128xf32, #tpu.memory_space<vmem>>, %arg7: memref<1x128xf32, #tpu.memory_space<vmem>>, %arg8: memref<128x256xbf16, #tpu.memory_space<vmem>>, %arg9: memref<1x256xf32, #tpu.memory_space<vmem>>, %arg10: memref<256x128xbf16, #tpu.memory_space<vmem>>, %arg11: memref<1x128xf32, #tpu.memory_space<vmem>>, %arg12: memref<1x128xf32, #tpu.memory_space<vmem>>, %arg13: memref<1x128xf32, #tpu.memory_space<vmem>>, %arg14: memref<1x8x128xf32, #tpu.memory_space<vmem>>) attributes {dimension_semantics = [#tpu.dimension_semantics<parallel>], iteration_bounds = array<i64: 2>, scalar_prefetch = 0 : i64, scratch_operands = 0 : i64, tpu.core_type = #tpu.core_type<tc>, window_params = [{transform_indices = @transform_0, window_bounds = array<i64: 1, 8, 128>}, {pipeline_mode = #tpu.pipeline_mode<synchronous>, transform_indices = @transform_1, window_bounds = array<i64: 128, 384>}, {pipeline_mode = #tpu.pipeline_mode<synchronous>, transform_indices = @transform_2, window_bounds = array<i64: 1, 384>}, {pipeline_mode = #tpu.pipeline_mode<synchronous>, transform_indices = @transform_3, window_bounds = array<i64: 128, 128>}, {pipeline_mode = #tpu.pipeline_mode<synchronous>, transform_indices = @transform_4, window_bounds = array<i64: 1, 128>}, {pipeline_mode = #tpu.pipeline_mode<synchronous>, transform_indices = @transform_5, window_bounds = array<i64: 1, 128>}, {pipeline_mode = #tpu.pipeline_mode<synchronous>, transform_indices = @transform_6, window_bounds = array<i64: 1, 128>}, {pipeline_mode = #tpu.pipeline_mode<synchronous>, transform_indices = @transform_7, window_bounds = array<i64: 128, 256>}, {pipeline_mode = #tpu.pipeline_mode<synchronous>, transform_indices = @transform_8, window_bounds = array<i64: 1, 256>}, {pipeline_mode = #tpu.pipeline_mode<synchronous>, transform_indices = @transform_9, window_bounds = array<i64: 256, 128>}, {pipeline_mode = #tpu.pipeline_mode<synchronous>, transform_indices = @transform_10, window_bounds = array<i64: 1, 128>}, {pipeline_mode = #tpu.pipeline_mode<synchronous>, transform_indices = @transform_11, window_bounds = array<i64: 1, 128>}, {pipeline_mode = #tpu.pipeline_mode<synchronous>, transform_indices = @transform_12, window_bounds = array<i64: 1, 128>}, {transform_indices = @transform_13, window_bounds = array<i64: 1, 8, 128>}]} {
    %c0 = arith.constant 0 : index
    %c0_0 = arith.constant 0 : index
    %c0_1 = arith.constant 0 : index
    %0 = vector.load %arg1[%c0, %c0_0, %c0_1] : memref<1x8x128xf32, #tpu.memory_space<vmem>>, vector<1x8x128xf32>
    %1 = vector.shape_cast %0 : vector<1x8x128xf32> to vector<8x128xf32>
    %2 = arith.truncf %1 : vector<8x128xf32> to vector<8x128xbf16>
    %c0_2 = arith.constant 0 : index
    %c0_3 = arith.constant 0 : index
    %3 = vector.load %arg2[%c0_2, %c0_3] : memref<128x384xbf16, #tpu.memory_space<vmem>>, vector<128x384xbf16>
    %cst = arith.constant dense<0.000000e+00> : vector<8x384xf32>
    %4 = tpu.matmul %2, %3, %cst {dimension_numbers = #tpu.dot_dimension_numbers<[1], [0], [0], [1], [0, 0, 1, 1], [], []>} : vector<8x128xbf16>, vector<128x384xbf16>, vector<8x384xf32> -> vector<8x384xf32>
    %c0_4 = arith.constant 0 : index
    %c0_5 = arith.constant 0 : index
    %5 = vector.load %arg3[%c0_4, %c0_5] : memref<1x384xf32, #tpu.memory_space<vmem>>, vector<1x384xf32>
    %6 = vector.broadcast %5 : vector<1x384xf32> to vector<8x384xf32>
    %7 = arith.addf %4, %6 : vector<8x384xf32>
    %8 = vector.extract_strided_slice %7 {offsets = [0, 0], sizes = [8, 128], strides = [1, 1]} : vector<8x384xf32> to vector<8x128xf32>
    %9 = vector.extract_strided_slice %7 {offsets = [0, 128], sizes = [8, 128], strides = [1, 1]} : vector<8x384xf32> to vector<8x128xf32>
    %10 = vector.extract_strided_slice %7 {offsets = [0, 256], sizes = [8, 128], strides = [1, 1]} : vector<8x384xf32> to vector<8x128xf32>
    %11 = arith.truncf %8 : vector<8x128xf32> to vector<8x128xbf16>
    %12 = arith.truncf %9 : vector<8x128xf32> to vector<8x128xbf16>
    %13 = arith.truncf %10 : vector<8x128xf32> to vector<8x128xbf16>
    %14 = vector.extract_strided_slice %11 {offsets = [0, 0], sizes = [8, 32], strides = [1, 1]} : vector<8x128xbf16> to vector<8x32xbf16>
    %15 = vector.extract_strided_slice %12 {offsets = [0, 0], sizes = [8, 32], strides = [1, 1]} : vector<8x128xbf16> to vector<8x32xbf16>
    %cst_6 = arith.constant dense<0.000000e+00> : vector<8x8xf32>
    %16 = tpu.matmul %14, %15, %cst_6 {dimension_numbers = #tpu.dot_dimension_numbers<[1], [1], [0], [0], [0, 0, 1, 0], [], []>} : vector<8x32xbf16>, vector<8x32xbf16>, vector<8x8xf32> -> vector<8x8xf32>
    %cst_7 = arith.constant 0.176776692 : f32
    %17 = vector.broadcast %cst_7 : f32 to vector<8x8xf32>
    %18 = arith.mulf %16, %17 : vector<8x8xf32>
    %cst_8 = arith.constant dense<0xFF800000> : vector<8xf32>
    %19 = vector.multi_reduction <maximumf>, %18, %cst_8 [1] : vector<8x8xf32> to vector<8xf32>
    %20 = vector.shape_cast %19 : vector<8xf32> to vector<8x1xf32>
    %21 = vector.broadcast %20 : vector<8x1xf32> to vector<8x8xf32>
    %22 = arith.subf %18, %21 : vector<8x8xf32>
    %23 = math.exp %22 : vector<8x8xf32>
    %cst_9 = arith.constant dense<0.000000e+00> : vector<8xf32>
    %24 = vector.multi_reduction <add>, %23, %cst_9 [1] : vector<8x8xf32> to vector<8xf32>
    %25 = vector.shape_cast %24 : vector<8xf32> to vector<8x1xf32>
    %26 = tpu.reciprocal %25 {approx = true} : vector<8x1xf32> -> vector<8x1xf32>
    %27 = vector.broadcast %26 : vector<8x1xf32> to vector<8x8xf32>
    %28 = arith.mulf %23, %27 : vector<8x8xf32>
    %29 = arith.truncf %28 : vector<8x8xf32> to vector<8x8xbf16>
    %30 = vector.extract_strided_slice %13 {offsets = [0, 0], sizes = [8, 32], strides = [1, 1]} : vector<8x128xbf16> to vector<8x32xbf16>
    %cst_10 = arith.constant dense<0.000000e+00> : vector<8x32xf32>
    %31 = tpu.matmul %29, %30, %cst_10 {dimension_numbers = #tpu.dot_dimension_numbers<[1], [0], [0], [1], [0, 0, 1, 1], [], []>} : vector<8x8xbf16>, vector<8x32xbf16>, vector<8x32xf32> -> vector<8x32xf32>
    %32 = vector.extract_strided_slice %11 {offsets = [0, 32], sizes = [8, 32], strides = [1, 1]} : vector<8x128xbf16> to vector<8x32xbf16>
    %33 = vector.extract_strided_slice %12 {offsets = [0, 32], sizes = [8, 32], strides = [1, 1]} : vector<8x128xbf16> to vector<8x32xbf16>
    %cst_11 = arith.constant dense<0.000000e+00> : vector<8x8xf32>
    %34 = tpu.matmul %32, %33, %cst_11 {dimension_numbers = #tpu.dot_dimension_numbers<[1], [1], [0], [0], [0, 0, 1, 0], [], []>} : vector<8x32xbf16>, vector<8x32xbf16>, vector<8x8xf32> -> vector<8x8xf32>
    %cst_12 = arith.constant 0.176776692 : f32
    %35 = vector.broadcast %cst_12 : f32 to vector<8x8xf32>
    %36 = arith.mulf %34, %35 : vector<8x8xf32>
    %cst_13 = arith.constant dense<0xFF800000> : vector<8xf32>
    %37 = vector.multi_reduction <maximumf>, %36, %cst_13 [1] : vector<8x8xf32> to vector<8xf32>
    %38 = vector.shape_cast %37 : vector<8xf32> to vector<8x1xf32>
    %39 = vector.broadcast %38 : vector<8x1xf32> to vector<8x8xf32>
    %40 = arith.subf %36, %39 : vector<8x8xf32>
    %41 = math.exp %40 : vector<8x8xf32>
    %cst_14 = arith.constant dense<0.000000e+00> : vector<8xf32>
    %42 = vector.multi_reduction <add>, %41, %cst_14 [1] : vector<8x8xf32> to vector<8xf32>
    %43 = vector.shape_cast %42 : vector<8xf32> to vector<8x1xf32>
    %44 = tpu.reciprocal %43 {approx = true} : vector<8x1xf32> -> vector<8x1xf32>
    %45 = vector.broadcast %44 : vector<8x1xf32> to vector<8x8xf32>
    %46 = arith.mulf %41, %45 : vector<8x8xf32>
    %47 = arith.truncf %46 : vector<8x8xf32> to vector<8x8xbf16>
    %48 = vector.extract_strided_slice %13 {offsets = [0, 32], sizes = [8, 32], strides = [1, 1]} : vector<8x128xbf16> to vector<8x32xbf16>
    %cst_15 = arith.constant dense<0.000000e+00> : vector<8x32xf32>
    %49 = tpu.matmul %47, %48, %cst_15 {dimension_numbers = #tpu.dot_dimension_numbers<[1], [0], [0], [1], [0, 0, 1, 1], [], []>} : vector<8x8xbf16>, vector<8x32xbf16>, vector<8x32xf32> -> vector<8x32xf32>
    %50 = vector.extract_strided_slice %11 {offsets = [0, 64], sizes = [8, 32], strides = [1, 1]} : vector<8x128xbf16> to vector<8x32xbf16>
    %51 = vector.extract_strided_slice %12 {offsets = [0, 64], sizes = [8, 32], strides = [1, 1]} : vector<8x128xbf16> to vector<8x32xbf16>
    %cst_16 = arith.constant dense<0.000000e+00> : vector<8x8xf32>
    %52 = tpu.matmul %50, %51, %cst_16 {dimension_numbers = #tpu.dot_dimension_numbers<[1], [1], [0], [0], [0, 0, 1, 0], [], []>} : vector<8x32xbf16>, vector<8x32xbf16>, vector<8x8xf32> -> vector<8x8xf32>
    %cst_17 = arith.constant 0.176776692 : f32
    %53 = vector.broadcast %cst_17 : f32 to vector<8x8xf32>
    %54 = arith.mulf %52, %53 : vector<8x8xf32>
    %cst_18 = arith.constant dense<0xFF800000> : vector<8xf32>
    %55 = vector.multi_reduction <maximumf>, %54, %cst_18 [1] : vector<8x8xf32> to vector<8xf32>
    %56 = vector.shape_cast %55 : vector<8xf32> to vector<8x1xf32>
    %57 = vector.broadcast %56 : vector<8x1xf32> to vector<8x8xf32>
    %58 = arith.subf %54, %57 : vector<8x8xf32>
    %59 = math.exp %58 : vector<8x8xf32>
    %cst_19 = arith.constant dense<0.000000e+00> : vector<8xf32>
    %60 = vector.multi_reduction <add>, %59, %cst_19 [1] : vector<8x8xf32> to vector<8xf32>
    %61 = vector.shape_cast %60 : vector<8xf32> to vector<8x1xf32>
    %62 = tpu.reciprocal %61 {approx = true} : vector<8x1xf32> -> vector<8x1xf32>
    %63 = vector.broadcast %62 : vector<8x1xf32> to vector<8x8xf32>
    %64 = arith.mulf %59, %63 : vector<8x8xf32>
    %65 = arith.truncf %64 : vector<8x8xf32> to vector<8x8xbf16>
    %66 = vector.extract_strided_slice %13 {offsets = [0, 64], sizes = [8, 32], strides = [1, 1]} : vector<8x128xbf16> to vector<8x32xbf16>
    %cst_20 = arith.constant dense<0.000000e+00> : vector<8x32xf32>
    %67 = tpu.matmul %65, %66, %cst_20 {dimension_numbers = #tpu.dot_dimension_numbers<[1], [0], [0], [1], [0, 0, 1, 1], [], []>} : vector<8x8xbf16>, vector<8x32xbf16>, vector<8x32xf32> -> vector<8x32xf32>
    %68 = vector.extract_strided_slice %11 {offsets = [0, 96], sizes = [8, 32], strides = [1, 1]} : vector<8x128xbf16> to vector<8x32xbf16>
    %69 = vector.extract_strided_slice %12 {offsets = [0, 96], sizes = [8, 32], strides = [1, 1]} : vector<8x128xbf16> to vector<8x32xbf16>
    %cst_21 = arith.constant dense<0.000000e+00> : vector<8x8xf32>
    %70 = tpu.matmul %68, %69, %cst_21 {dimension_numbers = #tpu.dot_dimension_numbers<[1], [1], [0], [0], [0, 0, 1, 0], [], []>} : vector<8x32xbf16>, vector<8x32xbf16>, vector<8x8xf32> -> vector<8x8xf32>
    %cst_22 = arith.constant 0.176776692 : f32
    %71 = vector.broadcast %cst_22 : f32 to vector<8x8xf32>
    %72 = arith.mulf %70, %71 : vector<8x8xf32>
    %cst_23 = arith.constant dense<0xFF800000> : vector<8xf32>
    %73 = vector.multi_reduction <maximumf>, %72, %cst_23 [1] : vector<8x8xf32> to vector<8xf32>
    %74 = vector.shape_cast %73 : vector<8xf32> to vector<8x1xf32>
    %75 = vector.broadcast %74 : vector<8x1xf32> to vector<8x8xf32>
    %76 = arith.subf %72, %75 : vector<8x8xf32>
    %77 = math.exp %76 : vector<8x8xf32>
    %cst_24 = arith.constant dense<0.000000e+00> : vector<8xf32>
    %78 = vector.multi_reduction <add>, %77, %cst_24 [1] : vector<8x8xf32> to vector<8xf32>
    %79 = vector.shape_cast %78 : vector<8xf32> to vector<8x1xf32>
    %80 = tpu.reciprocal %79 {approx = true} : vector<8x1xf32> -> vector<8x1xf32>
    %81 = vector.broadcast %80 : vector<8x1xf32> to vector<8x8xf32>
    %82 = arith.mulf %77, %81 : vector<8x8xf32>
    %83 = arith.truncf %82 : vector<8x8xf32> to vector<8x8xbf16>
    %84 = vector.extract_strided_slice %13 {offsets = [0, 96], sizes = [8, 32], strides = [1, 1]} : vector<8x128xbf16> to vector<8x32xbf16>
    %cst_25 = arith.constant dense<0.000000e+00> : vector<8x32xf32>
    %85 = tpu.matmul %83, %84, %cst_25 {dimension_numbers = #tpu.dot_dimension_numbers<[1], [0], [0], [1], [0, 0, 1, 1], [], []>} : vector<8x8xbf16>, vector<8x32xbf16>, vector<8x32xf32> -> vector<8x32xf32>
    %86 = tpu.concatenate %31, %49, %67, %85 in 1 : vector<8x32xf32>, vector<8x32xf32>, vector<8x32xf32>, vector<8x32xf32> -> vector<8x128xf32>
    %87 = arith.truncf %86 : vector<8x128xf32> to vector<8x128xbf16>
    %c0_26 = arith.constant 0 : index
    %c0_27 = arith.constant 0 : index
    %88 = vector.load %arg4[%c0_26, %c0_27] : memref<128x128xbf16, #tpu.memory_space<vmem>>, vector<128x128xbf16>
    %cst_28 = arith.constant dense<0.000000e+00> : vector<8x128xf32>
    %89 = tpu.matmul %87, %88, %cst_28 {dimension_numbers = #tpu.dot_dimension_numbers<[1], [0], [0], [1], [0, 0, 1, 1], [], []>} : vector<8x128xbf16>, vector<128x128xbf16>, vector<8x128xf32> -> vector<8x128xf32>
    %c0_29 = arith.constant 0 : index
    %c0_30 = arith.constant 0 : index
    %90 = vector.load %arg5[%c0_29, %c0_30] : memref<1x128xf32, #tpu.memory_space<vmem>>, vector<1x128xf32>
    %91 = vector.broadcast %90 : vector<1x128xf32> to vector<8x128xf32>
    %92 = arith.addf %89, %91 : vector<8x128xf32>
    %93 = arith.addf %92, %1 : vector<8x128xf32>
    %c0_31 = arith.constant 0 : index
    %c0_32 = arith.constant 0 : index
    %94 = vector.load %arg6[%c0_31, %c0_32] : memref<1x128xf32, #tpu.memory_space<vmem>>, vector<1x128xf32>
    %c0_33 = arith.constant 0 : index
    %c0_34 = arith.constant 0 : index
    %95 = vector.load %arg7[%c0_33, %c0_34] : memref<1x128xf32, #tpu.memory_space<vmem>>, vector<1x128xf32>
    %cst_35 = arith.constant dense<0.000000e+00> : vector<8xf32>
    %96 = vector.multi_reduction <add>, %93, %cst_35 [1] : vector<8x128xf32> to vector<8xf32>
    %97 = vector.shape_cast %96 : vector<8xf32> to vector<8x1xf32>
    %cst_36 = arith.constant 7.812500e-03 : f32
    %98 = vector.broadcast %cst_36 : f32 to vector<8x1xf32>
    %99 = arith.mulf %97, %98 : vector<8x1xf32>
    %100 = vector.broadcast %99 : vector<8x1xf32> to vector<8x128xf32>
    %101 = arith.subf %93, %100 : vector<8x128xf32>
    %102 = arith.mulf %101, %101 : vector<8x128xf32>
    %cst_37 = arith.constant dense<0.000000e+00> : vector<8xf32>
    %103 = vector.multi_reduction <add>, %102, %cst_37 [1] : vector<8x128xf32> to vector<8xf32>
    %104 = vector.shape_cast %103 : vector<8xf32> to vector<8x1xf32>
    %cst_38 = arith.constant 7.812500e-03 : f32
    %105 = vector.broadcast %cst_38 : f32 to vector<8x1xf32>
    %106 = arith.mulf %104, %105 : vector<8x1xf32>
    %cst_39 = arith.constant 9.99999974E-6 : f32
    %107 = vector.broadcast %cst_39 : f32 to vector<8x1xf32>
    %108 = arith.addf %106, %107 : vector<8x1xf32>
    %109 = math.rsqrt %108 : vector<8x1xf32>
    %110 = vector.broadcast %109 : vector<8x1xf32> to vector<8x128xf32>
    %111 = arith.mulf %101, %110 : vector<8x128xf32>
    %112 = vector.broadcast %94 : vector<1x128xf32> to vector<8x128xf32>
    %113 = arith.mulf %111, %112 : vector<8x128xf32>
    %114 = vector.broadcast %95 : vector<1x128xf32> to vector<8x128xf32>
    %115 = arith.addf %113, %114 : vector<8x128xf32>
    %116 = arith.truncf %115 : vector<8x128xf32> to vector<8x128xbf16>
    %c0_40 = arith.constant 0 : index
    %c0_41 = arith.constant 0 : index
    %117 = vector.load %arg8[%c0_40, %c0_41] : memref<128x256xbf16, #tpu.memory_space<vmem>>, vector<128x256xbf16>
    %cst_42 = arith.constant dense<0.000000e+00> : vector<8x256xf32>
    %118 = tpu.matmul %116, %117, %cst_42 {dimension_numbers = #tpu.dot_dimension_numbers<[1], [0], [0], [1], [0, 0, 1, 1], [], []>} : vector<8x128xbf16>, vector<128x256xbf16>, vector<8x256xf32> -> vector<8x256xf32>
    %c0_43 = arith.constant 0 : index
    %c0_44 = arith.constant 0 : index
    %119 = vector.load %arg9[%c0_43, %c0_44] : memref<1x256xf32, #tpu.memory_space<vmem>>, vector<1x256xf32>
    %120 = vector.broadcast %119 : vector<1x256xf32> to vector<8x256xf32>
    %121 = arith.addf %118, %120 : vector<8x256xf32>
    %cst_45 = arith.constant 0.000000e+00 : f32
    %122 = vector.broadcast %cst_45 : f32 to vector<8x256xf32>
    %123 = arith.maximumf %121, %122 : vector<8x256xf32>
    %124 = arith.truncf %123 : vector<8x256xf32> to vector<8x256xbf16>
    %c0_46 = arith.constant 0 : index
    %c0_47 = arith.constant 0 : index
    %125 = vector.load %arg10[%c0_46, %c0_47] : memref<256x128xbf16, #tpu.memory_space<vmem>>, vector<256x128xbf16>
    %cst_48 = arith.constant dense<0.000000e+00> : vector<8x128xf32>
    %126 = tpu.matmul %124, %125, %cst_48 {dimension_numbers = #tpu.dot_dimension_numbers<[1], [0], [0], [1], [0, 0, 1, 1], [], []>} : vector<8x256xbf16>, vector<256x128xbf16>, vector<8x128xf32> -> vector<8x128xf32>
    %c0_49 = arith.constant 0 : index
    %c0_50 = arith.constant 0 : index
    %127 = vector.load %arg11[%c0_49, %c0_50] : memref<1x128xf32, #tpu.memory_space<vmem>>, vector<1x128xf32>
    %128 = vector.broadcast %127 : vector<1x128xf32> to vector<8x128xf32>
    %129 = arith.addf %126, %128 : vector<8x128xf32>
    %130 = arith.addf %129, %115 : vector<8x128xf32>
    %c0_51 = arith.constant 0 : index
    %c0_52 = arith.constant 0 : index
    %131 = vector.load %arg12[%c0_51, %c0_52] : memref<1x128xf32, #tpu.memory_space<vmem>>, vector<1x128xf32>
    %c0_53 = arith.constant 0 : index
    %c0_54 = arith.constant 0 : index
    %132 = vector.load %arg13[%c0_53, %c0_54] : memref<1x128xf32, #tpu.memory_space<vmem>>, vector<1x128xf32>
    %cst_55 = arith.constant dense<0.000000e+00> : vector<8xf32>
    %133 = vector.multi_reduction <add>, %130, %cst_55 [1] : vector<8x128xf32> to vector<8xf32>
    %134 = vector.shape_cast %133 : vector<8xf32> to vector<8x1xf32>
    %cst_56 = arith.constant 7.812500e-03 : f32
    %135 = vector.broadcast %cst_56 : f32 to vector<8x1xf32>
    %136 = arith.mulf %134, %135 : vector<8x1xf32>
    %137 = vector.broadcast %136 : vector<8x1xf32> to vector<8x128xf32>
    %138 = arith.subf %130, %137 : vector<8x128xf32>
    %139 = arith.mulf %138, %138 : vector<8x128xf32>
    %cst_57 = arith.constant dense<0.000000e+00> : vector<8xf32>
    %140 = vector.multi_reduction <add>, %139, %cst_57 [1] : vector<8x128xf32> to vector<8xf32>
    %141 = vector.shape_cast %140 : vector<8xf32> to vector<8x1xf32>
    %cst_58 = arith.constant 7.812500e-03 : f32
    %142 = vector.broadcast %cst_58 : f32 to vector<8x1xf32>
    %143 = arith.mulf %141, %142 : vector<8x1xf32>
    %cst_59 = arith.constant 9.99999974E-6 : f32
    %144 = vector.broadcast %cst_59 : f32 to vector<8x1xf32>
    %145 = arith.addf %143, %144 : vector<8x1xf32>
    %146 = math.rsqrt %145 : vector<8x1xf32>
    %147 = vector.broadcast %146 : vector<8x1xf32> to vector<8x128xf32>
    %148 = arith.mulf %138, %147 : vector<8x128xf32>
    %149 = vector.broadcast %131 : vector<1x128xf32> to vector<8x128xf32>
    %150 = arith.mulf %148, %149 : vector<8x128xf32>
    %151 = vector.broadcast %132 : vector<1x128xf32> to vector<8x128xf32>
    %152 = arith.addf %150, %151 : vector<8x128xf32>
    %c0_60 = arith.constant 0 : index
    %c0_61 = arith.constant 0 : index
    %c0_62 = arith.constant 0 : index
    %153 = vector.load %arg14[%c0_60, %c0_61, %c0_62] : memref<1x8x128xf32, #tpu.memory_space<vmem>>, vector<1x8x128xf32>
    %154 = vector.shape_cast %153 : vector<1x8x128xf32> to vector<8x128xf32>
    %155 = vector.shape_cast %152 : vector<8x128xf32> to vector<1x8x128xf32>
    tpu.vector_store %arg14[%c0_60, %c0_61, %c0_62], %155 {strides = array<i32>} : memref<1x8x128xf32, #tpu.memory_space<vmem>>, vector<1x8x128xf32>,
    return
  }
  func.func @transform_0(%arg0: i32) -> (i32, i32, i32) {
    %c0_i32 = arith.constant 0 : i32
    %c0_i32_0 = arith.constant 0 : i32
    %c0_i32_1 = arith.constant 0 : i32
    return %arg0, %c0_i32, %c0_i32_0 : i32, i32, i32
  }
  func.func @transform_1(%arg0: i32) -> (i32, i32) {
    %c0_i32 = arith.constant 0 : i32
    %c0_i32_0 = arith.constant 0 : i32
    %c0_i32_1 = arith.constant 0 : i32
    return %c0_i32, %c0_i32_0 : i32, i32
  }
  func.func @transform_2(%arg0: i32) -> (i32, i32) {
    %c0_i32 = arith.constant 0 : i32
    %c0_i32_0 = arith.constant 0 : i32
    %c0_i32_1 = arith.constant 0 : i32
    return %c0_i32, %c0_i32_0 : i32, i32
  }
  func.func @transform_3(%arg0: i32) -> (i32, i32) {
    %c0_i32 = arith.constant 0 : i32
    %c0_i32_0 = arith.constant 0 : i32
    %c0_i32_1 = arith.constant 0 : i32
    return %c0_i32, %c0_i32_0 : i32, i32
  }
  func.func @transform_4(%arg0: i32) -> (i32, i32) {
    %c0_i32 = arith.constant 0 : i32
    %c0_i32_0 = arith.constant 0 : i32
    %c0_i32_1 = arith.constant 0 : i32
    return %c0_i32, %c0_i32_0 : i32, i32
  }
  func.func @transform_5(%arg0: i32) -> (i32, i32) {
    %c0_i32 = arith.constant 0 : i32
    %c0_i32_0 = arith.constant 0 : i32
    %c0_i32_1 = arith.constant 0 : i32
    return %c0_i32, %c0_i32_0 : i32, i32
  }
  func.func @transform_6(%arg0: i32) -> (i32, i32) {
    %c0_i32 = arith.constant 0 : i32
    %c0_i32_0 = arith.constant 0 : i32
    %c0_i32_1 = arith.constant 0 : i32
    return %c0_i32, %c0_i32_0 : i32, i32
  }
  func.func @transform_7(%arg0: i32) -> (i32, i32) {
    %c0_i32 = arith.constant 0 : i32
    %c0_i32_0 = arith.constant 0 : i32
    %c0_i32_1 = arith.constant 0 : i32
    return %c0_i32, %c0_i32_0 : i32, i32
  }
  func.func @transform_8(%arg0: i32) -> (i32, i32) {
    %c0_i32 = arith.constant 0 : i32
    %c0_i32_0 = arith.constant 0 : i32
    %c0_i32_1 = arith.constant 0 : i32
    return %c0_i32, %c0_i32_0 : i32, i32
  }
  func.func @transform_9(%arg0: i32) -> (i32, i32) {
    %c0_i32 = arith.constant 0 : i32
    %c0_i32_0 = arith.constant 0 : i32
    %c0_i32_1 = arith.constant 0 : i32
    return %c0_i32, %c0_i32_0 : i32, i32
  }
  func.func @transform_10(%arg0: i32) -> (i32, i32) {
    %c0_i32 = arith.constant 0 : i32
    %c0_i32_0 = arith.constant 0 : i32
    %c0_i32_1 = arith.constant 0 : i32
    return %c0_i32, %c0_i32_0 : i32, i32
  }
  func.func @transform_11(%arg0: i32) -> (i32, i32) {
    %c0_i32 = arith.constant 0 : i32
    %c0_i32_0 = arith.constant 0 : i32
    %c0_i32_1 = arith.constant 0 : i32
    return %c0_i32, %c0_i32_0 : i32, i32
  }
  func.func @transform_12(%arg0: i32) -> (i32, i32) {
    %c0_i32 = arith.constant 0 : i32
    %c0_i32_0 = arith.constant 0 : i32
    %c0_i32_1 = arith.constant 0 : i32
    return %c0_i32, %c0_i32_0 : i32, i32
  }
  func.func @transform_13(%arg0: i32) -> (i32, i32, i32) {
    %c0_i32 = arith.constant 0 : i32
    %c0_i32_0 = arith.constant 0 : i32
    %c0_i32_1 = arith.constant 0 : i32
    return %arg0, %c0_i32, %c0_i32_0 : i32, i32, i32
  }
}

module attributes {stable_mosaic.version = 11 : i64} {
  func.func @_head_kernel(%arg0: i32, %arg1: memref<16x128xf32, #tpu.memory_space<vmem>>, %arg2: memref<128x128xbf16, #tpu.memory_space<vmem>>, %arg3: memref<1x128xf32, #tpu.memory_space<vmem>>, %arg4: memref<16x128xf32, #tpu.memory_space<vmem>>) attributes {dimension_semantics = [#tpu.dimension_semantics<parallel>], iteration_bounds = array<i64: 2>, scalar_prefetch = 0 : i64, scratch_operands = 0 : i64, tpu.core_type = #tpu.core_type<tc>, window_params = [{pipeline_mode = #tpu.pipeline_mode<synchronous>, transform_indices = @transform_0, window_bounds = array<i64: 16, 128>}, {transform_indices = @transform_1, window_bounds = array<i64: 128, 128>}, {transform_indices = @transform_2, window_bounds = array<i64: 1, 128>}, {transform_indices = @transform_3, window_bounds = array<i64: 16, 128>}]} {
    %c0 = arith.constant 0 : index
    %c0_0 = arith.constant 0 : index
    %0 = vector.load %arg1[%c0, %c0_0] : memref<16x128xf32, #tpu.memory_space<vmem>>, vector<16x128xf32>
    %1 = arith.truncf %0 : vector<16x128xf32> to vector<16x128xbf16>
    %c0_1 = arith.constant 0 : index
    %c0_2 = arith.constant 0 : index
    %2 = vector.load %arg2[%c0_1, %c0_2] : memref<128x128xbf16, #tpu.memory_space<vmem>>, vector<128x128xbf16>
    %cst = arith.constant dense<0.000000e+00> : vector<16x128xf32>
    %3 = tpu.matmul %1, %2, %cst {dimension_numbers = #tpu.dot_dimension_numbers<[1], [0], [0], [1], [0, 0, 1, 1], [], []>} : vector<16x128xbf16>, vector<128x128xbf16>, vector<16x128xf32> -> vector<16x128xf32>
    %c0_3 = arith.constant 0 : index
    %c0_4 = arith.constant 0 : index
    %4 = vector.load %arg3[%c0_3, %c0_4] : memref<1x128xf32, #tpu.memory_space<vmem>>, vector<1x128xf32>
    %5 = vector.broadcast %4 : vector<1x128xf32> to vector<16x128xf32>
    %6 = arith.addf %3, %5 : vector<16x128xf32>
    %c0_5 = arith.constant 0 : index
    %c0_6 = arith.constant 0 : index
    %7 = vector.load %arg4[%c0_5, %c0_6] : memref<16x128xf32, #tpu.memory_space<vmem>>, vector<16x128xf32>
    tpu.vector_store %arg4[%c0_5, %c0_6], %6 {strides = array<i32>} : memref<16x128xf32, #tpu.memory_space<vmem>>, vector<16x128xf32>,
    return
  }
  func.func @transform_0(%arg0: i32) -> (i32, i32) {
    %c0_i32 = arith.constant 0 : i32
    %c0_i32_0 = arith.constant 0 : i32
    %c0_i32_1 = arith.constant 0 : i32
    return %c0_i32, %c0_i32_0 : i32, i32
  }
  func.func @transform_1(%arg0: i32) -> (i32, i32) {
    %c0_i32 = arith.constant 0 : i32
    %c0_i32_0 = arith.constant 0 : i32
    return %c0_i32, %arg0 : i32, i32
  }
  func.func @transform_2(%arg0: i32) -> (i32, i32) {
    %c0_i32 = arith.constant 0 : i32
    %c0_i32_0 = arith.constant 0 : i32
    return %c0_i32, %arg0 : i32, i32
  }
  func.func @transform_3(%arg0: i32) -> (i32, i32) {
    %c0_i32 = arith.constant 0 : i32
    %c0_i32_0 = arith.constant 0 : i32
    return %c0_i32, %arg0 : i32, i32
  }
}

module attributes {stable_mosaic.version = 11 : i64} {
  func.func @_decoder_layer_kernel(%arg0: i32, %arg1: memref<1x8x128xf32, #tpu.memory_space<vmem>>, %arg2: memref<1x8x128xf32, #tpu.memory_space<vmem>>, %arg3: memref<1x8x8xf32, #tpu.memory_space<vmem>>, %arg4: memref<128x384xbf16, #tpu.memory_space<vmem>>, %arg5: memref<1x384xf32, #tpu.memory_space<vmem>>, %arg6: memref<128x128xbf16, #tpu.memory_space<vmem>>, %arg7: memref<1x128xf32, #tpu.memory_space<vmem>>, %arg8: memref<1x128xf32, #tpu.memory_space<vmem>>, %arg9: memref<1x128xf32, #tpu.memory_space<vmem>>, %arg10: memref<128x128xbf16, #tpu.memory_space<vmem>>, %arg11: memref<1x128xf32, #tpu.memory_space<vmem>>, %arg12: memref<128x256xbf16, #tpu.memory_space<vmem>>, %arg13: memref<1x256xf32, #tpu.memory_space<vmem>>, %arg14: memref<128x128xbf16, #tpu.memory_space<vmem>>, %arg15: memref<1x128xf32, #tpu.memory_space<vmem>>, %arg16: memref<1x128xf32, #tpu.memory_space<vmem>>, %arg17: memref<1x128xf32, #tpu.memory_space<vmem>>, %arg18: memref<128x256xbf16, #tpu.memory_space<vmem>>, %arg19: memref<1x256xf32, #tpu.memory_space<vmem>>, %arg20: memref<256x128xbf16, #tpu.memory_space<vmem>>, %arg21: memref<1x128xf32, #tpu.memory_space<vmem>>, %arg22: memref<1x128xf32, #tpu.memory_space<vmem>>, %arg23: memref<1x128xf32, #tpu.memory_space<vmem>>, %arg24: memref<1x8x128xf32, #tpu.memory_space<vmem>>) attributes {dimension_semantics = [#tpu.dimension_semantics<parallel>], iteration_bounds = array<i64: 2>, scalar_prefetch = 0 : i64, scratch_operands = 0 : i64, tpu.core_type = #tpu.core_type<tc>, window_params = [{transform_indices = @transform_0, window_bounds = array<i64: 1, 8, 128>}, {transform_indices = @transform_1, window_bounds = array<i64: 1, 8, 128>}, {transform_indices = @transform_2, window_bounds = array<i64: 1, 8, 8>}, {pipeline_mode = #tpu.pipeline_mode<synchronous>, transform_indices = @transform_3, window_bounds = array<i64: 128, 384>}, {pipeline_mode = #tpu.pipeline_mode<synchronous>, transform_indices = @transform_4, window_bounds = array<i64: 1, 384>}, {pipeline_mode = #tpu.pipeline_mode<synchronous>, transform_indices = @transform_5, window_bounds = array<i64: 128, 128>}, {pipeline_mode = #tpu.pipeline_mode<synchronous>, transform_indices = @transform_6, window_bounds = array<i64: 1, 128>}, {pipeline_mode = #tpu.pipeline_mode<synchronous>, transform_indices = @transform_7, window_bounds = array<i64: 1, 128>}, {pipeline_mode = #tpu.pipeline_mode<synchronous>, transform_indices = @transform_8, window_bounds = array<i64: 1, 128>}, {pipeline_mode = #tpu.pipeline_mode<synchronous>, transform_indices = @transform_9, window_bounds = array<i64: 128, 128>}, {pipeline_mode = #tpu.pipeline_mode<synchronous>, transform_indices = @transform_10, window_bounds = array<i64: 1, 128>}, {pipeline_mode = #tpu.pipeline_mode<synchronous>, transform_indices = @transform_11, window_bounds = array<i64: 128, 256>}, {pipeline_mode = #tpu.pipeline_mode<synchronous>, transform_indices = @transform_12, window_bounds = array<i64: 1, 256>}, {pipeline_mode = #tpu.pipeline_mode<synchronous>, transform_indices = @transform_13, window_bounds = array<i64: 128, 128>}, {pipeline_mode = #tpu.pipeline_mode<synchronous>, transform_indices = @transform_14, window_bounds = array<i64: 1, 128>}, {pipeline_mode = #tpu.pipeline_mode<synchronous>, transform_indices = @transform_15, window_bounds = array<i64: 1, 128>}, {pipeline_mode = #tpu.pipeline_mode<synchronous>, transform_indices = @transform_16, window_bounds = array<i64: 1, 128>}, {pipeline_mode = #tpu.pipeline_mode<synchronous>, transform_indices = @transform_17, window_bounds = array<i64: 128, 256>}, {pipeline_mode = #tpu.pipeline_mode<synchronous>, transform_indices = @transform_18, window_bounds = array<i64: 1, 256>}, {pipeline_mode = #tpu.pipeline_mode<synchronous>, transform_indices = @transform_19, window_bounds = array<i64: 256, 128>}, {pipeline_mode = #tpu.pipeline_mode<synchronous>, transform_indices = @transform_20, window_bounds = array<i64: 1, 128>}, {pipeline_mode = #tpu.pipeline_mode<synchronous>, transform_indices = @transform_21, window_bounds = array<i64: 1, 128>}, {pipeline_mode = #tpu.pipeline_mode<synchronous>, transform_indices = @transform_22, window_bounds = array<i64: 1, 128>}, {transform_indices = @transform_23, window_bounds = array<i64: 1, 8, 128>}]} {
    %c0 = arith.constant 0 : index
    %c0_0 = arith.constant 0 : index
    %c0_1 = arith.constant 0 : index
    %0 = vector.load %arg1[%c0, %c0_0, %c0_1] : memref<1x8x128xf32, #tpu.memory_space<vmem>>, vector<1x8x128xf32>
    %1 = vector.shape_cast %0 : vector<1x8x128xf32> to vector<8x128xf32>
    %c0_2 = arith.constant 0 : index
    %c0_3 = arith.constant 0 : index
    %c0_4 = arith.constant 0 : index
    %2 = vector.load %arg2[%c0_2, %c0_3, %c0_4] : memref<1x8x128xf32, #tpu.memory_space<vmem>>, vector<1x8x128xf32>
    %3 = vector.shape_cast %2 : vector<1x8x128xf32> to vector<8x128xf32>
    %4 = arith.truncf %1 : vector<8x128xf32> to vector<8x128xbf16>
    %c0_5 = arith.constant 0 : index
    %c0_6 = arith.constant 0 : index
    %5 = vector.load %arg4[%c0_5, %c0_6] : memref<128x384xbf16, #tpu.memory_space<vmem>>, vector<128x384xbf16>
    %cst = arith.constant dense<0.000000e+00> : vector<8x384xf32>
    %6 = tpu.matmul %4, %5, %cst {dimension_numbers = #tpu.dot_dimension_numbers<[1], [0], [0], [1], [0, 0, 1, 1], [], []>} : vector<8x128xbf16>, vector<128x384xbf16>, vector<8x384xf32> -> vector<8x384xf32>
    %c0_7 = arith.constant 0 : index
    %c0_8 = arith.constant 0 : index
    %7 = vector.load %arg5[%c0_7, %c0_8] : memref<1x384xf32, #tpu.memory_space<vmem>>, vector<1x384xf32>
    %8 = vector.broadcast %7 : vector<1x384xf32> to vector<8x384xf32>
    %9 = arith.addf %6, %8 : vector<8x384xf32>
    %c0_9 = arith.constant 0 : index
    %c0_10 = arith.constant 0 : index
    %c0_11 = arith.constant 0 : index
    %10 = vector.load %arg3[%c0_9, %c0_10, %c0_11] : memref<1x8x8xf32, #tpu.memory_space<vmem>>, vector<1x8x8xf32>
    %11 = vector.shape_cast %10 : vector<1x8x8xf32> to vector<8x8xf32>
    %12 = vector.extract_strided_slice %9 {offsets = [0, 0], sizes = [8, 128], strides = [1, 1]} : vector<8x384xf32> to vector<8x128xf32>
    %13 = vector.extract_strided_slice %9 {offsets = [0, 128], sizes = [8, 128], strides = [1, 1]} : vector<8x384xf32> to vector<8x128xf32>
    %14 = vector.extract_strided_slice %9 {offsets = [0, 256], sizes = [8, 128], strides = [1, 1]} : vector<8x384xf32> to vector<8x128xf32>
    %15 = arith.truncf %12 : vector<8x128xf32> to vector<8x128xbf16>
    %16 = arith.truncf %13 : vector<8x128xf32> to vector<8x128xbf16>
    %17 = arith.truncf %14 : vector<8x128xf32> to vector<8x128xbf16>
    %18 = vector.extract_strided_slice %15 {offsets = [0, 0], sizes = [8, 32], strides = [1, 1]} : vector<8x128xbf16> to vector<8x32xbf16>
    %19 = vector.extract_strided_slice %16 {offsets = [0, 0], sizes = [8, 32], strides = [1, 1]} : vector<8x128xbf16> to vector<8x32xbf16>
    %cst_12 = arith.constant dense<0.000000e+00> : vector<8x8xf32>
    %20 = tpu.matmul %18, %19, %cst_12 {dimension_numbers = #tpu.dot_dimension_numbers<[1], [1], [0], [0], [0, 0, 1, 0], [], []>} : vector<8x32xbf16>, vector<8x32xbf16>, vector<8x8xf32> -> vector<8x8xf32>
    %cst_13 = arith.constant 0.176776692 : f32
    %21 = vector.broadcast %cst_13 : f32 to vector<8x8xf32>
    %22 = arith.mulf %20, %21 : vector<8x8xf32>
    %23 = arith.addf %22, %11 : vector<8x8xf32>
    %cst_14 = arith.constant dense<0xFF800000> : vector<8xf32>
    %24 = vector.multi_reduction <maximumf>, %23, %cst_14 [1] : vector<8x8xf32> to vector<8xf32>
    %25 = vector.shape_cast %24 : vector<8xf32> to vector<8x1xf32>
    %26 = vector.broadcast %25 : vector<8x1xf32> to vector<8x8xf32>
    %27 = arith.subf %23, %26 : vector<8x8xf32>
    %28 = math.exp %27 : vector<8x8xf32>
    %cst_15 = arith.constant dense<0.000000e+00> : vector<8xf32>
    %29 = vector.multi_reduction <add>, %28, %cst_15 [1] : vector<8x8xf32> to vector<8xf32>
    %30 = vector.shape_cast %29 : vector<8xf32> to vector<8x1xf32>
    %31 = tpu.reciprocal %30 {approx = true} : vector<8x1xf32> -> vector<8x1xf32>
    %32 = vector.broadcast %31 : vector<8x1xf32> to vector<8x8xf32>
    %33 = arith.mulf %28, %32 : vector<8x8xf32>
    %34 = arith.truncf %33 : vector<8x8xf32> to vector<8x8xbf16>
    %35 = vector.extract_strided_slice %17 {offsets = [0, 0], sizes = [8, 32], strides = [1, 1]} : vector<8x128xbf16> to vector<8x32xbf16>
    %cst_16 = arith.constant dense<0.000000e+00> : vector<8x32xf32>
    %36 = tpu.matmul %34, %35, %cst_16 {dimension_numbers = #tpu.dot_dimension_numbers<[1], [0], [0], [1], [0, 0, 1, 1], [], []>} : vector<8x8xbf16>, vector<8x32xbf16>, vector<8x32xf32> -> vector<8x32xf32>
    %37 = vector.extract_strided_slice %15 {offsets = [0, 32], sizes = [8, 32], strides = [1, 1]} : vector<8x128xbf16> to vector<8x32xbf16>
    %38 = vector.extract_strided_slice %16 {offsets = [0, 32], sizes = [8, 32], strides = [1, 1]} : vector<8x128xbf16> to vector<8x32xbf16>
    %cst_17 = arith.constant dense<0.000000e+00> : vector<8x8xf32>
    %39 = tpu.matmul %37, %38, %cst_17 {dimension_numbers = #tpu.dot_dimension_numbers<[1], [1], [0], [0], [0, 0, 1, 0], [], []>} : vector<8x32xbf16>, vector<8x32xbf16>, vector<8x8xf32> -> vector<8x8xf32>
    %cst_18 = arith.constant 0.176776692 : f32
    %40 = vector.broadcast %cst_18 : f32 to vector<8x8xf32>
    %41 = arith.mulf %39, %40 : vector<8x8xf32>
    %42 = arith.addf %41, %11 : vector<8x8xf32>
    %cst_19 = arith.constant dense<0xFF800000> : vector<8xf32>
    %43 = vector.multi_reduction <maximumf>, %42, %cst_19 [1] : vector<8x8xf32> to vector<8xf32>
    %44 = vector.shape_cast %43 : vector<8xf32> to vector<8x1xf32>
    %45 = vector.broadcast %44 : vector<8x1xf32> to vector<8x8xf32>
    %46 = arith.subf %42, %45 : vector<8x8xf32>
    %47 = math.exp %46 : vector<8x8xf32>
    %cst_20 = arith.constant dense<0.000000e+00> : vector<8xf32>
    %48 = vector.multi_reduction <add>, %47, %cst_20 [1] : vector<8x8xf32> to vector<8xf32>
    %49 = vector.shape_cast %48 : vector<8xf32> to vector<8x1xf32>
    %50 = tpu.reciprocal %49 {approx = true} : vector<8x1xf32> -> vector<8x1xf32>
    %51 = vector.broadcast %50 : vector<8x1xf32> to vector<8x8xf32>
    %52 = arith.mulf %47, %51 : vector<8x8xf32>
    %53 = arith.truncf %52 : vector<8x8xf32> to vector<8x8xbf16>
    %54 = vector.extract_strided_slice %17 {offsets = [0, 32], sizes = [8, 32], strides = [1, 1]} : vector<8x128xbf16> to vector<8x32xbf16>
    %cst_21 = arith.constant dense<0.000000e+00> : vector<8x32xf32>
    %55 = tpu.matmul %53, %54, %cst_21 {dimension_numbers = #tpu.dot_dimension_numbers<[1], [0], [0], [1], [0, 0, 1, 1], [], []>} : vector<8x8xbf16>, vector<8x32xbf16>, vector<8x32xf32> -> vector<8x32xf32>
    %56 = vector.extract_strided_slice %15 {offsets = [0, 64], sizes = [8, 32], strides = [1, 1]} : vector<8x128xbf16> to vector<8x32xbf16>
    %57 = vector.extract_strided_slice %16 {offsets = [0, 64], sizes = [8, 32], strides = [1, 1]} : vector<8x128xbf16> to vector<8x32xbf16>
    %cst_22 = arith.constant dense<0.000000e+00> : vector<8x8xf32>
    %58 = tpu.matmul %56, %57, %cst_22 {dimension_numbers = #tpu.dot_dimension_numbers<[1], [1], [0], [0], [0, 0, 1, 0], [], []>} : vector<8x32xbf16>, vector<8x32xbf16>, vector<8x8xf32> -> vector<8x8xf32>
    %cst_23 = arith.constant 0.176776692 : f32
    %59 = vector.broadcast %cst_23 : f32 to vector<8x8xf32>
    %60 = arith.mulf %58, %59 : vector<8x8xf32>
    %61 = arith.addf %60, %11 : vector<8x8xf32>
    %cst_24 = arith.constant dense<0xFF800000> : vector<8xf32>
    %62 = vector.multi_reduction <maximumf>, %61, %cst_24 [1] : vector<8x8xf32> to vector<8xf32>
    %63 = vector.shape_cast %62 : vector<8xf32> to vector<8x1xf32>
    %64 = vector.broadcast %63 : vector<8x1xf32> to vector<8x8xf32>
    %65 = arith.subf %61, %64 : vector<8x8xf32>
    %66 = math.exp %65 : vector<8x8xf32>
    %cst_25 = arith.constant dense<0.000000e+00> : vector<8xf32>
    %67 = vector.multi_reduction <add>, %66, %cst_25 [1] : vector<8x8xf32> to vector<8xf32>
    %68 = vector.shape_cast %67 : vector<8xf32> to vector<8x1xf32>
    %69 = tpu.reciprocal %68 {approx = true} : vector<8x1xf32> -> vector<8x1xf32>
    %70 = vector.broadcast %69 : vector<8x1xf32> to vector<8x8xf32>
    %71 = arith.mulf %66, %70 : vector<8x8xf32>
    %72 = arith.truncf %71 : vector<8x8xf32> to vector<8x8xbf16>
    %73 = vector.extract_strided_slice %17 {offsets = [0, 64], sizes = [8, 32], strides = [1, 1]} : vector<8x128xbf16> to vector<8x32xbf16>
    %cst_26 = arith.constant dense<0.000000e+00> : vector<8x32xf32>
    %74 = tpu.matmul %72, %73, %cst_26 {dimension_numbers = #tpu.dot_dimension_numbers<[1], [0], [0], [1], [0, 0, 1, 1], [], []>} : vector<8x8xbf16>, vector<8x32xbf16>, vector<8x32xf32> -> vector<8x32xf32>
    %75 = vector.extract_strided_slice %15 {offsets = [0, 96], sizes = [8, 32], strides = [1, 1]} : vector<8x128xbf16> to vector<8x32xbf16>
    %76 = vector.extract_strided_slice %16 {offsets = [0, 96], sizes = [8, 32], strides = [1, 1]} : vector<8x128xbf16> to vector<8x32xbf16>
    %cst_27 = arith.constant dense<0.000000e+00> : vector<8x8xf32>
    %77 = tpu.matmul %75, %76, %cst_27 {dimension_numbers = #tpu.dot_dimension_numbers<[1], [1], [0], [0], [0, 0, 1, 0], [], []>} : vector<8x32xbf16>, vector<8x32xbf16>, vector<8x8xf32> -> vector<8x8xf32>
    %cst_28 = arith.constant 0.176776692 : f32
    %78 = vector.broadcast %cst_28 : f32 to vector<8x8xf32>
    %79 = arith.mulf %77, %78 : vector<8x8xf32>
    %80 = arith.addf %79, %11 : vector<8x8xf32>
    %cst_29 = arith.constant dense<0xFF800000> : vector<8xf32>
    %81 = vector.multi_reduction <maximumf>, %80, %cst_29 [1] : vector<8x8xf32> to vector<8xf32>
    %82 = vector.shape_cast %81 : vector<8xf32> to vector<8x1xf32>
    %83 = vector.broadcast %82 : vector<8x1xf32> to vector<8x8xf32>
    %84 = arith.subf %80, %83 : vector<8x8xf32>
    %85 = math.exp %84 : vector<8x8xf32>
    %cst_30 = arith.constant dense<0.000000e+00> : vector<8xf32>
    %86 = vector.multi_reduction <add>, %85, %cst_30 [1] : vector<8x8xf32> to vector<8xf32>
    %87 = vector.shape_cast %86 : vector<8xf32> to vector<8x1xf32>
    %88 = tpu.reciprocal %87 {approx = true} : vector<8x1xf32> -> vector<8x1xf32>
    %89 = vector.broadcast %88 : vector<8x1xf32> to vector<8x8xf32>
    %90 = arith.mulf %85, %89 : vector<8x8xf32>
    %91 = arith.truncf %90 : vector<8x8xf32> to vector<8x8xbf16>
    %92 = vector.extract_strided_slice %17 {offsets = [0, 96], sizes = [8, 32], strides = [1, 1]} : vector<8x128xbf16> to vector<8x32xbf16>
    %cst_31 = arith.constant dense<0.000000e+00> : vector<8x32xf32>
    %93 = tpu.matmul %91, %92, %cst_31 {dimension_numbers = #tpu.dot_dimension_numbers<[1], [0], [0], [1], [0, 0, 1, 1], [], []>} : vector<8x8xbf16>, vector<8x32xbf16>, vector<8x32xf32> -> vector<8x32xf32>
    %94 = tpu.concatenate %36, %55, %74, %93 in 1 : vector<8x32xf32>, vector<8x32xf32>, vector<8x32xf32>, vector<8x32xf32> -> vector<8x128xf32>
    %95 = arith.truncf %94 : vector<8x128xf32> to vector<8x128xbf16>
    %c0_32 = arith.constant 0 : index
    %c0_33 = arith.constant 0 : index
    %96 = vector.load %arg6[%c0_32, %c0_33] : memref<128x128xbf16, #tpu.memory_space<vmem>>, vector<128x128xbf16>
    %cst_34 = arith.constant dense<0.000000e+00> : vector<8x128xf32>
    %97 = tpu.matmul %95, %96, %cst_34 {dimension_numbers = #tpu.dot_dimension_numbers<[1], [0], [0], [1], [0, 0, 1, 1], [], []>} : vector<8x128xbf16>, vector<128x128xbf16>, vector<8x128xf32> -> vector<8x128xf32>
    %c0_35 = arith.constant 0 : index
    %c0_36 = arith.constant 0 : index
    %98 = vector.load %arg7[%c0_35, %c0_36] : memref<1x128xf32, #tpu.memory_space<vmem>>, vector<1x128xf32>
    %99 = vector.broadcast %98 : vector<1x128xf32> to vector<8x128xf32>
    %100 = arith.addf %97, %99 : vector<8x128xf32>
    %101 = arith.addf %100, %1 : vector<8x128xf32>
    %c0_37 = arith.constant 0 : index
    %c0_38 = arith.constant 0 : index
    %102 = vector.load %arg8[%c0_37, %c0_38] : memref<1x128xf32, #tpu.memory_space<vmem>>, vector<1x128xf32>
    %c0_39 = arith.constant 0 : index
    %c0_40 = arith.constant 0 : index
    %103 = vector.load %arg9[%c0_39, %c0_40] : memref<1x128xf32, #tpu.memory_space<vmem>>, vector<1x128xf32>
    %cst_41 = arith.constant dense<0.000000e+00> : vector<8xf32>
    %104 = vector.multi_reduction <add>, %101, %cst_41 [1] : vector<8x128xf32> to vector<8xf32>
    %105 = vector.shape_cast %104 : vector<8xf32> to vector<8x1xf32>
    %cst_42 = arith.constant 7.812500e-03 : f32
    %106 = vector.broadcast %cst_42 : f32 to vector<8x1xf32>
    %107 = arith.mulf %105, %106 : vector<8x1xf32>
    %108 = vector.broadcast %107 : vector<8x1xf32> to vector<8x128xf32>
    %109 = arith.subf %101, %108 : vector<8x128xf32>
    %110 = arith.mulf %109, %109 : vector<8x128xf32>
    %cst_43 = arith.constant dense<0.000000e+00> : vector<8xf32>
    %111 = vector.multi_reduction <add>, %110, %cst_43 [1] : vector<8x128xf32> to vector<8xf32>
    %112 = vector.shape_cast %111 : vector<8xf32> to vector<8x1xf32>
    %cst_44 = arith.constant 7.812500e-03 : f32
    %113 = vector.broadcast %cst_44 : f32 to vector<8x1xf32>
    %114 = arith.mulf %112, %113 : vector<8x1xf32>
    %cst_45 = arith.constant 9.99999974E-6 : f32
    %115 = vector.broadcast %cst_45 : f32 to vector<8x1xf32>
    %116 = arith.addf %114, %115 : vector<8x1xf32>
    %117 = math.rsqrt %116 : vector<8x1xf32>
    %118 = vector.broadcast %117 : vector<8x1xf32> to vector<8x128xf32>
    %119 = arith.mulf %109, %118 : vector<8x128xf32>
    %120 = vector.broadcast %102 : vector<1x128xf32> to vector<8x128xf32>
    %121 = arith.mulf %119, %120 : vector<8x128xf32>
    %122 = vector.broadcast %103 : vector<1x128xf32> to vector<8x128xf32>
    %123 = arith.addf %121, %122 : vector<8x128xf32>
    %124 = arith.truncf %123 : vector<8x128xf32> to vector<8x128xbf16>
    %c0_46 = arith.constant 0 : index
    %c0_47 = arith.constant 0 : index
    %125 = vector.load %arg10[%c0_46, %c0_47] : memref<128x128xbf16, #tpu.memory_space<vmem>>, vector<128x128xbf16>
    %cst_48 = arith.constant dense<0.000000e+00> : vector<8x128xf32>
    %126 = tpu.matmul %124, %125, %cst_48 {dimension_numbers = #tpu.dot_dimension_numbers<[1], [0], [0], [1], [0, 0, 1, 1], [], []>} : vector<8x128xbf16>, vector<128x128xbf16>, vector<8x128xf32> -> vector<8x128xf32>
    %c0_49 = arith.constant 0 : index
    %c0_50 = arith.constant 0 : index
    %127 = vector.load %arg11[%c0_49, %c0_50] : memref<1x128xf32, #tpu.memory_space<vmem>>, vector<1x128xf32>
    %128 = vector.broadcast %127 : vector<1x128xf32> to vector<8x128xf32>
    %129 = arith.addf %126, %128 : vector<8x128xf32>
    %130 = arith.truncf %3 : vector<8x128xf32> to vector<8x128xbf16>
    %c0_51 = arith.constant 0 : index
    %c0_52 = arith.constant 0 : index
    %131 = vector.load %arg12[%c0_51, %c0_52] : memref<128x256xbf16, #tpu.memory_space<vmem>>, vector<128x256xbf16>
    %cst_53 = arith.constant dense<0.000000e+00> : vector<8x256xf32>
    %132 = tpu.matmul %130, %131, %cst_53 {dimension_numbers = #tpu.dot_dimension_numbers<[1], [0], [0], [1], [0, 0, 1, 1], [], []>} : vector<8x128xbf16>, vector<128x256xbf16>, vector<8x256xf32> -> vector<8x256xf32>
    %c0_54 = arith.constant 0 : index
    %c0_55 = arith.constant 0 : index
    %133 = vector.load %arg13[%c0_54, %c0_55] : memref<1x256xf32, #tpu.memory_space<vmem>>, vector<1x256xf32>
    %134 = vector.broadcast %133 : vector<1x256xf32> to vector<8x256xf32>
    %135 = arith.addf %132, %134 : vector<8x256xf32>
    %136 = vector.extract_strided_slice %135 {offsets = [0, 0], sizes = [8, 128], strides = [1, 1]} : vector<8x256xf32> to vector<8x128xf32>
    %137 = vector.extract_strided_slice %135 {offsets = [0, 128], sizes = [8, 128], strides = [1, 1]} : vector<8x256xf32> to vector<8x128xf32>
    %138 = arith.truncf %129 : vector<8x128xf32> to vector<8x128xbf16>
    %139 = arith.truncf %136 : vector<8x128xf32> to vector<8x128xbf16>
    %140 = arith.truncf %137 : vector<8x128xf32> to vector<8x128xbf16>
    %141 = vector.extract_strided_slice %138 {offsets = [0, 0], sizes = [8, 32], strides = [1, 1]} : vector<8x128xbf16> to vector<8x32xbf16>
    %142 = vector.extract_strided_slice %139 {offsets = [0, 0], sizes = [8, 32], strides = [1, 1]} : vector<8x128xbf16> to vector<8x32xbf16>
    %cst_56 = arith.constant dense<0.000000e+00> : vector<8x8xf32>
    %143 = tpu.matmul %141, %142, %cst_56 {dimension_numbers = #tpu.dot_dimension_numbers<[1], [1], [0], [0], [0, 0, 1, 0], [], []>} : vector<8x32xbf16>, vector<8x32xbf16>, vector<8x8xf32> -> vector<8x8xf32>
    %cst_57 = arith.constant 0.176776692 : f32
    %144 = vector.broadcast %cst_57 : f32 to vector<8x8xf32>
    %145 = arith.mulf %143, %144 : vector<8x8xf32>
    %cst_58 = arith.constant dense<0xFF800000> : vector<8xf32>
    %146 = vector.multi_reduction <maximumf>, %145, %cst_58 [1] : vector<8x8xf32> to vector<8xf32>
    %147 = vector.shape_cast %146 : vector<8xf32> to vector<8x1xf32>
    %148 = vector.broadcast %147 : vector<8x1xf32> to vector<8x8xf32>
    %149 = arith.subf %145, %148 : vector<8x8xf32>
    %150 = math.exp %149 : vector<8x8xf32>
    %cst_59 = arith.constant dense<0.000000e+00> : vector<8xf32>
    %151 = vector.multi_reduction <add>, %150, %cst_59 [1] : vector<8x8xf32> to vector<8xf32>
    %152 = vector.shape_cast %151 : vector<8xf32> to vector<8x1xf32>
    %153 = tpu.reciprocal %152 {approx = true} : vector<8x1xf32> -> vector<8x1xf32>
    %154 = vector.broadcast %153 : vector<8x1xf32> to vector<8x8xf32>
    %155 = arith.mulf %150, %154 : vector<8x8xf32>
    %156 = arith.truncf %155 : vector<8x8xf32> to vector<8x8xbf16>
    %157 = vector.extract_strided_slice %140 {offsets = [0, 0], sizes = [8, 32], strides = [1, 1]} : vector<8x128xbf16> to vector<8x32xbf16>
    %cst_60 = arith.constant dense<0.000000e+00> : vector<8x32xf32>
    %158 = tpu.matmul %156, %157, %cst_60 {dimension_numbers = #tpu.dot_dimension_numbers<[1], [0], [0], [1], [0, 0, 1, 1], [], []>} : vector<8x8xbf16>, vector<8x32xbf16>, vector<8x32xf32> -> vector<8x32xf32>
    %159 = vector.extract_strided_slice %138 {offsets = [0, 32], sizes = [8, 32], strides = [1, 1]} : vector<8x128xbf16> to vector<8x32xbf16>
    %160 = vector.extract_strided_slice %139 {offsets = [0, 32], sizes = [8, 32], strides = [1, 1]} : vector<8x128xbf16> to vector<8x32xbf16>
    %cst_61 = arith.constant dense<0.000000e+00> : vector<8x8xf32>
    %161 = tpu.matmul %159, %160, %cst_61 {dimension_numbers = #tpu.dot_dimension_numbers<[1], [1], [0], [0], [0, 0, 1, 0], [], []>} : vector<8x32xbf16>, vector<8x32xbf16>, vector<8x8xf32> -> vector<8x8xf32>
    %cst_62 = arith.constant 0.176776692 : f32
    %162 = vector.broadcast %cst_62 : f32 to vector<8x8xf32>
    %163 = arith.mulf %161, %162 : vector<8x8xf32>
    %cst_63 = arith.constant dense<0xFF800000> : vector<8xf32>
    %164 = vector.multi_reduction <maximumf>, %163, %cst_63 [1] : vector<8x8xf32> to vector<8xf32>
    %165 = vector.shape_cast %164 : vector<8xf32> to vector<8x1xf32>
    %166 = vector.broadcast %165 : vector<8x1xf32> to vector<8x8xf32>
    %167 = arith.subf %163, %166 : vector<8x8xf32>
    %168 = math.exp %167 : vector<8x8xf32>
    %cst_64 = arith.constant dense<0.000000e+00> : vector<8xf32>
    %169 = vector.multi_reduction <add>, %168, %cst_64 [1] : vector<8x8xf32> to vector<8xf32>
    %170 = vector.shape_cast %169 : vector<8xf32> to vector<8x1xf32>
    %171 = tpu.reciprocal %170 {approx = true} : vector<8x1xf32> -> vector<8x1xf32>
    %172 = vector.broadcast %171 : vector<8x1xf32> to vector<8x8xf32>
    %173 = arith.mulf %168, %172 : vector<8x8xf32>
    %174 = arith.truncf %173 : vector<8x8xf32> to vector<8x8xbf16>
    %175 = vector.extract_strided_slice %140 {offsets = [0, 32], sizes = [8, 32], strides = [1, 1]} : vector<8x128xbf16> to vector<8x32xbf16>
    %cst_65 = arith.constant dense<0.000000e+00> : vector<8x32xf32>
    %176 = tpu.matmul %174, %175, %cst_65 {dimension_numbers = #tpu.dot_dimension_numbers<[1], [0], [0], [1], [0, 0, 1, 1], [], []>} : vector<8x8xbf16>, vector<8x32xbf16>, vector<8x32xf32> -> vector<8x32xf32>
    %177 = vector.extract_strided_slice %138 {offsets = [0, 64], sizes = [8, 32], strides = [1, 1]} : vector<8x128xbf16> to vector<8x32xbf16>
    %178 = vector.extract_strided_slice %139 {offsets = [0, 64], sizes = [8, 32], strides = [1, 1]} : vector<8x128xbf16> to vector<8x32xbf16>
    %cst_66 = arith.constant dense<0.000000e+00> : vector<8x8xf32>
    %179 = tpu.matmul %177, %178, %cst_66 {dimension_numbers = #tpu.dot_dimension_numbers<[1], [1], [0], [0], [0, 0, 1, 0], [], []>} : vector<8x32xbf16>, vector<8x32xbf16>, vector<8x8xf32> -> vector<8x8xf32>
    %cst_67 = arith.constant 0.176776692 : f32
    %180 = vector.broadcast %cst_67 : f32 to vector<8x8xf32>
    %181 = arith.mulf %179, %180 : vector<8x8xf32>
    %cst_68 = arith.constant dense<0xFF800000> : vector<8xf32>
    %182 = vector.multi_reduction <maximumf>, %181, %cst_68 [1] : vector<8x8xf32> to vector<8xf32>
    %183 = vector.shape_cast %182 : vector<8xf32> to vector<8x1xf32>
    %184 = vector.broadcast %183 : vector<8x1xf32> to vector<8x8xf32>
    %185 = arith.subf %181, %184 : vector<8x8xf32>
    %186 = math.exp %185 : vector<8x8xf32>
    %cst_69 = arith.constant dense<0.000000e+00> : vector<8xf32>
    %187 = vector.multi_reduction <add>, %186, %cst_69 [1] : vector<8x8xf32> to vector<8xf32>
    %188 = vector.shape_cast %187 : vector<8xf32> to vector<8x1xf32>
    %189 = tpu.reciprocal %188 {approx = true} : vector<8x1xf32> -> vector<8x1xf32>
    %190 = vector.broadcast %189 : vector<8x1xf32> to vector<8x8xf32>
    %191 = arith.mulf %186, %190 : vector<8x8xf32>
    %192 = arith.truncf %191 : vector<8x8xf32> to vector<8x8xbf16>
    %193 = vector.extract_strided_slice %140 {offsets = [0, 64], sizes = [8, 32], strides = [1, 1]} : vector<8x128xbf16> to vector<8x32xbf16>
    %cst_70 = arith.constant dense<0.000000e+00> : vector<8x32xf32>
    %194 = tpu.matmul %192, %193, %cst_70 {dimension_numbers = #tpu.dot_dimension_numbers<[1], [0], [0], [1], [0, 0, 1, 1], [], []>} : vector<8x8xbf16>, vector<8x32xbf16>, vector<8x32xf32> -> vector<8x32xf32>
    %195 = vector.extract_strided_slice %138 {offsets = [0, 96], sizes = [8, 32], strides = [1, 1]} : vector<8x128xbf16> to vector<8x32xbf16>
    %196 = vector.extract_strided_slice %139 {offsets = [0, 96], sizes = [8, 32], strides = [1, 1]} : vector<8x128xbf16> to vector<8x32xbf16>
    %cst_71 = arith.constant dense<0.000000e+00> : vector<8x8xf32>
    %197 = tpu.matmul %195, %196, %cst_71 {dimension_numbers = #tpu.dot_dimension_numbers<[1], [1], [0], [0], [0, 0, 1, 0], [], []>} : vector<8x32xbf16>, vector<8x32xbf16>, vector<8x8xf32> -> vector<8x8xf32>
    %cst_72 = arith.constant 0.176776692 : f32
    %198 = vector.broadcast %cst_72 : f32 to vector<8x8xf32>
    %199 = arith.mulf %197, %198 : vector<8x8xf32>
    %cst_73 = arith.constant dense<0xFF800000> : vector<8xf32>
    %200 = vector.multi_reduction <maximumf>, %199, %cst_73 [1] : vector<8x8xf32> to vector<8xf32>
    %201 = vector.shape_cast %200 : vector<8xf32> to vector<8x1xf32>
    %202 = vector.broadcast %201 : vector<8x1xf32> to vector<8x8xf32>
    %203 = arith.subf %199, %202 : vector<8x8xf32>
    %204 = math.exp %203 : vector<8x8xf32>
    %cst_74 = arith.constant dense<0.000000e+00> : vector<8xf32>
    %205 = vector.multi_reduction <add>, %204, %cst_74 [1] : vector<8x8xf32> to vector<8xf32>
    %206 = vector.shape_cast %205 : vector<8xf32> to vector<8x1xf32>
    %207 = tpu.reciprocal %206 {approx = true} : vector<8x1xf32> -> vector<8x1xf32>
    %208 = vector.broadcast %207 : vector<8x1xf32> to vector<8x8xf32>
    %209 = arith.mulf %204, %208 : vector<8x8xf32>
    %210 = arith.truncf %209 : vector<8x8xf32> to vector<8x8xbf16>
    %211 = vector.extract_strided_slice %140 {offsets = [0, 96], sizes = [8, 32], strides = [1, 1]} : vector<8x128xbf16> to vector<8x32xbf16>
    %cst_75 = arith.constant dense<0.000000e+00> : vector<8x32xf32>
    %212 = tpu.matmul %210, %211, %cst_75 {dimension_numbers = #tpu.dot_dimension_numbers<[1], [0], [0], [1], [0, 0, 1, 1], [], []>} : vector<8x8xbf16>, vector<8x32xbf16>, vector<8x32xf32> -> vector<8x32xf32>
    %213 = tpu.concatenate %158, %176, %194, %212 in 1 : vector<8x32xf32>, vector<8x32xf32>, vector<8x32xf32>, vector<8x32xf32> -> vector<8x128xf32>
    %214 = arith.truncf %213 : vector<8x128xf32> to vector<8x128xbf16>
    %c0_76 = arith.constant 0 : index
    %c0_77 = arith.constant 0 : index
    %215 = vector.load %arg14[%c0_76, %c0_77] : memref<128x128xbf16, #tpu.memory_space<vmem>>, vector<128x128xbf16>
    %cst_78 = arith.constant dense<0.000000e+00> : vector<8x128xf32>
    %216 = tpu.matmul %214, %215, %cst_78 {dimension_numbers = #tpu.dot_dimension_numbers<[1], [0], [0], [1], [0, 0, 1, 1], [], []>} : vector<8x128xbf16>, vector<128x128xbf16>, vector<8x128xf32> -> vector<8x128xf32>
    %c0_79 = arith.constant 0 : index
    %c0_80 = arith.constant 0 : index
    %217 = vector.load %arg15[%c0_79, %c0_80] : memref<1x128xf32, #tpu.memory_space<vmem>>, vector<1x128xf32>
    %218 = vector.broadcast %217 : vector<1x128xf32> to vector<8x128xf32>
    %219 = arith.addf %216, %218 : vector<8x128xf32>
    %220 = arith.addf %219, %123 : vector<8x128xf32>
    %c0_81 = arith.constant 0 : index
    %c0_82 = arith.constant 0 : index
    %221 = vector.load %arg16[%c0_81, %c0_82] : memref<1x128xf32, #tpu.memory_space<vmem>>, vector<1x128xf32>
    %c0_83 = arith.constant 0 : index
    %c0_84 = arith.constant 0 : index
    %222 = vector.load %arg17[%c0_83, %c0_84] : memref<1x128xf32, #tpu.memory_space<vmem>>, vector<1x128xf32>
    %cst_85 = arith.constant dense<0.000000e+00> : vector<8xf32>
    %223 = vector.multi_reduction <add>, %220, %cst_85 [1] : vector<8x128xf32> to vector<8xf32>
    %224 = vector.shape_cast %223 : vector<8xf32> to vector<8x1xf32>
    %cst_86 = arith.constant 7.812500e-03 : f32
    %225 = vector.broadcast %cst_86 : f32 to vector<8x1xf32>
    %226 = arith.mulf %224, %225 : vector<8x1xf32>
    %227 = vector.broadcast %226 : vector<8x1xf32> to vector<8x128xf32>
    %228 = arith.subf %220, %227 : vector<8x128xf32>
    %229 = arith.mulf %228, %228 : vector<8x128xf32>
    %cst_87 = arith.constant dense<0.000000e+00> : vector<8xf32>
    %230 = vector.multi_reduction <add>, %229, %cst_87 [1] : vector<8x128xf32> to vector<8xf32>
    %231 = vector.shape_cast %230 : vector<8xf32> to vector<8x1xf32>
    %cst_88 = arith.constant 7.812500e-03 : f32
    %232 = vector.broadcast %cst_88 : f32 to vector<8x1xf32>
    %233 = arith.mulf %231, %232 : vector<8x1xf32>
    %cst_89 = arith.constant 9.99999974E-6 : f32
    %234 = vector.broadcast %cst_89 : f32 to vector<8x1xf32>
    %235 = arith.addf %233, %234 : vector<8x1xf32>
    %236 = math.rsqrt %235 : vector<8x1xf32>
    %237 = vector.broadcast %236 : vector<8x1xf32> to vector<8x128xf32>
    %238 = arith.mulf %228, %237 : vector<8x128xf32>
    %239 = vector.broadcast %221 : vector<1x128xf32> to vector<8x128xf32>
    %240 = arith.mulf %238, %239 : vector<8x128xf32>
    %241 = vector.broadcast %222 : vector<1x128xf32> to vector<8x128xf32>
    %242 = arith.addf %240, %241 : vector<8x128xf32>
    %243 = arith.truncf %242 : vector<8x128xf32> to vector<8x128xbf16>
    %c0_90 = arith.constant 0 : index
    %c0_91 = arith.constant 0 : index
    %244 = vector.load %arg18[%c0_90, %c0_91] : memref<128x256xbf16, #tpu.memory_space<vmem>>, vector<128x256xbf16>
    %cst_92 = arith.constant dense<0.000000e+00> : vector<8x256xf32>
    %245 = tpu.matmul %243, %244, %cst_92 {dimension_numbers = #tpu.dot_dimension_numbers<[1], [0], [0], [1], [0, 0, 1, 1], [], []>} : vector<8x128xbf16>, vector<128x256xbf16>, vector<8x256xf32> -> vector<8x256xf32>
    %c0_93 = arith.constant 0 : index
    %c0_94 = arith.constant 0 : index
    %246 = vector.load %arg19[%c0_93, %c0_94] : memref<1x256xf32, #tpu.memory_space<vmem>>, vector<1x256xf32>
    %247 = vector.broadcast %246 : vector<1x256xf32> to vector<8x256xf32>
    %248 = arith.addf %245, %247 : vector<8x256xf32>
    %cst_95 = arith.constant 0.000000e+00 : f32
    %249 = vector.broadcast %cst_95 : f32 to vector<8x256xf32>
    %250 = arith.maximumf %248, %249 : vector<8x256xf32>
    %251 = arith.truncf %250 : vector<8x256xf32> to vector<8x256xbf16>
    %c0_96 = arith.constant 0 : index
    %c0_97 = arith.constant 0 : index
    %252 = vector.load %arg20[%c0_96, %c0_97] : memref<256x128xbf16, #tpu.memory_space<vmem>>, vector<256x128xbf16>
    %cst_98 = arith.constant dense<0.000000e+00> : vector<8x128xf32>
    %253 = tpu.matmul %251, %252, %cst_98 {dimension_numbers = #tpu.dot_dimension_numbers<[1], [0], [0], [1], [0, 0, 1, 1], [], []>} : vector<8x256xbf16>, vector<256x128xbf16>, vector<8x128xf32> -> vector<8x128xf32>
    %c0_99 = arith.constant 0 : index
    %c0_100 = arith.constant 0 : index
    %254 = vector.load %arg21[%c0_99, %c0_100] : memref<1x128xf32, #tpu.memory_space<vmem>>, vector<1x128xf32>
    %255 = vector.broadcast %254 : vector<1x128xf32> to vector<8x128xf32>
    %256 = arith.addf %253, %255 : vector<8x128xf32>
    %257 = arith.addf %256, %242 : vector<8x128xf32>
    %c0_101 = arith.constant 0 : index
    %c0_102 = arith.constant 0 : index
    %258 = vector.load %arg22[%c0_101, %c0_102] : memref<1x128xf32, #tpu.memory_space<vmem>>, vector<1x128xf32>
    %c0_103 = arith.constant 0 : index
    %c0_104 = arith.constant 0 : index
    %259 = vector.load %arg23[%c0_103, %c0_104] : memref<1x128xf32, #tpu.memory_space<vmem>>, vector<1x128xf32>
    %cst_105 = arith.constant dense<0.000000e+00> : vector<8xf32>
    %260 = vector.multi_reduction <add>, %257, %cst_105 [1] : vector<8x128xf32> to vector<8xf32>
    %261 = vector.shape_cast %260 : vector<8xf32> to vector<8x1xf32>
    %cst_106 = arith.constant 7.812500e-03 : f32
    %262 = vector.broadcast %cst_106 : f32 to vector<8x1xf32>
    %263 = arith.mulf %261, %262 : vector<8x1xf32>
    %264 = vector.broadcast %263 : vector<8x1xf32> to vector<8x128xf32>
    %265 = arith.subf %257, %264 : vector<8x128xf32>
    %266 = arith.mulf %265, %265 : vector<8x128xf32>
    %cst_107 = arith.constant dense<0.000000e+00> : vector<8xf32>
    %267 = vector.multi_reduction <add>, %266, %cst_107 [1] : vector<8x128xf32> to vector<8xf32>
    %268 = vector.shape_cast %267 : vector<8xf32> to vector<8x1xf32>
    %cst_108 = arith.constant 7.812500e-03 : f32
    %269 = vector.broadcast %cst_108 : f32 to vector<8x1xf32>
    %270 = arith.mulf %268, %269 : vector<8x1xf32>
    %cst_109 = arith.constant 9.99999974E-6 : f32
    %271 = vector.broadcast %cst_109 : f32 to vector<8x1xf32>
    %272 = arith.addf %270, %271 : vector<8x1xf32>
    %273 = math.rsqrt %272 : vector<8x1xf32>
    %274 = vector.broadcast %273 : vector<8x1xf32> to vector<8x128xf32>
    %275 = arith.mulf %265, %274 : vector<8x128xf32>
    %276 = vector.broadcast %258 : vector<1x128xf32> to vector<8x128xf32>
    %277 = arith.mulf %275, %276 : vector<8x128xf32>
    %278 = vector.broadcast %259 : vector<1x128xf32> to vector<8x128xf32>
    %279 = arith.addf %277, %278 : vector<8x128xf32>
    %c0_110 = arith.constant 0 : index
    %c0_111 = arith.constant 0 : index
    %c0_112 = arith.constant 0 : index
    %280 = vector.load %arg24[%c0_110, %c0_111, %c0_112] : memref<1x8x128xf32, #tpu.memory_space<vmem>>, vector<1x8x128xf32>
    %281 = vector.shape_cast %280 : vector<1x8x128xf32> to vector<8x128xf32>
    %282 = vector.shape_cast %279 : vector<8x128xf32> to vector<1x8x128xf32>
    tpu.vector_store %arg24[%c0_110, %c0_111, %c0_112], %282 {strides = array<i32>} : memref<1x8x128xf32, #tpu.memory_space<vmem>>, vector<1x8x128xf32>,
    return
  }
  func.func @transform_0(%arg0: i32) -> (i32, i32, i32) {
    %c0_i32 = arith.constant 0 : i32
    %c0_i32_0 = arith.constant 0 : i32
    %c0_i32_1 = arith.constant 0 : i32
    return %arg0, %c0_i32, %c0_i32_0 : i32, i32, i32
  }
  func.func @transform_1(%arg0: i32) -> (i32, i32, i32) {
    %c0_i32 = arith.constant 0 : i32
    %c0_i32_0 = arith.constant 0 : i32
    %c0_i32_1 = arith.constant 0 : i32
    return %arg0, %c0_i32, %c0_i32_0 : i32, i32, i32
  }
  func.func @transform_2(%arg0: i32) -> (i32, i32, i32) {
    %c0_i32 = arith.constant 0 : i32
    %c0_i32_0 = arith.constant 0 : i32
    %c0_i32_1 = arith.constant 0 : i32
    return %arg0, %c0_i32, %c0_i32_0 : i32, i32, i32
  }
  func.func @transform_3(%arg0: i32) -> (i32, i32) {
    %c0_i32 = arith.constant 0 : i32
    %c0_i32_0 = arith.constant 0 : i32
    %c0_i32_1 = arith.constant 0 : i32
    return %c0_i32, %c0_i32_0 : i32, i32
  }
  func.func @transform_4(%arg0: i32) -> (i32, i32) {
    %c0_i32 = arith.constant 0 : i32
    %c0_i32_0 = arith.constant 0 : i32
    %c0_i32_1 = arith.constant 0 : i32
    return %c0_i32, %c0_i32_0 : i32, i32
  }
  func.func @transform_5(%arg0: i32) -> (i32, i32) {
    %c0_i32 = arith.constant 0 : i32
    %c0_i32_0 = arith.constant 0 : i32
    %c0_i32_1 = arith.constant 0 : i32
    return %c0_i32, %c0_i32_0 : i32, i32
  }
  func.func @transform_6(%arg0: i32) -> (i32, i32) {
    %c0_i32 = arith.constant 0 : i32
    %c0_i32_0 = arith.constant 0 : i32
    %c0_i32_1 = arith.constant 0 : i32
    return %c0_i32, %c0_i32_0 : i32, i32
  }
  func.func @transform_7(%arg0: i32) -> (i32, i32) {
    %c0_i32 = arith.constant 0 : i32
    %c0_i32_0 = arith.constant 0 : i32
    %c0_i32_1 = arith.constant 0 : i32
    return %c0_i32, %c0_i32_0 : i32, i32
  }
  func.func @transform_8(%arg0: i32) -> (i32, i32) {
    %c0_i32 = arith.constant 0 : i32
    %c0_i32_0 = arith.constant 0 : i32
    %c0_i32_1 = arith.constant 0 : i32
    return %c0_i32, %c0_i32_0 : i32, i32
  }
  func.func @transform_9(%arg0: i32) -> (i32, i32) {
    %c0_i32 = arith.constant 0 : i32
    %c0_i32_0 = arith.constant 0 : i32
    %c0_i32_1 = arith.constant 0 : i32
    return %c0_i32, %c0_i32_0 : i32, i32
  }
  func.func @transform_10(%arg0: i32) -> (i32, i32) {
    %c0_i32 = arith.constant 0 : i32
    %c0_i32_0 = arith.constant 0 : i32
    %c0_i32_1 = arith.constant 0 : i32
    return %c0_i32, %c0_i32_0 : i32, i32
  }
  func.func @transform_11(%arg0: i32) -> (i32, i32) {
    %c0_i32 = arith.constant 0 : i32
    %c0_i32_0 = arith.constant 0 : i32
    %c0_i32_1 = arith.constant 0 : i32
    return %c0_i32, %c0_i32_0 : i32, i32
  }
  func.func @transform_12(%arg0: i32) -> (i32, i32) {
    %c0_i32 = arith.constant 0 : i32
    %c0_i32_0 = arith.constant 0 : i32
    %c0_i32_1 = arith.constant 0 : i32
    return %c0_i32, %c0_i32_0 : i32, i32
  }
  func.func @transform_13(%arg0: i32) -> (i32, i32) {
    %c0_i32 = arith.constant 0 : i32
    %c0_i32_0 = arith.constant 0 : i32
    %c0_i32_1 = arith.constant 0 : i32
    return %c0_i32, %c0_i32_0 : i32, i32
  }
  func.func @transform_14(%arg0: i32) -> (i32, i32) {
    %c0_i32 = arith.constant 0 : i32
    %c0_i32_0 = arith.constant 0 : i32
    %c0_i32_1 = arith.constant 0 : i32
    return %c0_i32, %c0_i32_0 : i32, i32
  }
  func.func @transform_15(%arg0: i32) -> (i32, i32) {
    %c0_i32 = arith.constant 0 : i32
    %c0_i32_0 = arith.constant 0 : i32
    %c0_i32_1 = arith.constant 0 : i32
    return %c0_i32, %c0_i32_0 : i32, i32
  }
  func.func @transform_16(%arg0: i32) -> (i32, i32) {
    %c0_i32 = arith.constant 0 : i32
    %c0_i32_0 = arith.constant 0 : i32
    %c0_i32_1 = arith.constant 0 : i32
    return %c0_i32, %c0_i32_0 : i32, i32
  }
  func.func @transform_17(%arg0: i32) -> (i32, i32) {
    %c0_i32 = arith.constant 0 : i32
    %c0_i32_0 = arith.constant 0 : i32
    %c0_i32_1 = arith.constant 0 : i32
    return %c0_i32, %c0_i32_0 : i32, i32
  }
  func.func @transform_18(%arg0: i32) -> (i32, i32) {
    %c0_i32 = arith.constant 0 : i32
    %c0_i32_0 = arith.constant 0 : i32
    %c0_i32_1 = arith.constant 0 : i32
    return %c0_i32, %c0_i32_0 : i32, i32
  }
  func.func @transform_19(%arg0: i32) -> (i32, i32) {
    %c0_i32 = arith.constant 0 : i32
    %c0_i32_0 = arith.constant 0 : i32
    %c0_i32_1 = arith.constant 0 : i32
    return %c0_i32, %c0_i32_0 : i32, i32
  }
  func.func @transform_20(%arg0: i32) -> (i32, i32) {
    %c0_i32 = arith.constant 0 : i32
    %c0_i32_0 = arith.constant 0 : i32
    %c0_i32_1 = arith.constant 0 : i32
    return %c0_i32, %c0_i32_0 : i32, i32
  }
  func.func @transform_21(%arg0: i32) -> (i32, i32) {
    %c0_i32 = arith.constant 0 : i32
    %c0_i32_0 = arith.constant 0 : i32
    %c0_i32_1 = arith.constant 0 : i32
    return %c0_i32, %c0_i32_0 : i32, i32
  }
  func.func @transform_22(%arg0: i32) -> (i32, i32) {
    %c0_i32 = arith.constant 0 : i32
    %c0_i32_0 = arith.constant 0 : i32
    %c0_i32_1 = arith.constant 0 : i32
    return %c0_i32, %c0_i32_0 : i32, i32
  }
  func.func @transform_23(%arg0: i32) -> (i32, i32, i32) {
    %c0_i32 = arith.constant 0 : i32
    %c0_i32_0 = arith.constant 0 : i32
    %c0_i32_1 = arith.constant 0 : i32
    return %arg0, %c0_i32, %c0_i32_0 : i32, i32, i32
  }
}

module attributes {stable_mosaic.version = 11 : i64} {
  func.func @_decoder_layer_kernel(%arg0: i32, %arg1: memref<1x8x128xf32, #tpu.memory_space<vmem>>, %arg2: memref<1x8x128xf32, #tpu.memory_space<vmem>>, %arg3: memref<1x8x8xf32, #tpu.memory_space<vmem>>, %arg4: memref<128x384xbf16, #tpu.memory_space<vmem>>, %arg5: memref<1x384xf32, #tpu.memory_space<vmem>>, %arg6: memref<128x128xbf16, #tpu.memory_space<vmem>>, %arg7: memref<1x128xf32, #tpu.memory_space<vmem>>, %arg8: memref<1x128xf32, #tpu.memory_space<vmem>>, %arg9: memref<1x128xf32, #tpu.memory_space<vmem>>, %arg10: memref<128x128xbf16, #tpu.memory_space<vmem>>, %arg11: memref<1x128xf32, #tpu.memory_space<vmem>>, %arg12: memref<128x256xbf16, #tpu.memory_space<vmem>>, %arg13: memref<1x256xf32, #tpu.memory_space<vmem>>, %arg14: memref<128x128xbf16, #tpu.memory_space<vmem>>, %arg15: memref<1x128xf32, #tpu.memory_space<vmem>>, %arg16: memref<1x128xf32, #tpu.memory_space<vmem>>, %arg17: memref<1x128xf32, #tpu.memory_space<vmem>>, %arg18: memref<128x256xbf16, #tpu.memory_space<vmem>>, %arg19: memref<1x256xf32, #tpu.memory_space<vmem>>, %arg20: memref<256x128xbf16, #tpu.memory_space<vmem>>, %arg21: memref<1x128xf32, #tpu.memory_space<vmem>>, %arg22: memref<1x128xf32, #tpu.memory_space<vmem>>, %arg23: memref<1x128xf32, #tpu.memory_space<vmem>>, %arg24: memref<1x8x128xf32, #tpu.memory_space<vmem>>) attributes {dimension_semantics = [#tpu.dimension_semantics<parallel>], iteration_bounds = array<i64: 2>, scalar_prefetch = 0 : i64, scratch_operands = 0 : i64, tpu.core_type = #tpu.core_type<tc>, window_params = [{transform_indices = @transform_0, window_bounds = array<i64: 1, 8, 128>}, {transform_indices = @transform_1, window_bounds = array<i64: 1, 8, 128>}, {transform_indices = @transform_2, window_bounds = array<i64: 1, 8, 8>}, {pipeline_mode = #tpu.pipeline_mode<synchronous>, transform_indices = @transform_3, window_bounds = array<i64: 128, 384>}, {pipeline_mode = #tpu.pipeline_mode<synchronous>, transform_indices = @transform_4, window_bounds = array<i64: 1, 384>}, {pipeline_mode = #tpu.pipeline_mode<synchronous>, transform_indices = @transform_5, window_bounds = array<i64: 128, 128>}, {pipeline_mode = #tpu.pipeline_mode<synchronous>, transform_indices = @transform_6, window_bounds = array<i64: 1, 128>}, {pipeline_mode = #tpu.pipeline_mode<synchronous>, transform_indices = @transform_7, window_bounds = array<i64: 1, 128>}, {pipeline_mode = #tpu.pipeline_mode<synchronous>, transform_indices = @transform_8, window_bounds = array<i64: 1, 128>}, {pipeline_mode = #tpu.pipeline_mode<synchronous>, transform_indices = @transform_9, window_bounds = array<i64: 128, 128>}, {pipeline_mode = #tpu.pipeline_mode<synchronous>, transform_indices = @transform_10, window_bounds = array<i64: 1, 128>}, {pipeline_mode = #tpu.pipeline_mode<synchronous>, transform_indices = @transform_11, window_bounds = array<i64: 128, 256>}, {pipeline_mode = #tpu.pipeline_mode<synchronous>, transform_indices = @transform_12, window_bounds = array<i64: 1, 256>}, {pipeline_mode = #tpu.pipeline_mode<synchronous>, transform_indices = @transform_13, window_bounds = array<i64: 128, 128>}, {pipeline_mode = #tpu.pipeline_mode<synchronous>, transform_indices = @transform_14, window_bounds = array<i64: 1, 128>}, {pipeline_mode = #tpu.pipeline_mode<synchronous>, transform_indices = @transform_15, window_bounds = array<i64: 1, 128>}, {pipeline_mode = #tpu.pipeline_mode<synchronous>, transform_indices = @transform_16, window_bounds = array<i64: 1, 128>}, {pipeline_mode = #tpu.pipeline_mode<synchronous>, transform_indices = @transform_17, window_bounds = array<i64: 128, 256>}, {pipeline_mode = #tpu.pipeline_mode<synchronous>, transform_indices = @transform_18, window_bounds = array<i64: 1, 256>}, {pipeline_mode = #tpu.pipeline_mode<synchronous>, transform_indices = @transform_19, window_bounds = array<i64: 256, 128>}, {pipeline_mode = #tpu.pipeline_mode<synchronous>, transform_indices = @transform_20, window_bounds = array<i64: 1, 128>}, {pipeline_mode = #tpu.pipeline_mode<synchronous>, transform_indices = @transform_21, window_bounds = array<i64: 1, 128>}, {pipeline_mode = #tpu.pipeline_mode<synchronous>, transform_indices = @transform_22, window_bounds = array<i64: 1, 128>}, {transform_indices = @transform_23, window_bounds = array<i64: 1, 8, 128>}]} {
    %c0 = arith.constant 0 : index
    %c0_0 = arith.constant 0 : index
    %c0_1 = arith.constant 0 : index
    %0 = vector.load %arg1[%c0, %c0_0, %c0_1] : memref<1x8x128xf32, #tpu.memory_space<vmem>>, vector<1x8x128xf32>
    %1 = vector.shape_cast %0 : vector<1x8x128xf32> to vector<8x128xf32>
    %c0_2 = arith.constant 0 : index
    %c0_3 = arith.constant 0 : index
    %c0_4 = arith.constant 0 : index
    %2 = vector.load %arg2[%c0_2, %c0_3, %c0_4] : memref<1x8x128xf32, #tpu.memory_space<vmem>>, vector<1x8x128xf32>
    %3 = vector.shape_cast %2 : vector<1x8x128xf32> to vector<8x128xf32>
    %4 = arith.truncf %1 : vector<8x128xf32> to vector<8x128xbf16>
    %c0_5 = arith.constant 0 : index
    %c0_6 = arith.constant 0 : index
    %5 = vector.load %arg4[%c0_5, %c0_6] : memref<128x384xbf16, #tpu.memory_space<vmem>>, vector<128x384xbf16>
    %cst = arith.constant dense<0.000000e+00> : vector<8x384xf32>
    %6 = tpu.matmul %4, %5, %cst {dimension_numbers = #tpu.dot_dimension_numbers<[1], [0], [0], [1], [0, 0, 1, 1], [], []>} : vector<8x128xbf16>, vector<128x384xbf16>, vector<8x384xf32> -> vector<8x384xf32>
    %c0_7 = arith.constant 0 : index
    %c0_8 = arith.constant 0 : index
    %7 = vector.load %arg5[%c0_7, %c0_8] : memref<1x384xf32, #tpu.memory_space<vmem>>, vector<1x384xf32>
    %8 = vector.broadcast %7 : vector<1x384xf32> to vector<8x384xf32>
    %9 = arith.addf %6, %8 : vector<8x384xf32>
    %c0_9 = arith.constant 0 : index
    %c0_10 = arith.constant 0 : index
    %c0_11 = arith.constant 0 : index
    %10 = vector.load %arg3[%c0_9, %c0_10, %c0_11] : memref<1x8x8xf32, #tpu.memory_space<vmem>>, vector<1x8x8xf32>
    %11 = vector.shape_cast %10 : vector<1x8x8xf32> to vector<8x8xf32>
    %12 = vector.extract_strided_slice %9 {offsets = [0, 0], sizes = [8, 128], strides = [1, 1]} : vector<8x384xf32> to vector<8x128xf32>
    %13 = vector.extract_strided_slice %9 {offsets = [0, 128], sizes = [8, 128], strides = [1, 1]} : vector<8x384xf32> to vector<8x128xf32>
    %14 = vector.extract_strided_slice %9 {offsets = [0, 256], sizes = [8, 128], strides = [1, 1]} : vector<8x384xf32> to vector<8x128xf32>
    %15 = arith.truncf %12 : vector<8x128xf32> to vector<8x128xbf16>
    %16 = arith.truncf %13 : vector<8x128xf32> to vector<8x128xbf16>
    %17 = arith.truncf %14 : vector<8x128xf32> to vector<8x128xbf16>
    %18 = vector.extract_strided_slice %15 {offsets = [0, 0], sizes = [8, 32], strides = [1, 1]} : vector<8x128xbf16> to vector<8x32xbf16>
    %19 = vector.extract_strided_slice %16 {offsets = [0, 0], sizes = [8, 32], strides = [1, 1]} : vector<8x128xbf16> to vector<8x32xbf16>
    %cst_12 = arith.constant dense<0.000000e+00> : vector<8x8xf32>
    %20 = tpu.matmul %18, %19, %cst_12 {dimension_numbers = #tpu.dot_dimension_numbers<[1], [1], [0], [0], [0, 0, 1, 0], [], []>} : vector<8x32xbf16>, vector<8x32xbf16>, vector<8x8xf32> -> vector<8x8xf32>
    %cst_13 = arith.constant 0.176776692 : f32
    %21 = vector.broadcast %cst_13 : f32 to vector<8x8xf32>
    %22 = arith.mulf %20, %21 : vector<8x8xf32>
    %23 = arith.addf %22, %11 : vector<8x8xf32>
    %cst_14 = arith.constant dense<0xFF800000> : vector<8xf32>
    %24 = vector.multi_reduction <maximumf>, %23, %cst_14 [1] : vector<8x8xf32> to vector<8xf32>
    %25 = vector.shape_cast %24 : vector<8xf32> to vector<8x1xf32>
    %26 = vector.broadcast %25 : vector<8x1xf32> to vector<8x8xf32>
    %27 = arith.subf %23, %26 : vector<8x8xf32>
    %28 = math.exp %27 : vector<8x8xf32>
    %cst_15 = arith.constant dense<0.000000e+00> : vector<8xf32>
    %29 = vector.multi_reduction <add>, %28, %cst_15 [1] : vector<8x8xf32> to vector<8xf32>
    %30 = vector.shape_cast %29 : vector<8xf32> to vector<8x1xf32>
    %31 = tpu.reciprocal %30 {approx = true} : vector<8x1xf32> -> vector<8x1xf32>
    %32 = vector.broadcast %31 : vector<8x1xf32> to vector<8x8xf32>
    %33 = arith.mulf %28, %32 : vector<8x8xf32>
    %34 = arith.truncf %33 : vector<8x8xf32> to vector<8x8xbf16>
    %35 = vector.extract_strided_slice %17 {offsets = [0, 0], sizes = [8, 32], strides = [1, 1]} : vector<8x128xbf16> to vector<8x32xbf16>
    %cst_16 = arith.constant dense<0.000000e+00> : vector<8x32xf32>
    %36 = tpu.matmul %34, %35, %cst_16 {dimension_numbers = #tpu.dot_dimension_numbers<[1], [0], [0], [1], [0, 0, 1, 1], [], []>} : vector<8x8xbf16>, vector<8x32xbf16>, vector<8x32xf32> -> vector<8x32xf32>
    %37 = vector.extract_strided_slice %15 {offsets = [0, 32], sizes = [8, 32], strides = [1, 1]} : vector<8x128xbf16> to vector<8x32xbf16>
    %38 = vector.extract_strided_slice %16 {offsets = [0, 32], sizes = [8, 32], strides = [1, 1]} : vector<8x128xbf16> to vector<8x32xbf16>
    %cst_17 = arith.constant dense<0.000000e+00> : vector<8x8xf32>
    %39 = tpu.matmul %37, %38, %cst_17 {dimension_numbers = #tpu.dot_dimension_numbers<[1], [1], [0], [0], [0, 0, 1, 0], [], []>} : vector<8x32xbf16>, vector<8x32xbf16>, vector<8x8xf32> -> vector<8x8xf32>
    %cst_18 = arith.constant 0.176776692 : f32
    %40 = vector.broadcast %cst_18 : f32 to vector<8x8xf32>
    %41 = arith.mulf %39, %40 : vector<8x8xf32>
    %42 = arith.addf %41, %11 : vector<8x8xf32>
    %cst_19 = arith.constant dense<0xFF800000> : vector<8xf32>
    %43 = vector.multi_reduction <maximumf>, %42, %cst_19 [1] : vector<8x8xf32> to vector<8xf32>
    %44 = vector.shape_cast %43 : vector<8xf32> to vector<8x1xf32>
    %45 = vector.broadcast %44 : vector<8x1xf32> to vector<8x8xf32>
    %46 = arith.subf %42, %45 : vector<8x8xf32>
    %47 = math.exp %46 : vector<8x8xf32>
    %cst_20 = arith.constant dense<0.000000e+00> : vector<8xf32>
    %48 = vector.multi_reduction <add>, %47, %cst_20 [1] : vector<8x8xf32> to vector<8xf32>
    %49 = vector.shape_cast %48 : vector<8xf32> to vector<8x1xf32>
    %50 = tpu.reciprocal %49 {approx = true} : vector<8x1xf32> -> vector<8x1xf32>
    %51 = vector.broadcast %50 : vector<8x1xf32> to vector<8x8xf32>
    %52 = arith.mulf %47, %51 : vector<8x8xf32>
    %53 = arith.truncf %52 : vector<8x8xf32> to vector<8x8xbf16>
    %54 = vector.extract_strided_slice %17 {offsets = [0, 32], sizes = [8, 32], strides = [1, 1]} : vector<8x128xbf16> to vector<8x32xbf16>
    %cst_21 = arith.constant dense<0.000000e+00> : vector<8x32xf32>
    %55 = tpu.matmul %53, %54, %cst_21 {dimension_numbers = #tpu.dot_dimension_numbers<[1], [0], [0], [1], [0, 0, 1, 1], [], []>} : vector<8x8xbf16>, vector<8x32xbf16>, vector<8x32xf32> -> vector<8x32xf32>
    %56 = vector.extract_strided_slice %15 {offsets = [0, 64], sizes = [8, 32], strides = [1, 1]} : vector<8x128xbf16> to vector<8x32xbf16>
    %57 = vector.extract_strided_slice %16 {offsets = [0, 64], sizes = [8, 32], strides = [1, 1]} : vector<8x128xbf16> to vector<8x32xbf16>
    %cst_22 = arith.constant dense<0.000000e+00> : vector<8x8xf32>
    %58 = tpu.matmul %56, %57, %cst_22 {dimension_numbers = #tpu.dot_dimension_numbers<[1], [1], [0], [0], [0, 0, 1, 0], [], []>} : vector<8x32xbf16>, vector<8x32xbf16>, vector<8x8xf32> -> vector<8x8xf32>
    %cst_23 = arith.constant 0.176776692 : f32
    %59 = vector.broadcast %cst_23 : f32 to vector<8x8xf32>
    %60 = arith.mulf %58, %59 : vector<8x8xf32>
    %61 = arith.addf %60, %11 : vector<8x8xf32>
    %cst_24 = arith.constant dense<0xFF800000> : vector<8xf32>
    %62 = vector.multi_reduction <maximumf>, %61, %cst_24 [1] : vector<8x8xf32> to vector<8xf32>
    %63 = vector.shape_cast %62 : vector<8xf32> to vector<8x1xf32>
    %64 = vector.broadcast %63 : vector<8x1xf32> to vector<8x8xf32>
    %65 = arith.subf %61, %64 : vector<8x8xf32>
    %66 = math.exp %65 : vector<8x8xf32>
    %cst_25 = arith.constant dense<0.000000e+00> : vector<8xf32>
    %67 = vector.multi_reduction <add>, %66, %cst_25 [1] : vector<8x8xf32> to vector<8xf32>
    %68 = vector.shape_cast %67 : vector<8xf32> to vector<8x1xf32>
    %69 = tpu.reciprocal %68 {approx = true} : vector<8x1xf32> -> vector<8x1xf32>
    %70 = vector.broadcast %69 : vector<8x1xf32> to vector<8x8xf32>
    %71 = arith.mulf %66, %70 : vector<8x8xf32>
    %72 = arith.truncf %71 : vector<8x8xf32> to vector<8x8xbf16>
    %73 = vector.extract_strided_slice %17 {offsets = [0, 64], sizes = [8, 32], strides = [1, 1]} : vector<8x128xbf16> to vector<8x32xbf16>
    %cst_26 = arith.constant dense<0.000000e+00> : vector<8x32xf32>
    %74 = tpu.matmul %72, %73, %cst_26 {dimension_numbers = #tpu.dot_dimension_numbers<[1], [0], [0], [1], [0, 0, 1, 1], [], []>} : vector<8x8xbf16>, vector<8x32xbf16>, vector<8x32xf32> -> vector<8x32xf32>
    %75 = vector.extract_strided_slice %15 {offsets = [0, 96], sizes = [8, 32], strides = [1, 1]} : vector<8x128xbf16> to vector<8x32xbf16>
    %76 = vector.extract_strided_slice %16 {offsets = [0, 96], sizes = [8, 32], strides = [1, 1]} : vector<8x128xbf16> to vector<8x32xbf16>
    %cst_27 = arith.constant dense<0.000000e+00> : vector<8x8xf32>
    %77 = tpu.matmul %75, %76, %cst_27 {dimension_numbers = #tpu.dot_dimension_numbers<[1], [1], [0], [0], [0, 0, 1, 0], [], []>} : vector<8x32xbf16>, vector<8x32xbf16>, vector<8x8xf32> -> vector<8x8xf32>
    %cst_28 = arith.constant 0.176776692 : f32
    %78 = vector.broadcast %cst_28 : f32 to vector<8x8xf32>
    %79 = arith.mulf %77, %78 : vector<8x8xf32>
    %80 = arith.addf %79, %11 : vector<8x8xf32>
    %cst_29 = arith.constant dense<0xFF800000> : vector<8xf32>
    %81 = vector.multi_reduction <maximumf>, %80, %cst_29 [1] : vector<8x8xf32> to vector<8xf32>
    %82 = vector.shape_cast %81 : vector<8xf32> to vector<8x1xf32>
    %83 = vector.broadcast %82 : vector<8x1xf32> to vector<8x8xf32>
    %84 = arith.subf %80, %83 : vector<8x8xf32>
    %85 = math.exp %84 : vector<8x8xf32>
    %cst_30 = arith.constant dense<0.000000e+00> : vector<8xf32>
    %86 = vector.multi_reduction <add>, %85, %cst_30 [1] : vector<8x8xf32> to vector<8xf32>
    %87 = vector.shape_cast %86 : vector<8xf32> to vector<8x1xf32>
    %88 = tpu.reciprocal %87 {approx = true} : vector<8x1xf32> -> vector<8x1xf32>
    %89 = vector.broadcast %88 : vector<8x1xf32> to vector<8x8xf32>
    %90 = arith.mulf %85, %89 : vector<8x8xf32>
    %91 = arith.truncf %90 : vector<8x8xf32> to vector<8x8xbf16>
    %92 = vector.extract_strided_slice %17 {offsets = [0, 96], sizes = [8, 32], strides = [1, 1]} : vector<8x128xbf16> to vector<8x32xbf16>
    %cst_31 = arith.constant dense<0.000000e+00> : vector<8x32xf32>
    %93 = tpu.matmul %91, %92, %cst_31 {dimension_numbers = #tpu.dot_dimension_numbers<[1], [0], [0], [1], [0, 0, 1, 1], [], []>} : vector<8x8xbf16>, vector<8x32xbf16>, vector<8x32xf32> -> vector<8x32xf32>
    %94 = tpu.concatenate %36, %55, %74, %93 in 1 : vector<8x32xf32>, vector<8x32xf32>, vector<8x32xf32>, vector<8x32xf32> -> vector<8x128xf32>
    %95 = arith.truncf %94 : vector<8x128xf32> to vector<8x128xbf16>
    %c0_32 = arith.constant 0 : index
    %c0_33 = arith.constant 0 : index
    %96 = vector.load %arg6[%c0_32, %c0_33] : memref<128x128xbf16, #tpu.memory_space<vmem>>, vector<128x128xbf16>
    %cst_34 = arith.constant dense<0.000000e+00> : vector<8x128xf32>
    %97 = tpu.matmul %95, %96, %cst_34 {dimension_numbers = #tpu.dot_dimension_numbers<[1], [0], [0], [1], [0, 0, 1, 1], [], []>} : vector<8x128xbf16>, vector<128x128xbf16>, vector<8x128xf32> -> vector<8x128xf32>
    %c0_35 = arith.constant 0 : index
    %c0_36 = arith.constant 0 : index
    %98 = vector.load %arg7[%c0_35, %c0_36] : memref<1x128xf32, #tpu.memory_space<vmem>>, vector<1x128xf32>
    %99 = vector.broadcast %98 : vector<1x128xf32> to vector<8x128xf32>
    %100 = arith.addf %97, %99 : vector<8x128xf32>
    %101 = arith.addf %100, %1 : vector<8x128xf32>
    %c0_37 = arith.constant 0 : index
    %c0_38 = arith.constant 0 : index
    %102 = vector.load %arg8[%c0_37, %c0_38] : memref<1x128xf32, #tpu.memory_space<vmem>>, vector<1x128xf32>
    %c0_39 = arith.constant 0 : index
    %c0_40 = arith.constant 0 : index
    %103 = vector.load %arg9[%c0_39, %c0_40] : memref<1x128xf32, #tpu.memory_space<vmem>>, vector<1x128xf32>
    %cst_41 = arith.constant dense<0.000000e+00> : vector<8xf32>
    %104 = vector.multi_reduction <add>, %101, %cst_41 [1] : vector<8x128xf32> to vector<8xf32>
    %105 = vector.shape_cast %104 : vector<8xf32> to vector<8x1xf32>
    %cst_42 = arith.constant 7.812500e-03 : f32
    %106 = vector.broadcast %cst_42 : f32 to vector<8x1xf32>
    %107 = arith.mulf %105, %106 : vector<8x1xf32>
    %108 = vector.broadcast %107 : vector<8x1xf32> to vector<8x128xf32>
    %109 = arith.subf %101, %108 : vector<8x128xf32>
    %110 = arith.mulf %109, %109 : vector<8x128xf32>
    %cst_43 = arith.constant dense<0.000000e+00> : vector<8xf32>
    %111 = vector.multi_reduction <add>, %110, %cst_43 [1] : vector<8x128xf32> to vector<8xf32>
    %112 = vector.shape_cast %111 : vector<8xf32> to vector<8x1xf32>
    %cst_44 = arith.constant 7.812500e-03 : f32
    %113 = vector.broadcast %cst_44 : f32 to vector<8x1xf32>
    %114 = arith.mulf %112, %113 : vector<8x1xf32>
    %cst_45 = arith.constant 9.99999974E-6 : f32
    %115 = vector.broadcast %cst_45 : f32 to vector<8x1xf32>
    %116 = arith.addf %114, %115 : vector<8x1xf32>
    %117 = math.rsqrt %116 : vector<8x1xf32>
    %118 = vector.broadcast %117 : vector<8x1xf32> to vector<8x128xf32>
    %119 = arith.mulf %109, %118 : vector<8x128xf32>
    %120 = vector.broadcast %102 : vector<1x128xf32> to vector<8x128xf32>
    %121 = arith.mulf %119, %120 : vector<8x128xf32>
    %122 = vector.broadcast %103 : vector<1x128xf32> to vector<8x128xf32>
    %123 = arith.addf %121, %122 : vector<8x128xf32>
    %124 = arith.truncf %123 : vector<8x128xf32> to vector<8x128xbf16>
    %c0_46 = arith.constant 0 : index
    %c0_47 = arith.constant 0 : index
    %125 = vector.load %arg10[%c0_46, %c0_47] : memref<128x128xbf16, #tpu.memory_space<vmem>>, vector<128x128xbf16>
    %cst_48 = arith.constant dense<0.000000e+00> : vector<8x128xf32>
    %126 = tpu.matmul %124, %125, %cst_48 {dimension_numbers = #tpu.dot_dimension_numbers<[1], [0], [0], [1], [0, 0, 1, 1], [], []>} : vector<8x128xbf16>, vector<128x128xbf16>, vector<8x128xf32> -> vector<8x128xf32>
    %c0_49 = arith.constant 0 : index
    %c0_50 = arith.constant 0 : index
    %127 = vector.load %arg11[%c0_49, %c0_50] : memref<1x128xf32, #tpu.memory_space<vmem>>, vector<1x128xf32>
    %128 = vector.broadcast %127 : vector<1x128xf32> to vector<8x128xf32>
    %129 = arith.addf %126, %128 : vector<8x128xf32>
    %130 = arith.truncf %3 : vector<8x128xf32> to vector<8x128xbf16>
    %c0_51 = arith.constant 0 : index
    %c0_52 = arith.constant 0 : index
    %131 = vector.load %arg12[%c0_51, %c0_52] : memref<128x256xbf16, #tpu.memory_space<vmem>>, vector<128x256xbf16>
    %cst_53 = arith.constant dense<0.000000e+00> : vector<8x256xf32>
    %132 = tpu.matmul %130, %131, %cst_53 {dimension_numbers = #tpu.dot_dimension_numbers<[1], [0], [0], [1], [0, 0, 1, 1], [], []>} : vector<8x128xbf16>, vector<128x256xbf16>, vector<8x256xf32> -> vector<8x256xf32>
    %c0_54 = arith.constant 0 : index
    %c0_55 = arith.constant 0 : index
    %133 = vector.load %arg13[%c0_54, %c0_55] : memref<1x256xf32, #tpu.memory_space<vmem>>, vector<1x256xf32>
    %134 = vector.broadcast %133 : vector<1x256xf32> to vector<8x256xf32>
    %135 = arith.addf %132, %134 : vector<8x256xf32>
    %136 = vector.extract_strided_slice %135 {offsets = [0, 0], sizes = [8, 128], strides = [1, 1]} : vector<8x256xf32> to vector<8x128xf32>
    %137 = vector.extract_strided_slice %135 {offsets = [0, 128], sizes = [8, 128], strides = [1, 1]} : vector<8x256xf32> to vector<8x128xf32>
    %138 = arith.truncf %129 : vector<8x128xf32> to vector<8x128xbf16>
    %139 = arith.truncf %136 : vector<8x128xf32> to vector<8x128xbf16>
    %140 = arith.truncf %137 : vector<8x128xf32> to vector<8x128xbf16>
    %141 = vector.extract_strided_slice %138 {offsets = [0, 0], sizes = [8, 32], strides = [1, 1]} : vector<8x128xbf16> to vector<8x32xbf16>
    %142 = vector.extract_strided_slice %139 {offsets = [0, 0], sizes = [8, 32], strides = [1, 1]} : vector<8x128xbf16> to vector<8x32xbf16>
    %cst_56 = arith.constant dense<0.000000e+00> : vector<8x8xf32>
    %143 = tpu.matmul %141, %142, %cst_56 {dimension_numbers = #tpu.dot_dimension_numbers<[1], [1], [0], [0], [0, 0, 1, 0], [], []>} : vector<8x32xbf16>, vector<8x32xbf16>, vector<8x8xf32> -> vector<8x8xf32>
    %cst_57 = arith.constant 0.176776692 : f32
    %144 = vector.broadcast %cst_57 : f32 to vector<8x8xf32>
    %145 = arith.mulf %143, %144 : vector<8x8xf32>
    %cst_58 = arith.constant dense<0xFF800000> : vector<8xf32>
    %146 = vector.multi_reduction <maximumf>, %145, %cst_58 [1] : vector<8x8xf32> to vector<8xf32>
    %147 = vector.shape_cast %146 : vector<8xf32> to vector<8x1xf32>
    %148 = vector.broadcast %147 : vector<8x1xf32> to vector<8x8xf32>
    %149 = arith.subf %145, %148 : vector<8x8xf32>
    %150 = math.exp %149 : vector<8x8xf32>
    %cst_59 = arith.constant dense<0.000000e+00> : vector<8xf32>
    %151 = vector.multi_reduction <add>, %150, %cst_59 [1] : vector<8x8xf32> to vector<8xf32>
    %152 = vector.shape_cast %151 : vector<8xf32> to vector<8x1xf32>
    %153 = tpu.reciprocal %152 {approx = true} : vector<8x1xf32> -> vector<8x1xf32>
    %154 = vector.broadcast %153 : vector<8x1xf32> to vector<8x8xf32>
    %155 = arith.mulf %150, %154 : vector<8x8xf32>
    %156 = arith.truncf %155 : vector<8x8xf32> to vector<8x8xbf16>
    %157 = vector.extract_strided_slice %140 {offsets = [0, 0], sizes = [8, 32], strides = [1, 1]} : vector<8x128xbf16> to vector<8x32xbf16>
    %cst_60 = arith.constant dense<0.000000e+00> : vector<8x32xf32>
    %158 = tpu.matmul %156, %157, %cst_60 {dimension_numbers = #tpu.dot_dimension_numbers<[1], [0], [0], [1], [0, 0, 1, 1], [], []>} : vector<8x8xbf16>, vector<8x32xbf16>, vector<8x32xf32> -> vector<8x32xf32>
    %159 = vector.extract_strided_slice %138 {offsets = [0, 32], sizes = [8, 32], strides = [1, 1]} : vector<8x128xbf16> to vector<8x32xbf16>
    %160 = vector.extract_strided_slice %139 {offsets = [0, 32], sizes = [8, 32], strides = [1, 1]} : vector<8x128xbf16> to vector<8x32xbf16>
    %cst_61 = arith.constant dense<0.000000e+00> : vector<8x8xf32>
    %161 = tpu.matmul %159, %160, %cst_61 {dimension_numbers = #tpu.dot_dimension_numbers<[1], [1], [0], [0], [0, 0, 1, 0], [], []>} : vector<8x32xbf16>, vector<8x32xbf16>, vector<8x8xf32> -> vector<8x8xf32>
    %cst_62 = arith.constant 0.176776692 : f32
    %162 = vector.broadcast %cst_62 : f32 to vector<8x8xf32>
    %163 = arith.mulf %161, %162 : vector<8x8xf32>
    %cst_63 = arith.constant dense<0xFF800000> : vector<8xf32>
    %164 = vector.multi_reduction <maximumf>, %163, %cst_63 [1] : vector<8x8xf32> to vector<8xf32>
    %165 = vector.shape_cast %164 : vector<8xf32> to vector<8x1xf32>
    %166 = vector.broadcast %165 : vector<8x1xf32> to vector<8x8xf32>
    %167 = arith.subf %163, %166 : vector<8x8xf32>
    %168 = math.exp %167 : vector<8x8xf32>
    %cst_64 = arith.constant dense<0.000000e+00> : vector<8xf32>
    %169 = vector.multi_reduction <add>, %168, %cst_64 [1] : vector<8x8xf32> to vector<8xf32>
    %170 = vector.shape_cast %169 : vector<8xf32> to vector<8x1xf32>
    %171 = tpu.reciprocal %170 {approx = true} : vector<8x1xf32> -> vector<8x1xf32>
    %172 = vector.broadcast %171 : vector<8x1xf32> to vector<8x8xf32>
    %173 = arith.mulf %168, %172 : vector<8x8xf32>
    %174 = arith.truncf %173 : vector<8x8xf32> to vector<8x8xbf16>
    %175 = vector.extract_strided_slice %140 {offsets = [0, 32], sizes = [8, 32], strides = [1, 1]} : vector<8x128xbf16> to vector<8x32xbf16>
    %cst_65 = arith.constant dense<0.000000e+00> : vector<8x32xf32>
    %176 = tpu.matmul %174, %175, %cst_65 {dimension_numbers = #tpu.dot_dimension_numbers<[1], [0], [0], [1], [0, 0, 1, 1], [], []>} : vector<8x8xbf16>, vector<8x32xbf16>, vector<8x32xf32> -> vector<8x32xf32>
    %177 = vector.extract_strided_slice %138 {offsets = [0, 64], sizes = [8, 32], strides = [1, 1]} : vector<8x128xbf16> to vector<8x32xbf16>
    %178 = vector.extract_strided_slice %139 {offsets = [0, 64], sizes = [8, 32], strides = [1, 1]} : vector<8x128xbf16> to vector<8x32xbf16>
    %cst_66 = arith.constant dense<0.000000e+00> : vector<8x8xf32>
    %179 = tpu.matmul %177, %178, %cst_66 {dimension_numbers = #tpu.dot_dimension_numbers<[1], [1], [0], [0], [0, 0, 1, 0], [], []>} : vector<8x32xbf16>, vector<8x32xbf16>, vector<8x8xf32> -> vector<8x8xf32>
    %cst_67 = arith.constant 0.176776692 : f32
    %180 = vector.broadcast %cst_67 : f32 to vector<8x8xf32>
    %181 = arith.mulf %179, %180 : vector<8x8xf32>
    %cst_68 = arith.constant dense<0xFF800000> : vector<8xf32>
    %182 = vector.multi_reduction <maximumf>, %181, %cst_68 [1] : vector<8x8xf32> to vector<8xf32>
    %183 = vector.shape_cast %182 : vector<8xf32> to vector<8x1xf32>
    %184 = vector.broadcast %183 : vector<8x1xf32> to vector<8x8xf32>
    %185 = arith.subf %181, %184 : vector<8x8xf32>
    %186 = math.exp %185 : vector<8x8xf32>
    %cst_69 = arith.constant dense<0.000000e+00> : vector<8xf32>
    %187 = vector.multi_reduction <add>, %186, %cst_69 [1] : vector<8x8xf32> to vector<8xf32>
    %188 = vector.shape_cast %187 : vector<8xf32> to vector<8x1xf32>
    %189 = tpu.reciprocal %188 {approx = true} : vector<8x1xf32> -> vector<8x1xf32>
    %190 = vector.broadcast %189 : vector<8x1xf32> to vector<8x8xf32>
    %191 = arith.mulf %186, %190 : vector<8x8xf32>
    %192 = arith.truncf %191 : vector<8x8xf32> to vector<8x8xbf16>
    %193 = vector.extract_strided_slice %140 {offsets = [0, 64], sizes = [8, 32], strides = [1, 1]} : vector<8x128xbf16> to vector<8x32xbf16>
    %cst_70 = arith.constant dense<0.000000e+00> : vector<8x32xf32>
    %194 = tpu.matmul %192, %193, %cst_70 {dimension_numbers = #tpu.dot_dimension_numbers<[1], [0], [0], [1], [0, 0, 1, 1], [], []>} : vector<8x8xbf16>, vector<8x32xbf16>, vector<8x32xf32> -> vector<8x32xf32>
    %195 = vector.extract_strided_slice %138 {offsets = [0, 96], sizes = [8, 32], strides = [1, 1]} : vector<8x128xbf16> to vector<8x32xbf16>
    %196 = vector.extract_strided_slice %139 {offsets = [0, 96], sizes = [8, 32], strides = [1, 1]} : vector<8x128xbf16> to vector<8x32xbf16>
    %cst_71 = arith.constant dense<0.000000e+00> : vector<8x8xf32>
    %197 = tpu.matmul %195, %196, %cst_71 {dimension_numbers = #tpu.dot_dimension_numbers<[1], [1], [0], [0], [0, 0, 1, 0], [], []>} : vector<8x32xbf16>, vector<8x32xbf16>, vector<8x8xf32> -> vector<8x8xf32>
    %cst_72 = arith.constant 0.176776692 : f32
    %198 = vector.broadcast %cst_72 : f32 to vector<8x8xf32>
    %199 = arith.mulf %197, %198 : vector<8x8xf32>
    %cst_73 = arith.constant dense<0xFF800000> : vector<8xf32>
    %200 = vector.multi_reduction <maximumf>, %199, %cst_73 [1] : vector<8x8xf32> to vector<8xf32>
    %201 = vector.shape_cast %200 : vector<8xf32> to vector<8x1xf32>
    %202 = vector.broadcast %201 : vector<8x1xf32> to vector<8x8xf32>
    %203 = arith.subf %199, %202 : vector<8x8xf32>
    %204 = math.exp %203 : vector<8x8xf32>
    %cst_74 = arith.constant dense<0.000000e+00> : vector<8xf32>
    %205 = vector.multi_reduction <add>, %204, %cst_74 [1] : vector<8x8xf32> to vector<8xf32>
    %206 = vector.shape_cast %205 : vector<8xf32> to vector<8x1xf32>
    %207 = tpu.reciprocal %206 {approx = true} : vector<8x1xf32> -> vector<8x1xf32>
    %208 = vector.broadcast %207 : vector<8x1xf32> to vector<8x8xf32>
    %209 = arith.mulf %204, %208 : vector<8x8xf32>
    %210 = arith.truncf %209 : vector<8x8xf32> to vector<8x8xbf16>
    %211 = vector.extract_strided_slice %140 {offsets = [0, 96], sizes = [8, 32], strides = [1, 1]} : vector<8x128xbf16> to vector<8x32xbf16>
    %cst_75 = arith.constant dense<0.000000e+00> : vector<8x32xf32>
    %212 = tpu.matmul %210, %211, %cst_75 {dimension_numbers = #tpu.dot_dimension_numbers<[1], [0], [0], [1], [0, 0, 1, 1], [], []>} : vector<8x8xbf16>, vector<8x32xbf16>, vector<8x32xf32> -> vector<8x32xf32>
    %213 = tpu.concatenate %158, %176, %194, %212 in 1 : vector<8x32xf32>, vector<8x32xf32>, vector<8x32xf32>, vector<8x32xf32> -> vector<8x128xf32>
    %214 = arith.truncf %213 : vector<8x128xf32> to vector<8x128xbf16>
    %c0_76 = arith.constant 0 : index
    %c0_77 = arith.constant 0 : index
    %215 = vector.load %arg14[%c0_76, %c0_77] : memref<128x128xbf16, #tpu.memory_space<vmem>>, vector<128x128xbf16>
    %cst_78 = arith.constant dense<0.000000e+00> : vector<8x128xf32>
    %216 = tpu.matmul %214, %215, %cst_78 {dimension_numbers = #tpu.dot_dimension_numbers<[1], [0], [0], [1], [0, 0, 1, 1], [], []>} : vector<8x128xbf16>, vector<128x128xbf16>, vector<8x128xf32> -> vector<8x128xf32>
    %c0_79 = arith.constant 0 : index
    %c0_80 = arith.constant 0 : index
    %217 = vector.load %arg15[%c0_79, %c0_80] : memref<1x128xf32, #tpu.memory_space<vmem>>, vector<1x128xf32>
    %218 = vector.broadcast %217 : vector<1x128xf32> to vector<8x128xf32>
    %219 = arith.addf %216, %218 : vector<8x128xf32>
    %220 = arith.addf %219, %123 : vector<8x128xf32>
    %c0_81 = arith.constant 0 : index
    %c0_82 = arith.constant 0 : index
    %221 = vector.load %arg16[%c0_81, %c0_82] : memref<1x128xf32, #tpu.memory_space<vmem>>, vector<1x128xf32>
    %c0_83 = arith.constant 0 : index
    %c0_84 = arith.constant 0 : index
    %222 = vector.load %arg17[%c0_83, %c0_84] : memref<1x128xf32, #tpu.memory_space<vmem>>, vector<1x128xf32>
    %cst_85 = arith.constant dense<0.000000e+00> : vector<8xf32>
    %223 = vector.multi_reduction <add>, %220, %cst_85 [1] : vector<8x128xf32> to vector<8xf32>
    %224 = vector.shape_cast %223 : vector<8xf32> to vector<8x1xf32>
    %cst_86 = arith.constant 7.812500e-03 : f32
    %225 = vector.broadcast %cst_86 : f32 to vector<8x1xf32>
    %226 = arith.mulf %224, %225 : vector<8x1xf32>
    %227 = vector.broadcast %226 : vector<8x1xf32> to vector<8x128xf32>
    %228 = arith.subf %220, %227 : vector<8x128xf32>
    %229 = arith.mulf %228, %228 : vector<8x128xf32>
    %cst_87 = arith.constant dense<0.000000e+00> : vector<8xf32>
    %230 = vector.multi_reduction <add>, %229, %cst_87 [1] : vector<8x128xf32> to vector<8xf32>
    %231 = vector.shape_cast %230 : vector<8xf32> to vector<8x1xf32>
    %cst_88 = arith.constant 7.812500e-03 : f32
    %232 = vector.broadcast %cst_88 : f32 to vector<8x1xf32>
    %233 = arith.mulf %231, %232 : vector<8x1xf32>
    %cst_89 = arith.constant 9.99999974E-6 : f32
    %234 = vector.broadcast %cst_89 : f32 to vector<8x1xf32>
    %235 = arith.addf %233, %234 : vector<8x1xf32>
    %236 = math.rsqrt %235 : vector<8x1xf32>
    %237 = vector.broadcast %236 : vector<8x1xf32> to vector<8x128xf32>
    %238 = arith.mulf %228, %237 : vector<8x128xf32>
    %239 = vector.broadcast %221 : vector<1x128xf32> to vector<8x128xf32>
    %240 = arith.mulf %238, %239 : vector<8x128xf32>
    %241 = vector.broadcast %222 : vector<1x128xf32> to vector<8x128xf32>
    %242 = arith.addf %240, %241 : vector<8x128xf32>
    %243 = arith.truncf %242 : vector<8x128xf32> to vector<8x128xbf16>
    %c0_90 = arith.constant 0 : index
    %c0_91 = arith.constant 0 : index
    %244 = vector.load %arg18[%c0_90, %c0_91] : memref<128x256xbf16, #tpu.memory_space<vmem>>, vector<128x256xbf16>
    %cst_92 = arith.constant dense<0.000000e+00> : vector<8x256xf32>
    %245 = tpu.matmul %243, %244, %cst_92 {dimension_numbers = #tpu.dot_dimension_numbers<[1], [0], [0], [1], [0, 0, 1, 1], [], []>} : vector<8x128xbf16>, vector<128x256xbf16>, vector<8x256xf32> -> vector<8x256xf32>
    %c0_93 = arith.constant 0 : index
    %c0_94 = arith.constant 0 : index
    %246 = vector.load %arg19[%c0_93, %c0_94] : memref<1x256xf32, #tpu.memory_space<vmem>>, vector<1x256xf32>
    %247 = vector.broadcast %246 : vector<1x256xf32> to vector<8x256xf32>
    %248 = arith.addf %245, %247 : vector<8x256xf32>
    %cst_95 = arith.constant 0.000000e+00 : f32
    %249 = vector.broadcast %cst_95 : f32 to vector<8x256xf32>
    %250 = arith.maximumf %248, %249 : vector<8x256xf32>
    %251 = arith.truncf %250 : vector<8x256xf32> to vector<8x256xbf16>
    %c0_96 = arith.constant 0 : index
    %c0_97 = arith.constant 0 : index
    %252 = vector.load %arg20[%c0_96, %c0_97] : memref<256x128xbf16, #tpu.memory_space<vmem>>, vector<256x128xbf16>
    %cst_98 = arith.constant dense<0.000000e+00> : vector<8x128xf32>
    %253 = tpu.matmul %251, %252, %cst_98 {dimension_numbers = #tpu.dot_dimension_numbers<[1], [0], [0], [1], [0, 0, 1, 1], [], []>} : vector<8x256xbf16>, vector<256x128xbf16>, vector<8x128xf32> -> vector<8x128xf32>
    %c0_99 = arith.constant 0 : index
    %c0_100 = arith.constant 0 : index
    %254 = vector.load %arg21[%c0_99, %c0_100] : memref<1x128xf32, #tpu.memory_space<vmem>>, vector<1x128xf32>
    %255 = vector.broadcast %254 : vector<1x128xf32> to vector<8x128xf32>
    %256 = arith.addf %253, %255 : vector<8x128xf32>
    %257 = arith.addf %256, %242 : vector<8x128xf32>
    %c0_101 = arith.constant 0 : index
    %c0_102 = arith.constant 0 : index
    %258 = vector.load %arg22[%c0_101, %c0_102] : memref<1x128xf32, #tpu.memory_space<vmem>>, vector<1x128xf32>
    %c0_103 = arith.constant 0 : index
    %c0_104 = arith.constant 0 : index
    %259 = vector.load %arg23[%c0_103, %c0_104] : memref<1x128xf32, #tpu.memory_space<vmem>>, vector<1x128xf32>
    %cst_105 = arith.constant dense<0.000000e+00> : vector<8xf32>
    %260 = vector.multi_reduction <add>, %257, %cst_105 [1] : vector<8x128xf32> to vector<8xf32>
    %261 = vector.shape_cast %260 : vector<8xf32> to vector<8x1xf32>
    %cst_106 = arith.constant 7.812500e-03 : f32
    %262 = vector.broadcast %cst_106 : f32 to vector<8x1xf32>
    %263 = arith.mulf %261, %262 : vector<8x1xf32>
    %264 = vector.broadcast %263 : vector<8x1xf32> to vector<8x128xf32>
    %265 = arith.subf %257, %264 : vector<8x128xf32>
    %266 = arith.mulf %265, %265 : vector<8x128xf32>
    %cst_107 = arith.constant dense<0.000000e+00> : vector<8xf32>
    %267 = vector.multi_reduction <add>, %266, %cst_107 [1] : vector<8x128xf32> to vector<8xf32>
    %268 = vector.shape_cast %267 : vector<8xf32> to vector<8x1xf32>
    %cst_108 = arith.constant 7.812500e-03 : f32
    %269 = vector.broadcast %cst_108 : f32 to vector<8x1xf32>
    %270 = arith.mulf %268, %269 : vector<8x1xf32>
    %cst_109 = arith.constant 9.99999974E-6 : f32
    %271 = vector.broadcast %cst_109 : f32 to vector<8x1xf32>
    %272 = arith.addf %270, %271 : vector<8x1xf32>
    %273 = math.rsqrt %272 : vector<8x1xf32>
    %274 = vector.broadcast %273 : vector<8x1xf32> to vector<8x128xf32>
    %275 = arith.mulf %265, %274 : vector<8x128xf32>
    %276 = vector.broadcast %258 : vector<1x128xf32> to vector<8x128xf32>
    %277 = arith.mulf %275, %276 : vector<8x128xf32>
    %278 = vector.broadcast %259 : vector<1x128xf32> to vector<8x128xf32>
    %279 = arith.addf %277, %278 : vector<8x128xf32>
    %c0_110 = arith.constant 0 : index
    %c0_111 = arith.constant 0 : index
    %c0_112 = arith.constant 0 : index
    %280 = vector.load %arg24[%c0_110, %c0_111, %c0_112] : memref<1x8x128xf32, #tpu.memory_space<vmem>>, vector<1x8x128xf32>
    %281 = vector.shape_cast %280 : vector<1x8x128xf32> to vector<8x128xf32>
    %282 = vector.shape_cast %279 : vector<8x128xf32> to vector<1x8x128xf32>
    tpu.vector_store %arg24[%c0_110, %c0_111, %c0_112], %282 {strides = array<i32>} : memref<1x8x128xf32, #tpu.memory_space<vmem>>, vector<1x8x128xf32>,
    return
  }
  func.func @transform_0(%arg0: i32) -> (i32, i32, i32) {
    %c0_i32 = arith.constant 0 : i32
    %c0_i32_0 = arith.constant 0 : i32
    %c0_i32_1 = arith.constant 0 : i32
    return %arg0, %c0_i32, %c0_i32_0 : i32, i32, i32
  }
  func.func @transform_1(%arg0: i32) -> (i32, i32, i32) {
    %c0_i32 = arith.constant 0 : i32
    %c0_i32_0 = arith.constant 0 : i32
    %c0_i32_1 = arith.constant 0 : i32
    return %arg0, %c0_i32, %c0_i32_0 : i32, i32, i32
  }
  func.func @transform_2(%arg0: i32) -> (i32, i32, i32) {
    %c0_i32 = arith.constant 0 : i32
    %c0_i32_0 = arith.constant 0 : i32
    %c0_i32_1 = arith.constant 0 : i32
    return %arg0, %c0_i32, %c0_i32_0 : i32, i32, i32
  }
  func.func @transform_3(%arg0: i32) -> (i32, i32) {
    %c0_i32 = arith.constant 0 : i32
    %c0_i32_0 = arith.constant 0 : i32
    %c0_i32_1 = arith.constant 0 : i32
    return %c0_i32, %c0_i32_0 : i32, i32
  }
  func.func @transform_4(%arg0: i32) -> (i32, i32) {
    %c0_i32 = arith.constant 0 : i32
    %c0_i32_0 = arith.constant 0 : i32
    %c0_i32_1 = arith.constant 0 : i32
    return %c0_i32, %c0_i32_0 : i32, i32
  }
  func.func @transform_5(%arg0: i32) -> (i32, i32) {
    %c0_i32 = arith.constant 0 : i32
    %c0_i32_0 = arith.constant 0 : i32
    %c0_i32_1 = arith.constant 0 : i32
    return %c0_i32, %c0_i32_0 : i32, i32
  }
  func.func @transform_6(%arg0: i32) -> (i32, i32) {
    %c0_i32 = arith.constant 0 : i32
    %c0_i32_0 = arith.constant 0 : i32
    %c0_i32_1 = arith.constant 0 : i32
    return %c0_i32, %c0_i32_0 : i32, i32
  }
  func.func @transform_7(%arg0: i32) -> (i32, i32) {
    %c0_i32 = arith.constant 0 : i32
    %c0_i32_0 = arith.constant 0 : i32
    %c0_i32_1 = arith.constant 0 : i32
    return %c0_i32, %c0_i32_0 : i32, i32
  }
  func.func @transform_8(%arg0: i32) -> (i32, i32) {
    %c0_i32 = arith.constant 0 : i32
    %c0_i32_0 = arith.constant 0 : i32
    %c0_i32_1 = arith.constant 0 : i32
    return %c0_i32, %c0_i32_0 : i32, i32
  }
  func.func @transform_9(%arg0: i32) -> (i32, i32) {
    %c0_i32 = arith.constant 0 : i32
    %c0_i32_0 = arith.constant 0 : i32
    %c0_i32_1 = arith.constant 0 : i32
    return %c0_i32, %c0_i32_0 : i32, i32
  }
  func.func @transform_10(%arg0: i32) -> (i32, i32) {
    %c0_i32 = arith.constant 0 : i32
    %c0_i32_0 = arith.constant 0 : i32
    %c0_i32_1 = arith.constant 0 : i32
    return %c0_i32, %c0_i32_0 : i32, i32
  }
  func.func @transform_11(%arg0: i32) -> (i32, i32) {
    %c0_i32 = arith.constant 0 : i32
    %c0_i32_0 = arith.constant 0 : i32
    %c0_i32_1 = arith.constant 0 : i32
    return %c0_i32, %c0_i32_0 : i32, i32
  }
  func.func @transform_12(%arg0: i32) -> (i32, i32) {
    %c0_i32 = arith.constant 0 : i32
    %c0_i32_0 = arith.constant 0 : i32
    %c0_i32_1 = arith.constant 0 : i32
    return %c0_i32, %c0_i32_0 : i32, i32
  }
  func.func @transform_13(%arg0: i32) -> (i32, i32) {
    %c0_i32 = arith.constant 0 : i32
    %c0_i32_0 = arith.constant 0 : i32
    %c0_i32_1 = arith.constant 0 : i32
    return %c0_i32, %c0_i32_0 : i32, i32
  }
  func.func @transform_14(%arg0: i32) -> (i32, i32) {
    %c0_i32 = arith.constant 0 : i32
    %c0_i32_0 = arith.constant 0 : i32
    %c0_i32_1 = arith.constant 0 : i32
    return %c0_i32, %c0_i32_0 : i32, i32
  }
  func.func @transform_15(%arg0: i32) -> (i32, i32) {
    %c0_i32 = arith.constant 0 : i32
    %c0_i32_0 = arith.constant 0 : i32
    %c0_i32_1 = arith.constant 0 : i32
    return %c0_i32, %c0_i32_0 : i32, i32
  }
  func.func @transform_16(%arg0: i32) -> (i32, i32) {
    %c0_i32 = arith.constant 0 : i32
    %c0_i32_0 = arith.constant 0 : i32
    %c0_i32_1 = arith.constant 0 : i32
    return %c0_i32, %c0_i32_0 : i32, i32
  }
  func.func @transform_17(%arg0: i32) -> (i32, i32) {
    %c0_i32 = arith.constant 0 : i32
    %c0_i32_0 = arith.constant 0 : i32
    %c0_i32_1 = arith.constant 0 : i32
    return %c0_i32, %c0_i32_0 : i32, i32
  }
  func.func @transform_18(%arg0: i32) -> (i32, i32) {
    %c0_i32 = arith.constant 0 : i32
    %c0_i32_0 = arith.constant 0 : i32
    %c0_i32_1 = arith.constant 0 : i32
    return %c0_i32, %c0_i32_0 : i32, i32
  }
  func.func @transform_19(%arg0: i32) -> (i32, i32) {
    %c0_i32 = arith.constant 0 : i32
    %c0_i32_0 = arith.constant 0 : i32
    %c0_i32_1 = arith.constant 0 : i32
    return %c0_i32, %c0_i32_0 : i32, i32
  }
  func.func @transform_20(%arg0: i32) -> (i32, i32) {
    %c0_i32 = arith.constant 0 : i32
    %c0_i32_0 = arith.constant 0 : i32
    %c0_i32_1 = arith.constant 0 : i32
    return %c0_i32, %c0_i32_0 : i32, i32
  }
  func.func @transform_21(%arg0: i32) -> (i32, i32) {
    %c0_i32 = arith.constant 0 : i32
    %c0_i32_0 = arith.constant 0 : i32
    %c0_i32_1 = arith.constant 0 : i32
    return %c0_i32, %c0_i32_0 : i32, i32
  }
  func.func @transform_22(%arg0: i32) -> (i32, i32) {
    %c0_i32 = arith.constant 0 : i32
    %c0_i32_0 = arith.constant 0 : i32
    %c0_i32_1 = arith.constant 0 : i32
    return %c0_i32, %c0_i32_0 : i32, i32
  }
  func.func @transform_23(%arg0: i32) -> (i32, i32, i32) {
    %c0_i32 = arith.constant 0 : i32
    %c0_i32_0 = arith.constant 0 : i32
    %c0_i32_1 = arith.constant 0 : i32
    return %arg0, %c0_i32, %c0_i32_0 : i32, i32, i32
  }
}

</mosaic_0001>

<bundles_post_ra>
// kernel: _lambda_.9
= control target key start
LH: loop header
LB: loop body
LE: loop exit
PB: predicated region body
PF: predicated region fallthrough
CT: control target
= control target key end

     0   :  { %8 = vsyncpa [#allocation4], 0  ;;  %s825_s0 = inlined_call_operand.vmem [shape: f32[16,128], index: 0, kind: input, shape index: {}]   ;;  %s826_s1 = inlined_call_operand.vmem [shape: bf16[128,256], index: 1, kind: input, shape index: {}]   ;;  %s827_s2 = inlined_call_operand.vmem [shape: f32[1,256], index: 2, kind: input, shape index: {}]   ;;  %s828_s3 = inlined_call_operand.hbm [shape: f32[16,256], index: 3, kind: output, shape index: {}]  }
   0x1   :  { %10 = vsyncpa [#allocation4 + $0x1], 0  ;;  %s684_s12 = smov 0   ;;  %s686_s13 = smov 0  }
   0x2   :  { %s688_s14 = smov 0   ;;  %s690_s15 = smov 0  }
   0x3 LB: > { %s705_s16 = sadd.s32 4294967295, %s656_s15   ;;  %s492_s17 = sadd.s32 4294967294, %s656_s15   ;;  %s656_s15 = sphi %s690_s15, %s834_s15   ;;  %s652_s14 = sphi %s688_s14, %s833_s14   ;;  %s648_s13 = sphi %s686_s13, %s832_s13   ;;  %s644_s12 = sphi %s684_s12, %s831_s12  }
   0x4   : > { %s709_s18 = sadd.s32 1, %s656_s15   ;;  %s44_s19 = sadd.s32 1, %s652_s14 }
   0x5   : > { %s41_s20 = ssub.s32 %s656_s15, %s709_s18  ;;  %p51_p0 = scmp.ne.s32.totalorder %s652_s14, %s648_s13 }
   0x6   : > { %p42_p1 = scmp.eq.s32.totalorder %s41_s20, 0  ;;  %p52_p2 = scmp.eq.s32.totalorder %s656_s15, 0 }
   0x7   : > { %p107_p3 = scmp.eq.s32.totalorder %s705_s16, 1  ;;  %p112_p4 = scmp.ne.s32.totalorder %s648_s13, %s644_s12 }
   0x8   : > { %s721_s21 = scalar_select %p42_p1, %s652_s14, %s44_s19  }
   0x9   : > { %p53_p5 = por %p52_p2, %p51_p0  ;;  %p723_p6 = por %p107_p3, %p51_p0 }
   0xa   : > { %p113_p7 = scmp.eq.s32.totalorder %s492_s17, 1  ;;  %p494_p9 = scmp.ge.s32.totalorder %s656_s15, 2 }
   0xc   : > { %p727_p8 = por %p113_p7, %p112_p4  ;;  %132 = sbr.rel (%p494_p9) target bundleno = 33 (0x21), region = 20 }
  0x13   : > { %135 = sbr.rel (!%p53_p5) target bundleno = 33 (0x21), region = 24  ;;  %s137_s24 = sand.u32 (%p53_p5), 1, %s652_s14  }
  0x14   : > { %s496_s25 = sshll.u32 (%p53_p5), %s656_s15, 2  ;;  %s495_s26 = sshll.u32 (%p53_p5), %s137_s24, 6 }
  0x15   : > { %s739_s29 = scalar_lea.vmem (%p53_p5), %s826_s1, %s496_s25  ;;  %s139_s30 = scalar_lea.vmem (%p53_p5), [#allocation2], %s495_s26 }
  0x16   : > { %v157_v0 = vld [vmem:[%s739_s29] sm:$0xf] (%p53_p5)  ;;  %v159_v1 = vld [vmem:[%s739_s29 + $0x8] sm:$0xf] (%p53_p5)  ;;  %v161_v2 = vld [vmem:[%s739_s29 + $0x10] sm:$0xf] (%p53_p5) }
  0x17   : > { %158 = vst [vmem:[%s139_s30] sm:$0xf] (%p53_p5), %v157_v0  ;;  %160 = vst [vmem:[%s139_s30 + $0x4] sm:$0xf] (%p53_p5), %v159_v1  ;;  %v163_v3 = vld [vmem:[%s739_s29 + $0x18] sm:$0xf] (%p53_p5) }
  0x18   : > { %v165_v4 = vld [vmem:[%s739_s29 + $0x20] sm:$0xf] (%p53_p5)  ;;  %162 = vst [vmem:[%s139_s30 + $0x8] sm:$0xf] (%p53_p5), %v161_v2  ;;  %164 = vst [vmem:[%s139_s30 + $0xc] sm:$0xf] (%p53_p5), %v163_v3 }
  0x19   : > { %166 = vst [vmem:[%s139_s30 + $0x10] sm:$0xf] (%p53_p5), %v165_v4  ;;  %v167_v5 = vld [vmem:[%s739_s29 + $0x28] sm:$0xf] (%p53_p5)  ;;  %v169_v6 = vld [vmem:[%s739_s29 + $0x30] sm:$0xf] (%p53_p5) }
  0x1a   : > { %v171_v7 = vld [vmem:[%s739_s29 + $0x38] sm:$0xf]  ;;  %168 = vst [vmem:[%s139_s30 + $0x14] sm:$0xf] %v167_v5  ;;  %170 = vst [vmem:[%s139_s30 + $0x18] sm:$0xf] %v169_v6 }
  0x1b   : > { %172 = vst [vmem:[%s139_s30 + $0x1c] sm:$0xf] %v171_v7  ;;  %v173_v8 = vld [vmem:[%s739_s29 + $0x40] sm:$0xf]  ;;  %v175_v9 = vld [vmem:[%s739_s29 + $0x48] sm:$0xf] }
  0x1c   : > { %v177_v10 = vld [vmem:[%s739_s29 + $0x50] sm:$0xf]  ;;  %174 = vst [vmem:[%s139_s30 + $0x20] sm:$0xf] %v173_v8  ;;  %176 = vst [vmem:[%s139_s30 + $0x24] sm:$0xf] %v175_v9 }
  0x1d   : > { %178 = vst [vmem:[%s139_s30 + $0x28] sm:$0xf] %v177_v10  ;;  %v179_v11 = vld [vmem:[%s739_s29 + $0x58] sm:$0xf]  ;;  %v181_v12 = vld [vmem:[%s739_s29 + $0x60] sm:$0xf] }
  0x1e   : > { %v183_v13 = vld [vmem:[%s739_s29 + $0x68] sm:$0xf]  ;;  %180 = vst [vmem:[%s139_s30 + $0x2c] sm:$0xf] %v179_v11  ;;  %182 = vst [vmem:[%s139_s30 + $0x30] sm:$0xf] %v181_v12 }
  0x1f   : > { %184 = vst [vmem:[%s139_s30 + $0x34] sm:$0xf] %v183_v13  ;;  %v185_v14 = vld [vmem:[%s739_s29 + $0x70] sm:$0xf]  ;;  %v187_v15 = vld [vmem:[%s739_s29 + $0x78] sm:$0xf] }
  0x20   : > { %186 = vst [vmem:[%s139_s30 + $0x38] sm:$0xf] %v185_v14  ;;  %188 = vst [vmem:[%s139_s30 + $0x3c] sm:$0xf] %v187_v15 }
  0x21 PF: > { %p497_p10 = scmp.ge.s32.totalorder %s656_s15, 1  ;;  %p248_p11 = scmp.lt.s32.totalorder %s656_s15, 3 }
  0x23   : > { %p249_p12 = pnand %p497_p10, %p248_p11 }
  0x24   : > { %s760_s4 = sand.u32 (!%p249_p12), 1, %s648_s13   ;;  %v658_v16 = vmov (!%p249_p12), 0.0   ;;  %vm659_vm0 = vmmov (!%p249_p12), 0   ;;  %v285_v25 = vld [vmem:[%s825_s0] sm:$0xff] (!%p249_p12)  ;;  %v286_v26 = vld [vmem:[%s825_s0 + $0x8] sm:$0xff] (!%p249_p12)  ;;  %p281_p13 = scmp.lt.s32.totalorder (!%p249_p12), %s705_s16, 1 }
  0x25   : > { %252 = sbr.rel (%p249_p12) target bundleno = 303 (0x12f), region = 69  ;;  %522 = vmatprep.subr.bf16.mxu0 (!%p249_p12), %v658_v16  ;;  %s498_s5 = sshll.u32 (!%p249_p12), %s760_s4, 6  ;;  %538 = vmatprep.mubr.msk.bf16.mxu0 (!%p249_p12), %vm659_vm0, %v658_v16  ;;  %v287_v27 = vpack.c.bf16 (!%p249_p12), %v286_v26, %v285_v25 }
  0x26   : > { %s257_s6 = scalar_lea.vmem (!%p249_p12), [#allocation2], %s498_s5  ;;  %s499_s17 = sshll.u32 (!%p249_p12), %s760_s4, 4 }
  0x27   : > { %v586_v17 = vld [vmem:[%s257_s6] sm:$0xff] (!%p249_p12)   ;;  %v587_v18 = vld [vmem:[%s257_s6 + $0x8] sm:$0xff] (!%p249_p12)   ;;  %v588_v19 = vld [vmem:[%s257_s6 + $0x10] sm:$0xff] (!%p249_p12)   ;;  %s280_s25 = scalar_lea.vmem (!%p249_p12), [#allocation3], %s499_s17  ;;  %s510_s27 = sshll.u32 (!%p249_p12), %s705_s16, 7 }
  0x28   : > { %523 = vmatpush3.bf16.msra.mxu0 (!%p249_p12), %v586_v17  ;;  %v589_v20 = vld [vmem:[%s257_s6 + $0x18] sm:$0xff] (!%p249_p12)   ;;  %v590_v21 = vld [vmem:[%s257_s6 + $0x20] sm:$0xff] (!%p249_p12)   ;;  %v591_v22 = vld [vmem:[%s257_s6 + $0x28] sm:$0xff] (!%p249_p12)   ;;  %s415_s26 = sshll.u32 (!%p249_p12), %s280_s25, 4  ;;  %s781_s30 = scalar_lea.hbm (!%p249_p12), %s828_s3, %s510_s27  ;;  %s776_s26 = int_to_ptr.vmem [resolvable:$true] %s415_s26 }
  0x29   : > { %524 = vmatprep.subr.bf16.mxu0 (!%p249_p12), %v658_v16  ;;  %v592_v23 = vld [vmem:[%s257_s6 + $0x30] sm:$0xff] (!%p249_p12)   ;;  %v593_v24 = vld [vmem:[%s257_s6 + $0x38] sm:$0xff] (!%p249_p12)   ;;  %s403_s5 = scalar_lea.sflag (!%p249_p12), [#allocation4], %s760_s4  ;;  %s660_s6 = smov (!%p249_p12), [#allocation3]  }
  0x2a   : > { %s598_s7 = sshll.u32 (!%p249_p12), %s660_s6, 4  ;;  %s599_s7 = int_to_ptr.vmem [resolvable:$false] %s598_s7 }
  0x2b   : > { %s600_s8 = scalar_lea.vmem (!%p249_p12), %s599_s7, 512  ;;  %p601_p3 = scmp.lt.s32.totalorder (!%p249_p12), %s776_s26, %s599_s7 }
  0x2c   : > { %525 = vmatpush3.bf16.msra.mxu0 %v587_v18  ;;  %s282_s11 = scalar_select %p281_p13, %s705_s16, 1 }
  0x2d   : > { %526 = vmatprep.subr.bf16.mxu0 %v658_v16  ;;  %s594_s16 = scalar_lea.vmem %s776_s26, 256 }
  0x2e   : > { %s283_s24 = scalar_lea.vmem %s827_s2, %s282_s11  ;;  %p595_p0 = scmp.ne.s32.totalorder %s776_s26, %s594_s16 }
  0x2f   : > { %v500_v28 = vld [vmem:[%s283_s24] ss:$0 sm:$0xff]  ;;  %p602_p4 = scmp.lt.s32.totalorder %s600_s8, %s594_s16 }
  0x30   : > { %527 = vmatpush3.bf16.msra.mxu0 %v588_v19  ;;  %p596_p1 = pnand %p595_p0, %p723_p6 }
  0x31   : > { %528 = vmatprep.subr.bf16.mxu0 %v658_v16  ;;  %p603_p5 = por %p602_p4, %p601_p3 }
  0x32   : > { %p597_p2 = pneg %p596_p1 }
  0x34   : > { %529 = vmatpush3.bf16.msra.mxu0 %v589_v20  ;;  %p604_p7 = pnand %p603_p5, %p597_p2 }
  0x35   : > { %530 = vmatprep.subr.bf16.mxu0 %v658_v16 }
  0x38   : > { %531 = vmatpush3.bf16.msra.mxu0 %v590_v21 }
  0x39   : > { %532 = vmatprep.subr.bf16.mxu0 %v658_v16 }
  0x3c   : > { %533 = vmatpush3.bf16.msra.mxu0 %v591_v22 }
  0x3d   : > { %534 = vmatprep.subr.bf16.mxu0 %v658_v16 }
  0x40   : > { %535 = vmatpush3.bf16.msra.mxu0 %v592_v23 }
  0x41   : > { %536 = vmatprep.subr.bf16.mxu0 %v658_v16 }
  0x44   : > { %537 = vmatpush3.bf16.msra.mxu0 %v593_v24 }
  0x47   : > { %539 = vmatmul.mubr.bf16.vlgmr.msra.gmra.mrb[0].mxu0 %v287_v27 }
 0x11a   : > { %v393_v29 = vpop.f32.mrb[0].mxu0 }
 0x11b   : > { %v394_v30 = vadd.f32 %v500_v28, %v393_v29  ;;  %v540_v31 = vpop.f32.mrb[1].mxu0 }
 0x11c   : > { %v396_v32 = vpop.f32.mrb[2].mxu0 }
 0x11d   : > { %400 = vst [vmem:[%s280_s25] sm:$0xff] %v394_v30  ;;  %v397_v33 = vadd.f32 %v500_v28, %v396_v32  ;;  %v541_v34 = vpop.f32.mrb[3].mxu0 }
 0x11f   : > { %401 = vst [vmem:[%s280_s25 + $0x8] sm:$0xff] %v397_v33 }
 0x120   : > { %607 = shalt.err (!%p604_p7)
}
 0x121   : > { %s608_s9 = scalar_lea.hbm %s781_s30, 256  ;;  %s612_s17 = scalar_lea.hbm %s828_s3, 512 }
 0x122   : > { %p609_p10 = scmp.ne.s32.totalorder %s781_s30, %s608_s9  ;;  %p613_p13 = scmp.lt.u32.totalorder %s781_s30, %s828_s3 }
 0x123   : > { %p614_p0 = scmp.lt.u32.totalorder %s612_s17, %s608_s9  ;;  %p616_p2 = scmp.lt.u32.totalorder %s608_s9, %s781_s30 }
 0x124   : > { %p610_p11 = pnand %p609_p10, %p723_p6 }
 0x125   : > { %p615_p1 = por %p614_p0, %p613_p13 }
 0x126   : > { %p611_p12 = pneg %p610_p11 }
 0x127   : > { %p617_p3 = por %p616_p2, %p615_p1 }
 0x129   : > { %p618_p4 = pnand %p617_p3, %p611_p12 }
 0x12b   : > { %621 = shalt.err (!%p618_p4)
}
 0x12c   : > { %s661_s24 = smov 128   ;;  %s662_s25 = smov 256  }
 0x12d   : > { %s663_s27 = smov 8  }
 0x12e   : > { %542 = dma.vmem_to_hbm [thread:$0]  (%p723_p6), %s776_s26, 256, %s781_s30, %s403_s5, %s661_s24, %s662_s25, %s663_s27  }
 0x12f PF: > { %s430_s28 = sand.u32 1, %s644_s12   ;;  %p545_p5 = pnand %p494_p9, %p727_p8 }
 0x130   : > { %s431_s29 = scalar_lea.sflag [#allocation4], %s430_s28 }
 0x131   : > { %639 = dma.done.wait (!%p545_p5), %s431_s29, 256  }
 0x132   : > { %641 = vsyncadd (!%p545_p5), %s431_s29, 4294967040  ;;  %p13_p7 = scmp.ge.s32.totalorder %s709_s18, 4   ;;  %s831_s12 = smov %s648_s13 }
 0x133   : > { %s832_s13 = smov %s652_s14  ;;  %s833_s14 = smov %s721_s21 }
 0x134   : > { %s834_s15 = smov %s709_s18  ;;  %15 = sbr.rel (!%p13_p7) target bundleno = 3 (0x3), region = 116 }
 0x13b   :  { %436 = vsyncpa [#allocation4], 1 }
 0x13c   :  { %438 = vsyncpa [#allocation4 + $0x1], 1 }

// kernel: _lambda_.5
= control target key start
LH: loop header
LB: loop body
LE: loop exit
PB: predicated region body
PF: predicated region fallthrough
CT: control target
= control target key end

     0   :  { %s2141_s25 = smov 0   ;;  %s2491_s0 = inlined_call_operand.vmem [shape: f32[2,8,128], index: 0, kind: input, shape index: {}]   ;;  %s2492_s1 = inlined_call_operand.vmem [shape: bf16[128,384], index: 1, kind: input, shape index: {}]   ;;  %s2493_s2 = inlined_call_operand.vmem [shape: f32[1,384], index: 2, kind: input, shape index: {}]   ;;  %s2494_s3 = inlined_call_operand.vmem [shape: bf16[128,128], index: 3, kind: input, shape index: {}]   ;;  %s2495_s4 = inlined_call_operand.vmem [shape: f32[1,128], index: 4, kind: input, shape index: {}]   ;;  %s2496_s5 = inlined_call_operand.vmem [shape: f32[1,128], index: 5, kind: input, shape index: {}]   ;;  %s2497_s6 = inlined_call_operand.vmem [shape: f32[1,128], index: 6, kind: input, shape index: {}]   ;;  %s2498_s7 = inlined_call_operand.vmem [shape: bf16[128,256], index: 7, kind: input, shape index: {}]   ;;  %s2499_s8 = inlined_call_operand.vmem [shape: f32[1,256], index: 8, kind: input, shape index: {}]   ;;  %s2500_s9 = inlined_call_operand.vmem [shape: bf16[256,128], index: 9, kind: input, shape index: {}]   ;;  %s2501_s10 = inlined_call_operand.vmem [shape: f32[1,128], index: 10, kind: input, shape index: {}]   ;;  %s2502_s11 = inlined_call_operand.vmem [shape: f32[1,128], index: 11, kind: input, shape index: {}]   ;;  %s2503_s12 = inlined_call_operand.vmem [shape: f32[1,128], index: 12, kind: input, shape index: {}]   ;;  %s2504_s13 = inlined_call_operand.vmem [shape: f32[2,8,128], index: 13, kind: output, shape index: {}]  }
   0x1 LB: > { %s1712_s26 = sadd.s32 4294967295, %s2063_s25   ;;  %p1716_p0 = scmp.ge.s32.totalorder %s2063_s25, 1  ;;  %s2063_s25 = sphi %s2141_s25, %s23_s25  }
   0x2   : > { %p386_p1 = scmp.lt.s32.totalorder %s2063_s25, 3 }
   0x4   : > { %p387_p2 = pnand %p1716_p0, %p386_p1 }
   0x5   : > { %v1957_v0 = vld [vmem:[%s2492_s1 + $0x4] ss:$12 sps:$4 sm:$0xff] (!%p387_p2)   ;;  %v1959_v1 = vld [vmem:[%s2492_s1] ss:$12 sps:$4 sm:$0xff] (!%p387_p2)   ;;  %v2065_v2 = vmov (!%p387_p2), 0   ;;  %v2066_v4 = vmov (!%p387_p2), 0.0   ;;  %v473_v28 = vlaneseq (!%p387_p2) }
   0x6   : > { %390 = sbr.rel (%p387_p2) target bundleno = 2965 (0xb95), region = 72  ;;  %648 = vmatprep.mubr.bf16.mxu0 (!%p387_p2), %v2065_v2  ;;  %616 = vmatprep.subr.bf16.mxu0 (!%p387_p2), %v1957_v0  ;;  %v1960_v3 = vld [vmem:[%s2492_s1 + $0x1c] ss:$12 sps:$4 sm:$0xff] (!%p387_p2)   ;;  %v1962_v5 = vld [vmem:[%s2492_s1 + $0x18] ss:$12 sps:$4 sm:$0xff] (!%p387_p2)   ;;  %p428_p3 = scmp.lt.s32.totalorder (!%p387_p2), %s1712_s26, 1 }
   0x7   : > { %1855 = vmatprep.subr.bf16.mxu1 (!%p387_p2), %v2066_v4  ;;  %617 = vmatpush1.bf16.msra.mxu0 (!%p387_p2), %v1959_v1  ;;  %v1963_v6 = vld [vmem:[%s2492_s1 + $0x34] ss:$12 sps:$4 sm:$0xff] (!%p387_p2)   ;;  %v1965_v7 = vld [vmem:[%s2492_s1 + $0x30] ss:$12 sps:$4 sm:$0xff] (!%p387_p2)   ;;  %v1966_v8 = vld [vmem:[%s2492_s1 + $0x4c] ss:$12 sps:$4 sm:$0xff] (!%p387_p2)  }
   0x8   : > { %618 = vmatprep.subr.bf16.mxu0 (!%p387_p2), %v1960_v3  ;;  %v1968_v9 = vld [vmem:[%s2492_s1 + $0x48] ss:$12 sps:$4 sm:$0xff] (!%p387_p2)   ;;  %v1969_v11 = vld [vmem:[%s2492_s1 + $0x64] ss:$12 sps:$4 sm:$0xff] (!%p387_p2)   ;;  %v1982_v12 = vld [vmem:[%s2492_s1 + $0x20] ss:$12 sps:$4 sm:$0xff] (!%p387_p2)  }
   0x9   : > { %v1981_v10 = vld [vmem:[%s2492_s1 + $0x8] ss:$12 sps:$4 sm:$0xff] (!%p387_p2)   ;;  %v1971_v13 = vld [vmem:[%s2492_s1 + $0x60] ss:$12 sps:$4 sm:$0xff] (!%p387_p2)   ;;  %v1974_v15 = vld [vmem:[%s2492_s1 + $0x78] ss:$12 sps:$4 sm:$0xff] (!%p387_p2)  }
   0xa   : > { %1856 = vmatpush3.bf16.msra.mxu1 (!%p387_p2), %v1981_v10  ;;  %v1972_v14 = vld [vmem:[%s2492_s1 + $0x7c] ss:$12 sps:$4 sm:$0xff] (!%p387_p2)   ;;  %v1983_v16 = vld [vmem:[%s2492_s1 + $0x38] ss:$12 sps:$4 sm:$0xff] (!%p387_p2)   ;;  %v1975_v17 = vld [vmem:[%s2492_s1 + $0x94] ss:$12 sps:$4 sm:$0xff] (!%p387_p2)  }
   0xb   : > { %619 = vmatpush1.bf16.msra.mxu0 (!%p387_p2), %v1962_v5  ;;  %1857 = vmatprep.subr.bf16.mxu1 (!%p387_p2), %v2066_v4  ;;  %v1984_v18 = vld [vmem:[%s2492_s1 + $0x50] ss:$12 sps:$4 sm:$0xff] (!%p387_p2)   ;;  %v1978_v20 = vld [vmem:[%s2492_s1 + $0xac] ss:$12 sps:$4 sm:$0xff] (!%p387_p2)   ;;  %v1985_v21 = vld [vmem:[%s2492_s1 + $0x68] ss:$12 sps:$4 sm:$0xff] (!%p387_p2)  }
   0xc   : > { %620 = vmatprep.subr.bf16.mxu0 (!%p387_p2), %v1963_v6  ;;  %v1977_v19 = vld [vmem:[%s2492_s1 + $0x90] ss:$12 sps:$4 sm:$0xff] (!%p387_p2)   ;;  %v1980_v22 = vld [vmem:[%s2492_s1 + $0xa8] ss:$12 sps:$4 sm:$0xff] (!%p387_p2)   ;;  %v1986_v24 = vld [vmem:[%s2492_s1 + $0x80] ss:$12 sps:$4 sm:$0xff] (!%p387_p2)  }
   0xd   : > { %s2506_s26 = smov (!%p428_p3, %s1712_s26), 1  ;;  %v1987_v26 = vld [vmem:[%s2492_s1 + $0x98] ss:$12 sps:$4 sm:$0xff]   ;;  %v1988_v27 = vld [vmem:[%s2492_s1 + $0xb0] ss:$12 sps:$4 sm:$0xff]   ;;  %vm2067_vm0 = vmmov 0  }
   0xe   : > { %s1717_s17 = sshll.u32 %s2506_s26, 3  ;;  %1858 = vmatpush3.bf16.msra.mxu1 %v1982_v12  ;;  %1871 = vmatprep.mubr.msk.bf16.mxu1 %vm2067_vm0, %v2066_v4  ;;  %v2250_v29 = vshrl.u32 %v473_v28, 7  ;;  %v471_v31 = vld [vmem:[%s2493_s2] sm:$0x7]  ;;  %vm700_vm1 = vcmask 261120   ;;  %s2068_s21 = smov 96  }
   0xf   : > { %621 = vmatpush1.bf16.msra.mxu0 %v1965_v7  ;;  %1859 = vmatprep.subr.bf16.mxu1 %v2066_v4  ;;  %s431_s22 = scalar_lea.vmem %s2491_s0, %s1717_s17  ;;  %s2070_s23 = smov 32   ;;  %vm764_vm2 = vcmask 1043456   ;;  %vm748_vm3 = vcmask 64512   ;;  %vm1157_vm4 = vcmask 523264   ;;  %vm1159_vm5 = vcmask 785408  }
  0x10   : > { %622 = vmatprep.subr.bf16.mxu0 %v1966_v8  ;;  %v2225_v23 = vld [vmem:[%s431_s22] sm:$0xff]  ;;  %v479_v30 = vsub.s32 1, %v2250_v29  ;;  %v475_v32 = vsub.s32 0, %v2250_v29  ;;  %s2069_s22 = smov 64   ;;  %v483_v44 = vsub.s32 2, %v2250_v29  ;;  %s435_s27 = scalar_lea.vmem %s2504_s13, %s1717_s17 }
  0x11   : > { %v438_v25 = vpack.c.bf16 %v2225_v23, %v2225_v23 }
  0x12   : > { %1860 = vmatpush3.bf16.msra.mxu1 %v1983_v16  ;;  %v480_v33 = vrot.slane %v471_v31, %v479_v30  ;;  %v476_v34 = vrot.slane %v471_v31, %v475_v32  ;;  %v484_v45 = vrot.slane %v471_v31, %v483_v44 }
  0x13   : > { %623 = vmatpush1.bf16.msra.mxu0 %v1968_v9  ;;  %1861 = vmatprep.subr.bf16.mxu1 %v2066_v4 }
  0x14   : > { %624 = vmatprep.subr.bf16.mxu0 %v1969_v11 }
  0x16   : > { %1862 = vmatpush3.bf16.msra.mxu1 %v1984_v18 }
  0x17   : > { %625 = vmatpush1.bf16.msra.mxu0 %v1971_v13  ;;  %1863 = vmatprep.subr.bf16.mxu1 %v2066_v4 }
  0x18   : > { %626 = vmatprep.subr.bf16.mxu0 %v1972_v14 }
  0x1a   : > { %1864 = vmatpush3.bf16.msra.mxu1 %v1985_v21 }
  0x1b   : > { %627 = vmatpush1.bf16.msra.mxu0 %v1974_v15  ;;  %1865 = vmatprep.subr.bf16.mxu1 %v2066_v4 }
  0x1c   : > { %628 = vmatprep.subr.bf16.mxu0 %v1975_v17 }
  0x1e   : > { %1866 = vmatpush3.bf16.msra.mxu1 %v1986_v24 }
  0x1f   : > { %629 = vmatpush1.bf16.msra.mxu0 %v1977_v19  ;;  %1867 = vmatprep.subr.bf16.mxu1 %v2066_v4 }
  0x20   : > { %630 = vmatprep.subr.bf16.mxu0 %v1978_v20 }
  0x22   : > { %1868 = vmatpush3.bf16.msra.mxu1 %v1987_v26 }
  0x23   : > { %631 = vmatpush1.bf16.msra.mxu0 %v1980_v22  ;;  %1869 = vmatprep.subr.bf16.mxu1 %v2066_v4 }
  0x24   : > { %1899 = vmatprep.subr.bf16.mxu0 %v2066_v4 }
  0x26   : > { %649 = vmatmul.mubr.bf16.vlgmr.msra.gmra.mrb[0].mxu0 %v438_v25  ;;  %1870 = vmatpush3.bf16.msra.mxu1 %v1988_v27 }
  0x27   : > { %1875 = vmatprep.subr.bf16.mxu1 %v2066_v4  ;;  %1901 = vmatprep.mubr.msk.bf16.mxu0 %vm2067_vm0, %v2066_v4 }
  0x29   : > { %1872 = vmatmul.mubr.bf16.vlgmr.msra.gmra.mrb[0].mxu1 %v438_v25 }
  0x2a   : > { %1877 = vmatprep.mubr.msk.bf16.mxu1 %vm2067_vm0, %v2066_v4 }
  0xf9   : > { %v650_v35 = vpop.f32.mrb[0].mxu0 }
  0xfa   : > { %v652_v36 = vpop.f32.mrb[1].mxu0  ;;  %v651_v40 = vadd.f32 %v650_v35, %v476_v34 }
  0xfb   : > { %v653_v37 = vadd.f32 %v652_v36, %v480_v33  ;;  %v654_v38 = vpop.f32.mrb[2].mxu0 }
  0xfc   : > { %v655_v39 = vpop.f32.mrb[3].mxu0  ;;  %v697_v43 = vpack.c.bf16 %v651_v40, %v651_v40  ;;  %v691_v46 = vpop.f32.mrb[0].mxu1 }
  0xfd   : > { %v698_v41 = vpack.c.bf16 %v653_v37, %v653_v37  ;;  %v692_v47 = vadd.f32 %v691_v46, %v484_v45  ;;  %v1873_v48 = vpop.f32.mrb[1].mxu1 }
  0xfe   : > { %v694_v49 = vpop.f32.mrb[2].mxu1 }
  0xff   : > { %812 = vrot.lane.b32.xlu1 %v698_v41, %s2068_s21  ;;  %v705_v42 = vsel %vm700_vm1, %v698_v41, 0  ;;  %v2272_v50 = vpack.c.bf16 %v692_v47, %v692_v47  ;;  %v1874_v51 = vpop.f32.mrb[3].mxu1 }
 0x100   : > { %1876 = vmatpush3.bf16.xpose.msra.mxu1 %v705_v42 }
 0x101   : > { %1881 = vmatprep.subr.bf16.mxu1 %v2066_v4  ;;  %v766_v52 = vsel %vm764_vm2, %v2272_v50, 0 }
 0x103   : > { %809 = vrot.lane.b32.xlu1 %v697_v43, %s2068_s21 }
 0x107   : > { %922 = vrot.lane.b32.xlu1 %v697_v43, %s2069_s22  ;;  %1878 = vmatmul.mubr.msk.bf16.vlgmr.msra.gmra.mrb[4].mxu1 %vm700_vm1, %v697_v43 }
 0x108   : > { %1883 = vmatprep.mubr.msk.bf16.mxu1 %vm2067_vm0, %v2066_v4  ;;  %1882 = vmatpush3.bf16.msra.mxu1 %v766_v52 }
 0x109   : > { %1887 = vmatprep.subr.bf16.mxu1 %v2066_v4 }
 0x10b   : > { %1035 = vrot.lane.b32.xlu1 %v698_v41, %s2070_s23 }
 0x10f   : > { %1033 = vrot.lane.b32.xlu1 %v697_v43, %s2070_s23 }
 0x171   : > { %v813_v0 = vpop.permute.xlu1 %812 }
 0x172   : > { %v818_v13 = vsel %vm700_vm1, %v813_v0, 0 }
 0x175   : > { %v810_v1 = vpop.permute.xlu1 %809 }
 0x179   : > { %v923_v5 = vpop.permute.xlu1 %922 }
 0x17d   : > { %v1036_v8 = vpop.permute.xlu1 %1035 }
 0x17e   : > { %v1041_v11 = vsel %vm700_vm1, %v1036_v8, 0 }
 0x181   : > { %v1034_v14 = vpop.permute.xlu1 %1033 }
 0x1da   : > { %v741_v53 = vpop.f32.mrb[4].mxu1 }
 0x1db   : > { %v747_v54 = vmul.f32 0.17677669, %v741_v53  ;;  %v1879_v55 = vpop.f32.mrb[5].mxu1 }
 0x1dc   : > { %v744_v56 = vpop.f32.mrb[6].mxu1 }
 0x1dd   : > { %v1880_v57 = vpop.f32.mrb[7].mxu1  ;;  %v749_v58 = vsel %vm748_vm3, %v747_v54, -inf }
 0x1de   : > { %750 = vmax.xlane.f32.xlu0 %v749_v58 }
 0x26b   : > { %v751_v59 = vpop.xlane.xlu0 %750 }
 0x26c   : > { %v752_v60 = vsub.f32 %v747_v54, %v751_v59 }
 0x26e   : > { %v753_v61 = vmul.f32 1.442695, %v752_v60 }
 0x270   : > { %2037 = vpow2.f32 %v753_v61 }
 0x27a   : > { %v2038_v62 = vpop.eup %2037 }
 0x27b   : > { %v755_v63 = vsel %vm748_vm3, %v2038_v62, 0.0 }
 0x27c   : > { %756 = vadd.xlane.f32.xlu0 %v755_v63 }
 0x292   : > { %924 = vrot.lane.b32.xlu0 %v698_v41, %s2069_s22 }
 0x309   : > { %v757_v3 = vpop.xlane.xlu0 %756 }
 0x30a   : > { %2039 = vrcp.f32 %v757_v3 }
 0x30d   : > { %v925_v6 = vpop.permute.xlu0 %924 }
 0x30e   : > { %v930_v7 = vsel %vm700_vm1, %v925_v6, 0 }
 0x30f   : > { %1900 = vmatpush3.bf16.xpose.msra.mxu0 %v930_v7 }
 0x310   : > { %1911 = vmatprep.subr.bf16.mxu0 %v2066_v4 }
 0x314   : > { %v2040_v9 = vpop.eup %2039 }
 0x315   : > { %v759_v10 = vmul.f32 %v2040_v9, %v2038_v62 }
 0x316   : > { %1902 = vmatmul.mubr.msk.bf16.vlgmr.msra.gmra.mrb[4].mxu0 %vm700_vm1, %v923_v5 }
 0x317   : > { %1912 = vmatpush3.bf16.xpose.msra.mxu0 %v1041_v11  ;;  %v760_v12 = vpack.c.bf16 %v759_v10, %v759_v10  ;;  %1913 = vmatprep.mubr.msk.bf16.mxu0 %vm2067_vm0, %v2066_v4 }
 0x318   : > { %1923 = vmatprep.subr.bf16.mxu0 %v2066_v4 }
 0x319   : > { %1884 = vmatmul.mubr.msk.bf16.vlgmr.msra.gmra.mrb[8].mxu1 %vm748_vm3, %v760_v12  ;;  %v1989_v12 = vld [vmem:[%s2494_s3] sm:$0xff]  }
 0x31a   : > { %1888 = vmatpush3.bf16.xpose.msra.mxu1 %v818_v13  ;;  %1889 = vmatprep.mubr.msk.bf16.mxu1 %vm2067_vm0, %v2066_v4  ;;  %v1990_v13 = vld [vmem:[%s2494_s3 + $0x8] sm:$0xff]  }
 0x31b   : > { %1893 = vmatprep.subr.bf16.mxu1 %v2066_v4 }
 0x31e   : > { %1914 = vmatmul.mubr.msk.bf16.vlgmr.msra.gmra.mrb[8].mxu0 %vm700_vm1, %v1034_v14  ;;  %v1991_v14 = vld [vmem:[%s2494_s3 + $0x10] sm:$0xff]  }
 0x31f   : > { %1939 = vmatprep.mubr.msk.bf16.mxu0 %vm2067_vm0, %v2066_v4  ;;  %1924 = vmatpush3.bf16.msra.mxu0 %v1989_v12  ;;  %v2028_v12 = vld [vmem:[%s2500_s9 + $0x18] sm:$0xff]  }
 0x320   : > { %1925 = vmatprep.subr.bf16.mxu0 %v2066_v4 }
 0x321   : > { %1890 = vmatmul.mubr.msk.bf16.vlgmr.msra.gmra.mrb[12].mxu1 %vm700_vm1, %v810_v1 }
 0x322   : > { %1895 = vmatprep.mubr.msk.bf16.mxu1 %vm2067_vm0, %v2066_v4 }
 0x323   : > { %1926 = vmatpush3.bf16.msra.mxu0 %v1990_v13  ;;  %v2029_v13 = vld [vmem:[%s2500_s9 + $0x60] sm:$0xff]  }
 0x324   : > { %1927 = vmatprep.subr.bf16.mxu0 %v2066_v4 }
 0x327   : > { %1928 = vmatpush3.bf16.msra.mxu0 %v1991_v14  ;;  %v2030_v14 = vld [vmem:[%s2500_s9 + $0x20] sm:$0xff]  }
 0x328   : > { %1929 = vmatprep.subr.bf16.mxu0 %v2066_v4 }
 0x3e9   : > { %v966_v15 = vpop.f32.mrb[4].mxu0 }
 0x3ea   : > { %v972_v16 = vmul.f32 0.17677669, %v966_v15  ;;  %v1903_v17 = vpop.f32.mrb[5].mxu0  ;;  %v1993_v15 = vld [vmem:[%s2494_s3 + $0x20] sm:$0xff]  }
 0x3eb   : > { %v969_v18 = vpop.f32.mrb[6].mxu0  ;;  %v1995_v17 = vld [vmem:[%s2494_s3 + $0x30] sm:$0xff]  }
 0x3ec   : > { %v2298_v19 = vpop.f32.mrb[8].mxu1  ;;  %v1904_v20 = vpop.f32.mrb[7].mxu0  ;;  %v973_v21 = vsel %vm748_vm3, %v972_v16, -inf }
 0x3ed   : > { %974 = vmax.xlane.f32.xlu0 %v973_v21  ;;  %v1885_v22 = vpop.f32.mrb[9].mxu1 }
 0x3ee   : > { %v805_v24 = vpop.f32.mrb[10].mxu1 }
 0x3ef   : > { %v1886_v25 = vpop.f32.mrb[11].mxu1  ;;  %v1996_v24 = vld [vmem:[%s2494_s3 + $0x38] sm:$0xff]  }
 0x3f1   : > { %v1077_v26 = vpop.f32.mrb[8].mxu0 }
 0x3f2   : > { %v1915_v27 = vpop.f32.mrb[9].mxu0  ;;  %v1083_v37 = vmul.f32 0.17677669, %v1077_v26 }
 0x3f3   : > { %v1080_v28 = vpop.f32.mrb[10].mxu0 }
 0x3f4   : > { %v854_v31 = vpop.f32.mrb[12].mxu1  ;;  %v1916_v33 = vpop.f32.mrb[11].mxu0  ;;  %v1084_v40 = vsel %vm748_vm3, %v1083_v37, -inf }
 0x3f5   : > { %v860_v34 = vmul.f32 0.17677669, %v854_v31  ;;  %v1891_v35 = vpop.f32.mrb[13].mxu1 }
 0x3f6   : > { %v857_v36 = vpop.f32.mrb[14].mxu1 }
 0x3f7   : > { %v1892_v38 = vpop.f32.mrb[15].mxu1  ;;  %v861_v39 = vsel %vm748_vm3, %v860_v34, -inf }
 0x3f8   : > { %862 = vmax.xlane.f32.xlu1 %v861_v39 }
 0x3fc   : > { %1085 = vmax.xlane.f32.xlu1 %v1084_v40 }
 0x47a   : > { %v975_v41 = vpop.xlane.xlu0 %974 }
 0x47b   : > { %v976_v42 = vsub.f32 %v972_v16, %v975_v41  ;;  %v1994_v16 = vld [vmem:[%s2494_s3 + $0x28] sm:$0xff]  }
 0x47d   : > { %v977_v43 = vmul.f32 1.442695, %v976_v42  ;;  %v1751_v42 = vld [vmem:[%s2495_s4] ss:$0 sm:$0xff] }
 0x47f   : > { %2041 = vpow2.f32 %v977_v43 }
 0x485   : > { %v863_v44 = vpop.xlane.xlu1 %862 }
 0x486   : > { %v864_v45 = vsub.f32 %v860_v34, %v863_v44 }
 0x488   : > { %v865_v51 = vmul.f32 1.442695, %v864_v45 }
 0x489   : > { %v2042_v46 = vpop.eup %2041  ;;  %v1086_v47 = vpop.xlane.xlu1 %1085 }
 0x48a   : > { %v1087_v48 = vsub.f32 %v1083_v37, %v1086_v47  ;;  %v979_v49 = vsel %vm748_vm3, %v2042_v46, 0.0 }
 0x48b   : > { %980 = vadd.xlane.f32.xlu0 %v979_v49  ;;  %v1999_v49 = vld [vmem:[%s2498_s7 + $0x4] ss:$8 sps:$4 sm:$0xff]  }
 0x48c   : > { %v1088_v52 = vmul.f32 1.442695, %v1087_v48 }
 0x48e   : > { %2043 = vpow2.f32 %v1088_v52  ;;  %v2000_v52 = vld [vmem:[%s2498_s7 + $0x10] ss:$8 sps:$4 sm:$0xff]  }
 0x48f   : > { %2045 = vpow2.f32 %v865_v51  ;;  %v2002_v51 = vld [vmem:[%s2498_s7 + $0x14] ss:$8 sps:$4 sm:$0xff]  }
 0x498   : > { %v2044_v53 = vpop.eup %2043 }
 0x499   : > { %v1090_v54 = vsel %vm748_vm3, %v2044_v53, 0.0  ;;  %v2046_v55 = vpop.eup %2045 }
 0x49a   : > { %1091 = vadd.xlane.f32.xlu1 %v1090_v54  ;;  %v867_v56 = vsel %vm748_vm3, %v2046_v55, 0.0 }
 0x49e   : > { %868 = vadd.xlane.f32.xlu1 %v867_v56 }
 0x4a1   : > { %874 = vrot.lane.b32.xlu0 %v2272_v50, %s2068_s21 }
 0x4af   : > { %985 = vrot.lane.b32.xlu1 %v2272_v50, %s2069_s22 }
 0x4b3   : > { %1096 = vrot.lane.b32.xlu1 %v2272_v50, %s2070_s23 }
 0x518   : > { %v981_v57 = vpop.xlane.xlu0 %980 }
 0x51c   : > { %v875_v58 = vpop.permute.xlu0 %874 }
 0x51d   : > { %v880_v59 = vsel %vm764_vm2, %v875_v58, 0  ;;  %v2008_v58 = vld [vmem:[%s2498_s7 + $0x34] ss:$8 sps:$4 sm:$0xff]  }
 0x51e   : > { %1894 = vmatpush3.bf16.msra.mxu1 %v880_v59  ;;  %v2006_v59 = vld [vmem:[%s2498_s7 + $0x30] ss:$8 sps:$4 sm:$0xff]  }
 0x51f   : > { %1905 = vmatprep.subr.bf16.mxu1 %v2066_v4 }
 0x527   : > { %v1092_v60 = vpop.xlane.xlu1 %1091 }
 0x52b   : > { %v869_v61 = vpop.xlane.xlu1 %868 }
 0x52c   : > { %2047 = vrcp.f32 %v869_v61  ;;  %v2009_v61 = vld [vmem:[%s2498_s7 + $0x40] ss:$8 sps:$4 sm:$0xff]  }
 0x52d   : > { %2049 = vrcp.f32 %v981_v57 }
 0x52e   : > { %2051 = vrcp.f32 %v1092_v60  ;;  %v2011_v60 = vld [vmem:[%s2498_s7 + $0x44] ss:$8 sps:$4 sm:$0xff]  }
 0x52f   : > { %v986_v0 = vpop.permute.xlu1 %985 }
 0x530   : > { %v991_v5 = vsel %vm764_vm2, %v986_v0, 0  ;;  %v2017_v0 = vld [vmem:[%s2498_s7 + $0x64] ss:$8 sps:$4 sm:$0xff]  }
 0x533   : > { %v1097_v6 = vpop.permute.xlu1 %1096 }
 0x534   : > { %v1102_v9 = vsel %vm764_vm2, %v1097_v6, 0  ;;  %v2022_v6 = vld [vmem:[%s2500_s9] sm:$0xff]  }
 0x536   : > { %v2048_v62 = vpop.eup %2047 }
 0x537   : > { %v871_v63 = vmul.f32 %v2048_v62, %v2046_v55  ;;  %v2050_v3 = vpop.eup %2049  ;;  %v2014_v62 = vld [vmem:[%s2498_s7 + $0x54] ss:$8 sps:$4 sm:$0xff]  }
 0x538   : > { %v983_v50 = vmul.f32 %v2050_v3, %v2042_v46  ;;  %v2052_v8 = vpop.eup %2051  ;;  %v2020_v3 = vld [vmem:[%s2498_s7 + $0x74] ss:$8 sps:$4 sm:$0xff]  }
 0x539   : > { %v872_v1 = vpack.c.bf16 %v871_v63, %v871_v63  ;;  %v1094_v10 = vmul.f32 %v2052_v8, %v2044_v53  ;;  %v2003_v53 = vld [vmem:[%s2498_s7 + $0x20] ss:$8 sps:$4 sm:$0xff]   ;;  %v2012_v63 = vld [vmem:[%s2498_s7 + $0x50] ss:$8 sps:$4 sm:$0xff]  }
 0x53a   : > { %v984_v7 = vpack.c.bf16 %v983_v50, %v983_v50  ;;  %v2021_v50 = vld [vmem:[%s2500_s9 + $0x40] sm:$0xff]   ;;  %v2024_v8 = vld [vmem:[%s2500_s9 + $0x8] sm:$0xff]  }
 0x53b   : > { %1896 = vmatmul.mubr.msk.bf16.vlgmr.msra.gmra.mrb[16].mxu1 %vm748_vm3, %v872_v1  ;;  %v1095_v11 = vpack.c.bf16 %v1094_v10, %v1094_v10  ;;  %v2015_v1 = vld [vmem:[%s2498_s7 + $0x60] ss:$8 sps:$4 sm:$0xff]   ;;  %v2026_v10 = vld [vmem:[%s2500_s9 + $0x10] sm:$0xff]  }
 0x53c   : > { %1906 = vmatpush3.bf16.msra.mxu1 %v991_v5  ;;  %1907 = vmatprep.mubr.msk.bf16.mxu1 %vm2067_vm0, %v2066_v4  ;;  %v2018_v5 = vld [vmem:[%s2498_s7 + $0x70] ss:$8 sps:$4 sm:$0xff]  }
 0x53d   : > { %1917 = vmatprep.subr.bf16.mxu1 %v2066_v4 }
 0x543   : > { %1908 = vmatmul.mubr.msk.bf16.vlgmr.msra.gmra.mrb[20].mxu1 %vm748_vm3, %v984_v7  ;;  %v2023_v7 = vld [vmem:[%s2500_s9 + $0x48] sm:$0xff]  }
 0x544   : > { %1918 = vmatpush3.bf16.msra.mxu1 %v1102_v9  ;;  %1919 = vmatprep.mubr.msk.bf16.mxu1 %vm2067_vm0, %v2066_v4  ;;  %v2025_v9 = vld [vmem:[%s2500_s9 + $0x50] sm:$0xff]  }
 0x545   : > { %1410 = vmatprep.subr.bf16.mxu1 %v1999_v49 }
 0x54b   : > { %1920 = vmatmul.mubr.msk.bf16.vlgmr.msra.gmra.mrb[24].mxu1 %vm748_vm3, %v1095_v11  ;;  %v2027_v11 = vld [vmem:[%s2500_s9 + $0x58] sm:$0xff]  }
 0x54c   : > { %1442 = vmatprep.mubr.bf16.mxu1 %v2065_v2  ;;  %v1992_v2 = vld [vmem:[%s2494_s3 + $0x18] sm:$0xff]  }
 0x54d   : > { %1930 = vmatpush3.bf16.msra.mxu0 %v1992_v2  ;;  %v2031_v2 = vld [vmem:[%s2500_s9 + $0x68] sm:$0xff]  }
 0x54e   : > { %1931 = vmatprep.subr.bf16.mxu0 %v2066_v4 }
 0x551   : > { %1932 = vmatpush3.bf16.msra.mxu0 %v1993_v15  ;;  %v2032_v15 = vld [vmem:[%s2500_s9 + $0x28] sm:$0xff]  }
 0x552   : > { %1933 = vmatprep.subr.bf16.mxu0 %v2066_v4 }
 0x555   : > { %1934 = vmatpush3.bf16.msra.mxu0 %v1994_v16 }
 0x556   : > { %1935 = vmatprep.subr.bf16.mxu0 %v2066_v4 }
 0x559   : > { %1936 = vmatpush3.bf16.msra.mxu0 %v1995_v17 }
 0x55a   : > { %1937 = vmatprep.subr.bf16.mxu0 %v2066_v4 }
 0x55d   : > { %1938 = vmatpush3.bf16.msra.mxu0 %v1996_v24  ;;  %v1761_v24 = vld [vmem:[%s2497_s6] ss:$0 sm:$0xff] }
 0x55e   : > { %1833 = vmatprep.subr.bf16.mxu0 %v2021_v50 }
 0x60e   : > { %v916_v18 = vpop.f32.mrb[16].mxu1 }
 0x60f   : > { %1145 = vrot.lane.b32.xlu0 %v916_v18, %s2070_s23  ;;  %v1897_v20 = vpop.f32.mrb[17].mxu1 }
 0x610   : > { %v919_v21 = vpop.f32.mrb[18].mxu1 }
 0x611   : > { %v1898_v22 = vpop.f32.mrb[19].mxu1  ;;  %v1760_v21 = vld [vmem:[%s2496_s5] ss:$0 sm:$0xff] }
 0x616   : > { %v1027_v25 = vpop.f32.mrb[20].mxu1 }
 0x617   : > { %1149 = vrot.lane.b32.xlu1 %v1027_v25, %s2069_s22  ;;  %v1909_v26 = vpop.f32.mrb[21].mxu1 }
 0x618   : > { %v1030_v27 = vpop.f32.mrb[22].mxu1 }
 0x619   : > { %v1910_v28 = vpop.f32.mrb[23].mxu1 }
 0x61a   : > { %v2033_v28 = vld [vmem:[%s2500_s9 + $0x70] sm:$0xff]  }
 0x61e   : > { %v1138_v31 = vpop.f32.mrb[24].mxu1 }
 0x61f   : > { %1153 = vrot.lane.b32.xlu0 %v1138_v31, %s2068_s21  ;;  %v1921_v33 = vpop.f32.mrb[25].mxu1  ;;  %v2034_v31 = vld [vmem:[%s2500_s9 + $0x30] sm:$0xff]  }
 0x620   : > { %v1141_v34 = vpop.f32.mrb[26].mxu1  ;;  %v2035_v33 = vld [vmem:[%s2500_s9 + $0x78] sm:$0xff]  }
 0x621   : > { %v1922_v35 = vpop.f32.mrb[27].mxu1  ;;  %v2036_v34 = vld [vmem:[%s2500_s9 + $0x38] sm:$0xff]  }
 0x622   : > { %v1318_v35 = vld [vmem:[%s2499_s8] sm:$0x3] }
 0x681   : > { %v1146_v36 = vpop.permute.xlu0 %1145 }
 0x682   : > { %v1156_v37 = vsel %vm700_vm1, %v2298_v19, %v1146_v36  ;;  %v1997_v19 = vld [vmem:[%s2498_s7] ss:$8 sps:$4 sm:$0xff]   ;;  %v1323_v36 = vrot.slane %v1318_v35, %v475_v32 }
 0x683   : > { %1411 = vmatpush1.bf16.msra.mxu1 %v1997_v19  ;;  %v1778_v32 = vld [vmem:[%s2501_s10] ss:$0 sm:$0xff] }
 0x684   : > { %1412 = vmatprep.subr.bf16.mxu1 %v2002_v51 }
 0x687   : > { %1413 = vmatpush1.bf16.msra.mxu1 %v2000_v52 }
 0x689   : > { %v1150_v4 = vpop.permute.xlu1 %1149 }
 0x68a   : > { %v1158_v38 = vsel %vm1157_vm4, %v1156_v37, %v1150_v4  ;;  %v1327_v4 = vrot.slane %v1318_v35, %v479_v30 }
 0x691   : > { %v1154_v39 = vpop.permute.xlu0 %1153 }
 0x692   : > { %v1160_v40 = vsel %vm1159_vm5, %v1158_v38, %v1154_v39 }
 0x693   : > { %v1161_v41 = vpack.c.bf16 %v1160_v40, %v1160_v40 }
 0x695   : > { %1940 = vmatmul.mubr.bf16.vlgmr.msra.gmra.mrb[12].mxu0 %v1161_v41 }
 0x696   : > { %1834 = vmatpush3.bf16.msra.mxu0 %v2022_v6 }
 0x697   : > { %1835 = vmatprep.subr.bf16.mxu0 %v2023_v7 }
 0x69a   : > { %1836 = vmatpush3.bf16.msra.mxu0 %v2024_v8 }
 0x69b   : > { %1837 = vmatprep.subr.bf16.mxu0 %v2025_v9 }
 0x69e   : > { %1838 = vmatpush3.bf16.msra.mxu0 %v2026_v10 }
 0x69f   : > { %1839 = vmatprep.subr.bf16.mxu0 %v2027_v11 }
 0x6a2   : > { %1840 = vmatpush3.bf16.msra.mxu0 %v2028_v12 }
 0x6a3   : > { %1841 = vmatprep.subr.bf16.mxu0 %v2029_v13 }
 0x6a6   : > { %1842 = vmatpush3.bf16.msra.mxu0 %v2030_v14 }
 0x6a7   : > { %1843 = vmatprep.subr.bf16.mxu0 %v2031_v2 }
 0x6aa   : > { %1844 = vmatpush3.bf16.msra.mxu0 %v2032_v15 }
 0x6ab   : > { %1845 = vmatprep.subr.bf16.mxu0 %v2033_v28 }
 0x6ae   : > { %1846 = vmatpush3.bf16.msra.mxu0 %v2034_v31 }
 0x6af   : > { %1847 = vmatprep.subr.bf16.mxu0 %v2035_v33 }
 0x6b2   : > { %1848 = vmatpush3.bf16.msra.mxu0 %v2036_v34 }
 0x768   : > { %v1267_v43 = vpop.f32.mrb[12].mxu0 }
 0x769   : > { %v1268_v44 = vadd.f32 %v1751_v42, %v1267_v43  ;;  %v1941_v45 = vpop.f32.mrb[13].mxu0 }
 0x76a   : > { %v1270_v46 = vpop.f32.mrb[14].mxu0 }
 0x76b   : > { %v1942_v47 = vpop.f32.mrb[15].mxu0  ;;  %v1273_v48 = vadd.f32 %v1268_v44, %v2225_v23  ;;  %v2005_v23 = vld [vmem:[%s2498_s7 + $0x24] ss:$8 sps:$4 sm:$0xff]  }
 0x76c   : > { %1414 = vmatprep.subr.bf16.mxu1 %v2005_v23 }
 0x76d   : > { %1276 = vadd.xlane.f32.xlu1 %v1273_v48  ;;  %1415 = vmatpush1.bf16.msra.mxu1 %v2003_v53 }
 0x76e   : > { %1416 = vmatprep.subr.bf16.mxu1 %v2008_v58 }
 0x771   : > { %1417 = vmatpush1.bf16.msra.mxu1 %v2006_v59  ;;  %v1795_v59 = vld [vmem:[%s2502_s11] ss:$0 sm:$0xff] }
 0x772   : > { %1418 = vmatprep.subr.bf16.mxu1 %v2011_v60 }
 0x775   : > { %1419 = vmatpush1.bf16.msra.mxu1 %v2009_v61  ;;  %v1796_v61 = vld [vmem:[%s2503_s12] ss:$0 sm:$0xff] }
 0x776   : > { %1420 = vmatprep.subr.bf16.mxu1 %v2014_v62 }
 0x779   : > { %1421 = vmatpush1.bf16.msra.mxu1 %v2012_v63 }
 0x77a   : > { %1422 = vmatprep.subr.bf16.mxu1 %v2017_v0 }
 0x77d   : > { %1423 = vmatpush1.bf16.msra.mxu1 %v2015_v1 }
 0x77e   : > { %1424 = vmatprep.subr.bf16.mxu1 %v2020_v3 }
 0x781   : > { %1425 = vmatpush1.bf16.msra.mxu1 %v2018_v5 }
 0x7fa   : > { %v1277_v54 = vpop.xlane.xlu1 %1276 }
 0x7fb   : > { %v1278_v55 = vmul.f32 0.0078125, %v1277_v54 }
 0x7fd   : > { %v1279_v56 = vsub.f32 %v1273_v48, %v1278_v55 }
 0x7ff   : > { %v1280_v57 = vmul.f32 %v1279_v56, %v1279_v56 }
 0x801   : > { %1281 = vadd.xlane.f32.xlu0 %v1280_v57 }
 0x88e   : > { %v1282_v16 = vpop.xlane.xlu0 %1281 }
 0x88f   : > { %v1283_v17 = vmul.f32 0.0078125, %v1282_v16 }
 0x891   : > { %v1284_v18 = vadd.f32 1e-05, %v1283_v17 }
 0x893   : > { %2053 = vrsqrt.f32 %v1284_v18 }
 0x89d   : > { %v2054_v20 = vpop.eup %2053 }
 0x89e   : > { %v1286_v22 = vmul.f32 %v2054_v20, %v1279_v56 }
 0x8a0   : > { %v1293_v25 = vmul.f32 %v1760_v21, %v1286_v22 }
 0x8a2   : > { %v1300_v26 = vadd.f32 %v1761_v24, %v1293_v25 }
 0x8a4   : > { %v1301_v27 = vpack.c.bf16 %v1300_v26, %v1300_v26 }
 0x8a6   : > { %1443 = vmatmul.mubr.bf16.vlgmr.msra.gmra.mrb[28].mxu1 %v1301_v27 }
 0x979   : > { %v1444_v37 = vpop.f32.mrb[28].mxu1 }
 0x97a   : > { %v1445_v38 = vadd.f32 %v1444_v37, %v1323_v36  ;;  %v1446_v39 = vpop.f32.mrb[29].mxu1 }
 0x97b   : > { %v1447_v40 = vadd.f32 %v1446_v39, %v1327_v4  ;;  %v1448_v41 = vpop.f32.mrb[30].mxu1 }
 0x97c   : > { %v1451_v42 = vmax.f32 %v1445_v38, 0.0  ;;  %v1449_v43 = vpop.f32.mrb[31].mxu1 }
 0x97d   : > { %v1452_v44 = vmax.f32 %v1447_v40, 0.0 }
 0x97e   : > { %v1453_v46 = vpack.c.bf16 %v1451_v42, %v1451_v42 }
 0x97f   : > { %v1454_v45 = vpack.c.bf16 %v1452_v44, %v1452_v44 }
 0x981   : > { %1622 = vmatprep.mubr.bf16.mxu0 %v1454_v45 }
 0x982   : > { %1623 = vmatmul.mubr.bf16.vlgmr.msra.gmra.mrb[16].mxu0 %v1453_v46 }
 0xa55   : > { %v1849_v47 = vpop.f32.mrb[16].mxu0 }
 0xa56   : > { %v1850_v48 = vpop.f32.mrb[17].mxu0 }
 0xa57   : > { %v1851_v29 = vadd.f32 %v1850_v48, %v1849_v47  ;;  %v1852_v30 = vpop.f32.mrb[18].mxu0 }
 0xa58   : > { %v1853_v19 = vpop.f32.mrb[19].mxu0 }
 0xa59   : > { %v1625_v49 = vadd.f32 %v1851_v29, %v1778_v32 }
 0xa5b   : > { %v1630_v51 = vadd.f32 %v1625_v49, %v1300_v26 }
 0xa5d   : > { %1633 = vadd.xlane.f32.xlu0 %v1630_v51 }
 0xaea   : > { %v1634_v52 = vpop.xlane.xlu0 %1633 }
 0xaeb   : > { %v1635_v23 = vmul.f32 0.0078125, %v1634_v52 }
 0xaed   : > { %v1636_v53 = vsub.f32 %v1630_v51, %v1635_v23 }
 0xaef   : > { %v1637_v54 = vmul.f32 %v1636_v53, %v1636_v53 }
 0xaf1   : > { %1638 = vadd.xlane.f32.xlu1 %v1637_v54 }
 0xb7e   : > { %v1639_v55 = vpop.xlane.xlu1 %1638 }
 0xb7f   : > { %v1640_v56 = vmul.f32 0.0078125, %v1639_v55 }
 0xb81   : > { %v1641_v57 = vadd.f32 1e-05, %v1640_v56 }
 0xb83   : > { %2055 = vrsqrt.f32 %v1641_v57 }
 0xb8d   : > { %v2056_v58 = vpop.eup %2055 }
 0xb8e   : > { %v1643_v60 = vmul.f32 %v2056_v58, %v1636_v53 }
 0xb90   : > { %v1650_v62 = vmul.f32 %v1795_v59, %v1643_v60 }
 0xb92   : > { %v1657_v63 = vadd.f32 %v1796_v61, %v1650_v62 }
 0xb94   : > { %1658 = vst [vmem:[%s435_s27] sm:$0xff] %v1657_v63 }
 0xb95 PF: > { %s23_s25 = sadd.s32 1, %s2063_s25  }
 0xb96   : > { %p20_p4 = scmp.ge.s32.totalorder %s23_s25, 4  }
 0xb98   :  { %22 = sbr.rel (!%p20_p4) target bundleno = 1 (0x1), region = 102 }

// kernel: _lambda_.8
= control target key start
LH: loop header
LB: loop body
LE: loop exit
PB: predicated region body
PF: predicated region fallthrough
CT: control target
= control target key end

     0   :  { %s4181_s0 = inlined_call_operand.vmem [shape: f32[2,8,128], index: 0, kind: input, shape index: {}]   ;;  %s4182_s1 = inlined_call_operand.vmem [shape: f32[2,8,128], index: 1, kind: input, shape index: {}]   ;;  %s4183_s2 = inlined_call_operand.vmem [shape: f32[2,8,8], index: 2, kind: input, shape index: {}]   ;;  %s4184_s3 = inlined_call_operand.vmem [shape: bf16[128,384], index: 3, kind: input, shape index: {}]   ;;  %s4185_s4 = inlined_call_operand.vmem [shape: f32[1,384], index: 4, kind: input, shape index: {}]   ;;  %s4186_s5 = inlined_call_operand.vmem [shape: bf16[128,128], index: 5, kind: input, shape index: {}]   ;;  %s4187_s6 = inlined_call_operand.vmem [shape: f32[1,128], index: 6, kind: input, shape index: {}]   ;;  %s4188_s7 = inlined_call_operand.vmem [shape: f32[1,128], index: 7, kind: input, shape index: {}]   ;;  %s4189_s8 = inlined_call_operand.vmem [shape: f32[1,128], index: 8, kind: input, shape index: {}]   ;;  %s4190_s9 = inlined_call_operand.vmem [shape: bf16[128,128], index: 9, kind: input, shape index: {}]   ;;  %s4191_s10 = inlined_call_operand.vmem [shape: f32[1,128], index: 10, kind: input, shape index: {}]   ;;  %s4192_s11 = inlined_call_operand.vmem [shape: bf16[128,256], index: 11, kind: input, shape index: {}]   ;;  %s4193_s12 = inlined_call_operand.vmem [shape: f32[1,256], index: 12, kind: input, shape index: {}]   ;;  %s4194_s13 = inlined_call_operand.vmem [shape: bf16[128,128], index: 13, kind: input, shape index: {}]   ;;  %s4195_s14 = inlined_call_operand.vmem [shape: f32[1,128], index: 14, kind: input, shape index: {}]   ;;  %s4196_s15 = inlined_call_operand.vmem [shape: f32[1,128], index: 15, kind: input, shape index: {}]   ;;  %s4197_s16 = inlined_call_operand.vmem [shape: f32[1,128], index: 16, kind: input, shape index: {}]   ;;  %s4198_s17 = inlined_call_operand.vmem [shape: bf16[128,256], index: 17, kind: input, shape index: {}]   ;;  %s4199_s18 = inlined_call_operand.vmem [shape: f32[1,256], index: 18, kind: input, shape index: {}]   ;;  %s4200_s19 = inlined_call_operand.vmem [shape: bf16[256,128], index: 19, kind: input, shape index: {}]   ;;  %s4201_s20 = inlined_call_operand.vmem [shape: f32[1,128], index: 20, kind: input, shape index: {}]   ;;  %s4202_s21 = inlined_call_operand.vmem [shape: f32[1,128], index: 21, kind: input, shape index: {}]   ;;  %s4203_s22 = inlined_call_operand.vmem [shape: f32[1,128], index: 22, kind: input, shape index: {}]   ;;  %s4204_s23 = inlined_call_operand.vmem [shape: f32[2,8,128], index: 23, kind: output, shape index: {}]  }
   0x1   :  { %4211 = sst [smem:[#allocation2_spill]] %s4181_s0 }
   0x2   :  { %4212 = sst [smem:[#allocation3_spill]] %s4182_s1 }
   0x3   :  { %4213 = sst [smem:[#allocation4_spill]] %s4183_s2 }
   0x4   :  { %4214 = sst [smem:[#allocation5_spill]] %s4184_s3 }
   0x5   :  { %4215 = sst [smem:[#allocation6_spill]] %s4185_s4  ;;  %s3612_s4 = smov 0  }
   0x6   :  { %4216 = sst [smem:[#allocation7_spill]] %s4186_s5 }
   0x7   :  { %4217 = sst [smem:[#allocation8_spill]] %s4187_s6 }
   0x8   :  { %4218 = sst [smem:[#allocation9_spill]] %s4188_s7 }
   0x9 LB: > { %s2907_s30 = sadd.s32 4294967295, %s3484_s4   ;;  %p2911_p0 = scmp.ge.s32.totalorder %s3484_s4, 1  ;;  %s3484_s4 = sphi %s3612_s4, %s33_s4  }
   0xa   : > { %p654_p1 = scmp.lt.s32.totalorder %s3484_s4, 3 }
   0xc   : > { %p655_p2 = pnand %p2911_p0, %p654_p1 }
   0xd   : > { %s4219_s5 = sld [smem:[#allocation5_spill]] (!%p655_p2)  ;;  %v3486_v2 = vmov (!%p655_p2), 0   ;;  %v3487_v4 = vmov (!%p655_p2), 0.0   ;;  %p724_p3 = scmp.lt.s32.totalorder (!%p655_p2), %s2907_s30, 1  ;;  %vm3488_vm0 = vmmov (!%p655_p2), 0   ;;  %v778_v28 = vlaneseq (!%p655_p2) }
   0xe   : > { %658 = sbr.rel (%p655_p2) target bundleno = 5147 (0x141b), region = 112  ;;  %953 = vmatprep.mubr.bf16.mxu0 (!%p655_p2), %v3486_v2  ;;  %3130 = vmatprep.subr.bf16.mxu1 (!%p655_p2), %v3487_v4  ;;  %s4221_s27 = sld [smem:[#allocation6_spill]] (!%p655_p2)  ;;  %vm1006_vm1 = vcmask (!%p655_p2), 261120   ;;  %vm1071_vm2 = vcmask (!%p655_p2), 1043456   ;;  %vm1055_vm3 = vcmask (!%p655_p2), 64512   ;;  %vm1467_vm4 = vcmask (!%p655_p2), 523264  }
   0xf   : > { %3146 = vmatprep.mubr.msk.bf16.mxu1 (!%p655_p2), %vm3488_vm0, %v3487_v4  ;;  %v779_v29 = vshrl.u32 (!%p655_p2), %v778_v28, 7  ;;  %s3489_s7 = smov (!%p655_p2), 96   ;;  %s4209_s28 = smov (!%p655_p2), 64   ;;  %vm1469_vm5 = vcmask (!%p655_p2), 785408  }
  0x10   : > { %s4207_s29 = smov (!%p655_p2), 32   ;;  %s4222_s25 = sld [smem:[#allocation4_spill]] (!%p655_p2) }
  0x11   : > { %v3719_v30 = vsub.s32 (!%p655_p2), 1, %v779_v29  ;;  %v3724_v32 = vsub.s32 (!%p655_p2), 0, %v779_v29  ;;  %v788_v44 = vsub.s32 (!%p655_p2), 2, %v779_v29  ;;  %s4227_s0 = smov (!%p655_p2), 64   ;;  %s4228_s24 = smov (!%p655_p2), 32  }
  0x13   : > { %v3320_v0 = vld [vmem:[%s4219_s5 + $0x4] ss:$12 sps:$4 sm:$0xff] (!%p655_p2)   ;;  %v3322_v1 = vld [vmem:[%s4219_s5] ss:$12 sps:$4 sm:$0xff] (!%p655_p2)   ;;  %v3323_v3 = vld [vmem:[%s4219_s5 + $0x1c] ss:$12 sps:$4 sm:$0xff] (!%p655_p2)  }
  0x14   : > { %921 = vmatprep.subr.bf16.mxu0 (!%p655_p2), %v3320_v0  ;;  %v3325_v5 = vld [vmem:[%s4219_s5 + $0x18] ss:$12 sps:$4 sm:$0xff] (!%p655_p2)   ;;  %v3326_v6 = vld [vmem:[%s4219_s5 + $0x34] ss:$12 sps:$4 sm:$0xff] (!%p655_p2)   ;;  %v3328_v7 = vld [vmem:[%s4219_s5 + $0x30] ss:$12 sps:$4 sm:$0xff] (!%p655_p2)  }
  0x15   : > { %922 = vmatpush1.bf16.msra.mxu0 %v3322_v1  ;;  %v3329_v8 = vld [vmem:[%s4219_s5 + $0x4c] ss:$12 sps:$4 sm:$0xff]   ;;  %v3331_v9 = vld [vmem:[%s4219_s5 + $0x48] ss:$12 sps:$4 sm:$0xff]   ;;  %s4230_s30 = smov (!%p724_p3, %s2907_s30), 1 }
  0x16   : > { %923 = vmatprep.subr.bf16.mxu0 %v3323_v3  ;;  %v3344_v10 = vld [vmem:[%s4219_s5 + $0x8] ss:$12 sps:$4 sm:$0xff]   ;;  %v3332_v11 = vld [vmem:[%s4219_s5 + $0x64] ss:$12 sps:$4 sm:$0xff]   ;;  %v3345_v12 = vld [vmem:[%s4219_s5 + $0x20] ss:$12 sps:$4 sm:$0xff]  }
  0x17   : > { %3131 = vmatpush3.bf16.msra.mxu1 %v3344_v10  ;;  %s3655_s3 = sshll.u32 %s4230_s30, 3  ;;  %v3334_v13 = vld [vmem:[%s4219_s5 + $0x60] ss:$12 sps:$4 sm:$0xff]   ;;  %v3335_v14 = vld [vmem:[%s4219_s5 + $0x7c] ss:$12 sps:$4 sm:$0xff]   ;;  %s4220_s30 = sld [smem:[#allocation2_spill]] }
  0x18   : > { %3132 = vmatprep.subr.bf16.mxu1 %v3487_v4  ;;  %v3337_v15 = vld [vmem:[%s4219_s5 + $0x78] ss:$12 sps:$4 sm:$0xff]   ;;  %v3338_v17 = vld [vmem:[%s4219_s5 + $0x94] ss:$12 sps:$4 sm:$0xff]   ;;  %v3347_v18 = vld [vmem:[%s4219_s5 + $0x50] ss:$12 sps:$4 sm:$0xff]   ;;  %s735_s1 = scalar_lea.vmem %s4222_s25, %s3655_s3  ;;  %s739_s25 = scalar_lea.vmem %s4204_s23, %s3655_s3 }
  0x19   : > { %924 = vmatpush1.bf16.msra.mxu0 %v3325_v5  ;;  %v3346_v16 = vld [vmem:[%s4219_s5 + $0x38] ss:$12 sps:$4 sm:$0xff]   ;;  %v3340_v19 = vld [vmem:[%s4219_s5 + $0x90] ss:$12 sps:$4 sm:$0xff]   ;;  %v3348_v21 = vld [vmem:[%s4219_s5 + $0x68] ss:$12 sps:$4 sm:$0xff]  }
  0x1a   : > { %925 = vmatprep.subr.bf16.mxu0 %v3326_v6  ;;  %v3341_v20 = vld [vmem:[%s4219_s5 + $0xac] ss:$12 sps:$4 sm:$0xff]   ;;  %v3343_v22 = vld [vmem:[%s4219_s5 + $0xa8] ss:$12 sps:$4 sm:$0xff]   ;;  %v3351_v27 = vld [vmem:[%s4219_s5 + $0xb0] ss:$12 sps:$4 sm:$0xff]  }
  0x1b   : > { %3133 = vmatpush3.bf16.msra.mxu1 %v3345_v12  ;;  %v3349_v24 = vld [vmem:[%s4219_s5 + $0x80] ss:$12 sps:$4 sm:$0xff]   ;;  %v3350_v26 = vld [vmem:[%s4219_s5 + $0x98] ss:$12 sps:$4 sm:$0xff]  }
  0x1c   : > { %3134 = vmatprep.subr.bf16.mxu1 %v3487_v4  ;;  %v776_v31 = vld [vmem:[%s4221_s27] sm:$0x7] }
  0x1d   : > { %926 = vmatpush1.bf16.msra.mxu0 %v3328_v7  ;;  %s727_s6 = scalar_lea.vmem %s4220_s30, %s3655_s3  ;;  %v785_v33 = vrot.slane %v776_v31, %v3719_v30  ;;  %v781_v34 = vrot.slane %v776_v31, %v3724_v32  ;;  %v789_v45 = vrot.slane %v776_v31, %v788_v44  ;;  %v3747_v54 = vld [vmem:[%s735_s1] sm:$0xff]  ;;  %s4223_s30 = sld [smem:[#allocation7_spill]] }
  0x1e   : > { %927 = vmatprep.subr.bf16.mxu0 %v3329_v8  ;;  %v3694_v23 = vld [vmem:[%s727_s6] sm:$0xff]  ;;  %s4224_s6 = sld [smem:[#allocation8_spill]] }
  0x1f   : > { %3135 = vmatpush3.bf16.msra.mxu1 %v3346_v16  ;;  %v743_v25 = vpack.c.bf16 %v3694_v23, %v3694_v23 }
  0x20   : > { %3136 = vmatprep.subr.bf16.mxu1 %v3487_v4 }
  0x21   : > { %928 = vmatpush1.bf16.msra.mxu0 %v3331_v9 }
  0x22   : > { %929 = vmatprep.subr.bf16.mxu0 %v3332_v11 }
  0x23   : > { %3137 = vmatpush3.bf16.msra.mxu1 %v3347_v18 }
  0x24   : > { %3138 = vmatprep.subr.bf16.mxu1 %v3487_v4 }
  0x25   : > { %930 = vmatpush1.bf16.msra.mxu0 %v3334_v13 }
  0x26   : > { %931 = vmatprep.subr.bf16.mxu0 %v3335_v14 }
  0x27   : > { %3139 = vmatpush3.bf16.msra.mxu1 %v3348_v21 }
  0x28   : > { %3140 = vmatprep.subr.bf16.mxu1 %v3487_v4 }
  0x29   : > { %932 = vmatpush1.bf16.msra.mxu0 %v3337_v15 }
  0x2a   : > { %933 = vmatprep.subr.bf16.mxu0 %v3338_v17 }
  0x2b   : > { %3141 = vmatpush3.bf16.msra.mxu1 %v3349_v24 }
  0x2c   : > { %3142 = vmatprep.subr.bf16.mxu1 %v3487_v4 }
  0x2d   : > { %934 = vmatpush1.bf16.msra.mxu0 %v3340_v19 }
  0x2e   : > { %935 = vmatprep.subr.bf16.mxu0 %v3341_v20 }
  0x2f   : > { %3143 = vmatpush3.bf16.msra.mxu1 %v3350_v26 }
  0x30   : > { %3144 = vmatprep.subr.bf16.mxu1 %v3487_v4 }
  0x31   : > { %936 = vmatpush1.bf16.msra.mxu0 %v3343_v22 }
  0x32   : > { %3174 = vmatprep.subr.bf16.mxu0 %v3487_v4 }
  0x33   : > { %3145 = vmatpush3.bf16.msra.mxu1 %v3351_v27 }
  0x34   : > { %954 = vmatmul.mubr.bf16.vlgmr.msra.gmra.mrb[0].mxu0 %v743_v25  ;;  %3150 = vmatprep.subr.bf16.mxu1 %v3487_v4 }
  0x35   : > { %3176 = vmatprep.mubr.msk.bf16.mxu0 %vm3488_vm0, %v3487_v4 }
  0x36   : > { %3147 = vmatmul.mubr.bf16.vlgmr.msra.gmra.mrb[0].mxu1 %v743_v25 }
  0x37   : > { %3152 = vmatprep.mubr.msk.bf16.mxu1 %vm3488_vm0, %v3487_v4 }
 0x107   : > { %v955_v35 = vpop.f32.mrb[0].mxu0 }
 0x108   : > { %v957_v36 = vpop.f32.mrb[1].mxu0  ;;  %v956_v40 = vadd.f32 %v955_v35, %v781_v34 }
 0x109   : > { %v958_v37 = vadd.f32 %v957_v36, %v785_v33  ;;  %v959_v38 = vpop.f32.mrb[2].mxu0  ;;  %v996_v46 = vpop.f32.mrb[0].mxu1 }
 0x10a   : > { %v960_v39 = vpop.f32.mrb[3].mxu0  ;;  %v1003_v43 = vpack.c.bf16 %v956_v40, %v956_v40  ;;  %v997_v47 = vadd.f32 %v996_v46, %v789_v45  ;;  %v3148_v48 = vpop.f32.mrb[1].mxu1 }
 0x10b   : > { %v1004_v41 = vpack.c.bf16 %v958_v37, %v958_v37  ;;  %v999_v49 = vpop.f32.mrb[2].mxu1 }
 0x10c   : > { %v3738_v50 = vpack.c.bf16 %v997_v47, %v997_v47  ;;  %v3149_v51 = vpop.f32.mrb[3].mxu1 }
 0x10d   : > { %1119 = vrot.lane.b32.xlu1 %v1004_v41, %s3489_s7  ;;  %v1011_v42 = vsel %vm1006_vm1, %v1004_v41, 0 }
 0x10e   : > { %3151 = vmatpush3.bf16.xpose.msra.mxu1 %v1011_v42  ;;  %v1073_v52 = vsel %vm1071_vm2, %v3738_v50, 0 }
 0x10f   : > { %3156 = vmatprep.subr.bf16.mxu1 %v3487_v4 }
 0x111   : > { %1116 = vrot.lane.b32.xlu1 %v1003_v43, %s3489_s7 }
 0x115   : > { %1230 = vrot.lane.b32.xlu1 %v1003_v43, %s4209_s28  ;;  %3153 = vmatmul.mubr.msk.bf16.vlgmr.msra.gmra.mrb[4].mxu1 %vm1006_vm1, %v1003_v43 }
 0x116   : > { %3158 = vmatprep.mubr.msk.bf16.mxu1 %vm3488_vm0, %v3487_v4  ;;  %3157 = vmatpush3.bf16.msra.mxu1 %v1073_v52 }
 0x117   : > { %3162 = vmatprep.subr.bf16.mxu1 %v3487_v4 }
 0x119   : > { %1344 = vrot.lane.b32.xlu1 %v1004_v41, %s4207_s29 }
 0x11d   : > { %1342 = vrot.lane.b32.xlu1 %v1003_v43, %s4207_s29 }
 0x17f   : > { %v1120_v3 = vpop.permute.xlu1 %1119 }
 0x180   : > { %v1125_v15 = vsel %vm1006_vm1, %v1120_v3, 0 }
 0x183   : > { %v1117_v5 = vpop.permute.xlu1 %1116 }
 0x187   : > { %v1231_v7 = vpop.permute.xlu1 %1230 }
 0x18b   : > { %v1345_v10 = vpop.permute.xlu1 %1344 }
 0x18c   : > { %v1350_v13 = vsel %vm1006_vm1, %v1345_v10, 0 }
 0x18f   : > { %v1343_v16 = vpop.permute.xlu1 %1342 }
 0x1e8   : > { %v1047_v53 = vpop.f32.mrb[4].mxu1 }
 0x1e9   : > { %v1053_v55 = vmul.f32 0.17677669, %v1047_v53  ;;  %v3154_v56 = vpop.f32.mrb[5].mxu1 }
 0x1ea   : > { %v1050_v57 = vpop.f32.mrb[6].mxu1 }
 0x1eb   : > { %v3155_v58 = vpop.f32.mrb[7].mxu1  ;;  %v1054_v59 = vadd.f32 %v1053_v55, %v3747_v54 }
 0x1ed   : > { %v1056_v60 = vsel %vm1055_vm3, %v1054_v59, -inf }
 0x1ee   : > { %1057 = vmax.xlane.f32.xlu0 %v1056_v60 }
 0x27b   : > { %v1058_v61 = vpop.xlane.xlu0 %1057 }
 0x27c   : > { %v1059_v62 = vsub.f32 %v1054_v59, %v1058_v61 }
 0x27e   : > { %v1060_v63 = vmul.f32 1.442695, %v1059_v62 }
 0x280   : > { %3440 = vpow2.f32 %v1060_v63 }
 0x28a   : > { %v3441_v0 = vpop.eup %3440 }
 0x28b   : > { %v1062_v1 = vsel %vm1055_vm3, %v3441_v0, 0.0 }
 0x28c   : > { %1063 = vadd.xlane.f32.xlu0 %v1062_v1 }
 0x2a2   : > { %1232 = vrot.lane.b32.xlu0 %v1004_v41, %s4209_s28 }
 0x319   : > { %v1064_v6 = vpop.xlane.xlu0 %1063 }
 0x31a   : > { %3442 = vrcp.f32 %v1064_v6 }
 0x31d   : > { %v1233_v8 = vpop.permute.xlu0 %1232 }
 0x31e   : > { %v1238_v9 = vsel %vm1006_vm1, %v1233_v8, 0 }
 0x31f   : > { %3175 = vmatpush3.bf16.xpose.msra.mxu0 %v1238_v9 }
 0x320   : > { %3186 = vmatprep.subr.bf16.mxu0 %v3487_v4 }
 0x324   : > { %v3443_v11 = vpop.eup %3442 }
 0x325   : > { %v1066_v12 = vmul.f32 %v3443_v11, %v3441_v0 }
 0x326   : > { %3177 = vmatmul.mubr.msk.bf16.vlgmr.msra.gmra.mrb[4].mxu0 %vm1006_vm1, %v1231_v7 }
 0x327   : > { %3187 = vmatpush3.bf16.xpose.msra.mxu0 %v1350_v13  ;;  %v1067_v14 = vpack.c.bf16 %v1066_v12, %v1066_v12  ;;  %3188 = vmatprep.mubr.msk.bf16.mxu0 %vm3488_vm0, %v3487_v4 }
 0x328   : > { %3198 = vmatprep.subr.bf16.mxu0 %v3487_v4 }
 0x329   : > { %3159 = vmatmul.mubr.msk.bf16.vlgmr.msra.gmra.mrb[8].mxu1 %vm1055_vm3, %v1067_v14 }
 0x32a   : > { %3163 = vmatpush3.bf16.xpose.msra.mxu1 %v1125_v15  ;;  %3164 = vmatprep.mubr.msk.bf16.mxu1 %vm3488_vm0, %v3487_v4 }
 0x32b   : > { %3168 = vmatprep.subr.bf16.mxu1 %v3487_v4 }
 0x32e   : > { %3189 = vmatmul.mubr.msk.bf16.vlgmr.msra.gmra.mrb[8].mxu0 %vm1006_vm1, %v1343_v16  ;;  %v3352_v16 = vld [vmem:[%s4223_s30] sm:$0xff]  }
 0x32f   : > { %3214 = vmatprep.mubr.msk.bf16.mxu0 %vm3488_vm0, %v3487_v4  ;;  %3199 = vmatpush3.bf16.msra.mxu0 %v3352_v16  ;;  %v3389_v16 = vld [vmem:[%s4190_s9 + $0x28] sm:$0xff]  }
 0x330   : > { %3200 = vmatprep.subr.bf16.mxu0 %v3487_v4 }
 0x331   : > { %3165 = vmatmul.mubr.msk.bf16.vlgmr.msra.gmra.mrb[12].mxu1 %vm1006_vm1, %v1117_v5 }
 0x332   : > { %3170 = vmatprep.mubr.msk.bf16.mxu1 %vm3488_vm0, %v3487_v4 }
 0x3f9   : > { %v1274_v17 = vpop.f32.mrb[4].mxu0 }
 0x3fa   : > { %v1280_v18 = vmul.f32 0.17677669, %v1274_v17  ;;  %v3178_v19 = vpop.f32.mrb[5].mxu0  ;;  %v3353_v17 = vld [vmem:[%s4223_s30 + $0x8] sm:$0xff]  }
 0x3fb   : > { %v1277_v20 = vpop.f32.mrb[6].mxu0  ;;  %3201 = vmatpush3.bf16.msra.mxu0 %v3353_v17  ;;  %v3355_v19 = vld [vmem:[%s4223_s30 + $0x18] sm:$0xff]  }
 0x3fc   : > { %v3771_v21 = vpop.f32.mrb[8].mxu1  ;;  %v3179_v22 = vpop.f32.mrb[7].mxu0  ;;  %v1281_v24 = vadd.f32 %v1280_v18, %v3747_v54  ;;  %v3354_v18 = vld [vmem:[%s4223_s30 + $0x10] sm:$0xff]   ;;  %3202 = vmatprep.subr.bf16.mxu0 %v3487_v4  ;;  %v3356_v20 = vld [vmem:[%s4223_s30 + $0x20] sm:$0xff]  }
 0x3fd   : > { %v3160_v25 = vpop.f32.mrb[9].mxu1  ;;  %v3357_v22 = vld [vmem:[%s4223_s30 + $0x28] sm:$0xff]  }
 0x3fe   : > { %v1112_v26 = vpop.f32.mrb[10].mxu1  ;;  %v1282_v27 = vsel %vm1055_vm3, %v1281_v24, -inf }
 0x3ff   : > { %1283 = vmax.xlane.f32.xlu0 %v1282_v27  ;;  %v3161_v28 = vpop.f32.mrb[11].mxu1  ;;  %3203 = vmatpush3.bf16.msra.mxu0 %v3354_v18  ;;  %v3390_v18 = vld [vmem:[%s4190_s9 + $0x30] sm:$0xff]  }
 0x400   : > { %3204 = vmatprep.subr.bf16.mxu0 %v3487_v4 }
 0x401   : > { %v1386_v29 = vpop.f32.mrb[8].mxu0 }
 0x402   : > { %v3190_v31 = vpop.f32.mrb[9].mxu0  ;;  %v1392_v36 = vmul.f32 0.17677669, %v1386_v29  ;;  %v3359_v29 = vld [vmem:[%s4223_s30 + $0x38] sm:$0xff]  }
 0x403   : > { %v1389_v33 = vpop.f32.mrb[10].mxu0  ;;  %3205 = vmatpush3.bf16.msra.mxu0 %v3355_v19  ;;  %v3391_v19 = vld [vmem:[%s4190_s9 + $0x38] sm:$0xff]  }
 0x404   : > { %v1161_v34 = vpop.f32.mrb[12].mxu1  ;;  %v3191_v35 = vpop.f32.mrb[11].mxu0  ;;  %v1393_v43 = vadd.f32 %v1392_v36, %v3747_v54  ;;  %3206 = vmatprep.subr.bf16.mxu0 %v3487_v4 }
 0x405   : > { %v1167_v37 = vmul.f32 0.17677669, %v1161_v34  ;;  %v3166_v38 = vpop.f32.mrb[13].mxu1 }
 0x406   : > { %v1164_v39 = vpop.f32.mrb[14].mxu1  ;;  %v1394_v44 = vsel %vm1055_vm3, %v1393_v43, -inf }
 0x407   : > { %v3167_v40 = vpop.f32.mrb[15].mxu1  ;;  %v1168_v41 = vadd.f32 %v1167_v37, %v3747_v54  ;;  %3207 = vmatpush3.bf16.msra.mxu0 %v3356_v20 }
 0x408   : > { %3208 = vmatprep.subr.bf16.mxu0 %v3487_v4 }
 0x409   : > { %v1169_v42 = vsel %vm1055_vm3, %v1168_v41, -inf }
 0x40a   : > { %1170 = vmax.xlane.f32.xlu1 %v1169_v42 }
 0x40b   : > { %3209 = vmatpush3.bf16.msra.mxu0 %v3357_v22 }
 0x40c   : > { %3210 = vmatprep.subr.bf16.mxu0 %v3487_v4 }
 0x40e   : > { %1395 = vmax.xlane.f32.xlu1 %v1394_v44 }
 0x48c   : > { %v1284_v45 = vpop.xlane.xlu0 %1283 }
 0x48d   : > { %v1285_v46 = vsub.f32 %v1281_v24, %v1284_v45  ;;  %v3358_v24 = vld [vmem:[%s4223_s30 + $0x30] sm:$0xff]  }
 0x48e   : > { %3211 = vmatpush3.bf16.msra.mxu0 %v3358_v24 }
 0x48f   : > { %v1286_v47 = vmul.f32 1.442695, %v1285_v46  ;;  %3212 = vmatprep.subr.bf16.mxu0 %v3487_v4 }
 0x491   : > { %3444 = vpow2.f32 %v1286_v47  ;;  %v2948_v47 = vld [vmem:[%s4224_s6] ss:$0 sm:$0xff] }
 0x492   : > { %3213 = vmatpush3.bf16.msra.mxu0 %v3359_v29 }
 0x497   : > { %v1171_v48 = vpop.xlane.xlu1 %1170 }
 0x498   : > { %v1172_v49 = vsub.f32 %v1168_v41, %v1171_v48 }
 0x49a   : > { %v1173_v56 = vmul.f32 1.442695, %v1172_v49 }
 0x49b   : > { %v3445_v51 = vpop.eup %3444  ;;  %v1396_v52 = vpop.xlane.xlu1 %1395 }
 0x49c   : > { %v1397_v53 = vsub.f32 %v1393_v43, %v1396_v52  ;;  %v1288_v55 = vsel %vm1055_vm3, %v3445_v51, 0.0 }
 0x49d   : > { %1289 = vadd.xlane.f32.xlu0 %v1288_v55  ;;  %v3360_v55 = vld [vmem:[%s4192_s11] ss:$8 sps:$4 sm:$0xff]  }
 0x49e   : > { %v1398_v57 = vmul.f32 1.442695, %v1397_v53 }
 0x4a0   : > { %3446 = vpow2.f32 %v1398_v57  ;;  %v3365_v57 = vld [vmem:[%s4192_s11 + $0x14] ss:$8 sps:$4 sm:$0xff]  }
 0x4a1   : > { %3448 = vpow2.f32 %v1173_v56  ;;  %v3362_v56 = vld [vmem:[%s4192_s11 + $0x4] ss:$8 sps:$4 sm:$0xff]  }
 0x4a2   : > { %1832 = vmatprep.subr.bf16.mxu0 %v3362_v56 }
 0x4aa   : > { %v3447_v54 = vpop.eup %3446 }
 0x4ab   : > { %v1400_v58 = vsel %vm1055_vm3, %v3447_v54, 0.0  ;;  %v3449_v59 = vpop.eup %3448 }
 0x4ac   : > { %1401 = vadd.xlane.f32.xlu1 %v1400_v58  ;;  %v1175_v60 = vsel %vm1055_vm3, %v3449_v59, 0.0  ;;  %v3368_v58 = vld [vmem:[%s4192_s11 + $0x24] ss:$8 sps:$4 sm:$0xff]  }
 0x4b0   : > { %1176 = vadd.xlane.f32.xlu1 %v1175_v60  ;;  %v3366_v60 = vld [vmem:[%s4192_s11 + $0x20] ss:$8 sps:$4 sm:$0xff]  }
 0x4b3   : > { %1182 = vrot.lane.b32.xlu0 %v3738_v50, %s3489_s7 }
 0x4c1   : > { %1294 = vrot.lane.b32.xlu1 %v3738_v50, %s4209_s28 }
 0x4c5   : > { %1406 = vrot.lane.b32.xlu1 %v3738_v50, %s4207_s29 }
 0x52a   : > { %v1290_v61 = vpop.xlane.xlu0 %1289 }
 0x52e   : > { %v1183_v62 = vpop.permute.xlu0 %1182 }
 0x52f   : > { %v1188_v63 = vsel %vm1071_vm2, %v1183_v62, 0  ;;  %v3370_v62 = vld [vmem:[%s4192_s11 + $0x30] ss:$8 sps:$4 sm:$0xff]  }
 0x530   : > { %3169 = vmatpush3.bf16.msra.mxu1 %v1188_v63  ;;  %v3376_v63 = vld [vmem:[%s4192_s11 + $0x44] ss:$8 sps:$4 sm:$0xff]  }
 0x531   : > { %3180 = vmatprep.subr.bf16.mxu1 %v3487_v4 }
 0x539   : > { %v1402_v0 = vpop.xlane.xlu1 %1401 }
 0x53d   : > { %v1177_v1 = vpop.xlane.xlu1 %1176 }
 0x53e   : > { %3450 = vrcp.f32 %v1177_v1 }
 0x53f   : > { %3452 = vrcp.f32 %v1290_v61  ;;  %v3372_v61 = vld [vmem:[%s4192_s11 + $0x34] ss:$8 sps:$4 sm:$0xff]  }
 0x540   : > { %3454 = vrcp.f32 %v1402_v0  ;;  %v3374_v0 = vld [vmem:[%s4192_s11 + $0x40] ss:$8 sps:$4 sm:$0xff]  }
 0x541   : > { %v1295_v6 = vpop.permute.xlu1 %1294 }
 0x542   : > { %v1300_v9 = vsel %vm1071_vm2, %v1295_v6, 0 }
 0x545   : > { %v1407_v10 = vpop.permute.xlu1 %1406 }
 0x546   : > { %v1412_v13 = vsel %vm1071_vm2, %v1407_v10, 0  ;;  %v3384_v10 = vld [vmem:[%s4192_s11 + $0x64] ss:$8 sps:$4 sm:$0xff]  }
 0x548   : > { %v3451_v3 = vpop.eup %3450 }
 0x549   : > { %v1179_v5 = vmul.f32 %v3451_v3, %v3449_v59  ;;  %v3453_v8 = vpop.eup %3452  ;;  %v3373_v59 = vld [vmem:[%s4190_s9 + $0x8] sm:$0xff]  }
 0x54a   : > { %v1292_v50 = vmul.f32 %v3453_v8, %v3445_v51  ;;  %v3455_v12 = vpop.eup %3454  ;;  %v3380_v8 = vld [vmem:[%s4192_s11 + $0x54] ss:$8 sps:$4 sm:$0xff]  }
 0x54b   : > { %v1180_v7 = vpack.c.bf16 %v1179_v5, %v1179_v5  ;;  %v1404_v14 = vmul.f32 %v3455_v12, %v3447_v54  ;;  %v3369_v54 = vld [vmem:[%s4190_s9] sm:$0xff]  }
 0x54c   : > { %v1293_v11 = vpack.c.bf16 %v1292_v50, %v1292_v50  ;;  %v3381_v50 = vld [vmem:[%s4190_s9 + $0x18] sm:$0xff]   ;;  %v3385_v12 = vld [vmem:[%s4190_s9 + $0x20] sm:$0xff]  }
 0x54d   : > { %3171 = vmatmul.mubr.msk.bf16.vlgmr.msra.gmra.mrb[16].mxu1 %vm1055_vm3, %v1180_v7  ;;  %v1405_v15 = vpack.c.bf16 %v1404_v14, %v1404_v14  ;;  %v3377_v7 = vld [vmem:[%s4190_s9 + $0x10] sm:$0xff]  }
 0x54e   : > { %3181 = vmatpush3.bf16.msra.mxu1 %v1300_v9  ;;  %3182 = vmatprep.mubr.msk.bf16.mxu1 %vm3488_vm0, %v3487_v4  ;;  %v3378_v9 = vld [vmem:[%s4192_s11 + $0x50] ss:$8 sps:$4 sm:$0xff]  }
 0x54f   : > { %3192 = vmatprep.subr.bf16.mxu1 %v3487_v4  ;;  %v3386_v14 = vld [vmem:[%s4192_s11 + $0x70] ss:$8 sps:$4 sm:$0xff]  }
 0x555   : > { %3183 = vmatmul.mubr.msk.bf16.vlgmr.msra.gmra.mrb[20].mxu1 %vm1055_vm3, %v1293_v11  ;;  %v3382_v11 = vld [vmem:[%s4192_s11 + $0x60] ss:$8 sps:$4 sm:$0xff]  }
 0x556   : > { %3193 = vmatpush3.bf16.msra.mxu1 %v1412_v13  ;;  %3194 = vmatprep.mubr.msk.bf16.mxu1 %vm3488_vm0, %v3487_v4  ;;  %v3388_v13 = vld [vmem:[%s4192_s11 + $0x74] ss:$8 sps:$4 sm:$0xff]  }
 0x557   : > { %3218 = vmatprep.subr.bf16.mxu1 %v3487_v4 }
 0x55d   : > { %3195 = vmatmul.mubr.msk.bf16.vlgmr.msra.gmra.mrb[24].mxu1 %vm1055_vm3, %v1405_v15 }
 0x55e   : > { %3234 = vmatprep.mubr.msk.bf16.mxu1 %vm3488_vm0, %v3487_v4  ;;  %3219 = vmatpush3.bf16.msra.mxu1 %v3369_v54 }
 0x55f   : > { %3220 = vmatprep.subr.bf16.mxu1 %v3487_v4 }
 0x562   : > { %3221 = vmatpush3.bf16.msra.mxu1 %v3373_v59 }
 0x563   : > { %3222 = vmatprep.subr.bf16.mxu1 %v3487_v4 }
 0x566   : > { %3223 = vmatpush3.bf16.msra.mxu1 %v3377_v7 }
 0x567   : > { %3224 = vmatprep.subr.bf16.mxu1 %v3487_v4 }
 0x56a   : > { %3225 = vmatpush3.bf16.msra.mxu1 %v3381_v50 }
 0x56b   : > { %3226 = vmatprep.subr.bf16.mxu1 %v3487_v4 }
 0x56e   : > { %3227 = vmatpush3.bf16.msra.mxu1 %v3385_v12 }
 0x56f   : > { %3228 = vmatprep.subr.bf16.mxu1 %v3487_v4 }
 0x572   : > { %3229 = vmatpush3.bf16.msra.mxu1 %v3389_v16 }
 0x573   : > { %3230 = vmatprep.subr.bf16.mxu1 %v3487_v4 }
 0x576   : > { %3231 = vmatpush3.bf16.msra.mxu1 %v3390_v18 }
 0x577   : > { %3232 = vmatprep.subr.bf16.mxu1 %v3487_v4 }
 0x57a   : > { %3233 = vmatpush3.bf16.msra.mxu1 %v3391_v19 }
 0x57b   : > { %3238 = vmatprep.subr.bf16.mxu1 %v3487_v4 }
 0x620   : > { %v1224_v25 = vpop.f32.mrb[16].mxu1 }
 0x621   : > { %1455 = vrot.lane.b32.xlu0 %v1224_v25, %s4207_s29  ;;  %v3172_v26 = vpop.f32.mrb[17].mxu1  ;;  %s4225_s29 = sld [smem:[#allocation3_spill]] }
 0x622   : > { %v1227_v27 = vpop.f32.mrb[18].mxu1 }
 0x623   : > { %v3173_v28 = vpop.f32.mrb[19].mxu1 }
 0x624   : > { %v2958_v28 = vld [vmem:[%s4189_s8] ss:$0 sm:$0xff] }
 0x627   : > { %s731_s1 = scalar_lea.vmem %s4225_s29, %s3655_s3  ;;  %s4226_s29 = sld [smem:[#allocation9_spill]] }
 0x628   : > { %v1336_v31 = vpop.f32.mrb[20].mxu1  ;;  %v742_v15 = vld [vmem:[%s731_s1] sm:$0xff] }
 0x629   : > { %1459 = vrot.lane.b32.xlu1 %v1336_v31, %s4209_s28  ;;  %v3184_v33 = vpop.f32.mrb[21].mxu1  ;;  %v1723_v17 = vpack.c.bf16 %v742_v15, %v742_v15 }
 0x62a   : > { %v1339_v34 = vpop.f32.mrb[22].mxu1 }
 0x62b   : > { %v3185_v35 = vpop.f32.mrb[23].mxu1  ;;  %v1740_v34 = vld [vmem:[%s4193_s12] sm:$0x3] }
 0x62c   : > { %v1745_v35 = vrot.slane %v1740_v34, %v3724_v32 }
 0x62d   : > { %v2957_v26 = vld [vmem:[%s4226_s29] ss:$0 sm:$0xff] }
 0x630   : > { %v1448_v36 = vpop.f32.mrb[24].mxu1 }
 0x631   : > { %1463 = vrot.lane.b32.xlu0 %v1448_v36, %s3489_s7  ;;  %v3196_v37 = vpop.f32.mrb[25].mxu1 }
 0x632   : > { %v1451_v38 = vpop.f32.mrb[26].mxu1 }
 0x633   : > { %v3197_v39 = vpop.f32.mrb[27].mxu1 }
 0x693   : > { %v1456_v40 = vpop.permute.xlu0 %1455 }
 0x694   : > { %v1466_v42 = vsel %vm1006_vm1, %v3771_v21, %v1456_v40 }
 0x69b   : > { %v1460_v41 = vpop.permute.xlu1 %1459 }
 0x69c   : > { %v1468_v43 = vsel %vm1467_vm4, %v1466_v42, %v1460_v41 }
 0x6a3   : > { %v1464_v44 = vpop.permute.xlu0 %1463 }
 0x6a4   : > { %v1470_v45 = vsel %vm1469_vm5, %v1468_v43, %v1464_v44  ;;  %v1749_v43 = vrot.slane %v1740_v34, %v3719_v30 }
 0x6a5   : > { %v1471_v46 = vpack.c.bf16 %v1470_v45, %v1470_v45  ;;  %v2959_v45 = vld [vmem:[%s4191_s10] ss:$0 sm:$0xff] }
 0x6a7   : > { %3215 = vmatmul.mubr.bf16.vlgmr.msra.gmra.mrb[12].mxu0 %v1471_v46 }
 0x6a8   : > { %1864 = vmatprep.mubr.bf16.mxu0 %v3486_v2  ;;  %1833 = vmatpush1.bf16.msra.mxu0 %v3360_v55 }
 0x6a9   : > { %1834 = vmatprep.subr.bf16.mxu0 %v3365_v57 }
 0x77a   : > { %v1577_v48 = vpop.f32.mrb[12].mxu0 }
 0x77b   : > { %v1578_v49 = vadd.f32 %v2948_v47, %v1577_v48  ;;  %v3216_v51 = vpop.f32.mrb[13].mxu0 }
 0x77c   : > { %v1580_v52 = vpop.f32.mrb[14].mxu0 }
 0x77d   : > { %v3217_v53 = vpop.f32.mrb[15].mxu0  ;;  %v1583_v21 = vadd.f32 %v1578_v49, %v3694_v23  ;;  %v3363_v23 = vld [vmem:[%s4192_s11 + $0x10] ss:$8 sps:$4 sm:$0xff]  }
 0x77e   : > { %1835 = vmatpush1.bf16.msra.mxu0 %v3363_v23 }
 0x77f   : > { %1586 = vadd.xlane.f32.xlu1 %v1583_v21  ;;  %1836 = vmatprep.subr.bf16.mxu0 %v3368_v58 }
 0x782   : > { %1837 = vmatpush1.bf16.msra.mxu0 %v3366_v60 }
 0x783   : > { %1838 = vmatprep.subr.bf16.mxu0 %v3372_v61 }
 0x786   : > { %1839 = vmatpush1.bf16.msra.mxu0 %v3370_v62 }
 0x787   : > { %1840 = vmatprep.subr.bf16.mxu0 %v3376_v63 }
 0x78a   : > { %1841 = vmatpush1.bf16.msra.mxu0 %v3374_v0 }
 0x78b   : > { %1842 = vmatprep.subr.bf16.mxu0 %v3380_v8 }
 0x78e   : > { %1843 = vmatpush1.bf16.msra.mxu0 %v3378_v9 }
 0x78f   : > { %1844 = vmatprep.subr.bf16.mxu0 %v3384_v10 }
 0x792   : > { %1845 = vmatpush1.bf16.msra.mxu0 %v3382_v11 }
 0x793   : > { %1846 = vmatprep.subr.bf16.mxu0 %v3388_v13 }
 0x796   : > { %1847 = vmatpush1.bf16.msra.mxu0 %v3386_v14 }
 0x797   : > { %3262 = vmatprep.subr.bf16.mxu0 %v3487_v4 }
 0x799   : > { %1865 = vmatmul.mubr.bf16.vlgmr.msra.gmra.mrb[16].mxu0 %v1723_v17 }
 0x79a   : > { %3264 = vmatprep.mubr.msk.bf16.mxu0 %vm3488_vm0, %v3487_v4 }
 0x80c   : > { %v1587_v1 = vpop.xlane.xlu1 %1586 }
 0x80d   : > { %v1588_v3 = vmul.f32 0.0078125, %v1587_v1 }
 0x80f   : > { %v1589_v5 = vsub.f32 %v1583_v21, %v1588_v3 }
 0x811   : > { %v1590_v6 = vmul.f32 %v1589_v5, %v1589_v5 }
 0x813   : > { %1591 = vadd.xlane.f32.xlu0 %v1590_v6 }
 0x86c   : > { %v1866_v36 = vpop.f32.mrb[16].mxu0 }
 0x86d   : > { %v1867_v37 = vadd.f32 %v1866_v36, %v1745_v35  ;;  %v1868_v38 = vpop.f32.mrb[17].mxu0 }
 0x86e   : > { %v1870_v39 = vpop.f32.mrb[18].mxu0  ;;  %v1869_v44 = vadd.f32 %v1868_v38, %v1749_v43 }
 0x86f   : > { %v1874_v40 = vpack.c.bf16 %v1867_v37, %v1867_v37  ;;  %v1871_v41 = vpop.f32.mrb[19].mxu0 }
 0x870   : > { %v3955_v47 = vpack.c.bf16 %v1869_v44, %v1869_v44 }
 0x871   : > { %v1880_v42 = vsel %vm1006_vm1, %v1874_v40, 0 }
 0x872   : > { %v1939_v21 = vsel %vm1071_vm2, %v3955_v47, 0 }
 0x8a0   : > { %v1592_v20 = vpop.xlane.xlu0 %1591 }
 0x8a1   : > { %v1593_v22 = vmul.f32 0.0078125, %v1592_v20 }
 0x8a3   : > { %v1594_v24 = vadd.f32 1e-05, %v1593_v22 }
 0x8a5   : > { %3456 = vrsqrt.f32 %v1594_v24 }
 0x8af   : > { %v3457_v25 = vpop.eup %3456 }
 0x8b0   : > { %v1596_v27 = vmul.f32 %v3457_v25, %v1589_v5 }
 0x8b2   : > { %v1603_v29 = vmul.f32 %v2957_v26, %v1596_v27 }
 0x8b4   : > { %v3939_v31 = vadd.f32 %v2958_v28, %v1603_v29 }
 0x8b6   : > { %v1611_v33 = vpack.c.bf16 %v3939_v31, %v3939_v31 }
 0x8b8   : > { %3235 = vmatmul.mubr.bf16.vlgmr.msra.gmra.mrb[28].mxu1 %v1611_v33 }
 0x8b9   : > { %3240 = vmatprep.mubr.msk.bf16.mxu1 %vm3488_vm0, %v3487_v4  ;;  %3239 = vmatpush3.bf16.xpose.msra.mxu1 %v1880_v42 }
 0x8ba   : > { %3244 = vmatprep.subr.bf16.mxu1 %v3487_v4 }
 0x98b   : > { %v1717_v46 = vpop.f32.mrb[28].mxu1 }
 0x98c   : > { %v1718_v48 = vadd.f32 %v2959_v45, %v1717_v46  ;;  %v3236_v49 = vpop.f32.mrb[29].mxu1 }
 0x98d   : > { %v1720_v51 = vpop.f32.mrb[30].mxu1 }
 0x98e   : > { %v1873_v52 = vpack.c.bf16 %v1718_v48, %v1718_v48  ;;  %v3237_v53 = vpop.f32.mrb[31].mxu1 }
 0x990   : > { %3241 = vmatmul.mubr.msk.bf16.vlgmr.msra.gmra.mrb[32].mxu1 %vm1006_vm1, %v1873_v52 }
 0x991   : > { %3245 = vmatpush3.bf16.msra.mxu1 %v1939_v21  ;;  %3246 = vmatprep.mubr.msk.bf16.mxu1 %vm3488_vm0, %v3487_v4 }
 0x992   : > { %3250 = vmatprep.subr.bf16.mxu1 %v3487_v4 }
 0xa63   : > { %v1916_v55 = vpop.f32.mrb[32].mxu1 }
 0xa64   : > { %v1922_v56 = vmul.f32 0.17677669, %v1916_v55  ;;  %v3242_v57 = vpop.f32.mrb[33].mxu1 }
 0xa65   : > { %v1919_v54 = vpop.f32.mrb[34].mxu1 }
 0xa66   : > { %v3243_v23 = vpop.f32.mrb[35].mxu1  ;;  %v1923_v58 = vsel %vm1055_vm3, %v1922_v56, -inf }
 0xa67   : > { %1924 = vmax.xlane.f32.xlu0 %v1923_v58 }
 0xa7d   : > { %1985 = vrot.lane.b32.xlu0 %v1874_v40, %s3489_s7 }
 0xa81   : > { %2095 = vrot.lane.b32.xlu0 %v1873_v52, %s4227_s0 }
 0xa85   : > { %2206 = vrot.lane.b32.xlu0 %v1873_v52, %s4228_s24 }
 0xaf4   : > { %v1925_v59 = vpop.xlane.xlu0 %1924 }
 0xaf5   : > { %v1926_v60 = vsub.f32 %v1922_v56, %v1925_v59 }
 0xaf7   : > { %v1927_v61 = vmul.f32 1.442695, %v1926_v60 }
 0xaf8   : > { %v1986_v6 = vpop.permute.xlu0 %1985 }
 0xaf9   : > { %3458 = vpow2.f32 %v1927_v61  ;;  %v1991_v10 = vsel %vm1006_vm1, %v1986_v6, 0 }
 0xafc   : > { %v2096_v11 = vpop.permute.xlu0 %2095 }
 0xb00   : > { %v2207_v13 = vpop.permute.xlu0 %2206 }
 0xb03   : > { %v3459_v62 = vpop.eup %3458 }
 0xb04   : > { %v1929_v63 = vsel %vm1055_vm3, %v3459_v62, 0.0 }
 0xb05   : > { %1930 = vadd.xlane.f32.xlu1 %v1929_v63 }
 0xb16   : > { %1982 = vrot.lane.b32.xlu1 %v1873_v52, %s3489_s7 }
 0xb1a   : > { %2097 = vrot.lane.b32.xlu1 %v1874_v40, %s4227_s0 }
 0xb1e   : > { %2208 = vrot.lane.b32.xlu1 %v1874_v40, %s4228_s24 }
 0xb92   : > { %v1931_v0 = vpop.xlane.xlu1 %1930 }
 0xb93   : > { %3460 = vrcp.f32 %v1931_v0 }
 0xb96   : > { %v1983_v1 = vpop.permute.xlu1 %1982 }
 0xb9a   : > { %v2098_v3 = vpop.permute.xlu1 %2097 }
 0xb9b   : > { %v2103_v5 = vsel %vm1006_vm1, %v2098_v3, 0 }
 0xb9c   : > { %3263 = vmatpush3.bf16.xpose.msra.mxu0 %v2103_v5 }
 0xb9d   : > { %v3461_v7 = vpop.eup %3460  ;;  %3274 = vmatprep.subr.bf16.mxu0 %v3487_v4 }
 0xb9e   : > { %v1933_v8 = vmul.f32 %v3461_v7, %v3459_v62  ;;  %v2209_v9 = vpop.permute.xlu1 %2208 }
 0xb9f   : > { %v2214_v12 = vsel %vm1006_vm1, %v2209_v9, 0 }
 0xba0   : > { %v1934_v50 = vpack.c.bf16 %v1933_v8, %v1933_v8 }
 0xba2   : > { %3247 = vmatmul.mubr.msk.bf16.vlgmr.msra.gmra.mrb[36].mxu1 %vm1055_vm3, %v1934_v50 }
 0xba3   : > { %3251 = vmatpush3.bf16.xpose.msra.mxu1 %v1991_v10  ;;  %3265 = vmatmul.mubr.msk.bf16.vlgmr.msra.gmra.mrb[20].mxu0 %vm1006_vm1, %v2096_v11  ;;  %v3392_v10 = vld [vmem:[%s4194_s13] sm:$0xff]   ;;  %v3393_v11 = vld [vmem:[%s4194_s13 + $0x8] sm:$0xff]  }
 0xba4   : > { %3275 = vmatpush3.bf16.xpose.msra.mxu0 %v2214_v12  ;;  %3252 = vmatprep.mubr.msk.bf16.mxu1 %vm3488_vm0, %v3487_v4  ;;  %v3394_v12 = vld [vmem:[%s4194_s13 + $0x10] sm:$0xff]  }
 0xba5   : > { %3276 = vmatprep.mubr.msk.bf16.mxu0 %vm3488_vm0, %v3487_v4  ;;  %3256 = vmatprep.subr.bf16.mxu1 %v3487_v4 }
 0xba6   : > { %3286 = vmatprep.subr.bf16.mxu0 %v3487_v4 }
 0xbaa   : > { %3253 = vmatmul.mubr.msk.bf16.vlgmr.msra.gmra.mrb[40].mxu1 %vm1006_vm1, %v1983_v1 }
 0xbab   : > { %3277 = vmatmul.mubr.msk.bf16.vlgmr.msra.gmra.mrb[24].mxu0 %vm1006_vm1, %v2207_v13  ;;  %3258 = vmatprep.mubr.msk.bf16.mxu1 %vm3488_vm0, %v3487_v4  ;;  %v3396_v13 = vld [vmem:[%s4194_s13 + $0x20] sm:$0xff]  }
 0xbac   : > { %3302 = vmatprep.mubr.msk.bf16.mxu0 %vm3488_vm0, %v3487_v4  ;;  %3287 = vmatpush3.bf16.msra.mxu0 %v3392_v10  ;;  %v3432_v10 = vld [vmem:[%s4200_s19 + $0x60] sm:$0xff]  }
 0xbad   : > { %3288 = vmatprep.subr.bf16.mxu0 %v3487_v4 }
 0xbb0   : > { %3289 = vmatpush3.bf16.msra.mxu0 %v3393_v11  ;;  %v3433_v11 = vld [vmem:[%s4200_s19 + $0x20] sm:$0xff]  }
 0xbb1   : > { %3290 = vmatprep.subr.bf16.mxu0 %v3487_v4 }
 0xbb4   : > { %3291 = vmatpush3.bf16.msra.mxu0 %v3394_v12  ;;  %v3434_v12 = vld [vmem:[%s4200_s19 + $0x68] sm:$0xff]  }
 0xbb5   : > { %3292 = vmatprep.subr.bf16.mxu0 %v3487_v4 }
 0xc75   : > { %v3989_v14 = vpop.f32.mrb[36].mxu1 }
 0xc76   : > { %v3248_v15 = vpop.f32.mrb[37].mxu1  ;;  %v2139_v16 = vpop.f32.mrb[20].mxu0 }
 0xc77   : > { %v2145_v17 = vmul.f32 0.17677669, %v2139_v16  ;;  %v1978_v18 = vpop.f32.mrb[38].mxu1  ;;  %v3266_v19 = vpop.f32.mrb[21].mxu0  ;;  %v3397_v15 = vld [vmem:[%s4194_s13 + $0x28] sm:$0xff]   ;;  %v3398_v16 = vld [vmem:[%s4194_s13 + $0x30] sm:$0xff]  }
 0xc78   : > { %v3249_v20 = vpop.f32.mrb[39].mxu1  ;;  %v2142_v22 = vpop.f32.mrb[22].mxu0 }
 0xc79   : > { %v3267_v24 = vpop.f32.mrb[23].mxu0  ;;  %v2146_v25 = vsel %vm1055_vm3, %v2145_v17, -inf  ;;  %v3399_v22 = vld [vmem:[%s4194_s13 + $0x38] sm:$0xff]  }
 0xc7a   : > { %2147 = vmax.xlane.f32.xlu0 %v2146_v25 }
 0xc7d   : > { %v2027_v26 = vpop.f32.mrb[40].mxu1 }
 0xc7e   : > { %v2033_v27 = vmul.f32 0.17677669, %v2027_v26  ;;  %v3254_v28 = vpop.f32.mrb[41].mxu1  ;;  %v2250_v29 = vpop.f32.mrb[24].mxu0 }
 0xc7f   : > { %v2256_v33 = vmul.f32 0.17677669, %v2250_v29  ;;  %v2030_v34 = vpop.f32.mrb[42].mxu1  ;;  %v3278_v35 = vpop.f32.mrb[25].mxu0 }
 0xc80   : > { %v3255_v36 = vpop.f32.mrb[43].mxu1  ;;  %v2253_v37 = vpop.f32.mrb[26].mxu0  ;;  %v2034_v38 = vsel %vm1055_vm3, %v2033_v27, -inf }
 0xc81   : > { %v3279_v39 = vpop.f32.mrb[27].mxu0  ;;  %2035 = vmax.xlane.f32.xlu1 %v2034_v38  ;;  %v2257_v40 = vsel %vm1055_vm3, %v2256_v33, -inf }
 0xc82   : > { %2258 = vmax.xlane.f32.xlu0 %v2257_v40 }
 0xd07   : > { %v2148_v41 = vpop.xlane.xlu0 %2147 }
 0xd08   : > { %v2149_v42 = vsub.f32 %v2145_v17, %v2148_v41  ;;  %v2992_v41 = vld [vmem:[%s4195_s14] ss:$0 sm:$0xff] }
 0xd0a   : > { %v2150_v43 = vmul.f32 1.442695, %v2149_v42 }
 0xd0c   : > { %3462 = vpow2.f32 %v2150_v43 }
 0xd0e   : > { %v2036_v44 = vpop.xlane.xlu1 %2035 }
 0xd0f   : > { %v2037_v45 = vsub.f32 %v2033_v27, %v2036_v44  ;;  %v2259_v46 = vpop.xlane.xlu0 %2258 }
 0xd10   : > { %v2260_v48 = vsub.f32 %v2256_v33, %v2259_v46 }
 0xd11   : > { %v2038_v49 = vmul.f32 1.442695, %v2037_v45 }
 0xd12   : > { %v2261_v51 = vmul.f32 1.442695, %v2260_v48 }
 0xd14   : > { %3464 = vpow2.f32 %v2261_v51  ;;  %v3405_v51 = vld [vmem:[%s4198_s17 + $0x14] ss:$8 sps:$4 sm:$0xff]  }
 0xd15   : > { %3466 = vpow2.f32 %v2038_v49  ;;  %v3402_v49 = vld [vmem:[%s4198_s17 + $0x4] ss:$8 sps:$4 sm:$0xff]  }
 0xd16   : > { %v3463_v52 = vpop.eup %3462 }
 0xd17   : > { %v2152_v53 = vsel %vm1055_vm3, %v3463_v52, 0.0 }
 0xd18   : > { %2153 = vadd.xlane.f32.xlu0 %v2152_v53  ;;  %v3406_v53 = vld [vmem:[%s4198_s17 + $0x20] ss:$8 sps:$4 sm:$0xff]  }
 0xd1e   : > { %v3465_v21 = vpop.eup %3464 }
 0xd1f   : > { %v2263_v55 = vsel %vm1055_vm3, %v3465_v21, 0.0  ;;  %v3467_v56 = vpop.eup %3466 }
 0xd20   : > { %2264 = vadd.xlane.f32.xlu1 %v2263_v55  ;;  %v2040_v57 = vsel %vm1055_vm3, %v3467_v56, 0.0 }
 0xd24   : > { %2041 = vadd.xlane.f32.xlu1 %v2040_v57 }
 0xd2e   : > { %2047 = vrot.lane.b32.xlu0 %v3955_v47, %s3489_s7 }
 0xd35   : > { %2158 = vrot.lane.b32.xlu1 %v3955_v47, %s4227_s0 }
 0xd39   : > { %2269 = vrot.lane.b32.xlu1 %v3955_v47, %s4228_s24 }
 0xda5   : > { %v2154_v54 = vpop.xlane.xlu0 %2153 }
 0xda9   : > { %v2048_v23 = vpop.permute.xlu0 %2047 }
 0xdaa   : > { %v2053_v58 = vsel %vm1071_vm2, %v2048_v23, 0  ;;  %v3409_v23 = vld [vmem:[%s4198_s17 + $0x30] ss:$8 sps:$4 sm:$0xff]  }
 0xdab   : > { %3257 = vmatpush3.bf16.msra.mxu1 %v2053_v58  ;;  %v3414_v58 = vld [vmem:[%s4198_s17 + $0x44] ss:$8 sps:$4 sm:$0xff]  }
 0xdac   : > { %3268 = vmatprep.subr.bf16.mxu1 %v3487_v4 }
 0xdad   : > { %v2265_v59 = vpop.xlane.xlu1 %2264 }
 0xdb1   : > { %v2042_v60 = vpop.xlane.xlu1 %2041 }
 0xdb2   : > { %3468 = vrcp.f32 %v2042_v60  ;;  %v3417_v60 = vld [vmem:[%s4198_s17 + $0x54] ss:$8 sps:$4 sm:$0xff]  }
 0xdb3   : > { %3470 = vrcp.f32 %v2154_v54  ;;  %v3411_v54 = vld [vmem:[%s4198_s17 + $0x34] ss:$8 sps:$4 sm:$0xff]  }
 0xdb4   : > { %3472 = vrcp.f32 %v2265_v59  ;;  %v3412_v59 = vld [vmem:[%s4198_s17 + $0x40] ss:$8 sps:$4 sm:$0xff]  }
 0xdb5   : > { %v2159_v63 = vpop.permute.xlu1 %2158 }
 0xdb6   : > { %v2164_v3 = vsel %vm1071_vm2, %v2159_v63, 0  ;;  %v3418_v63 = vld [vmem:[%s4198_s17 + $0x60] ss:$8 sps:$4 sm:$0xff]  }
 0xdb9   : > { %v2270_v5 = vpop.permute.xlu1 %2269 }
 0xdba   : > { %v2275_v8 = vsel %vm1071_vm2, %v2270_v5, 0  ;;  %v3426_v5 = vld [vmem:[%s4200_s19 + $0x48] sm:$0xff]  }
 0xdbc   : > { %v3469_v61 = vpop.eup %3468 }
 0xdbd   : > { %v2044_v62 = vmul.f32 %v3469_v61, %v3467_v56  ;;  %v3471_v1 = vpop.eup %3470  ;;  %v3415_v61 = vld [vmem:[%s4198_s17 + $0x50] ss:$8 sps:$4 sm:$0xff]  }
 0xdbe   : > { %v2156_v47 = vmul.f32 %v3471_v1, %v3463_v52  ;;  %v3473_v7 = vpop.eup %3472  ;;  %v3403_v52 = vld [vmem:[%s4198_s17 + $0x10] ss:$8 sps:$4 sm:$0xff]  }
 0xdbf   : > { %v2045_v0 = vpack.c.bf16 %v2044_v62, %v2044_v62  ;;  %v2267_v9 = vmul.f32 %v3473_v7, %v3465_v21  ;;  %v3420_v62 = vld [vmem:[%s4198_s17 + $0x64] ss:$8 sps:$4 sm:$0xff]   ;;  %v3421_v1 = vld [vmem:[%s4198_s17 + $0x70] ss:$8 sps:$4 sm:$0xff]  }
 0xdc0   : > { %v2157_v6 = vpack.c.bf16 %v2156_v47, %v2156_v47  ;;  %v3425_v47 = vld [vmem:[%s4200_s19] sm:$0xff]   ;;  %v3428_v7 = vld [vmem:[%s4200_s19 + $0x50] sm:$0xff]  }
 0xdc1   : > { %3259 = vmatmul.mubr.msk.bf16.vlgmr.msra.gmra.mrb[44].mxu1 %vm1055_vm3, %v2045_v0  ;;  %v2268_v50 = vpack.c.bf16 %v2267_v9, %v2267_v9  ;;  %v3423_v0 = vld [vmem:[%s4198_s17 + $0x74] ss:$8 sps:$4 sm:$0xff]  }
 0xdc2   : > { %3269 = vmatpush3.bf16.msra.mxu1 %v2164_v3  ;;  %3270 = vmatprep.mubr.msk.bf16.mxu1 %vm3488_vm0, %v3487_v4  ;;  %v3424_v3 = vld [vmem:[%s4200_s19 + $0x40] sm:$0xff]   ;;  %v3430_v9 = vld [vmem:[%s4200_s19 + $0x58] sm:$0xff]  }
 0xdc3   : > { %3280 = vmatprep.subr.bf16.mxu1 %v3487_v4 }
 0xdc9   : > { %3271 = vmatmul.mubr.msk.bf16.vlgmr.msra.gmra.mrb[48].mxu1 %vm1055_vm3, %v2157_v6  ;;  %v3427_v6 = vld [vmem:[%s4200_s19 + $0x8] sm:$0xff]  }
 0xdca   : > { %3281 = vmatpush3.bf16.msra.mxu1 %v2275_v8  ;;  %3282 = vmatprep.mubr.msk.bf16.mxu1 %vm3488_vm0, %v3487_v4  ;;  %v3429_v8 = vld [vmem:[%s4200_s19 + $0x10] sm:$0xff]  }
 0xdcb   : > { %2581 = vmatprep.subr.bf16.mxu1 %v3402_v49 }
 0xdd1   : > { %3283 = vmatmul.mubr.msk.bf16.vlgmr.msra.gmra.mrb[52].mxu1 %vm1055_vm3, %v2268_v50  ;;  %v3431_v50 = vld [vmem:[%s4200_s19 + $0x18] sm:$0xff]  }
 0xdd2   : > { %2613 = vmatprep.mubr.bf16.mxu1 %v3486_v2  ;;  %v3395_v2 = vld [vmem:[%s4194_s13 + $0x18] sm:$0xff]  }
 0xdd3   : > { %3293 = vmatpush3.bf16.msra.mxu0 %v3395_v2  ;;  %v3435_v2 = vld [vmem:[%s4200_s19 + $0x28] sm:$0xff]  }
 0xdd4   : > { %3294 = vmatprep.subr.bf16.mxu0 %v3487_v4 }
 0xdd7   : > { %3295 = vmatpush3.bf16.msra.mxu0 %v3396_v13 }
 0xdd8   : > { %3296 = vmatprep.subr.bf16.mxu0 %v3487_v4 }
 0xddb   : > { %3297 = vmatpush3.bf16.msra.mxu0 %v3397_v15 }
 0xddc   : > { %3298 = vmatprep.subr.bf16.mxu0 %v3487_v4 }
 0xddf   : > { %3299 = vmatpush3.bf16.msra.mxu0 %v3398_v16 }
 0xde0   : > { %3300 = vmatprep.subr.bf16.mxu0 %v3487_v4 }
 0xde3   : > { %3301 = vmatpush3.bf16.msra.mxu0 %v3399_v22 }
 0xde4   : > { %3108 = vmatprep.subr.bf16.mxu0 %v3424_v3 }
 0xe94   : > { %v2089_v17 = vpop.f32.mrb[44].mxu1 }
 0xe95   : > { %2318 = vrot.lane.b32.xlu0 %v2089_v17, %s4228_s24  ;;  %v3260_v18 = vpop.f32.mrb[45].mxu1 }
 0xe96   : > { %v2092_v19 = vpop.f32.mrb[46].mxu1  ;;  %v3001_v18 = vld [vmem:[%s4196_s15] ss:$0 sm:$0xff] }
 0xe97   : > { %v3261_v20 = vpop.f32.mrb[47].mxu1 }
 0xe98   : > { %v3002_v20 = vld [vmem:[%s4197_s16] ss:$0 sm:$0xff] }
 0xe9c   : > { %v2200_v24 = vpop.f32.mrb[48].mxu1 }
 0xe9d   : > { %2322 = vrot.lane.b32.xlu1 %v2200_v24, %s4227_s0  ;;  %v3272_v25 = vpop.f32.mrb[49].mxu1 }
 0xe9e   : > { %v2203_v26 = vpop.f32.mrb[50].mxu1 }
 0xe9f   : > { %v3273_v27 = vpop.f32.mrb[51].mxu1  ;;  %v3436_v26 = vld [vmem:[%s4200_s19 + $0x70] sm:$0xff]  }
 0xea0   : > { %v3437_v27 = vld [vmem:[%s4200_s19 + $0x30] sm:$0xff]  }
 0xea4   : > { %v2311_v28 = vpop.f32.mrb[52].mxu1 }
 0xea5   : > { %2326 = vrot.lane.b32.xlu0 %v2311_v28, %s3489_s7  ;;  %v3284_v29 = vpop.f32.mrb[53].mxu1  ;;  %v3438_v28 = vld [vmem:[%s4200_s19 + $0x78] sm:$0xff]  }
 0xea6   : > { %v2314_v33 = vpop.f32.mrb[54].mxu1  ;;  %v3439_v29 = vld [vmem:[%s4200_s19 + $0x38] sm:$0xff]  }
 0xea7   : > { %v3285_v34 = vpop.f32.mrb[55].mxu1  ;;  %v2489_v33 = vld [vmem:[%s4199_s18] sm:$0x3] }
 0xea8   : > { %v2494_v34 = vrot.slane %v2489_v33, %v3724_v32 }
 0xf07   : > { %v2319_v35 = vpop.permute.xlu0 %2318 }
 0xf08   : > { %v2329_v36 = vsel %vm1006_vm1, %v3989_v14, %v2319_v35  ;;  %v3400_v14 = vld [vmem:[%s4198_s17] ss:$8 sps:$4 sm:$0xff]   ;;  %v2498_v35 = vrot.slane %v2489_v33, %v3719_v30 }
 0xf09   : > { %2582 = vmatpush1.bf16.msra.mxu1 %v3400_v14 }
 0xf0a   : > { %2583 = vmatprep.subr.bf16.mxu1 %v3405_v51 }
 0xf0d   : > { %2584 = vmatpush1.bf16.msra.mxu1 %v3403_v52 }
 0xf0f   : > { %v2323_v4 = vpop.permute.xlu1 %2322 }
 0xf10   : > { %v2330_v37 = vsel %vm1467_vm4, %v2329_v36, %v2323_v4 }
 0xf17   : > { %v2327_v38 = vpop.permute.xlu0 %2326 }
 0xf18   : > { %v2331_v39 = vsel %vm1469_vm5, %v2330_v37, %v2327_v38 }
 0xf19   : > { %v2332_v40 = vpack.c.bf16 %v2331_v39, %v2331_v39 }
 0xf1b   : > { %3303 = vmatmul.mubr.bf16.vlgmr.msra.gmra.mrb[28].mxu0 %v2332_v40 }
 0xf1c   : > { %3109 = vmatpush3.bf16.msra.mxu0 %v3425_v47 }
 0xf1d   : > { %3110 = vmatprep.subr.bf16.mxu0 %v3426_v5 }
 0xf20   : > { %3111 = vmatpush3.bf16.msra.mxu0 %v3427_v6 }
 0xf21   : > { %3112 = vmatprep.subr.bf16.mxu0 %v3428_v7 }
 0xf24   : > { %3113 = vmatpush3.bf16.msra.mxu0 %v3429_v8 }
 0xf25   : > { %3114 = vmatprep.subr.bf16.mxu0 %v3430_v9 }
 0xf28   : > { %3115 = vmatpush3.bf16.msra.mxu0 %v3431_v50 }
 0xf29   : > { %3116 = vmatprep.subr.bf16.mxu0 %v3432_v10 }
 0xf2c   : > { %3117 = vmatpush3.bf16.msra.mxu0 %v3433_v11 }
 0xf2d   : > { %3118 = vmatprep.subr.bf16.mxu0 %v3434_v12 }
 0xf30   : > { %3119 = vmatpush3.bf16.msra.mxu0 %v3435_v2 }
 0xf31   : > { %3120 = vmatprep.subr.bf16.mxu0 %v3436_v26 }
 0xf34   : > { %3121 = vmatpush3.bf16.msra.mxu0 %v3437_v27 }
 0xf35   : > { %3122 = vmatprep.subr.bf16.mxu0 %v3438_v28 }
 0xf38   : > { %3123 = vmatpush3.bf16.msra.mxu0 %v3439_v29 }
 0xfee   : > { %v2438_v42 = vpop.f32.mrb[28].mxu0 }
 0xfef   : > { %v2439_v43 = vadd.f32 %v2992_v41, %v2438_v42  ;;  %v3304_v44 = vpop.f32.mrb[29].mxu0 }
 0xff0   : > { %v2441_v45 = vpop.f32.mrb[30].mxu0 }
 0xff1   : > { %v3305_v46 = vpop.f32.mrb[31].mxu0  ;;  %v2444_v48 = vadd.f32 %v2439_v43, %v3939_v31  ;;  %v3408_v31 = vld [vmem:[%s4198_s17 + $0x24] ss:$8 sps:$4 sm:$0xff]  }
 0xff2   : > { %2585 = vmatprep.subr.bf16.mxu1 %v3408_v31  ;;  %v3019_v46 = vld [vmem:[%s4201_s20] ss:$0 sm:$0xff] }
 0xff3   : > { %2447 = vadd.xlane.f32.xlu1 %v2444_v48  ;;  %2586 = vmatpush1.bf16.msra.mxu1 %v3406_v53 }
 0xff4   : > { %2587 = vmatprep.subr.bf16.mxu1 %v3411_v54 }
 0xff7   : > { %2588 = vmatpush1.bf16.msra.mxu1 %v3409_v23  ;;  %v3036_v23 = vld [vmem:[%s4202_s21] ss:$0 sm:$0xff] }
 0xff8   : > { %2589 = vmatprep.subr.bf16.mxu1 %v3414_v58 }
 0xffb   : > { %2590 = vmatpush1.bf16.msra.mxu1 %v3412_v59  ;;  %v3037_v59 = vld [vmem:[%s4203_s22] ss:$0 sm:$0xff] }
 0xffc   : > { %2591 = vmatprep.subr.bf16.mxu1 %v3417_v60 }
 0xfff   : > { %2592 = vmatpush1.bf16.msra.mxu1 %v3415_v61 }
0x1000   : > { %2593 = vmatprep.subr.bf16.mxu1 %v3420_v62 }
0x1003   : > { %2594 = vmatpush1.bf16.msra.mxu1 %v3418_v63 }
0x1004   : > { %2595 = vmatprep.subr.bf16.mxu1 %v3423_v0 }
0x1007   : > { %2596 = vmatpush1.bf16.msra.mxu1 %v3421_v1 }
0x1080   : > { %v2448_v21 = vpop.xlane.xlu1 %2447 }
0x1081   : > { %v2449_v55 = vmul.f32 0.0078125, %v2448_v21 }
0x1083   : > { %v2450_v56 = vsub.f32 %v2444_v48, %v2449_v55 }
0x1085   : > { %v2451_v57 = vmul.f32 %v2450_v56, %v2450_v56 }
0x1087   : > { %2452 = vadd.xlane.f32.xlu0 %v2451_v57 }
0x1114   : > { %v2453_v13 = vpop.xlane.xlu0 %2452 }
0x1115   : > { %v2454_v15 = vmul.f32 0.0078125, %v2453_v13 }
0x1117   : > { %v2455_v16 = vadd.f32 1e-05, %v2454_v15 }
0x1119   : > { %3474 = vrsqrt.f32 %v2455_v16 }
0x1123   : > { %v3475_v17 = vpop.eup %3474 }
0x1124   : > { %v2457_v19 = vmul.f32 %v3475_v17, %v2450_v56 }
0x1126   : > { %v2464_v22 = vmul.f32 %v3001_v18, %v2457_v19 }
0x1128   : > { %v2471_v24 = vadd.f32 %v3002_v20, %v2464_v22 }
0x112a   : > { %v2472_v25 = vpack.c.bf16 %v2471_v24, %v2471_v24 }
0x112c   : > { %2614 = vmatmul.mubr.bf16.vlgmr.msra.gmra.mrb[56].mxu1 %v2472_v25 }
0x11ff   : > { %v2615_v4 = vpop.f32.mrb[56].mxu1 }
0x1200   : > { %v2616_v36 = vadd.f32 %v2615_v4, %v2494_v34  ;;  %v2617_v37 = vpop.f32.mrb[57].mxu1 }
0x1201   : > { %v2618_v38 = vadd.f32 %v2617_v37, %v2498_v35  ;;  %v2619_v39 = vpop.f32.mrb[58].mxu1 }
0x1202   : > { %v2622_v40 = vmax.f32 %v2616_v36, 0.0  ;;  %v2620_v41 = vpop.f32.mrb[59].mxu1 }
0x1203   : > { %v2623_v42 = vmax.f32 %v2618_v38, 0.0 }
0x1204   : > { %v2624_v44 = vpack.c.bf16 %v2622_v40, %v2622_v40 }
0x1205   : > { %v2625_v43 = vpack.c.bf16 %v2623_v42, %v2623_v42 }
0x1207   : > { %2793 = vmatprep.mubr.bf16.mxu0 %v2625_v43 }
0x1208   : > { %2794 = vmatmul.mubr.bf16.vlgmr.msra.gmra.mrb[32].mxu0 %v2624_v44 }
0x12db   : > { %v3124_v45 = vpop.f32.mrb[32].mxu0 }
0x12dc   : > { %v3125_v32 = vpop.f32.mrb[33].mxu0 }
0x12dd   : > { %v3126_v48 = vadd.f32 %v3125_v32, %v3124_v45  ;;  %v3127_v30 = vpop.f32.mrb[34].mxu0 }
0x12de   : > { %v3128_v14 = vpop.f32.mrb[35].mxu0 }
0x12df   : > { %v2796_v49 = vadd.f32 %v3126_v48, %v3019_v46 }
0x12e1   : > { %v2801_v51 = vadd.f32 %v2796_v49, %v2471_v24 }
0x12e3   : > { %2804 = vadd.xlane.f32.xlu0 %v2801_v51 }
0x1370   : > { %v2805_v52 = vpop.xlane.xlu0 %2804 }
0x1371   : > { %v2806_v31 = vmul.f32 0.0078125, %v2805_v52 }
0x1373   : > { %v2807_v53 = vsub.f32 %v2801_v51, %v2806_v31 }
0x1375   : > { %v2808_v21 = vmul.f32 %v2807_v53, %v2807_v53 }
0x1377   : > { %2809 = vadd.xlane.f32.xlu1 %v2808_v21 }
0x1404   : > { %v2810_v55 = vpop.xlane.xlu1 %2809 }
0x1405   : > { %v2811_v56 = vmul.f32 0.0078125, %v2810_v55 }
0x1407   : > { %v2812_v57 = vadd.f32 1e-05, %v2811_v56 }
0x1409   : > { %3476 = vrsqrt.f32 %v2812_v57 }
0x1413   : > { %v3477_v54 = vpop.eup %3476 }
0x1414   : > { %v2814_v58 = vmul.f32 %v3477_v54, %v2807_v53 }
0x1416   : > { %v2821_v60 = vmul.f32 %v3036_v23, %v2814_v58 }
0x1418   : > { %v2828_v61 = vadd.f32 %v3037_v59, %v2821_v60 }
0x141a   : > { %2829 = vst [vmem:[%s739_s25] sm:$0xff] %v2828_v61 }
0x141b PF: > { %s33_s4 = sadd.s32 1, %s3484_s4  }
0x141c   : > { %p30_p4 = scmp.ge.s32.totalorder %s33_s4, 4  }
0x141e   :  { %32 = sbr.rel (!%p30_p4) target bundleno = 9 (0x9), region = 148 }

// kernel: _lambda_.7
= control target key start
LH: loop header
LB: loop body
LE: loop exit
PB: predicated region body
PF: predicated region fallthrough
CT: control target
= control target key end

     0   :  { %s5427_s0 = inlined_call_operand.vmem [shape: f32[2,8,128], index: 0, kind: input, shape index: {}]   ;;  %s5428_s1 = inlined_call_operand.vmem [shape: f32[2,8,128], index: 1, kind: input, shape index: {}]   ;;  %s5429_s2 = inlined_call_operand.vmem [shape: f32[2,8,8], index: 2, kind: input, shape index: {}]   ;;  %s5430_s3 = inlined_call_operand.vmem [shape: bf16[128,384], index: 3, kind: input, shape index: {}]   ;;  %s5431_s4 = inlined_call_operand.vmem [shape: f32[1,384], index: 4, kind: input, shape index: {}]   ;;  %s5432_s5 = inlined_call_operand.hbm [shape: bf16[128,128], index: 5, kind: input, shape index: {}]   ;;  %s5433_s6 = inlined_call_operand.hbm [shape: f32[1,128], index: 6, kind: input, shape index: {}]   ;;  %s5434_s7 = inlined_call_operand.hbm [shape: f32[1,128], index: 7, kind: input, shape index: {}]   ;;  %s5435_s8 = inlined_call_operand.hbm [shape: f32[1,128], index: 8, kind: input, shape index: {}]   ;;  %s5436_s9 = inlined_call_operand.hbm [shape: bf16[128,128], index: 9, kind: input, shape index: {}]   ;;  %s5437_s10 = inlined_call_operand.hbm [shape: f32[1,128], index: 10, kind: input, shape index: {}]   ;;  %s5438_s11 = inlined_call_operand.vmem [shape: bf16[128,256], index: 11, kind: input, shape index: {}]   ;;  %s5439_s12 = inlined_call_operand.hbm [shape: f32[1,256], index: 12, kind: input, shape index: {}]   ;;  %s5440_s13 = inlined_call_operand.hbm [shape: bf16[128,128], index: 13, kind: input, shape index: {}]   ;;  %s5441_s14 = inlined_call_operand.hbm [shape: f32[1,128], index: 14, kind: input, shape index: {}]   ;;  %s5442_s15 = inlined_call_operand.hbm [shape: f32[1,128], index: 15, kind: input, shape index: {}]   ;;  %s5443_s16 = inlined_call_operand.hbm [shape: f32[1,128], index: 16, kind: input, shape index: {}]   ;;  %s5444_s17 = inlined_call_operand.vmem [shape: bf16[128,256], index: 17, kind: input, shape index: {}]   ;;  %s5445_s18 = inlined_call_operand.hbm [shape: f32[1,256], index: 18, kind: input, shape index: {}]   ;;  %s5446_s19 = inlined_call_operand.vmem [shape: bf16[256,128], index: 19, kind: input, shape index: {}]   ;;  %s5447_s20 = inlined_call_operand.hbm [shape: f32[1,128], index: 20, kind: input, shape index: {}]   ;;  %s5448_s21 = inlined_call_operand.hbm [shape: f32[1,128], index: 21, kind: input, shape index: {}]   ;;  %s5449_s22 = inlined_call_operand.hbm [shape: f32[1,128], index: 22, kind: input, shape index: {}]   ;;  %s5450_s23 = inlined_call_operand.vmem [shape: f32[2,8,128], index: 23, kind: output, shape index: {}]  }
   0x1   :  { %5461 = sst [smem:[#allocation34_spill]] %s5427_s0 }
   0x2   :  { %5462 = sst [smem:[#allocation35_spill]] %s5428_s1 }
   0x3   :  { %5463 = sst [smem:[#allocation36_spill]] %s5429_s2 }
   0x4   :  { %5464 = sst [smem:[#allocation37_spill]] %s5430_s3 }
   0x5   :  { %5465 = sst [smem:[#allocation38_spill]] %s5431_s4 }
   0x6   :  { %5466 = sst [smem:[#allocation39_spill]] %s5432_s5 }
   0x7   :  { %5467 = sst [smem:[#allocation40_spill]] %s5433_s6 }
   0x8   :  { %5468 = sst [smem:[#allocation41_spill]] %s5434_s7 }
   0x9   :  { %5469 = sst [smem:[#allocation42_spill]] %s5435_s8 }
   0xa   :  { %5470 = sst [smem:[#allocation43_spill]] %s5437_s10 }
   0xb   :  { %5471 = sst [smem:[#allocation44_spill]] %s5440_s13 }
   0xc   :  { %5472 = sst [smem:[#allocation45_spill]] %s5444_s17 }
   0xd   :  { %5473 = sst [smem:[#allocation46_spill]] %s5446_s19 }
   0xe   :  { %5474 = sst [smem:[#allocation47_spill]] %s5450_s23 }
   0xf   :  { %28 = vsyncpa [#allocation3], 0 }
  0x10   :  { %29 = vsyncpa [#allocation5], 0 }
  0x11   :  { %30 = vsyncpa [#allocation8], 0 }
  0x12   :  { %31 = vsyncpa [#allocation11], 0 }
  0x13   :  { %32 = vsyncpa [#allocation14], 0 }
  0x14   :  { %33 = vsyncpa [#allocation17], 0 }
  0x15   :  { %34 = vsyncpa [#allocation20], 0 }
  0x16   :  { %35 = vsyncpa [#allocation23], 0  ;;  %s4603_s4 = smov 0  }
  0x17 LB: > { %5475 = sst [smem:[#allocation33_spill]] %s4458_s4  ;;  %s4460_s30 = smov [#allocation4]   ;;  %s4458_s4 = sphi %s4603_s4, %s41_s4  }
  0x18   : > { %s602_s24 = sshll.u32 %s4460_s30, 4  ;;  %s4609_s25 = sadd.s32 4294967295, %s4458_s4   ;;  %s4614_s24 = int_to_ptr.vmem [resolvable:$true] %s602_s24 }
  0x19   : > { %p3248_p0 = scmp.ge.s32.totalorder %s4458_s4, 1  ;;  %p570_p1 = scmp.lt.s32.totalorder %s4458_s4, 3 }
  0x1a   : > { %p5458_p2 = scmp.eq.s32.totalorder %s4609_s25, 0  ;;  %s4461_s1 = smov [#allocation7]  }
  0x1b   : > { %p4616_p3 = pnand %p3248_p0, %p570_p1  ;;  %s624_s26 = sshll.u32 %s4461_s1, 4  ;;  %s4622_s26 = int_to_ptr.vmem [resolvable:$true] %s624_s26 }
  0x1c   : > { %s4462_s2 = smov [#allocation10]   ;;  %s4463_s7 = smov [#allocation13]  }
  0x1d   : > { %s5476_s5 = scalar_select %p4616_p3, 1, 0 }
  0x1e   : > { %p3735_p4 = pneg %p4616_p3  ;;  %s648_s6 = sshll.u32 %s4462_s2, 4  ;;  %s4630_s6 = int_to_ptr.vmem [resolvable:$true] %s648_s6 }
  0x1f   : > { %s4632_s28 = sshll.u32 %s4463_s7, 4  ;;  %s5478_s0 = sld [smem:[#allocation40_spill]]  ;;  %s673_s28 = int_to_ptr.vmem [resolvable:$true] %s4632_s28 }
  0x20   : > { %p4626_p5 = pnand %p5458_p2, %p3735_p4 }
  0x22   : > { %p4642_p7 = pneg %p4626_p5 }
  0x25   : > { %s4000_s30 = scalar_lea.hbm %s5478_s0, 16 }
  0x26   : > { %p4001_p6 = scmp.ne.s32.totalorder %s5478_s0, %s4000_s30  ;;  %p4007_p10 = scmp.lt.u32.totalorder %s4000_s30, %s5478_s0 }
  0x28   : > { %p4003_p8 = pnand %p4642_p7, %p4001_p6 }
  0x2a   : > { %p4004_p9 = pneg %p4003_p8 }
  0x2c   : > { %p4009_p11 = pnand %p4007_p10, %p4004_p9 }
  0x2e   : > { %4012 = shalt.err (!%p4009_p11)
}
  0x2f   : > { %s4013_s4 = scalar_lea.vmem %s4614_s24, 16  ;;  %s4020_s29 = scalar_lea.vmem %s4614_s24, 32 }
  0x30   : > { %p4014_p12 = scmp.ne.s32.totalorder %s4614_s24, %s4013_s4  ;;  %p4021_p1 = scmp.lt.s32.totalorder %s4614_s24, %s4614_s24 }
  0x31   : > { %p4022_p4 = scmp.lt.s32.totalorder %s4020_s29, %s4013_s4 }
  0x32   : > { %p4016_p13 = pnand %p4014_p12, %p4642_p7 }
  0x33   : > { %p4023_p6 = por %p4022_p4, %p4021_p1 }
  0x34   : > { %p4017_p0 = pneg %p4016_p13 }
  0x36   : > { %p4024_p8 = pnand %p4023_p6, %p4017_p0 }
  0x38   : > { %4027 = shalt.err (!%p4024_p8)
}
  0x39   : > { %3741 = dma.hbm_to_vmem [thread:$0]  (!%p4626_p5), %s5478_s0, 16, %s4614_s24, [#allocation5]  }
  0x3a   : > { %s5480_s8 = sld [smem:[#allocation42_spill]] }
  0x40   : > { %s4028_s7 = scalar_lea.hbm %s5480_s8, 16 }
  0x41   : > { %p4029_p9 = scmp.ne.s32.totalorder %s5480_s8, %s4028_s7  ;;  %p4035_p12 = scmp.lt.u32.totalorder %s4028_s7, %s5480_s8 }
  0x43   : > { %p4031_p10 = pnand %p4029_p9, %p4642_p7 }
  0x45   : > { %p4032_p11 = pneg %p4031_p10 }
  0x47   : > { %p4037_p13 = pnand %p4035_p12, %p4032_p11 }
  0x49   : > { %4040 = shalt.err (!%p4037_p13)
}
  0x4a   : > { %s4041_s24 = scalar_lea.vmem %s4622_s26, 16  ;;  %s4048_s17 = scalar_lea.vmem %s4622_s26, 32 }
  0x4b   : > { %p4042_p0 = scmp.ne.s32.totalorder %s4622_s26, %s4041_s24  ;;  %p4049_p6 = scmp.lt.s32.totalorder %s4622_s26, %s4622_s26 }
  0x4c   : > { %p4050_p8 = scmp.lt.s32.totalorder %s4048_s17, %s4041_s24 }
  0x4d   : > { %p4044_p1 = pnand %p4042_p0, %p4642_p7 }
  0x4e   : > { %p4051_p9 = por %p4050_p8, %p4049_p6 }
  0x4f   : > { %p4045_p4 = pneg %p4044_p1 }
  0x51   : > { %p4052_p10 = pnand %p4051_p9, %p4045_p4 }
  0x53   : > { %4055 = shalt.err (!%p4052_p10)
}
  0x54   : > { %3747 = dma.hbm_to_vmem [thread:$0]  (!%p4626_p5), %s5480_s8, 16, %s4622_s26, [#allocation8]  }
  0x55   : > { %s5481_s10 = sld [smem:[#allocation43_spill]] }
  0x5b   : > { %s4056_s1 = scalar_lea.hbm %s5481_s10, 16 }
  0x5c   : > { %p4057_p11 = scmp.ne.s32.totalorder %s5481_s10, %s4056_s1  ;;  %p4063_p0 = scmp.lt.u32.totalorder %s4056_s1, %s5481_s10 }
  0x5e   : > { %p4059_p12 = pnand %p4057_p11, %p4642_p7 }
  0x60   : > { %p4060_p13 = pneg %p4059_p12 }
  0x62   : > { %p4065_p1 = pnand %p4063_p0, %p4060_p13 }
  0x64   : > { %4068 = shalt.err (!%p4065_p1)
}
  0x65   : > { %s4069_s26 = scalar_lea.vmem %s4630_s6, 16  ;;  %s4076_s17 = scalar_lea.vmem %s4630_s6, 32 }
  0x66   : > { %p4070_p4 = scmp.ne.s32.totalorder %s4630_s6, %s4069_s26  ;;  %p4077_p9 = scmp.lt.s32.totalorder %s4630_s6, %s4630_s6 }
  0x67   : > { %p4078_p10 = scmp.lt.s32.totalorder %s4076_s17, %s4069_s26 }
  0x68   : > { %p4072_p6 = pnand %p4070_p4, %p4642_p7 }
  0x69   : > { %p4079_p11 = por %p4078_p10, %p4077_p9 }
  0x6a   : > { %p4073_p8 = pneg %p4072_p6 }
  0x6c   : > { %p4080_p12 = pnand %p4079_p11, %p4073_p8 }
  0x6e   : > { %4083 = shalt.err (!%p4080_p12)
}
  0x6f   : > { %3753 = dma.hbm_to_vmem [thread:$0]  (!%p4626_p5), %s5481_s10, 16, %s4630_s6, [#allocation11]  }
  0x70   : > { %s5482_s13 = sld [smem:[#allocation44_spill]] }
  0x76   : > { %s4084_s1 = scalar_lea.hbm %s5482_s13, 1024 }
  0x77   : > { %p4085_p13 = scmp.ne.s32.totalorder %s5482_s13, %s4084_s1  ;;  %p4091_p4 = scmp.lt.u32.totalorder %s4084_s1, %s5482_s13 }
  0x79   : > { %p4087_p0 = pnand %p4085_p13, %p4642_p7 }
  0x7b   : > { %p4088_p1 = pneg %p4087_p0 }
  0x7d   : > { %p4093_p6 = pnand %p4091_p4, %p4088_p1 }
  0x7f   : > { %4096 = shalt.err (!%p4093_p6)
}
  0x80   : > { %s4097_s26 = scalar_lea.vmem %s673_s28, 1024  ;;  %p4105_p11 = scmp.lt.s32.totalorder %s673_s28, %s673_s28 }
  0x81   : > { %p4098_p8 = scmp.ne.s32.totalorder %s673_s28, %s4097_s26  ;;  %p4106_p12 = scmp.lt.s32.totalorder %s4097_s26, %s4097_s26 }
  0x83   : > { %p4100_p9 = pnand %p4098_p8, %p4642_p7  ;;  %p4107_p2 = por %p4106_p12, %p4105_p11 }
  0x85   : > { %p4101_p10 = pneg %p4100_p9 }
  0x87   : > { %p4108_p3 = pnand %p4107_p2, %p4101_p10 }
  0x89   : > { %4111 = shalt.err (!%p4108_p3)
}
  0x8a   : > { %s4464_s6 = smov 64   ;;  %s4465_s17 = smov 4  }
  0x8b   : > { %3759 = dma.hbm_to_vmem [thread:$0]  (!%p4626_p5), %s5482_s13, 1024, %s673_s28, [#allocation14], %s4464_s6, %s4464_s6, %s4465_s17  }
  0x8c   : > { %s4466_s3 = smov [#allocation16]   ;;  %s4467_s1 = smov [#allocation19]  }
  0x8d   : > { %s697_s30 = sshll.u32 %s4466_s3, 4  ;;  %s722_s7 = sshll.u32 %s4467_s1, 4  ;;  %s698_s30 = int_to_ptr.vmem [resolvable:$true] %s697_s30  ;;  %s723_s7 = int_to_ptr.vmem [resolvable:$true] %s722_s7 }
  0x8e   : > { %s4112_s24 = scalar_lea.hbm %s5442_s15, 16 }
  0x8f   : > { %p4113_p2 = scmp.ne.s32.totalorder %s5442_s15, %s4112_s24  ;;  %p4119_p0 = scmp.lt.u32.totalorder %s4112_s24, %s5442_s15 }
  0x91   : > { %p4115_p3 = pnand %p4113_p2, %p4642_p7 }
  0x93   : > { %p4116_p13 = pneg %p4115_p3 }
  0x95   : > { %p4121_p1 = pnand %p4119_p0, %p4116_p13 }
  0x97   : > { %4124 = shalt.err (!%p4121_p1)
}
  0x98   : > { %s4125_s28 = scalar_lea.vmem %s698_s30, 16  ;;  %s4132_s19 = scalar_lea.vmem %s698_s30, 32 }
  0x99   : > { %p4126_p4 = scmp.ne.s32.totalorder %s698_s30, %s4125_s28  ;;  %p4133_p9 = scmp.lt.s32.totalorder %s698_s30, %s698_s30 }
  0x9a   : > { %p4134_p10 = scmp.lt.s32.totalorder %s4132_s19, %s4125_s28 }
  0x9b   : > { %p4128_p6 = pnand %p4126_p4, %p4642_p7 }
  0x9c   : > { %p4135_p11 = por %p4134_p10, %p4133_p9 }
  0x9d   : > { %p4129_p8 = pneg %p4128_p6 }
  0x9f   : > { %p4136_p12 = pnand %p4135_p11, %p4129_p8 }
  0xa1   : > { %4139 = shalt.err (!%p4136_p12)
}
  0xa2   : > { %3765 = dma.hbm_to_vmem [thread:$0]  (!%p4626_p5), %s5442_s15, 16, %s698_s30, [#allocation17]  }
  0xa3   : > { %s4140_s3 = scalar_lea.hbm %s5445_s18, 32 }
  0xa4   : > { %p4141_p2 = scmp.ne.s32.totalorder %s5445_s18, %s4140_s3  ;;  %p4147_p0 = scmp.lt.u32.totalorder %s4140_s3, %s5445_s18 }
  0xa6   : > { %p4143_p3 = pnand %p4141_p2, %p4642_p7 }
  0xa8   : > { %p4144_p13 = pneg %p4143_p3 }
  0xaa   : > { %p4149_p1 = pnand %p4147_p0, %p4144_p13 }
  0xac   : > { %4152 = shalt.err (!%p4149_p1)
}
  0xad   : > { %s4153_s26 = scalar_lea.vmem %s723_s7, 32  ;;  %p4161_p9 = scmp.lt.s32.totalorder %s723_s7, %s723_s7 }
  0xae   : > { %p4154_p4 = scmp.ne.s32.totalorder %s723_s7, %s4153_s26  ;;  %p4162_p10 = scmp.lt.s32.totalorder %s4153_s26, %s4153_s26 }
  0xb0   : > { %p4156_p6 = pnand %p4154_p4, %p4642_p7  ;;  %p4163_p11 = por %p4162_p10, %p4161_p9 }
  0xb2   : > { %p4157_p8 = pneg %p4156_p6 }
  0xb4   : > { %p4164_p12 = pnand %p4163_p11, %p4157_p8 }
  0xb6   : > { %4167 = shalt.err (!%p4164_p12)
}
  0xb7   : > { %3771 = dma.hbm_to_vmem [thread:$0]  (!%p4626_p5), %s5445_s18, 32, %s723_s7, [#allocation20]  }
  0xb8   : > { %s4468_s19 = smov [#allocation22]   ;;  %s4469_s23 = smov [#allocation2]  }
  0xb9   : > { %s747_s0 = sshll.u32 %s4468_s19, 4  ;;  %s588_s8 = sshll.u32 %s4469_s23, 4  ;;  %s748_s0 = int_to_ptr.vmem [resolvable:$true] %s747_s0  ;;  %s589_s8 = int_to_ptr.vmem [resolvable:$true] %s588_s8 }
  0xba   : > { %s4168_s1 = scalar_lea.hbm %s5448_s21, 16 }
  0xbb   : > { %p4169_p2 = scmp.ne.s32.totalorder %s5448_s21, %s4168_s1  ;;  %p4175_p0 = scmp.lt.u32.totalorder %s4168_s1, %s5448_s21 }
  0xbd   : > { %p4171_p3 = pnand %p4169_p2, %p4642_p7 }
  0xbf   : > { %p4172_p13 = pneg %p4171_p3 }
  0xc1   : > { %p4177_p1 = pnand %p4175_p0, %p4172_p13 }
  0xc3   : > { %4180 = shalt.err (!%p4177_p1)
}
  0xc4   : > { %s4181_s7 = scalar_lea.vmem %s748_s0, 16  ;;  %s4188_s30 = scalar_lea.vmem %s748_s0, 32 }
  0xc5   : > { %p4182_p4 = scmp.ne.s32.totalorder %s748_s0, %s4181_s7  ;;  %p4189_p9 = scmp.lt.s32.totalorder %s748_s0, %s748_s0 }
  0xc6   : > { %p4190_p10 = scmp.lt.s32.totalorder %s4188_s30, %s4181_s7 }
  0xc7   : > { %p4184_p6 = pnand %p4182_p4, %p4642_p7 }
  0xc8   : > { %p4191_p11 = por %p4190_p10, %p4189_p9 }
  0xc9   : > { %p4185_p8 = pneg %p4184_p6 }
  0xcb   : > { %p4192_p12 = pnand %p4191_p11, %p4185_p8 }
  0xcd   : > { %4195 = shalt.err (!%p4192_p12)
}
  0xce   : > { %3777 = dma.hbm_to_vmem [thread:$0]  (!%p4626_p5), %s5448_s21, 16, %s748_s0, [#allocation23]  }
  0xcf   : > { %s5483_s3 = sld [smem:[#allocation39_spill]] }
  0xd5   : > { %s4196_s1 = scalar_lea.hbm %s5483_s3, 1024 }
  0xd6   : > { %p4197_p2 = scmp.ne.s32.totalorder %s5483_s3, %s4196_s1  ;;  %p4203_p0 = scmp.lt.u32.totalorder %s4196_s1, %s5483_s3 }
  0xd8   : > { %p4199_p3 = pnand %p4197_p2, %p4642_p7 }
  0xda   : > { %p4200_p13 = pneg %p4199_p3 }
  0xdc   : > { %p4205_p1 = pnand %p4203_p0, %p4200_p13 }
  0xde   : > { %4208 = shalt.err (!%p4205_p1)
}
  0xdf   : > { %s4209_s7 = scalar_lea.vmem %s589_s8, 1024  ;;  %p4217_p9 = scmp.lt.s32.totalorder %s589_s8, %s589_s8 }
  0xe0   : > { %p4210_p4 = scmp.ne.s32.totalorder %s589_s8, %s4209_s7  ;;  %p4218_p10 = scmp.lt.s32.totalorder %s4209_s7, %s4209_s7 }
  0xe2   : > { %p4212_p6 = pnand %p4210_p4, %p4642_p7  ;;  %p4219_p11 = por %p4218_p10, %p4217_p9 }
  0xe4   : > { %p4213_p8 = pneg %p4212_p6 }
  0xe6   : > { %p4220_p12 = pnand %p4219_p11, %p4213_p8 }
  0xe8   : > { %4223 = shalt.err (!%p4220_p12)
}
  0xe9   : > { %3738 = dma.hbm_to_vmem [thread:$0]  (!%p4626_p5), %s5483_s3, 1024, %s589_s8, [#allocation3], %s4464_s6, %s4464_s6, %s4465_s17  }
  0xea   : > { %s4470_s28 = smov [#allocation6]   ;;  %s4471_s23 = smov [#allocation9]  }
  0xeb   : > { %s613_s19 = sshll.u32 %s4470_s28, 4  ;;  %s634_s10 = sshll.u32 %s4471_s23, 4  ;;  %s614_s19 = int_to_ptr.vmem [resolvable:$true] %s613_s19  ;;  %s635_s10 = int_to_ptr.vmem [resolvable:$true] %s634_s10 }
  0xec   : > { %s5484_s29 = sld [smem:[#allocation41_spill]] }
  0xf2   : > { %s4224_s24 = scalar_lea.hbm %s5484_s29, 16 }
  0xf3   : > { %p4225_p2 = scmp.ne.s32.totalorder %s5484_s29, %s4224_s24  ;;  %p4231_p0 = scmp.lt.u32.totalorder %s4224_s24, %s5484_s29 }
  0xf5   : > { %p4227_p3 = pnand %p4225_p2, %p4642_p7 }
  0xf7   : > { %p4228_p13 = pneg %p4227_p3 }
  0xf9   : > { %p4233_p1 = pnand %p4231_p0, %p4228_p13 }
  0xfb   : > { %4236 = shalt.err (!%p4233_p1)
}
  0xfc   : > { %s4237_s8 = scalar_lea.vmem %s614_s19, 16  ;;  %s4244_s30 = scalar_lea.vmem %s614_s19, 32 }
  0xfd   : > { %p4238_p4 = scmp.ne.s32.totalorder %s614_s19, %s4237_s8  ;;  %p4245_p9 = scmp.lt.s32.totalorder %s614_s19, %s614_s19 }
  0xfe   : > { %p4246_p10 = scmp.lt.s32.totalorder %s4244_s30, %s4237_s8 }
  0xff   : > { %p4240_p6 = pnand %p4238_p4, %p4642_p7 }
 0x100   : > { %p4247_p11 = por %p4246_p10, %p4245_p9 }
 0x101   : > { %p4241_p8 = pneg %p4240_p6 }
 0x103   : > { %p4248_p12 = pnand %p4247_p11, %p4241_p8 }
 0x105   : > { %4251 = shalt.err (!%p4248_p12)
}
 0x106   : > { %3744 = dma.hbm_to_vmem [thread:$0]  (!%p4626_p5), %s5484_s29, 16, %s614_s19, [#allocation5]  }
 0x107   : > { %s4252_s4 = scalar_lea.hbm %s5436_s9, 1024 }
 0x108   : > { %p4253_p2 = scmp.ne.s32.totalorder %s5436_s9, %s4252_s4  ;;  %p4259_p0 = scmp.lt.u32.totalorder %s4252_s4, %s5436_s9 }
 0x10a   : > { %p4255_p3 = pnand %p4253_p2, %p4642_p7 }
 0x10c   : > { %p4256_p13 = pneg %p4255_p3 }
 0x10e   : > { %p4261_p1 = pnand %p4259_p0, %p4256_p13 }
 0x110   : > { %4264 = shalt.err (!%p4261_p1)
}
 0x111   : > { %s4265_s8 = scalar_lea.vmem %s635_s10, 1024  ;;  %p4273_p9 = scmp.lt.s32.totalorder %s635_s10, %s635_s10 }
 0x112   : > { %p4266_p4 = scmp.ne.s32.totalorder %s635_s10, %s4265_s8  ;;  %p4274_p10 = scmp.lt.s32.totalorder %s4265_s8, %s4265_s8 }
 0x114   : > { %p4268_p6 = pnand %p4266_p4, %p4642_p7  ;;  %p4275_p11 = por %p4274_p10, %p4273_p9 }
 0x116   : > { %p4269_p8 = pneg %p4268_p6 }
 0x118   : > { %p4276_p12 = pnand %p4275_p11, %p4269_p8 }
 0x11a   : > { %4279 = shalt.err (!%p4276_p12)
}
 0x11b   : > { %3750 = dma.hbm_to_vmem [thread:$0]  (!%p4626_p5), %s5436_s9, 1024, %s635_s10, [#allocation8], %s4464_s6, %s4464_s6, %s4465_s17  }
 0x11c   : > { %s4472_s28 = smov [#allocation12]   ;;  %s4473_s13 = smov [#allocation15]  }
 0x11d   : > { %s662_s23 = sshll.u32 %s4472_s28, 4  ;;  %s686_s1 = sshll.u32 %s4473_s13, 4  ;;  %s663_s23 = int_to_ptr.vmem [resolvable:$true] %s662_s23  ;;  %s687_s1 = int_to_ptr.vmem [resolvable:$true] %s686_s1 }
 0x11e   : > { %s4280_s26 = scalar_lea.hbm %s5439_s12, 32 }
 0x11f   : > { %p4281_p2 = scmp.ne.s32.totalorder %s5439_s12, %s4280_s26  ;;  %p4287_p0 = scmp.lt.u32.totalorder %s4280_s26, %s5439_s12 }
 0x121   : > { %p4283_p3 = pnand %p4281_p2, %p4642_p7 }
 0x123   : > { %p4284_p13 = pneg %p4283_p3 }
 0x125   : > { %p4289_p1 = pnand %p4287_p0, %p4284_p13 }
 0x127   : > { %4292 = shalt.err (!%p4289_p1)
}
 0x128   : > { %s4293_s6 = scalar_lea.vmem %s663_s23, 32  ;;  %p4301_p9 = scmp.lt.s32.totalorder %s663_s23, %s663_s23 }
 0x129   : > { %p4294_p4 = scmp.ne.s32.totalorder %s663_s23, %s4293_s6  ;;  %p4302_p10 = scmp.lt.s32.totalorder %s4293_s6, %s4293_s6 }
 0x12b   : > { %p4296_p6 = pnand %p4294_p4, %p4642_p7  ;;  %p4303_p11 = por %p4302_p10, %p4301_p9 }
 0x12d   : > { %p4297_p8 = pneg %p4296_p6 }
 0x12f   : > { %p4304_p12 = pnand %p4303_p11, %p4297_p8 }
 0x131   : > { %4307 = shalt.err (!%p4304_p12)
}
 0x132   : > { %3756 = dma.hbm_to_vmem [thread:$0]  (!%p4626_p5), %s5439_s12, 32, %s663_s23, [#allocation11]  }
 0x133   : > { %s4308_s13 = scalar_lea.hbm %s5441_s14, 16 }
 0x134   : > { %p4309_p2 = scmp.ne.s32.totalorder %s5441_s14, %s4308_s13  ;;  %p4315_p0 = scmp.lt.u32.totalorder %s4308_s13, %s5441_s14 }
 0x136   : > { %p4311_p3 = pnand %p4309_p2, %p4642_p7 }
 0x138   : > { %p4312_p13 = pneg %p4311_p3 }
 0x13a   : > { %p4317_p1 = pnand %p4315_p0, %p4312_p13 }
 0x13c   : > { %4320 = shalt.err (!%p4317_p1)
}
 0x13d   : > { %s4321_s0 = scalar_lea.vmem %s687_s1, 16  ;;  %s4328_s23 = scalar_lea.vmem %s687_s1, 32 }
 0x13e   : > { %p4322_p4 = scmp.ne.s32.totalorder %s687_s1, %s4321_s0  ;;  %p4329_p9 = scmp.lt.s32.totalorder %s687_s1, %s687_s1 }
 0x13f   : > { %p4330_p10 = scmp.lt.s32.totalorder %s4328_s23, %s4321_s0 }
 0x140   : > { %p4324_p6 = pnand %p4322_p4, %p4642_p7 }
 0x141   : > { %p4331_p11 = por %p4330_p10, %p4329_p9 }
 0x142   : > { %p4325_p8 = pneg %p4324_p6 }
 0x144   : > { %p4332_p12 = pnand %p4331_p11, %p4325_p8 }
 0x146   : > { %4335 = shalt.err (!%p4332_p12)
}
 0x147   : > { %3762 = dma.hbm_to_vmem [thread:$0]  (!%p4626_p5), %s5441_s14, 16, %s687_s1, [#allocation14]  }
 0x148   : > { %s4474_s6 = smov [#allocation18]   ;;  %s4475_s10 = smov [#allocation21]  }
 0x149   : > { %s708_s17 = sshll.u32 %s4474_s6, 4  ;;  %s736_s30 = sshll.u32 %s4475_s10, 4  ;;  %s709_s17 = int_to_ptr.vmem [resolvable:$true] %s708_s17  ;;  %s737_s30 = int_to_ptr.vmem [resolvable:$true] %s736_s30 }
 0x14a   : > { %s4336_s4 = scalar_lea.hbm %s5443_s16, 16 }
 0x14b   : > { %p4337_p2 = scmp.ne.s32.totalorder %s5443_s16, %s4336_s4  ;;  %p4343_p0 = scmp.lt.u32.totalorder %s4336_s4, %s5443_s16 }
 0x14d   : > { %p4339_p3 = pnand %p4337_p2, %p4642_p7 }
 0x14f   : > { %p4340_p13 = pneg %p4339_p3 }
 0x151   : > { %p4345_p1 = pnand %p4343_p0, %p4340_p13 }
 0x153   : > { %4348 = shalt.err (!%p4345_p1)
}
 0x154   : > { %s4349_s1 = scalar_lea.vmem %s709_s17, 16  ;;  %s4356_s23 = scalar_lea.vmem %s709_s17, 32 }
 0x155   : > { %p4350_p4 = scmp.ne.s32.totalorder %s709_s17, %s4349_s1  ;;  %p4357_p9 = scmp.lt.s32.totalorder %s709_s17, %s709_s17 }
 0x156   : > { %p4358_p10 = scmp.lt.s32.totalorder %s4356_s23, %s4349_s1 }
 0x157   : > { %p4352_p6 = pnand %p4350_p4, %p4642_p7 }
 0x158   : > { %p4359_p11 = por %p4358_p10, %p4357_p9 }
 0x159   : > { %p4353_p8 = pneg %p4352_p6 }
 0x15b   : > { %p4360_p12 = pnand %p4359_p11, %p4353_p8 }
 0x15d   : > { %4363 = shalt.err (!%p4360_p12)
}
 0x15e   : > { %3768 = dma.hbm_to_vmem [thread:$0]  (!%p4626_p5), %s5443_s16, 16, %s709_s17, [#allocation17]  }
 0x15f   : > { %s4364_s28 = scalar_lea.hbm %s5447_s20, 16 }
 0x160   : > { %p4365_p2 = scmp.ne.s32.totalorder %s5447_s20, %s4364_s28  ;;  %p4371_p0 = scmp.lt.u32.totalorder %s4364_s28, %s5447_s20 }
 0x162   : > { %p4367_p3 = pnand %p4365_p2, %p4642_p7 }
 0x164   : > { %p4368_p13 = pneg %p4367_p3 }
 0x166   : > { %p4373_p1 = pnand %p4371_p0, %p4368_p13 }
 0x168   : > { %4376 = shalt.err (!%p4373_p1)
}
 0x169   : > { %s4377_s7 = scalar_lea.vmem %s737_s30, 16  ;;  %s4384_s17 = scalar_lea.vmem %s737_s30, 32 }
 0x16a   : > { %p4378_p4 = scmp.ne.s32.totalorder %s737_s30, %s4377_s7  ;;  %p4385_p9 = scmp.lt.s32.totalorder %s737_s30, %s737_s30 }
 0x16b   : > { %p4386_p10 = scmp.lt.s32.totalorder %s4384_s17, %s4377_s7 }
 0x16c   : > { %p4380_p6 = pnand %p4378_p4, %p4642_p7 }
 0x16d   : > { %p4387_p11 = por %p4386_p10, %p4385_p9 }
 0x16e   : > { %p4381_p8 = pneg %p4380_p6 }
 0x170   : > { %p4388_p12 = pnand %p4387_p11, %p4381_p8 }
 0x172   : > { %4391 = shalt.err (!%p4388_p12)
}
 0x173   : > { %3774 = dma.hbm_to_vmem [thread:$0]  (!%p4626_p5), %s5447_s20, 16, %s737_s30, [#allocation20]  }
 0x174   : > { %s4476_s23 = smov [#allocation24]   ;;  %s4392_s10 = scalar_lea.hbm %s5449_s22, 16 }
 0x175   : > { %s758_s8 = sshll.u32 %s4476_s23, 4  ;;  %p4393_p2 = scmp.ne.s32.totalorder %s5449_s22, %s4392_s10  ;;  %s759_s8 = int_to_ptr.vmem [resolvable:$true] %s758_s8 }
 0x176   : > { %p4399_p0 = scmp.lt.u32.totalorder %s4392_s10, %s5449_s22 }
 0x177   : > { %p4395_p3 = pnand %p4393_p2, %p4642_p7 }
 0x179   : > { %p4396_p13 = pneg %p4395_p3 }
 0x17b   : > { %p4401_p1 = pnand %p4399_p0, %p4396_p13 }
 0x17d   : > { %4404 = shalt.err (!%p4401_p1)
}
 0x17e   : > { %s4405_s30 = scalar_lea.vmem %s759_s8, 16  ;;  %s4412_s26 = scalar_lea.vmem %s759_s8, 32 }
 0x17f   : > { %p4406_p4 = scmp.ne.s32.totalorder %s759_s8, %s4405_s30  ;;  %p4413_p9 = scmp.lt.s32.totalorder %s759_s8, %s759_s8 }
 0x180   : > { %p4414_p10 = scmp.lt.s32.totalorder %s4412_s26, %s4405_s30 }
 0x181   : > { %p4408_p6 = pnand %p4406_p4, %p4642_p7 }
 0x182   : > { %p4415_p11 = por %p4414_p10, %p4413_p9 }
 0x183   : > { %p4409_p8 = pneg %p4408_p6 }
 0x185   : > { %p4416_p12 = pnand %p4415_p11, %p4409_p8 }
 0x187   : > { %4419 = shalt.err (!%p4416_p12)
}
 0x188   : > { %3780 = dma.hbm_to_vmem [thread:$0]  (!%p4626_p5), %s5449_s22, 16, %s759_s8, [#allocation23]  }
 0x189   : > { %p5485_p2 = scmp.ne.s32.totalorder %s5476_s5, 0 }
 0x18a   : > { %p5486_p3 = scmp.eq.s32.totalorder (!%p5485_p2), %s4609_s25, 0 }
 0x18b   : > { %792 = sbr.rel (%p5485_p2) target bundleno = 5559 (0x15b7), region = 112 }
 0x192   : > { %4425 = dma.done.wait (%p5486_p3), [#allocation3], 1024   ;;  %p5487_p7 = pmov %p5486_p3 }
 0x193   : > { %p5488_p13 = pmov %p5486_p3 }
 0x194   : > { %4427 = vsyncadd (%p5487_p7), [#allocation3], 4294966272 }
 0x195   : > { %4429 = dma.done.wait (%p5488_p13), [#allocation5], 32   ;;  %p5489_p0 = pmov %p5486_p3 }
 0x197   : > { %4431 = vsyncadd (%p5489_p0), [#allocation5], 4294967264  ;;  %p5490_p1 = pmov %p5489_p0 }
 0x198   : > { %p5491_p5 = pmov %p5489_p0 }
 0x199   : > { %4433 = dma.done.wait (%p5490_p1), [#allocation8], 1040  }
 0x19a   : > { %4435 = vsyncadd (%p5491_p5), [#allocation8], 4294966256  ;;  %p5492_p4 = pmov %p5489_p0 }
 0x19b   : > { %p5493_p6 = pmov %p5489_p0 }
 0x19c   : > { %4437 = dma.done.wait (%p5492_p4), [#allocation11], 48  }
 0x19d   : > { %4439 = vsyncadd (%p5493_p6), [#allocation11], 4294967248  ;;  %p5494_p8 = pmov %p5489_p0 }
 0x19e   : > { %p5495_p9 = pmov %p5489_p0 }
 0x19f   : > { %4441 = dma.done.wait (%p5494_p8), [#allocation14], 1040  }
 0x1a0   : > { %4443 = vsyncadd (%p5495_p9), [#allocation14], 4294966256  ;;  %p5496_p10 = pmov %p5489_p0 }
 0x1a1   : > { %p5497_p11 = pmov %p5489_p0 }
 0x1a2   : > { %4445 = dma.done.wait (%p5496_p10), [#allocation17], 32  }
 0x1a3   : > { %4447 = vsyncadd (%p5497_p11), [#allocation17], 4294967264  ;;  %p5498_p12 = pmov %p5489_p0 }
 0x1a4   : > { %p5499_p2 = pmov %p5489_p0 }
 0x1a5   : > { %4449 = dma.done.wait (%p5498_p12), [#allocation20], 48  }
 0x1a6   : > { %4451 = vsyncadd (%p5499_p2), [#allocation20], 4294967248  ;;  %p5500_p3 = pmov %p5489_p0 }
 0x1a7   : > { %p5501_p7 = pmov %p5489_p0 }
 0x1a8   : > { %4453 = dma.done.wait (%p5500_p3), [#allocation23], 32  }
 0x1a9   : > { %4455 = vsyncadd (%p5501_p7), [#allocation23], 4294967264  ;;  %v4477_v0 = vmov 0   ;;  %v4478_v1 = vmov 0.0   ;;  %s5502_s2 = sld [smem:[#allocation37_spill]]  ;;  %p918_p13 = scmp.lt.s32.totalorder %s4609_s25, 1  ;;  %v972_v28 = vlaneseq }
 0x1aa   : > { %1147 = vmatprep.mubr.bf16.mxu0 %v4477_v0  ;;  %3499 = vmatprep.subr.bf16.mxu1 %v4478_v1  ;;  %s5503_s6 = sld [smem:[#allocation34_spill]]  ;;  %vm4479_vm0 = vmmov 0   ;;  %s5504_s1 = sld [smem:[#allocation38_spill]]  ;;  %vm1200_vm1 = vcmask 261120   ;;  %vm1265_vm2 = vcmask 1043456   ;;  %vm1249_vm3 = vcmask 64512  }
 0x1ab   : > { %s5512_s25 = smov (!%p918_p13, %s4609_s25), 1  ;;  %3515 = vmatprep.mubr.msk.bf16.mxu1 %vm4479_vm0, %v4478_v1  ;;  %v973_v29 = vshrl.u32 %v972_v28, 7  ;;  %s4480_s23 = smov 96   ;;  %vm1661_vm4 = vcmask 523264   ;;  %vm1663_vm5 = vcmask 785408  }
 0x1ac   : > { %s5009_s8 = sshll.u32 %s5512_s25, 3  ;;  %s4481_s19 = smov 64  }
 0x1ad   : > { %v5073_v30 = vsub.s32 1, %v973_v29  ;;  %v5078_v32 = vsub.s32 0, %v973_v29  ;;  %v982_v44 = vsub.s32 2, %v973_v29  ;;  %s5505_s13 = sld [smem:[#allocation36_spill]]  ;;  %s5506_s5 = sld [smem:[#allocation35_spill]] }
 0x1ae   : > { %s5508_s0 = sld [smem:[#allocation46_spill]]  ;;  %s5509_s28 = sld [smem:[#allocation47_spill]] }
 0x1af   : > { %v3842_v2 = vld [vmem:[%s5502_s2 + $0x4] ss:$12 sps:$4 sm:$0xff]   ;;  %v3844_v3 = vld [vmem:[%s5502_s2] ss:$12 sps:$4 sm:$0xff]   ;;  %v3845_v4 = vld [vmem:[%s5502_s2 + $0x1c] ss:$12 sps:$4 sm:$0xff]  }
 0x1b0   : > { %1115 = vmatprep.subr.bf16.mxu0 %v3842_v2  ;;  %v3847_v5 = vld [vmem:[%s5502_s2 + $0x18] ss:$12 sps:$4 sm:$0xff]   ;;  %v3848_v6 = vld [vmem:[%s5502_s2 + $0x34] ss:$12 sps:$4 sm:$0xff]   ;;  %v3850_v7 = vld [vmem:[%s5502_s2 + $0x30] ss:$12 sps:$4 sm:$0xff]   ;;  %s921_s10 = scalar_lea.vmem %s5503_s6, %s5009_s8 }
 0x1b1   : > { %1116 = vmatpush1.bf16.msra.mxu0 %v3844_v3  ;;  %v3851_v8 = vld [vmem:[%s5502_s2 + $0x4c] ss:$12 sps:$4 sm:$0xff]   ;;  %v3853_v9 = vld [vmem:[%s5502_s2 + $0x48] ss:$12 sps:$4 sm:$0xff]   ;;  %v3854_v11 = vld [vmem:[%s5502_s2 + $0x64] ss:$12 sps:$4 sm:$0xff]  }
 0x1b2   : > { %1117 = vmatprep.subr.bf16.mxu0 %v3845_v4  ;;  %v3866_v10 = vld [vmem:[%s5502_s2 + $0x8] ss:$12 sps:$4 sm:$0xff]   ;;  %v3867_v12 = vld [vmem:[%s5502_s2 + $0x20] ss:$12 sps:$4 sm:$0xff]   ;;  %v3859_v15 = vld [vmem:[%s5502_s2 + $0x78] ss:$12 sps:$4 sm:$0xff]  }
 0x1b3   : > { %3500 = vmatpush3.bf16.msra.mxu1 %v3866_v10  ;;  %v3856_v13 = vld [vmem:[%s5502_s2 + $0x60] ss:$12 sps:$4 sm:$0xff]   ;;  %v3857_v14 = vld [vmem:[%s5502_s2 + $0x7c] ss:$12 sps:$4 sm:$0xff]   ;;  %v3868_v16 = vld [vmem:[%s5502_s2 + $0x38] ss:$12 sps:$4 sm:$0xff]   ;;  %s929_s4 = scalar_lea.vmem %s5505_s13, %s5009_s8  ;;  %s925_s27 = scalar_lea.vmem %s5506_s5, %s5009_s8 }
 0x1b4   : > { %3501 = vmatprep.subr.bf16.mxu1 %v4478_v1  ;;  %v3860_v17 = vld [vmem:[%s5502_s2 + $0x94] ss:$12 sps:$4 sm:$0xff]   ;;  %v3869_v18 = vld [vmem:[%s5502_s2 + $0x50] ss:$12 sps:$4 sm:$0xff]   ;;  %v3863_v20 = vld [vmem:[%s5502_s2 + $0xac] ss:$12 sps:$4 sm:$0xff]   ;;  %s933_s13 = scalar_lea.vmem %s5509_s28, %s5009_s8 }
 0x1b5   : > { %1118 = vmatpush1.bf16.msra.mxu0 %v3847_v5  ;;  %v3862_v19 = vld [vmem:[%s5502_s2 + $0x90] ss:$12 sps:$4 sm:$0xff]   ;;  %v3870_v21 = vld [vmem:[%s5502_s2 + $0x68] ss:$12 sps:$4 sm:$0xff]   ;;  %v5048_v23 = vld [vmem:[%s921_s10] sm:$0xff]  ;;  %s4482_s6 = smov 32  }
 0x1b6   : > { %1119 = vmatprep.subr.bf16.mxu0 %v3848_v6  ;;  %v3865_v22 = vld [vmem:[%s5502_s2 + $0xa8] ss:$12 sps:$4 sm:$0xff]   ;;  %v3871_v24 = vld [vmem:[%s5502_s2 + $0x80] ss:$12 sps:$4 sm:$0xff]   ;;  %v937_v25 = vpack.c.bf16 %v5048_v23, %v5048_v23  ;;  %v3872_v26 = vld [vmem:[%s5502_s2 + $0x98] ss:$12 sps:$4 sm:$0xff]  }
 0x1b7   : > { %3502 = vmatpush3.bf16.msra.mxu1 %v3867_v12  ;;  %v3873_v27 = vld [vmem:[%s5502_s2 + $0xb0] ss:$12 sps:$4 sm:$0xff]   ;;  %v970_v31 = vld [vmem:[%s5504_s1] sm:$0x7] }
 0x1b8   : > { %3503 = vmatprep.subr.bf16.mxu1 %v4478_v1  ;;  %v979_v33 = vrot.slane %v970_v31, %v5073_v30  ;;  %v975_v34 = vrot.slane %v970_v31, %v5078_v32  ;;  %v983_v45 = vrot.slane %v970_v31, %v982_v44  ;;  %v5101_v54 = vld [vmem:[%s929_s4] sm:$0xff] }
 0x1b9   : > { %1120 = vmatpush1.bf16.msra.mxu0 %v3850_v7 }
 0x1ba   : > { %1121 = vmatprep.subr.bf16.mxu0 %v3851_v8 }
 0x1bb   : > { %3504 = vmatpush3.bf16.msra.mxu1 %v3868_v16 }
 0x1bc   : > { %3505 = vmatprep.subr.bf16.mxu1 %v4478_v1 }
 0x1bd   : > { %1122 = vmatpush1.bf16.msra.mxu0 %v3853_v9 }
 0x1be   : > { %1123 = vmatprep.subr.bf16.mxu0 %v3854_v11 }
 0x1bf   : > { %3506 = vmatpush3.bf16.msra.mxu1 %v3869_v18 }
 0x1c0   : > { %3507 = vmatprep.subr.bf16.mxu1 %v4478_v1 }
 0x1c1   : > { %1124 = vmatpush1.bf16.msra.mxu0 %v3856_v13 }
 0x1c2   : > { %1125 = vmatprep.subr.bf16.mxu0 %v3857_v14 }
 0x1c3   : > { %3508 = vmatpush3.bf16.msra.mxu1 %v3870_v21 }
 0x1c4   : > { %3509 = vmatprep.subr.bf16.mxu1 %v4478_v1 }
 0x1c5   : > { %1126 = vmatpush1.bf16.msra.mxu0 %v3859_v15 }
 0x1c6   : > { %1127 = vmatprep.subr.bf16.mxu0 %v3860_v17 }
 0x1c7   : > { %3510 = vmatpush3.bf16.msra.mxu1 %v3871_v24 }
 0x1c8   : > { %3511 = vmatprep.subr.bf16.mxu1 %v4478_v1 }
 0x1c9   : > { %1128 = vmatpush1.bf16.msra.mxu0 %v3862_v19 }
 0x1ca   : > { %1129 = vmatprep.subr.bf16.mxu0 %v3863_v20 }
 0x1cb   : > { %3512 = vmatpush3.bf16.msra.mxu1 %v3872_v26 }
 0x1cc   : > { %3513 = vmatprep.subr.bf16.mxu1 %v4478_v1 }
 0x1cd   : > { %1130 = vmatpush1.bf16.msra.mxu0 %v3865_v22 }
 0x1ce   : > { %3543 = vmatprep.subr.bf16.mxu0 %v4478_v1 }
 0x1cf   : > { %3514 = vmatpush3.bf16.msra.mxu1 %v3873_v27 }
 0x1d0   : > { %1148 = vmatmul.mubr.bf16.vlgmr.msra.gmra.mrb[0].mxu0 %v937_v25  ;;  %3519 = vmatprep.subr.bf16.mxu1 %v4478_v1 }
 0x1d1   : > { %3545 = vmatprep.mubr.msk.bf16.mxu0 %vm4479_vm0, %v4478_v1 }
 0x1d2   : > { %3516 = vmatmul.mubr.bf16.vlgmr.msra.gmra.mrb[0].mxu1 %v937_v25 }
 0x1d3   : > { %3521 = vmatprep.mubr.msk.bf16.mxu1 %vm4479_vm0, %v4478_v1 }
 0x2a3   : > { %v1149_v35 = vpop.f32.mrb[0].mxu0 }
 0x2a4   : > { %v1151_v36 = vpop.f32.mrb[1].mxu0  ;;  %v1150_v40 = vadd.f32 %v1149_v35, %v975_v34 }
 0x2a5   : > { %v1152_v37 = vadd.f32 %v1151_v36, %v979_v33  ;;  %v1153_v38 = vpop.f32.mrb[2].mxu0  ;;  %v1190_v46 = vpop.f32.mrb[0].mxu1 }
 0x2a6   : > { %v1154_v39 = vpop.f32.mrb[3].mxu0  ;;  %v1197_v43 = vpack.c.bf16 %v1150_v40, %v1150_v40  ;;  %v1191_v47 = vadd.f32 %v1190_v46, %v983_v45  ;;  %v3517_v48 = vpop.f32.mrb[1].mxu1 }
 0x2a7   : > { %v1198_v41 = vpack.c.bf16 %v1152_v37, %v1152_v37  ;;  %v1193_v49 = vpop.f32.mrb[2].mxu1 }
 0x2a8   : > { %v5092_v50 = vpack.c.bf16 %v1191_v47, %v1191_v47  ;;  %v3518_v51 = vpop.f32.mrb[3].mxu1 }
 0x2a9   : > { %1313 = vrot.lane.b32.xlu1 %v1198_v41, %s4480_s23  ;;  %v1205_v42 = vsel %vm1200_vm1, %v1198_v41, 0 }
 0x2aa   : > { %3520 = vmatpush3.bf16.xpose.msra.mxu1 %v1205_v42  ;;  %v1267_v52 = vsel %vm1265_vm2, %v5092_v50, 0 }
 0x2ab   : > { %3525 = vmatprep.subr.bf16.mxu1 %v4478_v1 }
 0x2ad   : > { %1310 = vrot.lane.b32.xlu1 %v1197_v43, %s4480_s23 }
 0x2b1   : > { %1424 = vrot.lane.b32.xlu1 %v1197_v43, %s4481_s19  ;;  %3522 = vmatmul.mubr.msk.bf16.vlgmr.msra.gmra.mrb[4].mxu1 %vm1200_vm1, %v1197_v43 }
 0x2b2   : > { %3527 = vmatprep.mubr.msk.bf16.mxu1 %vm4479_vm0, %v4478_v1  ;;  %3526 = vmatpush3.bf16.msra.mxu1 %v1267_v52 }
 0x2b3   : > { %3531 = vmatprep.subr.bf16.mxu1 %v4478_v1 }
 0x2b5   : > { %1538 = vrot.lane.b32.xlu1 %v1198_v41, %s4482_s6 }
 0x2b9   : > { %1536 = vrot.lane.b32.xlu1 %v1197_v43, %s4482_s6 }
 0x31b   : > { %v1314_v4 = vpop.permute.xlu1 %1313 }
 0x31c   : > { %v1319_v15 = vsel %vm1200_vm1, %v1314_v4, 0 }
 0x31f   : > { %v1311_v5 = vpop.permute.xlu1 %1310 }
 0x323   : > { %v1425_v7 = vpop.permute.xlu1 %1424 }
 0x327   : > { %v1539_v10 = vpop.permute.xlu1 %1538 }
 0x328   : > { %v1544_v13 = vsel %vm1200_vm1, %v1539_v10, 0 }
 0x32b   : > { %v1537_v16 = vpop.permute.xlu1 %1536 }
 0x384   : > { %v1241_v53 = vpop.f32.mrb[4].mxu1 }
 0x385   : > { %v1247_v55 = vmul.f32 0.17677669, %v1241_v53  ;;  %v3523_v56 = vpop.f32.mrb[5].mxu1 }
 0x386   : > { %v1244_v57 = vpop.f32.mrb[6].mxu1 }
 0x387   : > { %v3524_v58 = vpop.f32.mrb[7].mxu1  ;;  %v1248_v59 = vadd.f32 %v1247_v55, %v5101_v54 }
 0x389   : > { %v1250_v60 = vsel %vm1249_vm3, %v1248_v59, -inf }
 0x38a   : > { %1251 = vmax.xlane.f32.xlu0 %v1250_v60 }
 0x417   : > { %v1252_v61 = vpop.xlane.xlu0 %1251 }
 0x418   : > { %v1253_v62 = vsub.f32 %v1248_v59, %v1252_v61 }
 0x41a   : > { %v1254_v63 = vmul.f32 1.442695, %v1253_v62 }
 0x41c   : > { %3962 = vpow2.f32 %v1254_v63 }
 0x426   : > { %v3963_v2 = vpop.eup %3962 }
 0x427   : > { %v1256_v3 = vsel %vm1249_vm3, %v3963_v2, 0.0 }
 0x428   : > { %1257 = vadd.xlane.f32.xlu0 %v1256_v3 }
 0x43e   : > { %1426 = vrot.lane.b32.xlu0 %v1198_v41, %s4481_s19 }
 0x4b5   : > { %v1258_v6 = vpop.xlane.xlu0 %1257 }
 0x4b6   : > { %3964 = vrcp.f32 %v1258_v6 }
 0x4b9   : > { %v1427_v8 = vpop.permute.xlu0 %1426 }
 0x4ba   : > { %v1432_v9 = vsel %vm1200_vm1, %v1427_v8, 0 }
 0x4bb   : > { %3544 = vmatpush3.bf16.xpose.msra.mxu0 %v1432_v9 }
 0x4bc   : > { %3555 = vmatprep.subr.bf16.mxu0 %v4478_v1 }
 0x4c0   : > { %v3965_v11 = vpop.eup %3964 }
 0x4c1   : > { %v1260_v12 = vmul.f32 %v3965_v11, %v3963_v2 }
 0x4c2   : > { %3546 = vmatmul.mubr.msk.bf16.vlgmr.msra.gmra.mrb[4].mxu0 %vm1200_vm1, %v1425_v7 }
 0x4c3   : > { %3556 = vmatpush3.bf16.xpose.msra.mxu0 %v1544_v13  ;;  %v1261_v14 = vpack.c.bf16 %v1260_v12, %v1260_v12  ;;  %3557 = vmatprep.mubr.msk.bf16.mxu0 %vm4479_vm0, %v4478_v1 }
 0x4c4   : > { %3567 = vmatprep.subr.bf16.mxu0 %v4478_v1 }
 0x4c5   : > { %3528 = vmatmul.mubr.msk.bf16.vlgmr.msra.gmra.mrb[8].mxu1 %vm1249_vm3, %v1261_v14 }
 0x4c6   : > { %3532 = vmatpush3.bf16.xpose.msra.mxu1 %v1319_v15  ;;  %3533 = vmatprep.mubr.msk.bf16.mxu1 %vm4479_vm0, %v4478_v1 }
 0x4c7   : > { %3537 = vmatprep.subr.bf16.mxu1 %v4478_v1 }
 0x4ca   : > { %3558 = vmatmul.mubr.msk.bf16.vlgmr.msra.gmra.mrb[8].mxu0 %vm1200_vm1, %v1537_v16  ;;  %v3874_v16 = vld [vmem:[#allocation2] sm:$0xff]  }
 0x4cb   : > { %3583 = vmatprep.mubr.msk.bf16.mxu0 %vm4479_vm0, %v4478_v1  ;;  %3568 = vmatpush3.bf16.msra.mxu0 %v3874_v16  ;;  %v3911_v16 = vld [vmem:[#allocation9 + $0x28] sm:$0xff]  }
 0x4cc   : > { %3569 = vmatprep.subr.bf16.mxu0 %v4478_v1 }
 0x4cd   : > { %3534 = vmatmul.mubr.msk.bf16.vlgmr.msra.gmra.mrb[12].mxu1 %vm1200_vm1, %v1311_v5 }
 0x4ce   : > { %3539 = vmatprep.mubr.msk.bf16.mxu1 %vm4479_vm0, %v4478_v1 }
 0x595   : > { %v1468_v17 = vpop.f32.mrb[4].mxu0 }
 0x596   : > { %v1474_v18 = vmul.f32 0.17677669, %v1468_v17  ;;  %v3547_v19 = vpop.f32.mrb[5].mxu0  ;;  %v3875_v17 = vld [vmem:[#allocation2 + $0x8] sm:$0xff]  }
 0x597   : > { %v1471_v20 = vpop.f32.mrb[6].mxu0  ;;  %3570 = vmatpush3.bf16.msra.mxu0 %v3875_v17  ;;  %v3877_v19 = vld [vmem:[#allocation2 + $0x18] sm:$0xff]  }
 0x598   : > { %v5125_v21 = vpop.f32.mrb[8].mxu1  ;;  %v3548_v22 = vpop.f32.mrb[7].mxu0  ;;  %v1475_v24 = vadd.f32 %v1474_v18, %v5101_v54  ;;  %v3876_v18 = vld [vmem:[#allocation2 + $0x10] sm:$0xff]   ;;  %3571 = vmatprep.subr.bf16.mxu0 %v4478_v1  ;;  %v3878_v20 = vld [vmem:[#allocation2 + $0x20] sm:$0xff]  }
 0x599   : > { %v3529_v25 = vpop.f32.mrb[9].mxu1  ;;  %v3879_v22 = vld [vmem:[#allocation2 + $0x28] sm:$0xff]  }
 0x59a   : > { %v1306_v26 = vpop.f32.mrb[10].mxu1  ;;  %v1476_v27 = vsel %vm1249_vm3, %v1475_v24, -inf }
 0x59b   : > { %1477 = vmax.xlane.f32.xlu0 %v1476_v27  ;;  %v3530_v28 = vpop.f32.mrb[11].mxu1  ;;  %3572 = vmatpush3.bf16.msra.mxu0 %v3876_v18  ;;  %v3912_v18 = vld [vmem:[#allocation9 + $0x30] sm:$0xff]  }
 0x59c   : > { %3573 = vmatprep.subr.bf16.mxu0 %v4478_v1 }
 0x59d   : > { %v1580_v29 = vpop.f32.mrb[8].mxu0 }
 0x59e   : > { %v3559_v31 = vpop.f32.mrb[9].mxu0  ;;  %v1586_v36 = vmul.f32 0.17677669, %v1580_v29  ;;  %v3881_v29 = vld [vmem:[#allocation2 + $0x38] sm:$0xff]  }
 0x59f   : > { %v1583_v33 = vpop.f32.mrb[10].mxu0  ;;  %3574 = vmatpush3.bf16.msra.mxu0 %v3877_v19  ;;  %v3913_v19 = vld [vmem:[#allocation9 + $0x38] sm:$0xff]  }
 0x5a0   : > { %v1355_v34 = vpop.f32.mrb[12].mxu1  ;;  %v3560_v35 = vpop.f32.mrb[11].mxu0  ;;  %v1587_v43 = vadd.f32 %v1586_v36, %v5101_v54  ;;  %3575 = vmatprep.subr.bf16.mxu0 %v4478_v1 }
 0x5a1   : > { %v1361_v37 = vmul.f32 0.17677669, %v1355_v34  ;;  %v3535_v38 = vpop.f32.mrb[13].mxu1 }
 0x5a2   : > { %v1358_v39 = vpop.f32.mrb[14].mxu1  ;;  %v1588_v44 = vsel %vm1249_vm3, %v1587_v43, -inf }
 0x5a3   : > { %v3536_v40 = vpop.f32.mrb[15].mxu1  ;;  %v1362_v41 = vadd.f32 %v1361_v37, %v5101_v54  ;;  %3576 = vmatpush3.bf16.msra.mxu0 %v3878_v20 }
 0x5a4   : > { %3577 = vmatprep.subr.bf16.mxu0 %v4478_v1 }
 0x5a5   : > { %v1363_v42 = vsel %vm1249_vm3, %v1362_v41, -inf }
 0x5a6   : > { %1364 = vmax.xlane.f32.xlu1 %v1363_v42 }
 0x5a7   : > { %3578 = vmatpush3.bf16.msra.mxu0 %v3879_v22 }
 0x5a8   : > { %3579 = vmatprep.subr.bf16.mxu0 %v4478_v1 }
 0x5aa   : > { %1589 = vmax.xlane.f32.xlu1 %v1588_v44 }
 0x628   : > { %v1478_v45 = vpop.xlane.xlu0 %1477 }
 0x629   : > { %v1479_v46 = vsub.f32 %v1475_v24, %v1478_v45  ;;  %v3880_v24 = vld [vmem:[#allocation2 + $0x30] sm:$0xff]  }
 0x62a   : > { %3580 = vmatpush3.bf16.msra.mxu0 %v3880_v24 }
 0x62b   : > { %v1480_v47 = vmul.f32 1.442695, %v1479_v46  ;;  %3581 = vmatprep.subr.bf16.mxu0 %v4478_v1 }
 0x62d   : > { %3966 = vpow2.f32 %v1480_v47  ;;  %v3317_v47 = vld [vmem:[#allocation4] ss:$0 sm:$0xff] }
 0x62e   : > { %3582 = vmatpush3.bf16.msra.mxu0 %v3881_v29 }
 0x633   : > { %v1365_v48 = vpop.xlane.xlu1 %1364 }
 0x634   : > { %v1366_v49 = vsub.f32 %v1362_v41, %v1365_v48 }
 0x636   : > { %v1367_v56 = vmul.f32 1.442695, %v1366_v49 }
 0x637   : > { %v3967_v51 = vpop.eup %3966  ;;  %v1590_v52 = vpop.xlane.xlu1 %1589 }
 0x638   : > { %v1591_v53 = vsub.f32 %v1587_v43, %v1590_v52  ;;  %v1482_v55 = vsel %vm1249_vm3, %v3967_v51, 0.0 }
 0x639   : > { %1483 = vadd.xlane.f32.xlu0 %v1482_v55 }
 0x63a   : > { %v1592_v57 = vmul.f32 1.442695, %v1591_v53 }
 0x63c   : > { %3968 = vpow2.f32 %v1592_v57  ;;  %v3887_v57 = vld [vmem:[%s5438_s11 + $0x14] ss:$8 sps:$4 sm:$0xff]  }
 0x63d   : > { %3970 = vpow2.f32 %v1367_v56  ;;  %v3884_v56 = vld [vmem:[%s5438_s11 + $0x4] ss:$8 sps:$4 sm:$0xff]  }
 0x63e   : > { %2026 = vmatprep.subr.bf16.mxu0 %v3884_v56 }
 0x646   : > { %v3969_v54 = vpop.eup %3968 }
 0x647   : > { %v1594_v58 = vsel %vm1249_vm3, %v3969_v54, 0.0  ;;  %v3971_v59 = vpop.eup %3970 }
 0x648   : > { %1595 = vadd.xlane.f32.xlu1 %v1594_v58  ;;  %v1369_v60 = vsel %vm1249_vm3, %v3971_v59, 0.0  ;;  %v3890_v58 = vld [vmem:[%s5438_s11 + $0x24] ss:$8 sps:$4 sm:$0xff]  }
 0x64c   : > { %1370 = vadd.xlane.f32.xlu1 %v1369_v60  ;;  %v3888_v60 = vld [vmem:[%s5438_s11 + $0x20] ss:$8 sps:$4 sm:$0xff]  }
 0x64f   : > { %1376 = vrot.lane.b32.xlu0 %v5092_v50, %s4480_s23 }
 0x65d   : > { %1488 = vrot.lane.b32.xlu1 %v5092_v50, %s4481_s19 }
 0x661   : > { %1600 = vrot.lane.b32.xlu1 %v5092_v50, %s4482_s6 }
 0x6c6   : > { %v1484_v61 = vpop.xlane.xlu0 %1483 }
 0x6ca   : > { %v1377_v62 = vpop.permute.xlu0 %1376 }
 0x6cb   : > { %v1382_v63 = vsel %vm1265_vm2, %v1377_v62, 0  ;;  %v3892_v62 = vld [vmem:[%s5438_s11 + $0x30] ss:$8 sps:$4 sm:$0xff]  }
 0x6cc   : > { %3538 = vmatpush3.bf16.msra.mxu1 %v1382_v63  ;;  %v3898_v63 = vld [vmem:[%s5438_s11 + $0x44] ss:$8 sps:$4 sm:$0xff]  }
 0x6cd   : > { %3549 = vmatprep.subr.bf16.mxu1 %v4478_v1 }
 0x6d5   : > { %v1596_v2 = vpop.xlane.xlu1 %1595 }
 0x6d9   : > { %v1371_v3 = vpop.xlane.xlu1 %1370 }
 0x6da   : > { %3972 = vrcp.f32 %v1371_v3 }
 0x6db   : > { %3974 = vrcp.f32 %v1484_v61  ;;  %v3894_v61 = vld [vmem:[%s5438_s11 + $0x34] ss:$8 sps:$4 sm:$0xff]  }
 0x6dc   : > { %3976 = vrcp.f32 %v1596_v2  ;;  %v3896_v2 = vld [vmem:[%s5438_s11 + $0x40] ss:$8 sps:$4 sm:$0xff]  }
 0x6dd   : > { %v1489_v6 = vpop.permute.xlu1 %1488 }
 0x6de   : > { %v1494_v9 = vsel %vm1265_vm2, %v1489_v6, 0 }
 0x6e1   : > { %v1601_v10 = vpop.permute.xlu1 %1600 }
 0x6e2   : > { %v1606_v13 = vsel %vm1265_vm2, %v1601_v10, 0  ;;  %v3906_v10 = vld [vmem:[%s5438_s11 + $0x64] ss:$8 sps:$4 sm:$0xff]  }
 0x6e4   : > { %v3973_v4 = vpop.eup %3972 }
 0x6e5   : > { %v1373_v5 = vmul.f32 %v3973_v4, %v3971_v59  ;;  %v3975_v8 = vpop.eup %3974  ;;  %v3895_v59 = vld [vmem:[#allocation9 + $0x8] sm:$0xff]  }
 0x6e6   : > { %v1486_v50 = vmul.f32 %v3975_v8, %v3967_v51  ;;  %v3977_v12 = vpop.eup %3976  ;;  %v3902_v8 = vld [vmem:[%s5438_s11 + $0x54] ss:$8 sps:$4 sm:$0xff]  }
 0x6e7   : > { %v1374_v7 = vpack.c.bf16 %v1373_v5, %v1373_v5  ;;  %v1598_v14 = vmul.f32 %v3977_v12, %v3969_v54  ;;  %v3891_v54 = vld [vmem:[#allocation9] sm:$0xff]  }
 0x6e8   : > { %v1487_v11 = vpack.c.bf16 %v1486_v50, %v1486_v50  ;;  %v3903_v50 = vld [vmem:[#allocation9 + $0x18] sm:$0xff]   ;;  %v3907_v12 = vld [vmem:[#allocation9 + $0x20] sm:$0xff]  }
 0x6e9   : > { %3540 = vmatmul.mubr.msk.bf16.vlgmr.msra.gmra.mrb[16].mxu1 %vm1249_vm3, %v1374_v7  ;;  %v1599_v15 = vpack.c.bf16 %v1598_v14, %v1598_v14  ;;  %v3899_v7 = vld [vmem:[#allocation9 + $0x10] sm:$0xff]  }
 0x6ea   : > { %3550 = vmatpush3.bf16.msra.mxu1 %v1494_v9  ;;  %3551 = vmatprep.mubr.msk.bf16.mxu1 %vm4479_vm0, %v4478_v1  ;;  %v3900_v9 = vld [vmem:[%s5438_s11 + $0x50] ss:$8 sps:$4 sm:$0xff]  }
 0x6eb   : > { %3561 = vmatprep.subr.bf16.mxu1 %v4478_v1  ;;  %v3908_v14 = vld [vmem:[%s5438_s11 + $0x70] ss:$8 sps:$4 sm:$0xff]  }
 0x6f1   : > { %3552 = vmatmul.mubr.msk.bf16.vlgmr.msra.gmra.mrb[20].mxu1 %vm1249_vm3, %v1487_v11  ;;  %v3904_v11 = vld [vmem:[%s5438_s11 + $0x60] ss:$8 sps:$4 sm:$0xff]  }
 0x6f2   : > { %3562 = vmatpush3.bf16.msra.mxu1 %v1606_v13  ;;  %3563 = vmatprep.mubr.msk.bf16.mxu1 %vm4479_vm0, %v4478_v1  ;;  %v3910_v13 = vld [vmem:[%s5438_s11 + $0x74] ss:$8 sps:$4 sm:$0xff]  }
 0x6f3   : > { %3587 = vmatprep.subr.bf16.mxu1 %v4478_v1 }
 0x6f9   : > { %3564 = vmatmul.mubr.msk.bf16.vlgmr.msra.gmra.mrb[24].mxu1 %vm1249_vm3, %v1599_v15  ;;  %v936_v15 = vld [vmem:[%s925_s27] sm:$0xff] }
 0x6fa   : > { %3603 = vmatprep.mubr.msk.bf16.mxu1 %vm4479_vm0, %v4478_v1  ;;  %3588 = vmatpush3.bf16.msra.mxu1 %v3891_v54  ;;  %v1917_v17 = vpack.c.bf16 %v936_v15, %v936_v15 }
 0x6fb   : > { %3589 = vmatprep.subr.bf16.mxu1 %v4478_v1 }
 0x6fe   : > { %3590 = vmatpush3.bf16.msra.mxu1 %v3895_v59 }
 0x6ff   : > { %3591 = vmatprep.subr.bf16.mxu1 %v4478_v1 }
 0x702   : > { %3592 = vmatpush3.bf16.msra.mxu1 %v3899_v7 }
 0x703   : > { %3593 = vmatprep.subr.bf16.mxu1 %v4478_v1 }
 0x706   : > { %3594 = vmatpush3.bf16.msra.mxu1 %v3903_v50 }
 0x707   : > { %3595 = vmatprep.subr.bf16.mxu1 %v4478_v1 }
 0x70a   : > { %3596 = vmatpush3.bf16.msra.mxu1 %v3907_v12 }
 0x70b   : > { %3597 = vmatprep.subr.bf16.mxu1 %v4478_v1 }
 0x70e   : > { %3598 = vmatpush3.bf16.msra.mxu1 %v3911_v16 }
 0x70f   : > { %3599 = vmatprep.subr.bf16.mxu1 %v4478_v1 }
 0x712   : > { %3600 = vmatpush3.bf16.msra.mxu1 %v3912_v18 }
 0x713   : > { %3601 = vmatprep.subr.bf16.mxu1 %v4478_v1 }
 0x716   : > { %3602 = vmatpush3.bf16.msra.mxu1 %v3913_v19 }
 0x717   : > { %3607 = vmatprep.subr.bf16.mxu1 %v4478_v1 }
 0x7bc   : > { %v1418_v25 = vpop.f32.mrb[16].mxu1 }
 0x7bd   : > { %1649 = vrot.lane.b32.xlu0 %v1418_v25, %s4482_s6  ;;  %v3541_v26 = vpop.f32.mrb[17].mxu1 }
 0x7be   : > { %v1421_v27 = vpop.f32.mrb[18].mxu1  ;;  %v3326_v26 = vld [vmem:[#allocation6] ss:$0 sm:$0xff] }
 0x7bf   : > { %v3542_v28 = vpop.f32.mrb[19].mxu1 }
 0x7c0   : > { %v3327_v28 = vld [vmem:[#allocation7] ss:$0 sm:$0xff] }
 0x7c4   : > { %v1530_v31 = vpop.f32.mrb[20].mxu1 }
 0x7c5   : > { %1653 = vrot.lane.b32.xlu1 %v1530_v31, %s4481_s19  ;;  %v3553_v33 = vpop.f32.mrb[21].mxu1 }
 0x7c6   : > { %v1533_v34 = vpop.f32.mrb[22].mxu1 }
 0x7c7   : > { %v3554_v35 = vpop.f32.mrb[23].mxu1  ;;  %v1934_v34 = vld [vmem:[#allocation12] sm:$0x3] }
 0x7c8   : > { %v1939_v35 = vrot.slane %v1934_v34, %v5078_v32 }
 0x7cc   : > { %v1642_v36 = vpop.f32.mrb[24].mxu1 }
 0x7cd   : > { %1657 = vrot.lane.b32.xlu0 %v1642_v36, %s4480_s23  ;;  %v3565_v37 = vpop.f32.mrb[25].mxu1 }
 0x7ce   : > { %v1645_v38 = vpop.f32.mrb[26].mxu1 }
 0x7cf   : > { %v3566_v39 = vpop.f32.mrb[27].mxu1 }
 0x82f   : > { %v1650_v40 = vpop.permute.xlu0 %1649 }
 0x830   : > { %v1660_v42 = vsel %vm1200_vm1, %v5125_v21, %v1650_v40  ;;  %v3882_v21 = vld [vmem:[%s5438_s11] ss:$8 sps:$4 sm:$0xff]  }
 0x837   : > { %v1654_v41 = vpop.permute.xlu1 %1653 }
 0x838   : > { %v1662_v43 = vsel %vm1661_vm4, %v1660_v42, %v1654_v41 }
 0x83f   : > { %v1658_v44 = vpop.permute.xlu0 %1657 }
 0x840   : > { %v1664_v45 = vsel %vm1663_vm5, %v1662_v43, %v1658_v44  ;;  %v1943_v43 = vrot.slane %v1934_v34, %v5073_v30 }
 0x841   : > { %v1665_v46 = vpack.c.bf16 %v1664_v45, %v1664_v45  ;;  %v3328_v45 = vld [vmem:[#allocation10] ss:$0 sm:$0xff] }
 0x843   : > { %3584 = vmatmul.mubr.bf16.vlgmr.msra.gmra.mrb[12].mxu0 %v1665_v46 }
 0x844   : > { %2058 = vmatprep.mubr.bf16.mxu0 %v4477_v0  ;;  %2027 = vmatpush1.bf16.msra.mxu0 %v3882_v21 }
 0x845   : > { %2028 = vmatprep.subr.bf16.mxu0 %v3887_v57 }
 0x916   : > { %v1771_v48 = vpop.f32.mrb[12].mxu0 }
 0x917   : > { %v1772_v49 = vadd.f32 %v3317_v47, %v1771_v48  ;;  %v3585_v51 = vpop.f32.mrb[13].mxu0 }
 0x918   : > { %v1774_v52 = vpop.f32.mrb[14].mxu0 }
 0x919   : > { %v3586_v53 = vpop.f32.mrb[15].mxu0  ;;  %v1777_v55 = vadd.f32 %v1772_v49, %v5048_v23  ;;  %v3885_v23 = vld [vmem:[%s5438_s11 + $0x10] ss:$8 sps:$4 sm:$0xff]  }
 0x91a   : > { %2029 = vmatpush1.bf16.msra.mxu0 %v3885_v23 }
 0x91b   : > { %1780 = vadd.xlane.f32.xlu1 %v1777_v55  ;;  %2030 = vmatprep.subr.bf16.mxu0 %v3890_v58 }
 0x91e   : > { %2031 = vmatpush1.bf16.msra.mxu0 %v3888_v60 }
 0x91f   : > { %2032 = vmatprep.subr.bf16.mxu0 %v3894_v61 }
 0x922   : > { %2033 = vmatpush1.bf16.msra.mxu0 %v3892_v62 }
 0x923   : > { %2034 = vmatprep.subr.bf16.mxu0 %v3898_v63 }
 0x926   : > { %2035 = vmatpush1.bf16.msra.mxu0 %v3896_v2 }
 0x927   : > { %2036 = vmatprep.subr.bf16.mxu0 %v3902_v8 }
 0x92a   : > { %2037 = vmatpush1.bf16.msra.mxu0 %v3900_v9 }
 0x92b   : > { %2038 = vmatprep.subr.bf16.mxu0 %v3906_v10 }
 0x92e   : > { %2039 = vmatpush1.bf16.msra.mxu0 %v3904_v11 }
 0x92f   : > { %2040 = vmatprep.subr.bf16.mxu0 %v3910_v13 }
 0x932   : > { %2041 = vmatpush1.bf16.msra.mxu0 %v3908_v14 }
 0x933   : > { %3631 = vmatprep.subr.bf16.mxu0 %v4478_v1 }
 0x935   : > { %2059 = vmatmul.mubr.bf16.vlgmr.msra.gmra.mrb[16].mxu0 %v1917_v17 }
 0x936   : > { %3633 = vmatprep.mubr.msk.bf16.mxu0 %vm4479_vm0, %v4478_v1 }
 0x9a8   : > { %v1781_v3 = vpop.xlane.xlu1 %1780 }
 0x9a9   : > { %v1782_v4 = vmul.f32 0.0078125, %v1781_v3 }
 0x9ab   : > { %v1783_v5 = vsub.f32 %v1777_v55, %v1782_v4 }
 0x9ad   : > { %v1784_v6 = vmul.f32 %v1783_v5, %v1783_v5 }
 0x9af   : > { %1785 = vadd.xlane.f32.xlu0 %v1784_v6 }
 0xa08   : > { %v2060_v36 = vpop.f32.mrb[16].mxu0 }
 0xa09   : > { %v2061_v37 = vadd.f32 %v2060_v36, %v1939_v35  ;;  %v2062_v38 = vpop.f32.mrb[17].mxu0 }
 0xa0a   : > { %v2064_v39 = vpop.f32.mrb[18].mxu0  ;;  %v2063_v44 = vadd.f32 %v2062_v38, %v1943_v43 }
 0xa0b   : > { %v2068_v40 = vpack.c.bf16 %v2061_v37, %v2061_v37  ;;  %v2065_v41 = vpop.f32.mrb[19].mxu0 }
 0xa0c   : > { %v5246_v47 = vpack.c.bf16 %v2063_v44, %v2063_v44 }
 0xa0d   : > { %v2074_v42 = vsel %vm1200_vm1, %v2068_v40, 0 }
 0xa0e   : > { %v2133_v55 = vsel %vm1265_vm2, %v5246_v47, 0 }
 0xa3c   : > { %v1786_v20 = vpop.xlane.xlu0 %1785 }
 0xa3d   : > { %v1787_v22 = vmul.f32 0.0078125, %v1786_v20 }
 0xa3f   : > { %v1788_v24 = vadd.f32 1e-05, %v1787_v22 }
 0xa41   : > { %3978 = vrsqrt.f32 %v1788_v24 }
 0xa4b   : > { %v3979_v25 = vpop.eup %3978 }
 0xa4c   : > { %v1790_v27 = vmul.f32 %v3979_v25, %v1783_v5 }
 0xa4e   : > { %v1797_v29 = vmul.f32 %v3326_v26, %v1790_v27 }
 0xa50   : > { %v5236_v31 = vadd.f32 %v3327_v28, %v1797_v29 }
 0xa52   : > { %v1805_v33 = vpack.c.bf16 %v5236_v31, %v5236_v31 }
 0xa54   : > { %3604 = vmatmul.mubr.bf16.vlgmr.msra.gmra.mrb[28].mxu1 %v1805_v33 }
 0xa55   : > { %3609 = vmatprep.mubr.msk.bf16.mxu1 %vm4479_vm0, %v4478_v1  ;;  %3608 = vmatpush3.bf16.xpose.msra.mxu1 %v2074_v42 }
 0xa56   : > { %3613 = vmatprep.subr.bf16.mxu1 %v4478_v1 }
 0xb27   : > { %v1911_v46 = vpop.f32.mrb[28].mxu1 }
 0xb28   : > { %v1912_v48 = vadd.f32 %v3328_v45, %v1911_v46  ;;  %v3605_v49 = vpop.f32.mrb[29].mxu1 }
 0xb29   : > { %v1914_v51 = vpop.f32.mrb[30].mxu1 }
 0xb2a   : > { %v2067_v52 = vpack.c.bf16 %v1912_v48, %v1912_v48  ;;  %v3606_v53 = vpop.f32.mrb[31].mxu1 }
 0xb2c   : > { %3610 = vmatmul.mubr.msk.bf16.vlgmr.msra.gmra.mrb[32].mxu1 %vm1200_vm1, %v2067_v52 }
 0xb2d   : > { %3614 = vmatpush3.bf16.msra.mxu1 %v2133_v55  ;;  %3615 = vmatprep.mubr.msk.bf16.mxu1 %vm4479_vm0, %v4478_v1 }
 0xb2e   : > { %3619 = vmatprep.subr.bf16.mxu1 %v4478_v1 }
 0xbff   : > { %v2110_v21 = vpop.f32.mrb[32].mxu1 }
 0xc00   : > { %v2116_v56 = vmul.f32 0.17677669, %v2110_v21  ;;  %v3611_v57 = vpop.f32.mrb[33].mxu1 }
 0xc01   : > { %v2113_v54 = vpop.f32.mrb[34].mxu1 }
 0xc02   : > { %v3612_v23 = vpop.f32.mrb[35].mxu1  ;;  %v2117_v58 = vsel %vm1249_vm3, %v2116_v56, -inf }
 0xc03   : > { %2118 = vmax.xlane.f32.xlu0 %v2117_v58 }
 0xc19   : > { %2179 = vrot.lane.b32.xlu0 %v2068_v40, %s4480_s23 }
 0xc1d   : > { %2289 = vrot.lane.b32.xlu0 %v2067_v52, %s4481_s19 }
 0xc21   : > { %2400 = vrot.lane.b32.xlu0 %v2067_v52, %s4482_s6 }
 0xc90   : > { %v2119_v59 = vpop.xlane.xlu0 %2118 }
 0xc91   : > { %v2120_v60 = vsub.f32 %v2116_v56, %v2119_v59 }
 0xc93   : > { %v2121_v61 = vmul.f32 1.442695, %v2120_v60 }
 0xc94   : > { %v2180_v6 = vpop.permute.xlu0 %2179 }
 0xc95   : > { %3980 = vpow2.f32 %v2121_v61  ;;  %v2185_v10 = vsel %vm1200_vm1, %v2180_v6, 0 }
 0xc98   : > { %v2290_v11 = vpop.permute.xlu0 %2289 }
 0xc9c   : > { %v2401_v13 = vpop.permute.xlu0 %2400 }
 0xc9f   : > { %v3981_v62 = vpop.eup %3980 }
 0xca0   : > { %v2123_v63 = vsel %vm1249_vm3, %v3981_v62, 0.0 }
 0xca1   : > { %2124 = vadd.xlane.f32.xlu1 %v2123_v63 }
 0xcb2   : > { %2176 = vrot.lane.b32.xlu1 %v2067_v52, %s4480_s23 }
 0xcb6   : > { %2291 = vrot.lane.b32.xlu1 %v2068_v40, %s4481_s19 }
 0xcba   : > { %2402 = vrot.lane.b32.xlu1 %v2068_v40, %s4482_s6 }
 0xd2e   : > { %v2125_v2 = vpop.xlane.xlu1 %2124 }
 0xd2f   : > { %3982 = vrcp.f32 %v2125_v2 }
 0xd32   : > { %v2177_v3 = vpop.permute.xlu1 %2176 }
 0xd36   : > { %v2292_v4 = vpop.permute.xlu1 %2291 }
 0xd37   : > { %v2297_v5 = vsel %vm1200_vm1, %v2292_v4, 0 }
 0xd38   : > { %3632 = vmatpush3.bf16.xpose.msra.mxu0 %v2297_v5 }
 0xd39   : > { %v3983_v7 = vpop.eup %3982  ;;  %3643 = vmatprep.subr.bf16.mxu0 %v4478_v1 }
 0xd3a   : > { %v2127_v8 = vmul.f32 %v3983_v7, %v3981_v62  ;;  %v2403_v9 = vpop.permute.xlu1 %2402 }
 0xd3b   : > { %v2408_v12 = vsel %vm1200_vm1, %v2403_v9, 0 }
 0xd3c   : > { %v2128_v50 = vpack.c.bf16 %v2127_v8, %v2127_v8 }
 0xd3e   : > { %3616 = vmatmul.mubr.msk.bf16.vlgmr.msra.gmra.mrb[36].mxu1 %vm1249_vm3, %v2128_v50 }
 0xd3f   : > { %3620 = vmatpush3.bf16.xpose.msra.mxu1 %v2185_v10  ;;  %3634 = vmatmul.mubr.msk.bf16.vlgmr.msra.gmra.mrb[20].mxu0 %vm1200_vm1, %v2290_v11  ;;  %v3914_v10 = vld [vmem:[#allocation13] sm:$0xff]   ;;  %v3915_v11 = vld [vmem:[#allocation13 + $0x8] sm:$0xff]  }
 0xd40   : > { %3644 = vmatpush3.bf16.xpose.msra.mxu0 %v2408_v12  ;;  %3621 = vmatprep.mubr.msk.bf16.mxu1 %vm4479_vm0, %v4478_v1  ;;  %v3916_v12 = vld [vmem:[#allocation13 + $0x10] sm:$0xff]  }
 0xd41   : > { %3645 = vmatprep.mubr.msk.bf16.mxu0 %vm4479_vm0, %v4478_v1  ;;  %3625 = vmatprep.subr.bf16.mxu1 %v4478_v1 }
 0xd42   : > { %3655 = vmatprep.subr.bf16.mxu0 %v4478_v1 }
 0xd46   : > { %3622 = vmatmul.mubr.msk.bf16.vlgmr.msra.gmra.mrb[40].mxu1 %vm1200_vm1, %v2177_v3 }
 0xd47   : > { %3646 = vmatmul.mubr.msk.bf16.vlgmr.msra.gmra.mrb[24].mxu0 %vm1200_vm1, %v2401_v13  ;;  %3627 = vmatprep.mubr.msk.bf16.mxu1 %vm4479_vm0, %v4478_v1  ;;  %v3917_v13 = vld [vmem:[#allocation13 + $0x18] sm:$0xff]  }
 0xd48   : > { %3671 = vmatprep.mubr.msk.bf16.mxu0 %vm4479_vm0, %v4478_v1  ;;  %3656 = vmatpush3.bf16.msra.mxu0 %v3914_v10  ;;  %v3954_v10 = vld [vmem:[%s5508_s0 + $0x60] sm:$0xff]  }
 0xd49   : > { %3657 = vmatprep.subr.bf16.mxu0 %v4478_v1 }
 0xd4c   : > { %3658 = vmatpush3.bf16.msra.mxu0 %v3915_v11  ;;  %v3955_v11 = vld [vmem:[%s5508_s0 + $0x20] sm:$0xff]  }
 0xd4d   : > { %3659 = vmatprep.subr.bf16.mxu0 %v4478_v1 }
 0xd50   : > { %3660 = vmatpush3.bf16.msra.mxu0 %v3916_v12  ;;  %v3956_v12 = vld [vmem:[%s5508_s0 + $0x68] sm:$0xff]  }
 0xd51   : > { %3661 = vmatprep.subr.bf16.mxu0 %v4478_v1 }
 0xd54   : > { %3662 = vmatpush3.bf16.msra.mxu0 %v3917_v13  ;;  %v3957_v13 = vld [vmem:[%s5508_s0 + $0x28] sm:$0xff]  }
 0xd55   : > { %3663 = vmatprep.subr.bf16.mxu0 %v4478_v1 }
 0xe11   : > { %v5280_v14 = vpop.f32.mrb[36].mxu1 }
 0xe12   : > { %v3617_v15 = vpop.f32.mrb[37].mxu1  ;;  %v2333_v16 = vpop.f32.mrb[20].mxu0 }
 0xe13   : > { %v2339_v17 = vmul.f32 0.17677669, %v2333_v16  ;;  %v2172_v18 = vpop.f32.mrb[38].mxu1  ;;  %v3635_v19 = vpop.f32.mrb[21].mxu0  ;;  %v3918_v15 = vld [vmem:[#allocation13 + $0x20] sm:$0xff]   ;;  %v3920_v16 = vld [vmem:[#allocation13 + $0x30] sm:$0xff]  }
 0xe14   : > { %v3618_v20 = vpop.f32.mrb[39].mxu1  ;;  %v2336_v22 = vpop.f32.mrb[22].mxu0  ;;  %3664 = vmatpush3.bf16.msra.mxu0 %v3918_v15 }
 0xe15   : > { %v3636_v24 = vpop.f32.mrb[23].mxu0  ;;  %v2340_v25 = vsel %vm1249_vm3, %v2339_v17, -inf  ;;  %3665 = vmatprep.subr.bf16.mxu0 %v4478_v1  ;;  %v3921_v22 = vld [vmem:[#allocation13 + $0x38] sm:$0xff]  }
 0xe16   : > { %2341 = vmax.xlane.f32.xlu0 %v2340_v25 }
 0xe19   : > { %v2221_v26 = vpop.f32.mrb[40].mxu1 }
 0xe1a   : > { %v2227_v27 = vmul.f32 0.17677669, %v2221_v26  ;;  %v3623_v28 = vpop.f32.mrb[41].mxu1  ;;  %v2444_v29 = vpop.f32.mrb[24].mxu0 }
 0xe1b   : > { %v2450_v33 = vmul.f32 0.17677669, %v2444_v29  ;;  %v2224_v34 = vpop.f32.mrb[42].mxu1  ;;  %v3647_v35 = vpop.f32.mrb[25].mxu0 }
 0xe1c   : > { %v3624_v36 = vpop.f32.mrb[43].mxu1  ;;  %v2447_v37 = vpop.f32.mrb[26].mxu0  ;;  %v2228_v38 = vsel %vm1249_vm3, %v2227_v27, -inf }
 0xe1d   : > { %v3648_v39 = vpop.f32.mrb[27].mxu0  ;;  %2229 = vmax.xlane.f32.xlu1 %v2228_v38  ;;  %v2451_v40 = vsel %vm1249_vm3, %v2450_v33, -inf }
 0xe1e   : > { %2452 = vmax.xlane.f32.xlu0 %v2451_v40 }
 0xea3   : > { %v2342_v41 = vpop.xlane.xlu0 %2341 }
 0xea4   : > { %v2343_v42 = vsub.f32 %v2339_v17, %v2342_v41  ;;  %v3361_v41 = vld [vmem:[#allocation15] ss:$0 sm:$0xff] }
 0xea6   : > { %v2344_v43 = vmul.f32 1.442695, %v2343_v42 }
 0xea8   : > { %3984 = vpow2.f32 %v2344_v43 }
 0xeaa   : > { %v2230_v44 = vpop.xlane.xlu1 %2229 }
 0xeab   : > { %v2231_v45 = vsub.f32 %v2227_v27, %v2230_v44  ;;  %v2453_v46 = vpop.xlane.xlu0 %2452 }
 0xeac   : > { %v2454_v48 = vsub.f32 %v2450_v33, %v2453_v46 }
 0xead   : > { %v2232_v49 = vmul.f32 1.442695, %v2231_v45 }
 0xeae   : > { %v2455_v51 = vmul.f32 1.442695, %v2454_v48 }
 0xeb0   : > { %3986 = vpow2.f32 %v2455_v51 }
 0xeb1   : > { %3988 = vpow2.f32 %v2232_v49 }
 0xeb2   : > { %v3985_v52 = vpop.eup %3984 }
 0xeb3   : > { %v2346_v53 = vsel %vm1249_vm3, %v3985_v52, 0.0 }
 0xeb4   : > { %2347 = vadd.xlane.f32.xlu0 %v2346_v53 }
 0xeba   : > { %v3987_v55 = vpop.eup %3986 }
 0xebb   : > { %v2457_v21 = vsel %vm1249_vm3, %v3987_v55, 0.0  ;;  %v3989_v56 = vpop.eup %3988 }
 0xebc   : > { %2458 = vadd.xlane.f32.xlu1 %v2457_v21  ;;  %v2234_v57 = vsel %vm1249_vm3, %v3989_v56, 0.0 }
 0xec0   : > { %2235 = vadd.xlane.f32.xlu1 %v2234_v57 }
 0xeca   : > { %2241 = vrot.lane.b32.xlu0 %v5246_v47, %s4480_s23 }
 0xed1   : > { %2352 = vrot.lane.b32.xlu1 %v5246_v47, %s4481_s19 }
 0xed5   : > { %2463 = vrot.lane.b32.xlu1 %v5246_v47, %s4482_s6 }
 0xf41   : > { %v2348_v54 = vpop.xlane.xlu0 %2347 }
 0xf45   : > { %v2242_v23 = vpop.permute.xlu0 %2241 }
 0xf46   : > { %v2247_v58 = vsel %vm1265_vm2, %v2242_v23, 0 }
 0xf47   : > { %3626 = vmatpush3.bf16.msra.mxu1 %v2247_v58 }
 0xf48   : > { %3637 = vmatprep.subr.bf16.mxu1 %v4478_v1 }
 0xf49   : > { %v2459_v59 = vpop.xlane.xlu1 %2458 }
 0xf4d   : > { %v2236_v60 = vpop.xlane.xlu1 %2235 }
 0xf4e   : > { %3990 = vrcp.f32 %v2236_v60 }
 0xf4f   : > { %3992 = vrcp.f32 %v2348_v54 }
 0xf50   : > { %3994 = vrcp.f32 %v2459_v59 }
 0xf51   : > { %v2353_v63 = vpop.permute.xlu1 %2352 }
 0xf52   : > { %v2358_v4 = vsel %vm1265_vm2, %v2353_v63, 0 }
 0xf55   : > { %v2464_v5 = vpop.permute.xlu1 %2463 }
 0xf56   : > { %v2469_v8 = vsel %vm1265_vm2, %v2464_v5, 0  ;;  %v3948_v5 = vld [vmem:[%s5508_s0 + $0x48] sm:$0xff]  }
 0xf58   : > { %v3991_v61 = vpop.eup %3990 }
 0xf59   : > { %v2238_v62 = vmul.f32 %v3991_v61, %v3989_v56  ;;  %v3993_v3 = vpop.eup %3992 }
 0xf5a   : > { %v2350_v47 = vmul.f32 %v3993_v3, %v3985_v52  ;;  %v3995_v7 = vpop.eup %3994 }
 0xf5b   : > { %v2239_v2 = vpack.c.bf16 %v2238_v62, %v2238_v62  ;;  %v2461_v9 = vmul.f32 %v3995_v7, %v3987_v55  ;;  %v3950_v7 = vld [vmem:[%s5508_s0 + $0x50] sm:$0xff]  }
 0xf5c   : > { %v2351_v6 = vpack.c.bf16 %v2350_v47, %v2350_v47  ;;  %v3947_v47 = vld [vmem:[%s5508_s0] sm:$0xff]  }
 0xf5d   : > { %3628 = vmatmul.mubr.msk.bf16.vlgmr.msra.gmra.mrb[44].mxu1 %vm1249_vm3, %v2239_v2  ;;  %v2462_v50 = vpack.c.bf16 %v2461_v9, %v2461_v9  ;;  %v3952_v9 = vld [vmem:[%s5508_s0 + $0x58] sm:$0xff]  }
 0xf5e   : > { %3638 = vmatpush3.bf16.msra.mxu1 %v2358_v4  ;;  %3639 = vmatprep.mubr.msk.bf16.mxu1 %vm4479_vm0, %v4478_v1  ;;  %v3946_v4 = vld [vmem:[%s5508_s0 + $0x40] sm:$0xff]  }
 0xf5f   : > { %3649 = vmatprep.subr.bf16.mxu1 %v4478_v1 }
 0xf65   : > { %3640 = vmatmul.mubr.msk.bf16.vlgmr.msra.gmra.mrb[48].mxu1 %vm1249_vm3, %v2351_v6  ;;  %v3949_v6 = vld [vmem:[%s5508_s0 + $0x8] sm:$0xff]  }
 0xf66   : > { %3650 = vmatpush3.bf16.msra.mxu1 %v2469_v8  ;;  %3651 = vmatprep.mubr.msk.bf16.mxu1 %vm4479_vm0, %v4478_v1  ;;  %v3951_v8 = vld [vmem:[%s5508_s0 + $0x10] sm:$0xff]  }
 0xf6d   : > { %3652 = vmatmul.mubr.msk.bf16.vlgmr.msra.gmra.mrb[52].mxu1 %vm1249_vm3, %v2462_v50  ;;  %v3953_v50 = vld [vmem:[%s5508_s0 + $0x18] sm:$0xff]  }
 0xf6e   : > { %2807 = vmatprep.mubr.bf16.mxu1 %v4477_v0  ;;  %v3919_v0 = vld [vmem:[#allocation13 + $0x28] sm:$0xff]  }
 0xf6f   : > { %3666 = vmatpush3.bf16.msra.mxu0 %v3919_v0 }
 0xf70   : > { %3667 = vmatprep.subr.bf16.mxu0 %v4478_v1 }
 0xf73   : > { %3668 = vmatpush3.bf16.msra.mxu0 %v3920_v16 }
 0xf74   : > { %3669 = vmatprep.subr.bf16.mxu0 %v4478_v1 }
 0xf77   : > { %3670 = vmatpush3.bf16.msra.mxu0 %v3921_v22 }
 0xf78   : > { %3477 = vmatprep.subr.bf16.mxu0 %v3946_v4 }
0x1030   : > { %v2283_v17 = vpop.f32.mrb[44].mxu1 }
0x1031   : > { %2512 = vrot.lane.b32.xlu0 %v2283_v17, %s4482_s6  ;;  %v3629_v18 = vpop.f32.mrb[45].mxu1  ;;  %s5507_s6 = sld [smem:[#allocation45_spill]] }
0x1032   : > { %v2286_v19 = vpop.f32.mrb[46].mxu1  ;;  %v3370_v18 = vld [vmem:[#allocation16] ss:$0 sm:$0xff] }
0x1033   : > { %v3630_v20 = vpop.f32.mrb[47].mxu1 }
0x1034   : > { %v3371_v20 = vld [vmem:[#allocation18] ss:$0 sm:$0xff] }
0x1037   : > { %v3924_v49 = vld [vmem:[%s5507_s6 + $0x4] ss:$8 sps:$4 sm:$0xff]   ;;  %v3927_v51 = vld [vmem:[%s5507_s6 + $0x14] ss:$8 sps:$4 sm:$0xff]   ;;  %v3925_v52 = vld [vmem:[%s5507_s6 + $0x10] ss:$8 sps:$4 sm:$0xff]  }
0x1038   : > { %v2394_v24 = vpop.f32.mrb[48].mxu1  ;;  %2775 = vmatprep.subr.bf16.mxu1 %v3924_v49  ;;  %v3928_v53 = vld [vmem:[%s5507_s6 + $0x20] ss:$8 sps:$4 sm:$0xff]   ;;  %v3933_v54 = vld [vmem:[%s5507_s6 + $0x34] ss:$8 sps:$4 sm:$0xff]  }
0x1039   : > { %2516 = vrot.lane.b32.xlu1 %v2394_v24, %s4481_s19  ;;  %v3641_v25 = vpop.f32.mrb[49].mxu1  ;;  %v3931_v23 = vld [vmem:[%s5507_s6 + $0x30] ss:$8 sps:$4 sm:$0xff]   ;;  %v3936_v58 = vld [vmem:[%s5507_s6 + $0x44] ss:$8 sps:$4 sm:$0xff]  }
0x103a   : > { %v2397_v26 = vpop.f32.mrb[50].mxu1  ;;  %v3934_v59 = vld [vmem:[%s5507_s6 + $0x40] ss:$8 sps:$4 sm:$0xff]   ;;  %v3939_v60 = vld [vmem:[%s5507_s6 + $0x54] ss:$8 sps:$4 sm:$0xff]  }
0x103b   : > { %v3642_v27 = vpop.f32.mrb[51].mxu1  ;;  %v3937_v61 = vld [vmem:[%s5507_s6 + $0x50] ss:$8 sps:$4 sm:$0xff]   ;;  %v3942_v62 = vld [vmem:[%s5507_s6 + $0x64] ss:$8 sps:$4 sm:$0xff]  }
0x103c   : > { %v3940_v63 = vld [vmem:[%s5507_s6 + $0x60] ss:$8 sps:$4 sm:$0xff]   ;;  %v3945_v2 = vld [vmem:[%s5507_s6 + $0x74] ss:$8 sps:$4 sm:$0xff]   ;;  %v3943_v3 = vld [vmem:[%s5507_s6 + $0x70] ss:$8 sps:$4 sm:$0xff]  }
0x103d   : > { %v3958_v26 = vld [vmem:[%s5508_s0 + $0x70] sm:$0xff]  }
0x103e   : > { %v3959_v27 = vld [vmem:[%s5508_s0 + $0x30] sm:$0xff]  }
0x1040   : > { %v2505_v28 = vpop.f32.mrb[52].mxu1 }
0x1041   : > { %2520 = vrot.lane.b32.xlu0 %v2505_v28, %s4480_s23  ;;  %v3653_v29 = vpop.f32.mrb[53].mxu1  ;;  %v3960_v28 = vld [vmem:[%s5508_s0 + $0x78] sm:$0xff]  }
0x1042   : > { %v2508_v33 = vpop.f32.mrb[54].mxu1  ;;  %v3961_v29 = vld [vmem:[%s5508_s0 + $0x38] sm:$0xff]  }
0x1043   : > { %v3654_v34 = vpop.f32.mrb[55].mxu1  ;;  %v2683_v33 = vld [vmem:[#allocation19] sm:$0x3] }
0x1044   : > { %v2688_v34 = vrot.slane %v2683_v33, %v5078_v32 }
0x10a3   : > { %v2513_v35 = vpop.permute.xlu0 %2512 }
0x10a4   : > { %v2523_v1 = vsel %vm1200_vm1, %v5280_v14, %v2513_v35  ;;  %v3922_v14 = vld [vmem:[%s5507_s6] ss:$8 sps:$4 sm:$0xff]   ;;  %v2692_v35 = vrot.slane %v2683_v33, %v5073_v30 }
0x10a5   : > { %2776 = vmatpush1.bf16.msra.mxu1 %v3922_v14 }
0x10a6   : > { %2777 = vmatprep.subr.bf16.mxu1 %v3927_v51 }
0x10a9   : > { %2778 = vmatpush1.bf16.msra.mxu1 %v3925_v52 }
0x10ab   : > { %v2517_v36 = vpop.permute.xlu1 %2516 }
0x10ac   : > { %v2524_v37 = vsel %vm1661_vm4, %v2523_v1, %v2517_v36 }
0x10b3   : > { %v2521_v38 = vpop.permute.xlu0 %2520 }
0x10b4   : > { %v2525_v39 = vsel %vm1663_vm5, %v2524_v37, %v2521_v38 }
0x10b5   : > { %v2526_v40 = vpack.c.bf16 %v2525_v39, %v2525_v39 }
0x10b7   : > { %3672 = vmatmul.mubr.bf16.vlgmr.msra.gmra.mrb[28].mxu0 %v2526_v40 }
0x10b8   : > { %3478 = vmatpush3.bf16.msra.mxu0 %v3947_v47 }
0x10b9   : > { %3479 = vmatprep.subr.bf16.mxu0 %v3948_v5 }
0x10bc   : > { %3480 = vmatpush3.bf16.msra.mxu0 %v3949_v6 }
0x10bd   : > { %3481 = vmatprep.subr.bf16.mxu0 %v3950_v7 }
0x10c0   : > { %3482 = vmatpush3.bf16.msra.mxu0 %v3951_v8 }
0x10c1   : > { %3483 = vmatprep.subr.bf16.mxu0 %v3952_v9 }
0x10c4   : > { %3484 = vmatpush3.bf16.msra.mxu0 %v3953_v50 }
0x10c5   : > { %3485 = vmatprep.subr.bf16.mxu0 %v3954_v10 }
0x10c8   : > { %3486 = vmatpush3.bf16.msra.mxu0 %v3955_v11 }
0x10c9   : > { %3487 = vmatprep.subr.bf16.mxu0 %v3956_v12 }
0x10cc   : > { %3488 = vmatpush3.bf16.msra.mxu0 %v3957_v13 }
0x10cd   : > { %3489 = vmatprep.subr.bf16.mxu0 %v3958_v26 }
0x10d0   : > { %3490 = vmatpush3.bf16.msra.mxu0 %v3959_v27 }
0x10d1   : > { %3491 = vmatprep.subr.bf16.mxu0 %v3960_v28 }
0x10d4   : > { %3492 = vmatpush3.bf16.msra.mxu0 %v3961_v29 }
0x118a   : > { %v2632_v42 = vpop.f32.mrb[28].mxu0 }
0x118b   : > { %v2633_v43 = vadd.f32 %v3361_v41, %v2632_v42  ;;  %v3673_v44 = vpop.f32.mrb[29].mxu0 }
0x118c   : > { %v2635_v45 = vpop.f32.mrb[30].mxu0 }
0x118d   : > { %v3674_v46 = vpop.f32.mrb[31].mxu0  ;;  %v2638_v48 = vadd.f32 %v2633_v43, %v5236_v31  ;;  %v3930_v31 = vld [vmem:[%s5507_s6 + $0x24] ss:$8 sps:$4 sm:$0xff]  }
0x118e   : > { %2779 = vmatprep.subr.bf16.mxu1 %v3930_v31  ;;  %v3388_v46 = vld [vmem:[#allocation21] ss:$0 sm:$0xff] }
0x118f   : > { %2641 = vadd.xlane.f32.xlu1 %v2638_v48  ;;  %2780 = vmatpush1.bf16.msra.mxu1 %v3928_v53 }
0x1190   : > { %2781 = vmatprep.subr.bf16.mxu1 %v3933_v54 }
0x1193   : > { %2782 = vmatpush1.bf16.msra.mxu1 %v3931_v23  ;;  %v3405_v23 = vld [vmem:[#allocation22] ss:$0 sm:$0xff] }
0x1194   : > { %2783 = vmatprep.subr.bf16.mxu1 %v3936_v58 }
0x1197   : > { %2784 = vmatpush1.bf16.msra.mxu1 %v3934_v59  ;;  %v3406_v59 = vld [vmem:[#allocation24] ss:$0 sm:$0xff] }
0x1198   : > { %2785 = vmatprep.subr.bf16.mxu1 %v3939_v60 }
0x119b   : > { %2786 = vmatpush1.bf16.msra.mxu1 %v3937_v61 }
0x119c   : > { %2787 = vmatprep.subr.bf16.mxu1 %v3942_v62 }
0x119f   : > { %2788 = vmatpush1.bf16.msra.mxu1 %v3940_v63 }
0x11a0   : > { %2789 = vmatprep.subr.bf16.mxu1 %v3945_v2 }
0x11a3   : > { %2790 = vmatpush1.bf16.msra.mxu1 %v3943_v3 }
0x121c   : > { %v2642_v55 = vpop.xlane.xlu1 %2641 }
0x121d   : > { %v2643_v21 = vmul.f32 0.0078125, %v2642_v55 }
0x121f   : > { %v2644_v56 = vsub.f32 %v2638_v48, %v2643_v21 }
0x1221   : > { %v2645_v57 = vmul.f32 %v2644_v56, %v2644_v56 }
0x1223   : > { %2646 = vadd.xlane.f32.xlu0 %v2645_v57 }
0x12b0   : > { %v2647_v15 = vpop.xlane.xlu0 %2646 }
0x12b1   : > { %v2648_v0 = vmul.f32 0.0078125, %v2647_v15 }
0x12b3   : > { %v2649_v16 = vadd.f32 1e-05, %v2648_v0 }
0x12b5   : > { %3996 = vrsqrt.f32 %v2649_v16 }
0x12bf   : > { %v3997_v17 = vpop.eup %3996 }
0x12c0   : > { %v2651_v19 = vmul.f32 %v3997_v17, %v2644_v56 }
0x12c2   : > { %v2658_v22 = vmul.f32 %v3370_v18, %v2651_v19 }
0x12c4   : > { %v2665_v24 = vadd.f32 %v3371_v20, %v2658_v22 }
0x12c6   : > { %v2666_v25 = vpack.c.bf16 %v2665_v24, %v2665_v24 }
0x12c8   : > { %2808 = vmatmul.mubr.bf16.vlgmr.msra.gmra.mrb[56].mxu1 %v2666_v25 }
0x139b   : > { %v2809_v36 = vpop.f32.mrb[56].mxu1 }
0x139c   : > { %v2810_v1 = vadd.f32 %v2809_v36, %v2688_v34  ;;  %v2811_v37 = vpop.f32.mrb[57].mxu1 }
0x139d   : > { %v2812_v38 = vadd.f32 %v2811_v37, %v2692_v35  ;;  %v2813_v39 = vpop.f32.mrb[58].mxu1 }
0x139e   : > { %v2816_v40 = vmax.f32 %v2810_v1, 0.0  ;;  %v2814_v41 = vpop.f32.mrb[59].mxu1 }
0x139f   : > { %v2817_v42 = vmax.f32 %v2812_v38, 0.0 }
0x13a0   : > { %v2818_v44 = vpack.c.bf16 %v2816_v40, %v2816_v40 }
0x13a1   : > { %v2819_v43 = vpack.c.bf16 %v2817_v42, %v2817_v42 }
0x13a3   : > { %2987 = vmatprep.mubr.bf16.mxu0 %v2819_v43 }
0x13a4   : > { %2988 = vmatmul.mubr.bf16.vlgmr.msra.gmra.mrb[32].mxu0 %v2818_v44 }
0x1477   : > { %v3493_v45 = vpop.f32.mrb[32].mxu0 }
0x1478   : > { %v3494_v48 = vpop.f32.mrb[33].mxu0 }
0x1479   : > { %v3495_v14 = vadd.f32 %v3494_v48, %v3493_v45  ;;  %v3496_v49 = vpop.f32.mrb[34].mxu0 }
0x147a   : > { %v3497_v32 = vpop.f32.mrb[35].mxu0 }
0x147b   : > { %v2990_v51 = vadd.f32 %v3495_v14, %v3388_v46 }
0x147d   : > { %v2995_v30 = vadd.f32 %v2990_v51, %v2665_v24 }
0x147f   : > { %2998 = vadd.xlane.f32.xlu0 %v2995_v30 }
0x150c   : > { %v2999_v52 = vpop.xlane.xlu0 %2998 }
0x150d   : > { %v3000_v31 = vmul.f32 0.0078125, %v2999_v52 }
0x150f   : > { %v3001_v53 = vsub.f32 %v2995_v30, %v3000_v31 }
0x1511   : > { %v3002_v55 = vmul.f32 %v3001_v53, %v3001_v53 }
0x1513   : > { %3003 = vadd.xlane.f32.xlu1 %v3002_v55 }
0x15a0   : > { %v3004_v21 = vpop.xlane.xlu1 %3003 }
0x15a1   : > { %v3005_v56 = vmul.f32 0.0078125, %v3004_v21 }
0x15a3   : > { %v3006_v57 = vadd.f32 1e-05, %v3005_v56 }
0x15a5   : > { %3998 = vrsqrt.f32 %v3006_v57 }
0x15af   : > { %v3999_v54 = vpop.eup %3998 }
0x15b0   : > { %v3008_v58 = vmul.f32 %v3999_v54, %v3001_v53 }
0x15b2   : > { %v3015_v60 = vmul.f32 %v3405_v23, %v3008_v58 }
0x15b4   : > { %v3022_v61 = vadd.f32 %v3406_v59, %v3015_v60 }
0x15b6   : > { %3023 = vst [vmem:[%s933_s13] sm:$0xff] %v3022_v61 }
0x15b7 PF: > { %s5510_s4 = sld [smem:[#allocation33_spill]] }
0x15bd   : > { %s41_s4 = sadd.s32 1, %s5510_s4  }
0x15be   : > { %p38_p0 = scmp.ge.s32.totalorder %s41_s4, 4  }
0x15c0   :  { %40 = sbr.rel (!%p38_p0) target bundleno = 23 (0x17), region = 209 }
0x15c7   :  { %3043 = vsyncpa [#allocation3], 1 }
0x15c8   :  { %3045 = vsyncpa [#allocation3 + $0x1], 1 }
0x15c9   :  { %3046 = vsyncpa [#allocation5], 1 }
0x15ca   :  { %3047 = vsyncpa [#allocation8], 1 }
0x15cb   :  { %3048 = vsyncpa [#allocation11], 1 }
0x15cc   :  { %3049 = vsyncpa [#allocation14], 1 }
0x15cd   :  { %3050 = vsyncpa [#allocation17], 1 }
0x15ce   :  { %3051 = vsyncpa [#allocation20], 1 }
0x15cf   :  { %3052 = vsyncpa [#allocation23], 1 }

</bundles_post_ra>
